<compile_context>
chip_gen: v6e
topology: v6e:2x2x1
jax: 0.10.0
libtpu: 0.0.40
codegen_flags: <defaults>
</compile_context>

<pallas_src>
import functools

import jax
import jax.numpy as jnp
from jax.experimental import pallas as pl
from jax.experimental.pallas import tpu as pltpu

# --- module hyper-parameters (consistent with EncoderCNN.__init__) ---
NUM_WAVELENGTHS = 128          # num_wavelengths
KERNEL_SIZE = 5                # kernel_size (odd)
ENCODING_SIZE = 16             # encoding_size
POOL = 4                       # MaxPool1d kernel (stride defaults to kernel)
PAD = (KERNEL_SIZE - 1) // 2
POOLED = (NUM_WAVELENGTHS - POOL) // POOL + 1   # 32
FEAT = 16 * POOLED                              # 512
C1, C2 = 4, 16                                  # conv output channels
H1, H2 = 256, 128                               # dense hidden sizes


def _shift_lanes(v, s):
    """out[:, l] = v[:, l + s], zero-filled outside [0, W). Result stays 128 lanes wide."""
    if s == 0:
        return v
    rows = v.shape[0]
    if s > 0:
        pad = jnp.zeros((rows, s), v.dtype)
        return jnp.concatenate([v[:, s:], pad], axis=1)
    pad = jnp.zeros((rows, -s), v.dtype)
    return jnp.concatenate([pad, v[:, :s]], axis=1)


# ------------------------- fused kernel -------------------------
def fused_encoder_kernel(x_ref, w1_ref, b1_ref, w2_ref, b2_ref,
                         w1e_ref, b1d_ref, w2d_ref, b2d_ref, wml_ref, bml_ref,
                         o_ref):
    TB = x_ref.shape[0]
    K = KERNEL_SIZE

    x = x_ref[...]                                            # (TB, 128) f32
    xs = [_shift_lanes(x, t - PAD) for t in range(K)]         # 5 shifted input planes

    # conv1 (1 -> 4 channels) + ReLU; pre-shift each h1 plane for conv2's 5 taps.
    sh = []                                                   # 20 planes, index ci*K + t
    for ci in range(C1):
        acc = w1_ref[ci, 0] * xs[0]
        for t in range(1, K):
            acc = acc + w1_ref[ci, t] * xs[t]
        h1c = jnp.maximum(acc + b1_ref[ci], 0.0)              # (TB, 128)
        for t in range(K):
            sh.append(_shift_lanes(h1c, t - PAD))

    # conv2 (4 -> 16) + ReLU + maxpool(4) + channel-major flatten + dense1, channel by
    # channel.  Channel co's pooled/flattened contribution to dense1 is one
    # (TB, 128) @ (128, 256) MXU matmul against w1e_ref[co] (rows off the pool grid are
    # zero), so no lane compaction / flatten concatenate is needed.
    h_pre = jnp.zeros((TB, H1), jnp.float32)
    for co in range(C2):
        acc = w2_ref[co, 0] * sh[0]
        for idx in range(1, C1 * K):
            acc = acc + w2_ref[co, idx] * sh[idx]
        h2c = jnp.maximum(acc + b2_ref[co], 0.0)              # (TB, 128)
        # after this, lane 4p holds max(h2c[:, 4p:4p+4]); other lanes hit zero weight rows
        m = jnp.maximum(jnp.maximum(h2c, _shift_lanes(h2c, 1)),
                        jnp.maximum(_shift_lanes(h2c, 2), _shift_lanes(h2c, 3)))
        h_pre = h_pre + jnp.dot(m, w1e_ref[co],
                                preferred_element_type=jnp.float32)

    # dense head (dense1 bias/ReLU, dense2, fused mean|logvar projection)
    h = jnp.maximum(h_pre + b1d_ref[...], 0.0)                                   # (TB, 256)
    h = jnp.maximum(jnp.dot(h, w2d_ref[...],
                            preferred_element_type=jnp.float32) + b2d_ref[...],
                    0.0)                                                         # (TB, 128)
    ml = jnp.tanh(jnp.dot(h, wml_ref[...],
                          preferred_element_type=jnp.float32) + bml_ref[...])    # (TB, 32)
    o_ref[...] = ml


# ------------------------- parameter init (PyTorch-style bounds) -------------------------
def init_params(key):
    def uniform(key, shape, fan_in):
        bound = 1.0 / jnp.sqrt(float(fan_in))
        return jax.random.uniform(key, shape, jnp.float32, -bound, bound)

    ks = jax.random.split(key, 12)
    p = {}
    p["conv1_w"] = uniform(ks[0], (C1, 1, KERNEL_SIZE), 1 * KERNEL_SIZE)
    p["conv1_b"] = uniform(ks[1], (C1,), 1 * KERNEL_SIZE)
    p["conv2_w"] = uniform(ks[2], (C2, C1, KERNEL_SIZE), C1 * KERNEL_SIZE)
    p["conv2_b"] = uniform(ks[3], (C2,), C1 * KERNEL_SIZE)
    p["dense1_w"] = uniform(ks[4], (FEAT, H1), FEAT)         # stored as (in, out)
    p["dense1_b"] = uniform(ks[5], (H1,), FEAT)
    p["dense2_w"] = uniform(ks[6], (H1, H2), H1)
    p["dense2_b"] = uniform(ks[7], (H2,), H1)
    p["mean_w"] = uniform(ks[8], (H2, ENCODING_SIZE), H2)
    p["mean_b"] = uniform(ks[9], (ENCODING_SIZE,), H2)
    p["logvar_w"] = uniform(ks[10], (H2, ENCODING_SIZE), H2)
    p["logvar_b"] = uniform(ks[11], (ENCODING_SIZE,), H2)
    return p


# ------------------------- forward wrapper -------------------------
@functools.partial(jax.jit, static_argnames=("tb",))
def encoder_cnn_forward(x, params, tb=256):
    # x.view(-1, 1, num_wavelengths)
    x = x.reshape(-1, NUM_WAVELENGTHS).astype(jnp.float32)
    B = x.shape[0]

    # batch tile: >=256 rows/step for big batches; otherwise the 8-aligned padded batch
    TB = tb if B >= tb else max(8, ((B + 7) // 8) * 8)
    Bp = ((B + TB - 1) // TB) * TB
    if Bp != B:
        x = jnp.pad(x, ((0, Bp - B), (0, 0)))     # zero-pad ragged last tile

    # conv params in SMEM-friendly layouts
    w1 = params["conv1_w"][:, 0, :]                          # (4, 5)   (Cin == 1)
    b1 = params["conv1_b"]                                   # (4,)
    w2 = params["conv2_w"].reshape(C2, C1 * KERNEL_SIZE)     # (16, 20), idx = ci*5 + t
    b2 = params["conv2_b"]                                   # (16,)

    # dense1 weight expanded onto the 128-lane conv grid:
    # w1_exp[c, 4p, :] = dense1_w[c*32 + p, :], zero elsewhere  (folds pool-compaction +
    # channel-major flatten into the matmul).
    w1_cp = params["dense1_w"].reshape(C2, POOLED, H1)
    w1_exp = jnp.zeros((C2, NUM_WAVELENGTHS, H1), jnp.float32)
    w1_exp = w1_exp.at[:, ::POOL, :].set(w1_cp)

    # fused mean|logvar projection
    wml = jnp.concatenate([params["mean_w"], params["logvar_w"]], axis=1)   # (128, 32)
    bml = jnp.concatenate([params["mean_b"], params["logvar_b"]])           # (32,)

    smem = pl.BlockSpec(memory_space=pltpu.MemorySpace.SMEM)

    def const(shape):
        return pl.BlockSpec(shape, lambda i: tuple(0 for _ in shape))

    out = pl.pallas_call(
        fused_encoder_kernel,
        out_shape=jax.ShapeDtypeStruct((Bp, 2 * ENCODING_SIZE), jnp.float32),
        grid_spec=pltpu.PrefetchScalarGridSpec(
            num_scalar_prefetch=0,
            grid=(Bp // TB,),
            in_specs=[
                pl.BlockSpec((TB, NUM_WAVELENGTHS), lambda i: (i, 0)),   # x tile
                smem, smem, smem, smem,                                  # conv w1,b1,w2,b2
                const((C2, NUM_WAVELENGTHS, H1)),                        # expanded dense1 w
                const((1, H1)),                                          # dense1 bias
                const((H1, H2)),                                         # dense2 w
                const((1, H2)),                                          # dense2 bias
                const((H2, 2 * ENCODING_SIZE)),                          # mean|logvar w
                const((1, 2 * ENCODING_SIZE)),                           # mean|logvar bias
            ],
            out_specs=pl.BlockSpec((TB, 2 * ENCODING_SIZE), lambda i: (i, 0)),
        ),
        compiler_params=pltpu.CompilerParams(
            dimension_semantics=("parallel",),
            vmem_limit_bytes=32 * 1024 * 1024,
        ),
    )(x, w1, b1, w2, b2,
      w1_exp, params["dense1_b"][None, :],
      params["dense2_w"], params["dense2_b"][None, :],
      wml, bml[None, :])

    mean = out[:B, :ENCODING_SIZE]
    logvar = out[:B, ENCODING_SIZE:]
    return mean, logvar


# ------------------------- pure-JAX reference (correctness guard) -------------------------
def reference_forward(x, params):
    xb = x.reshape(-1, 1, NUM_WAVELENGTHS).astype(jnp.float32)
    h = jax.lax.conv_general_dilated(xb, params["conv1_w"], (1,), [(PAD, PAD)],
                                     dimension_numbers=("NCH", "OIH", "NCH"))
    h = jax.nn.relu(h + params["conv1_b"][None, :, None])
    h = jax.lax.conv_general_dilated(h, params["conv2_w"], (1,), [(PAD, PAD)],
                                     dimension_numbers=("NCH", "OIH", "NCH"))
    h = jax.nn.relu(h + params["conv2_b"][None, :, None])
    h = h.reshape(h.shape[0], C2, POOLED, POOL).max(axis=-1)
    f = h.reshape(h.shape[0], FEAT)
    h = jax.nn.relu(f @ params["dense1_w"] + params["dense1_b"])
    h = jax.nn.relu(h @ params["dense2_w"] + params["dense2_b"])
    mean = jnp.tanh(h @ params["mean_w"] + params["mean_b"])
    logvar = jnp.tanh(h @ params["logvar_w"] + params["logvar_b"])
    return mean, logvar


if __name__ == "__main__":
    key = jax.random.PRNGKey(0)
    kx, kp = jax.random.split(key)
    B = 2
    x = jax.random.normal(kx, (B, NUM_WAVELENGTHS), jnp.float32)
    params = init_params(kp)

    mean, logvar = encoder_cnn_forward(x, params)
    jax.block_until_ready((mean, logvar))
    assert mean.shape == (B, ENCODING_SIZE) and logvar.shape == (B, ENCODING_SIZE)

    ref_mean, ref_logvar = reference_forward(x, params)
    err = max(float(jnp.max(jnp.abs(mean - ref_mean))),
              float(jnp.max(jnp.abs(logvar - ref_logvar))))
    assert err < 2e-2, f"mismatch vs reference: max abs err {err}"

    print("KERNEL_OK")
</pallas_src>

<mosaic_0001>
module attributes {stable_mosaic.version = 11 : i64} {
  func.func @fused_encoder_kernel(%arg0: i32, %arg1: memref<8x128xf32, #tpu.memory_space<vmem>>, %arg2: memref<4x5xf32, #tpu.memory_space<smem>>, %arg3: memref<4xf32, #tpu.memory_space<smem>>, %arg4: memref<16x20xf32, #tpu.memory_space<smem>>, %arg5: memref<16xf32, #tpu.memory_space<smem>>, %arg6: memref<16x128x256xf32, #tpu.memory_space<vmem>>, %arg7: memref<1x256xf32, #tpu.memory_space<vmem>>, %arg8: memref<256x128xf32, #tpu.memory_space<vmem>>, %arg9: memref<1x128xf32, #tpu.memory_space<vmem>>, %arg10: memref<128x32xf32, #tpu.memory_space<vmem>>, %arg11: memref<1x32xf32, #tpu.memory_space<vmem>>, %arg12: memref<8x32xf32, #tpu.memory_space<vmem>>) attributes {dimension_semantics = [#tpu.dimension_semantics<parallel>], iteration_bounds = array<i64: 1>, scalar_prefetch = 0 : i64, scratch_operands = 0 : i64, tpu.core_type = #tpu.core_type<tc>, window_params = [{transform_indices = @transform_0, window_bounds = array<i64: 8, 128>}, {transform_indices = @transform_1, window_bounds = array<i64: 4, 5>}, {transform_indices = @transform_2, window_bounds = array<i64: 4>}, {transform_indices = @transform_3, window_bounds = array<i64: 16, 20>}, {transform_indices = @transform_4, window_bounds = array<i64: 16>}, {pipeline_mode = #tpu.pipeline_mode<synchronous>, transform_indices = @transform_5, window_bounds = array<i64: 16, 128, 256>}, {pipeline_mode = #tpu.pipeline_mode<synchronous>, transform_indices = @transform_6, window_bounds = array<i64: 1, 256>}, {pipeline_mode = #tpu.pipeline_mode<synchronous>, transform_indices = @transform_7, window_bounds = array<i64: 256, 128>}, {pipeline_mode = #tpu.pipeline_mode<synchronous>, transform_indices = @transform_8, window_bounds = array<i64: 1, 128>}, {pipeline_mode = #tpu.pipeline_mode<synchronous>, transform_indices = @transform_9, window_bounds = array<i64: 128, 32>}, {pipeline_mode = #tpu.pipeline_mode<synchronous>, transform_indices = @transform_10, window_bounds = array<i64: 1, 32>}, {transform_indices = @transform_11, window_bounds = array<i64: 8, 32>}]} {
    %c0 = arith.constant 0 : index
    %c0_0 = arith.constant 0 : index
    %0 = vector.load %arg1[%c0, %c0_0] : memref<8x128xf32, #tpu.memory_space<vmem>>, vector<8x128xf32>
    %cst = arith.constant 0.000000e+00 : f32
    %1 = vector.broadcast %cst : f32 to vector<8x2xf32>
    %2 = vector.extract_strided_slice %0 {offsets = [0, 0], sizes = [8, 126], strides = [1, 1]} : vector<8x128xf32> to vector<8x126xf32>
    %3 = tpu.concatenate %1, %2 in 1 : vector<8x2xf32>, vector<8x126xf32> -> vector<8x128xf32>
    %cst_1 = arith.constant 0.000000e+00 : f32
    %4 = vector.broadcast %cst_1 : f32 to vector<8x1xf32>
    %5 = vector.extract_strided_slice %0 {offsets = [0, 0], sizes = [8, 127], strides = [1, 1]} : vector<8x128xf32> to vector<8x127xf32>
    %6 = tpu.concatenate %4, %5 in 1 : vector<8x1xf32>, vector<8x127xf32> -> vector<8x128xf32>
    %cst_2 = arith.constant 0.000000e+00 : f32
    %7 = vector.broadcast %cst_2 : f32 to vector<8x1xf32>
    %8 = vector.extract_strided_slice %0 {offsets = [0, 1], sizes = [8, 127], strides = [1, 1]} : vector<8x128xf32> to vector<8x127xf32>
    %9 = tpu.concatenate %8, %7 in 1 : vector<8x127xf32>, vector<8x1xf32> -> vector<8x128xf32>
    %cst_3 = arith.constant 0.000000e+00 : f32
    %10 = vector.broadcast %cst_3 : f32 to vector<8x2xf32>
    %11 = vector.extract_strided_slice %0 {offsets = [0, 2], sizes = [8, 126], strides = [1, 1]} : vector<8x128xf32> to vector<8x126xf32>
    %12 = tpu.concatenate %11, %10 in 1 : vector<8x126xf32>, vector<8x2xf32> -> vector<8x128xf32>
    %c0_4 = arith.constant 0 : index
    %c0_5 = arith.constant 0 : index
    %13 = memref.load %arg2[%c0_4, %c0_5] : memref<4x5xf32, #tpu.memory_space<smem>>
    %14 = vector.broadcast %13 : f32 to vector<8x128xf32>
    %15 = arith.mulf %14, %3 : vector<8x128xf32>
    %c0_6 = arith.constant 0 : index
    %c1 = arith.constant 1 : index
    %16 = memref.load %arg2[%c0_6, %c1] : memref<4x5xf32, #tpu.memory_space<smem>>
    %17 = vector.broadcast %16 : f32 to vector<8x128xf32>
    %18 = arith.mulf %17, %6 : vector<8x128xf32>
    %19 = arith.addf %15, %18 : vector<8x128xf32>
    %c0_7 = arith.constant 0 : index
    %c2 = arith.constant 2 : index
    %20 = memref.load %arg2[%c0_7, %c2] : memref<4x5xf32, #tpu.memory_space<smem>>
    %21 = vector.broadcast %20 : f32 to vector<8x128xf32>
    %22 = arith.mulf %21, %0 : vector<8x128xf32>
    %23 = arith.addf %19, %22 : vector<8x128xf32>
    %c0_8 = arith.constant 0 : index
    %c3 = arith.constant 3 : index
    %24 = memref.load %arg2[%c0_8, %c3] : memref<4x5xf32, #tpu.memory_space<smem>>
    %25 = vector.broadcast %24 : f32 to vector<8x128xf32>
    %26 = arith.mulf %25, %9 : vector<8x128xf32>
    %27 = arith.addf %23, %26 : vector<8x128xf32>
    %c0_9 = arith.constant 0 : index
    %c4 = arith.constant 4 : index
    %28 = memref.load %arg2[%c0_9, %c4] : memref<4x5xf32, #tpu.memory_space<smem>>
    %29 = vector.broadcast %28 : f32 to vector<8x128xf32>
    %30 = arith.mulf %29, %12 : vector<8x128xf32>
    %31 = arith.addf %27, %30 : vector<8x128xf32>
    %c0_10 = arith.constant 0 : index
    %32 = memref.load %arg3[%c0_10] : memref<4xf32, #tpu.memory_space<smem>>
    %33 = vector.broadcast %32 : f32 to vector<8x128xf32>
    %34 = arith.addf %31, %33 : vector<8x128xf32>
    %cst_11 = arith.constant 0.000000e+00 : f32
    %35 = vector.broadcast %cst_11 : f32 to vector<8x128xf32>
    %36 = arith.maximumf %34, %35 : vector<8x128xf32>
    %cst_12 = arith.constant 0.000000e+00 : f32
    %37 = vector.broadcast %cst_12 : f32 to vector<8x2xf32>
    %38 = vector.extract_strided_slice %36 {offsets = [0, 0], sizes = [8, 126], strides = [1, 1]} : vector<8x128xf32> to vector<8x126xf32>
    %39 = tpu.concatenate %37, %38 in 1 : vector<8x2xf32>, vector<8x126xf32> -> vector<8x128xf32>
    %cst_13 = arith.constant 0.000000e+00 : f32
    %40 = vector.broadcast %cst_13 : f32 to vector<8x1xf32>
    %41 = vector.extract_strided_slice %36 {offsets = [0, 0], sizes = [8, 127], strides = [1, 1]} : vector<8x128xf32> to vector<8x127xf32>
    %42 = tpu.concatenate %40, %41 in 1 : vector<8x1xf32>, vector<8x127xf32> -> vector<8x128xf32>
    %cst_14 = arith.constant 0.000000e+00 : f32
    %43 = vector.broadcast %cst_14 : f32 to vector<8x1xf32>
    %44 = vector.extract_strided_slice %36 {offsets = [0, 1], sizes = [8, 127], strides = [1, 1]} : vector<8x128xf32> to vector<8x127xf32>
    %45 = tpu.concatenate %44, %43 in 1 : vector<8x127xf32>, vector<8x1xf32> -> vector<8x128xf32>
    %cst_15 = arith.constant 0.000000e+00 : f32
    %46 = vector.broadcast %cst_15 : f32 to vector<8x2xf32>
    %47 = vector.extract_strided_slice %36 {offsets = [0, 2], sizes = [8, 126], strides = [1, 1]} : vector<8x128xf32> to vector<8x126xf32>
    %48 = tpu.concatenate %47, %46 in 1 : vector<8x126xf32>, vector<8x2xf32> -> vector<8x128xf32>
    %c1_16 = arith.constant 1 : index
    %c0_17 = arith.constant 0 : index
    %49 = memref.load %arg2[%c1_16, %c0_17] : memref<4x5xf32, #tpu.memory_space<smem>>
    %50 = vector.broadcast %49 : f32 to vector<8x128xf32>
    %51 = arith.mulf %50, %3 : vector<8x128xf32>
    %c1_18 = arith.constant 1 : index
    %c1_19 = arith.constant 1 : index
    %52 = memref.load %arg2[%c1_18, %c1_19] : memref<4x5xf32, #tpu.memory_space<smem>>
    %53 = vector.broadcast %52 : f32 to vector<8x128xf32>
    %54 = arith.mulf %53, %6 : vector<8x128xf32>
    %55 = arith.addf %51, %54 : vector<8x128xf32>
    %c1_20 = arith.constant 1 : index
    %c2_21 = arith.constant 2 : index
    %56 = memref.load %arg2[%c1_20, %c2_21] : memref<4x5xf32, #tpu.memory_space<smem>>
    %57 = vector.broadcast %56 : f32 to vector<8x128xf32>
    %58 = arith.mulf %57, %0 : vector<8x128xf32>
    %59 = arith.addf %55, %58 : vector<8x128xf32>
    %c1_22 = arith.constant 1 : index
    %c3_23 = arith.constant 3 : index
    %60 = memref.load %arg2[%c1_22, %c3_23] : memref<4x5xf32, #tpu.memory_space<smem>>
    %61 = vector.broadcast %60 : f32 to vector<8x128xf32>
    %62 = arith.mulf %61, %9 : vector<8x128xf32>
    %63 = arith.addf %59, %62 : vector<8x128xf32>
    %c1_24 = arith.constant 1 : index
    %c4_25 = arith.constant 4 : index
    %64 = memref.load %arg2[%c1_24, %c4_25] : memref<4x5xf32, #tpu.memory_space<smem>>
    %65 = vector.broadcast %64 : f32 to vector<8x128xf32>
    %66 = arith.mulf %65, %12 : vector<8x128xf32>
    %67 = arith.addf %63, %66 : vector<8x128xf32>
    %c1_26 = arith.constant 1 : index
    %68 = memref.load %arg3[%c1_26] : memref<4xf32, #tpu.memory_space<smem>>
    %69 = vector.broadcast %68 : f32 to vector<8x128xf32>
    %70 = arith.addf %67, %69 : vector<8x128xf32>
    %cst_27 = arith.constant 0.000000e+00 : f32
    %71 = vector.broadcast %cst_27 : f32 to vector<8x128xf32>
    %72 = arith.maximumf %70, %71 : vector<8x128xf32>
    %cst_28 = arith.constant 0.000000e+00 : f32
    %73 = vector.broadcast %cst_28 : f32 to vector<8x2xf32>
    %74 = vector.extract_strided_slice %72 {offsets = [0, 0], sizes = [8, 126], strides = [1, 1]} : vector<8x128xf32> to vector<8x126xf32>
    %75 = tpu.concatenate %73, %74 in 1 : vector<8x2xf32>, vector<8x126xf32> -> vector<8x128xf32>
    %cst_29 = arith.constant 0.000000e+00 : f32
    %76 = vector.broadcast %cst_29 : f32 to vector<8x1xf32>
    %77 = vector.extract_strided_slice %72 {offsets = [0, 0], sizes = [8, 127], strides = [1, 1]} : vector<8x128xf32> to vector<8x127xf32>
    %78 = tpu.concatenate %76, %77 in 1 : vector<8x1xf32>, vector<8x127xf32> -> vector<8x128xf32>
    %cst_30 = arith.constant 0.000000e+00 : f32
    %79 = vector.broadcast %cst_30 : f32 to vector<8x1xf32>
    %80 = vector.extract_strided_slice %72 {offsets = [0, 1], sizes = [8, 127], strides = [1, 1]} : vector<8x128xf32> to vector<8x127xf32>
    %81 = tpu.concatenate %80, %79 in 1 : vector<8x127xf32>, vector<8x1xf32> -> vector<8x128xf32>
    %cst_31 = arith.constant 0.000000e+00 : f32
    %82 = vector.broadcast %cst_31 : f32 to vector<8x2xf32>
    %83 = vector.extract_strided_slice %72 {offsets = [0, 2], sizes = [8, 126], strides = [1, 1]} : vector<8x128xf32> to vector<8x126xf32>
    %84 = tpu.concatenate %83, %82 in 1 : vector<8x126xf32>, vector<8x2xf32> -> vector<8x128xf32>
    %c2_32 = arith.constant 2 : index
    %c0_33 = arith.constant 0 : index
    %85 = memref.load %arg2[%c2_32, %c0_33] : memref<4x5xf32, #tpu.memory_space<smem>>
    %86 = vector.broadcast %85 : f32 to vector<8x128xf32>
    %87 = arith.mulf %86, %3 : vector<8x128xf32>
    %c2_34 = arith.constant 2 : index
    %c1_35 = arith.constant 1 : index
    %88 = memref.load %arg2[%c2_34, %c1_35] : memref<4x5xf32, #tpu.memory_space<smem>>
    %89 = vector.broadcast %88 : f32 to vector<8x128xf32>
    %90 = arith.mulf %89, %6 : vector<8x128xf32>
    %91 = arith.addf %87, %90 : vector<8x128xf32>
    %c2_36 = arith.constant 2 : index
    %c2_37 = arith.constant 2 : index
    %92 = memref.load %arg2[%c2_36, %c2_37] : memref<4x5xf32, #tpu.memory_space<smem>>
    %93 = vector.broadcast %92 : f32 to vector<8x128xf32>
    %94 = arith.mulf %93, %0 : vector<8x128xf32>
    %95 = arith.addf %91, %94 : vector<8x128xf32>
    %c2_38 = arith.constant 2 : index
    %c3_39 = arith.constant 3 : index
    %96 = memref.load %arg2[%c2_38, %c3_39] : memref<4x5xf32, #tpu.memory_space<smem>>
    %97 = vector.broadcast %96 : f32 to vector<8x128xf32>
    %98 = arith.mulf %97, %9 : vector<8x128xf32>
    %99 = arith.addf %95, %98 : vector<8x128xf32>
    %c2_40 = arith.constant 2 : index
    %c4_41 = arith.constant 4 : index
    %100 = memref.load %arg2[%c2_40, %c4_41] : memref<4x5xf32, #tpu.memory_space<smem>>
    %101 = vector.broadcast %100 : f32 to vector<8x128xf32>
    %102 = arith.mulf %101, %12 : vector<8x128xf32>
    %103 = arith.addf %99, %102 : vector<8x128xf32>
    %c2_42 = arith.constant 2 : index
    %104 = memref.load %arg3[%c2_42] : memref<4xf32, #tpu.memory_space<smem>>
    %105 = vector.broadcast %104 : f32 to vector<8x128xf32>
    %106 = arith.addf %103, %105 : vector<8x128xf32>
    %cst_43 = arith.constant 0.000000e+00 : f32
    %107 = vector.broadcast %cst_43 : f32 to vector<8x128xf32>
    %108 = arith.maximumf %106, %107 : vector<8x128xf32>
    %cst_44 = arith.constant 0.000000e+00 : f32
    %109 = vector.broadcast %cst_44 : f32 to vector<8x2xf32>
    %110 = vector.extract_strided_slice %108 {offsets = [0, 0], sizes = [8, 126], strides = [1, 1]} : vector<8x128xf32> to vector<8x126xf32>
    %111 = tpu.concatenate %109, %110 in 1 : vector<8x2xf32>, vector<8x126xf32> -> vector<8x128xf32>
    %cst_45 = arith.constant 0.000000e+00 : f32
    %112 = vector.broadcast %cst_45 : f32 to vector<8x1xf32>
    %113 = vector.extract_strided_slice %108 {offsets = [0, 0], sizes = [8, 127], strides = [1, 1]} : vector<8x128xf32> to vector<8x127xf32>
    %114 = tpu.concatenate %112, %113 in 1 : vector<8x1xf32>, vector<8x127xf32> -> vector<8x128xf32>
    %cst_46 = arith.constant 0.000000e+00 : f32
    %115 = vector.broadcast %cst_46 : f32 to vector<8x1xf32>
    %116 = vector.extract_strided_slice %108 {offsets = [0, 1], sizes = [8, 127], strides = [1, 1]} : vector<8x128xf32> to vector<8x127xf32>
    %117 = tpu.concatenate %116, %115 in 1 : vector<8x127xf32>, vector<8x1xf32> -> vector<8x128xf32>
    %cst_47 = arith.constant 0.000000e+00 : f32
    %118 = vector.broadcast %cst_47 : f32 to vector<8x2xf32>
    %119 = vector.extract_strided_slice %108 {offsets = [0, 2], sizes = [8, 126], strides = [1, 1]} : vector<8x128xf32> to vector<8x126xf32>
    %120 = tpu.concatenate %119, %118 in 1 : vector<8x126xf32>, vector<8x2xf32> -> vector<8x128xf32>
    %c3_48 = arith.constant 3 : index
    %c0_49 = arith.constant 0 : index
    %121 = memref.load %arg2[%c3_48, %c0_49] : memref<4x5xf32, #tpu.memory_space<smem>>
    %122 = vector.broadcast %121 : f32 to vector<8x128xf32>
    %123 = arith.mulf %122, %3 : vector<8x128xf32>
    %c3_50 = arith.constant 3 : index
    %c1_51 = arith.constant 1 : index
    %124 = memref.load %arg2[%c3_50, %c1_51] : memref<4x5xf32, #tpu.memory_space<smem>>
    %125 = vector.broadcast %124 : f32 to vector<8x128xf32>
    %126 = arith.mulf %125, %6 : vector<8x128xf32>
    %127 = arith.addf %123, %126 : vector<8x128xf32>
    %c3_52 = arith.constant 3 : index
    %c2_53 = arith.constant 2 : index
    %128 = memref.load %arg2[%c3_52, %c2_53] : memref<4x5xf32, #tpu.memory_space<smem>>
    %129 = vector.broadcast %128 : f32 to vector<8x128xf32>
    %130 = arith.mulf %129, %0 : vector<8x128xf32>
    %131 = arith.addf %127, %130 : vector<8x128xf32>
    %c3_54 = arith.constant 3 : index
    %c3_55 = arith.constant 3 : index
    %132 = memref.load %arg2[%c3_54, %c3_55] : memref<4x5xf32, #tpu.memory_space<smem>>
    %133 = vector.broadcast %132 : f32 to vector<8x128xf32>
    %134 = arith.mulf %133, %9 : vector<8x128xf32>
    %135 = arith.addf %131, %134 : vector<8x128xf32>
    %c3_56 = arith.constant 3 : index
    %c4_57 = arith.constant 4 : index
    %136 = memref.load %arg2[%c3_56, %c4_57] : memref<4x5xf32, #tpu.memory_space<smem>>
    %137 = vector.broadcast %136 : f32 to vector<8x128xf32>
    %138 = arith.mulf %137, %12 : vector<8x128xf32>
    %139 = arith.addf %135, %138 : vector<8x128xf32>
    %c3_58 = arith.constant 3 : index
    %140 = memref.load %arg3[%c3_58] : memref<4xf32, #tpu.memory_space<smem>>
    %141 = vector.broadcast %140 : f32 to vector<8x128xf32>
    %142 = arith.addf %139, %141 : vector<8x128xf32>
    %cst_59 = arith.constant 0.000000e+00 : f32
    %143 = vector.broadcast %cst_59 : f32 to vector<8x128xf32>
    %144 = arith.maximumf %142, %143 : vector<8x128xf32>
    %cst_60 = arith.constant 0.000000e+00 : f32
    %145 = vector.broadcast %cst_60 : f32 to vector<8x2xf32>
    %146 = vector.extract_strided_slice %144 {offsets = [0, 0], sizes = [8, 126], strides = [1, 1]} : vector<8x128xf32> to vector<8x126xf32>
    %147 = tpu.concatenate %145, %146 in 1 : vector<8x2xf32>, vector<8x126xf32> -> vector<8x128xf32>
    %cst_61 = arith.constant 0.000000e+00 : f32
    %148 = vector.broadcast %cst_61 : f32 to vector<8x1xf32>
    %149 = vector.extract_strided_slice %144 {offsets = [0, 0], sizes = [8, 127], strides = [1, 1]} : vector<8x128xf32> to vector<8x127xf32>
    %150 = tpu.concatenate %148, %149 in 1 : vector<8x1xf32>, vector<8x127xf32> -> vector<8x128xf32>
    %cst_62 = arith.constant 0.000000e+00 : f32
    %151 = vector.broadcast %cst_62 : f32 to vector<8x1xf32>
    %152 = vector.extract_strided_slice %144 {offsets = [0, 1], sizes = [8, 127], strides = [1, 1]} : vector<8x128xf32> to vector<8x127xf32>
    %153 = tpu.concatenate %152, %151 in 1 : vector<8x127xf32>, vector<8x1xf32> -> vector<8x128xf32>
    %cst_63 = arith.constant 0.000000e+00 : f32
    %154 = vector.broadcast %cst_63 : f32 to vector<8x2xf32>
    %155 = vector.extract_strided_slice %144 {offsets = [0, 2], sizes = [8, 126], strides = [1, 1]} : vector<8x128xf32> to vector<8x126xf32>
    %156 = tpu.concatenate %155, %154 in 1 : vector<8x126xf32>, vector<8x2xf32> -> vector<8x128xf32>
    %cst_64 = arith.constant 0.000000e+00 : f32
    %157 = vector.broadcast %cst_64 : f32 to vector<8x256xf32>
    %c0_65 = arith.constant 0 : index
    %c0_66 = arith.constant 0 : index
    %158 = memref.load %arg4[%c0_65, %c0_66] : memref<16x20xf32, #tpu.memory_space<smem>>
    %159 = vector.broadcast %158 : f32 to vector<8x128xf32>
    %160 = arith.mulf %159, %39 : vector<8x128xf32>
    %c0_67 = arith.constant 0 : index
    %c1_68 = arith.constant 1 : index
    %161 = memref.load %arg4[%c0_67, %c1_68] : memref<16x20xf32, #tpu.memory_space<smem>>
    %162 = vector.broadcast %161 : f32 to vector<8x128xf32>
    %163 = arith.mulf %162, %42 : vector<8x128xf32>
    %164 = arith.addf %160, %163 : vector<8x128xf32>
    %c0_69 = arith.constant 0 : index
    %c2_70 = arith.constant 2 : index
    %165 = memref.load %arg4[%c0_69, %c2_70] : memref<16x20xf32, #tpu.memory_space<smem>>
    %166 = vector.broadcast %165 : f32 to vector<8x128xf32>
    %167 = arith.mulf %166, %36 : vector<8x128xf32>
    %168 = arith.addf %164, %167 : vector<8x128xf32>
    %c0_71 = arith.constant 0 : index
    %c3_72 = arith.constant 3 : index
    %169 = memref.load %arg4[%c0_71, %c3_72] : memref<16x20xf32, #tpu.memory_space<smem>>
    %170 = vector.broadcast %169 : f32 to vector<8x128xf32>
    %171 = arith.mulf %170, %45 : vector<8x128xf32>
    %172 = arith.addf %168, %171 : vector<8x128xf32>
    %c0_73 = arith.constant 0 : index
    %c4_74 = arith.constant 4 : index
    %173 = memref.load %arg4[%c0_73, %c4_74] : memref<16x20xf32, #tpu.memory_space<smem>>
    %174 = vector.broadcast %173 : f32 to vector<8x128xf32>
    %175 = arith.mulf %174, %48 : vector<8x128xf32>
    %176 = arith.addf %172, %175 : vector<8x128xf32>
    %c0_75 = arith.constant 0 : index
    %c5 = arith.constant 5 : index
    %177 = memref.load %arg4[%c0_75, %c5] : memref<16x20xf32, #tpu.memory_space<smem>>
    %178 = vector.broadcast %177 : f32 to vector<8x128xf32>
    %179 = arith.mulf %178, %75 : vector<8x128xf32>
    %180 = arith.addf %176, %179 : vector<8x128xf32>
    %c0_76 = arith.constant 0 : index
    %c6 = arith.constant 6 : index
    %181 = memref.load %arg4[%c0_76, %c6] : memref<16x20xf32, #tpu.memory_space<smem>>
    %182 = vector.broadcast %181 : f32 to vector<8x128xf32>
    %183 = arith.mulf %182, %78 : vector<8x128xf32>
    %184 = arith.addf %180, %183 : vector<8x128xf32>
    %c0_77 = arith.constant 0 : index
    %c7 = arith.constant 7 : index
    %185 = memref.load %arg4[%c0_77, %c7] : memref<16x20xf32, #tpu.memory_space<smem>>
    %186 = vector.broadcast %185 : f32 to vector<8x128xf32>
    %187 = arith.mulf %186, %72 : vector<8x128xf32>
    %188 = arith.addf %184, %187 : vector<8x128xf32>
    %c0_78 = arith.constant 0 : index
    %c8 = arith.constant 8 : index
    %189 = memref.load %arg4[%c0_78, %c8] : memref<16x20xf32, #tpu.memory_space<smem>>
    %190 = vector.broadcast %189 : f32 to vector<8x128xf32>
    %191 = arith.mulf %190, %81 : vector<8x128xf32>
    %192 = arith.addf %188, %191 : vector<8x128xf32>
    %c0_79 = arith.constant 0 : index
    %c9 = arith.constant 9 : index
    %193 = memref.load %arg4[%c0_79, %c9] : memref<16x20xf32, #tpu.memory_space<smem>>
    %194 = vector.broadcast %193 : f32 to vector<8x128xf32>
    %195 = arith.mulf %194, %84 : vector<8x128xf32>
    %196 = arith.addf %192, %195 : vector<8x128xf32>
    %c0_80 = arith.constant 0 : index
    %c10 = arith.constant 10 : index
    %197 = memref.load %arg4[%c0_80, %c10] : memref<16x20xf32, #tpu.memory_space<smem>>
    %198 = vector.broadcast %197 : f32 to vector<8x128xf32>
    %199 = arith.mulf %198, %111 : vector<8x128xf32>
    %200 = arith.addf %196, %199 : vector<8x128xf32>
    %c0_81 = arith.constant 0 : index
    %c11 = arith.constant 11 : index
    %201 = memref.load %arg4[%c0_81, %c11] : memref<16x20xf32, #tpu.memory_space<smem>>
    %202 = vector.broadcast %201 : f32 to vector<8x128xf32>
    %203 = arith.mulf %202, %114 : vector<8x128xf32>
    %204 = arith.addf %200, %203 : vector<8x128xf32>
    %c0_82 = arith.constant 0 : index
    %c12 = arith.constant 12 : index
    %205 = memref.load %arg4[%c0_82, %c12] : memref<16x20xf32, #tpu.memory_space<smem>>
    %206 = vector.broadcast %205 : f32 to vector<8x128xf32>
    %207 = arith.mulf %206, %108 : vector<8x128xf32>
    %208 = arith.addf %204, %207 : vector<8x128xf32>
    %c0_83 = arith.constant 0 : index
    %c13 = arith.constant 13 : index
    %209 = memref.load %arg4[%c0_83, %c13] : memref<16x20xf32, #tpu.memory_space<smem>>
    %210 = vector.broadcast %209 : f32 to vector<8x128xf32>
    %211 = arith.mulf %210, %117 : vector<8x128xf32>
    %212 = arith.addf %208, %211 : vector<8x128xf32>
    %c0_84 = arith.constant 0 : index
    %c14 = arith.constant 14 : index
    %213 = memref.load %arg4[%c0_84, %c14] : memref<16x20xf32, #tpu.memory_space<smem>>
    %214 = vector.broadcast %213 : f32 to vector<8x128xf32>
    %215 = arith.mulf %214, %120 : vector<8x128xf32>
    %216 = arith.addf %212, %215 : vector<8x128xf32>
    %c0_85 = arith.constant 0 : index
    %c15 = arith.constant 15 : index
    %217 = memref.load %arg4[%c0_85, %c15] : memref<16x20xf32, #tpu.memory_space<smem>>
    %218 = vector.broadcast %217 : f32 to vector<8x128xf32>
    %219 = arith.mulf %218, %147 : vector<8x128xf32>
    %220 = arith.addf %216, %219 : vector<8x128xf32>
    %c0_86 = arith.constant 0 : index
    %c16 = arith.constant 16 : index
    %221 = memref.load %arg4[%c0_86, %c16] : memref<16x20xf32, #tpu.memory_space<smem>>
    %222 = vector.broadcast %221 : f32 to vector<8x128xf32>
    %223 = arith.mulf %222, %150 : vector<8x128xf32>
    %224 = arith.addf %220, %223 : vector<8x128xf32>
    %c0_87 = arith.constant 0 : index
    %c17 = arith.constant 17 : index
    %225 = memref.load %arg4[%c0_87, %c17] : memref<16x20xf32, #tpu.memory_space<smem>>
    %226 = vector.broadcast %225 : f32 to vector<8x128xf32>
    %227 = arith.mulf %226, %144 : vector<8x128xf32>
    %228 = arith.addf %224, %227 : vector<8x128xf32>
    %c0_88 = arith.constant 0 : index
    %c18 = arith.constant 18 : index
    %229 = memref.load %arg4[%c0_88, %c18] : memref<16x20xf32, #tpu.memory_space<smem>>
    %230 = vector.broadcast %229 : f32 to vector<8x128xf32>
    %231 = arith.mulf %230, %153 : vector<8x128xf32>
    %232 = arith.addf %228, %231 : vector<8x128xf32>
    %c0_89 = arith.constant 0 : index
    %c19 = arith.constant 19 : index
    %233 = memref.load %arg4[%c0_89, %c19] : memref<16x20xf32, #tpu.memory_space<smem>>
    %234 = vector.broadcast %233 : f32 to vector<8x128xf32>
    %235 = arith.mulf %234, %156 : vector<8x128xf32>
    %236 = arith.addf %232, %235 : vector<8x128xf32>
    %c0_90 = arith.constant 0 : index
    %237 = memref.load %arg5[%c0_90] : memref<16xf32, #tpu.memory_space<smem>>
    %238 = vector.broadcast %237 : f32 to vector<8x128xf32>
    %239 = arith.addf %236, %238 : vector<8x128xf32>
    %cst_91 = arith.constant 0.000000e+00 : f32
    %240 = vector.broadcast %cst_91 : f32 to vector<8x128xf32>
    %241 = arith.maximumf %239, %240 : vector<8x128xf32>
    %cst_92 = arith.constant 0.000000e+00 : f32
    %242 = vector.broadcast %cst_92 : f32 to vector<8x1xf32>
    %243 = vector.extract_strided_slice %241 {offsets = [0, 1], sizes = [8, 127], strides = [1, 1]} : vector<8x128xf32> to vector<8x127xf32>
    %244 = tpu.concatenate %243, %242 in 1 : vector<8x127xf32>, vector<8x1xf32> -> vector<8x128xf32>
    %245 = arith.maximumf %241, %244 : vector<8x128xf32>
    %cst_93 = arith.constant 0.000000e+00 : f32
    %246 = vector.broadcast %cst_93 : f32 to vector<8x2xf32>
    %247 = vector.extract_strided_slice %241 {offsets = [0, 2], sizes = [8, 126], strides = [1, 1]} : vector<8x128xf32> to vector<8x126xf32>
    %248 = tpu.concatenate %247, %246 in 1 : vector<8x126xf32>, vector<8x2xf32> -> vector<8x128xf32>
    %cst_94 = arith.constant 0.000000e+00 : f32
    %249 = vector.broadcast %cst_94 : f32 to vector<8x3xf32>
    %250 = vector.extract_strided_slice %241 {offsets = [0, 3], sizes = [8, 125], strides = [1, 1]} : vector<8x128xf32> to vector<8x125xf32>
    %251 = tpu.concatenate %250, %249 in 1 : vector<8x125xf32>, vector<8x3xf32> -> vector<8x128xf32>
    %252 = arith.maximumf %248, %251 : vector<8x128xf32>
    %253 = arith.maximumf %245, %252 : vector<8x128xf32>
    %c0_95 = arith.constant 0 : index
    %c0_96 = arith.constant 0 : index
    %c0_97 = arith.constant 0 : index
    %254 = vector.load %arg6[%c0_95, %c0_96, %c0_97] : memref<16x128x256xf32, #tpu.memory_space<vmem>>, vector<1x128x256xf32>
    %255 = vector.shape_cast %254 : vector<1x128x256xf32> to vector<128x256xf32>
    %cst_98 = arith.constant dense<0.000000e+00> : vector<8x256xf32>
    %256 = tpu.matmul %253, %255, %cst_98 {dimension_numbers = #tpu.dot_dimension_numbers<[1], [0], [0], [1], [0, 0, 1, 1], [], []>} : vector<8x128xf32>, vector<128x256xf32>, vector<8x256xf32> -> vector<8x256xf32>
    %257 = arith.addf %157, %256 : vector<8x256xf32>
    %c1_99 = arith.constant 1 : index
    %c0_100 = arith.constant 0 : index
    %258 = memref.load %arg4[%c1_99, %c0_100] : memref<16x20xf32, #tpu.memory_space<smem>>
    %259 = vector.broadcast %258 : f32 to vector<8x128xf32>
    %260 = arith.mulf %259, %39 : vector<8x128xf32>
    %c1_101 = arith.constant 1 : index
    %c1_102 = arith.constant 1 : index
    %261 = memref.load %arg4[%c1_101, %c1_102] : memref<16x20xf32, #tpu.memory_space<smem>>
    %262 = vector.broadcast %261 : f32 to vector<8x128xf32>
    %263 = arith.mulf %262, %42 : vector<8x128xf32>
    %264 = arith.addf %260, %263 : vector<8x128xf32>
    %c1_103 = arith.constant 1 : index
    %c2_104 = arith.constant 2 : index
    %265 = memref.load %arg4[%c1_103, %c2_104] : memref<16x20xf32, #tpu.memory_space<smem>>
    %266 = vector.broadcast %265 : f32 to vector<8x128xf32>
    %267 = arith.mulf %266, %36 : vector<8x128xf32>
    %268 = arith.addf %264, %267 : vector<8x128xf32>
    %c1_105 = arith.constant 1 : index
    %c3_106 = arith.constant 3 : index
    %269 = memref.load %arg4[%c1_105, %c3_106] : memref<16x20xf32, #tpu.memory_space<smem>>
    %270 = vector.broadcast %269 : f32 to vector<8x128xf32>
    %271 = arith.mulf %270, %45 : vector<8x128xf32>
    %272 = arith.addf %268, %271 : vector<8x128xf32>
    %c1_107 = arith.constant 1 : index
    %c4_108 = arith.constant 4 : index
    %273 = memref.load %arg4[%c1_107, %c4_108] : memref<16x20xf32, #tpu.memory_space<smem>>
    %274 = vector.broadcast %273 : f32 to vector<8x128xf32>
    %275 = arith.mulf %274, %48 : vector<8x128xf32>
    %276 = arith.addf %272, %275 : vector<8x128xf32>
    %c1_109 = arith.constant 1 : index
    %c5_110 = arith.constant 5 : index
    %277 = memref.load %arg4[%c1_109, %c5_110] : memref<16x20xf32, #tpu.memory_space<smem>>
    %278 = vector.broadcast %277 : f32 to vector<8x128xf32>
    %279 = arith.mulf %278, %75 : vector<8x128xf32>
    %280 = arith.addf %276, %279 : vector<8x128xf32>
    %c1_111 = arith.constant 1 : index
    %c6_112 = arith.constant 6 : index
    %281 = memref.load %arg4[%c1_111, %c6_112] : memref<16x20xf32, #tpu.memory_space<smem>>
    %282 = vector.broadcast %281 : f32 to vector<8x128xf32>
    %283 = arith.mulf %282, %78 : vector<8x128xf32>
    %284 = arith.addf %280, %283 : vector<8x128xf32>
    %c1_113 = arith.constant 1 : index
    %c7_114 = arith.constant 7 : index
    %285 = memref.load %arg4[%c1_113, %c7_114] : memref<16x20xf32, #tpu.memory_space<smem>>
    %286 = vector.broadcast %285 : f32 to vector<8x128xf32>
    %287 = arith.mulf %286, %72 : vector<8x128xf32>
    %288 = arith.addf %284, %287 : vector<8x128xf32>
    %c1_115 = arith.constant 1 : index
    %c8_116 = arith.constant 8 : index
    %289 = memref.load %arg4[%c1_115, %c8_116] : memref<16x20xf32, #tpu.memory_space<smem>>
    %290 = vector.broadcast %289 : f32 to vector<8x128xf32>
    %291 = arith.mulf %290, %81 : vector<8x128xf32>
    %292 = arith.addf %288, %291 : vector<8x128xf32>
    %c1_117 = arith.constant 1 : index
    %c9_118 = arith.constant 9 : index
    %293 = memref.load %arg4[%c1_117, %c9_118] : memref<16x20xf32, #tpu.memory_space<smem>>
    %294 = vector.broadcast %293 : f32 to vector<8x128xf32>
    %295 = arith.mulf %294, %84 : vector<8x128xf32>
    %296 = arith.addf %292, %295 : vector<8x128xf32>
    %c1_119 = arith.constant 1 : index
    %c10_120 = arith.constant 10 : index
    %297 = memref.load %arg4[%c1_119, %c10_120] : memref<16x20xf32, #tpu.memory_space<smem>>
    %298 = vector.broadcast %297 : f32 to vector<8x128xf32>
    %299 = arith.mulf %298, %111 : vector<8x128xf32>
    %300 = arith.addf %296, %299 : vector<8x128xf32>
    %c1_121 = arith.constant 1 : index
    %c11_122 = arith.constant 11 : index
    %301 = memref.load %arg4[%c1_121, %c11_122] : memref<16x20xf32, #tpu.memory_space<smem>>
    %302 = vector.broadcast %301 : f32 to vector<8x128xf32>
    %303 = arith.mulf %302, %114 : vector<8x128xf32>
    %304 = arith.addf %300, %303 : vector<8x128xf32>
    %c1_123 = arith.constant 1 : index
    %c12_124 = arith.constant 12 : index
    %305 = memref.load %arg4[%c1_123, %c12_124] : memref<16x20xf32, #tpu.memory_space<smem>>
    %306 = vector.broadcast %305 : f32 to vector<8x128xf32>
    %307 = arith.mulf %306, %108 : vector<8x128xf32>
    %308 = arith.addf %304, %307 : vector<8x128xf32>
    %c1_125 = arith.constant 1 : index
    %c13_126 = arith.constant 13 : index
    %309 = memref.load %arg4[%c1_125, %c13_126] : memref<16x20xf32, #tpu.memory_space<smem>>
    %310 = vector.broadcast %309 : f32 to vector<8x128xf32>
    %311 = arith.mulf %310, %117 : vector<8x128xf32>
    %312 = arith.addf %308, %311 : vector<8x128xf32>
    %c1_127 = arith.constant 1 : index
    %c14_128 = arith.constant 14 : index
    %313 = memref.load %arg4[%c1_127, %c14_128] : memref<16x20xf32, #tpu.memory_space<smem>>
    %314 = vector.broadcast %313 : f32 to vector<8x128xf32>
    %315 = arith.mulf %314, %120 : vector<8x128xf32>
    %316 = arith.addf %312, %315 : vector<8x128xf32>
    %c1_129 = arith.constant 1 : index
    %c15_130 = arith.constant 15 : index
    %317 = memref.load %arg4[%c1_129, %c15_130] : memref<16x20xf32, #tpu.memory_space<smem>>
    %318 = vector.broadcast %317 : f32 to vector<8x128xf32>
    %319 = arith.mulf %318, %147 : vector<8x128xf32>
    %320 = arith.addf %316, %319 : vector<8x128xf32>
    %c1_131 = arith.constant 1 : index
    %c16_132 = arith.constant 16 : index
    %321 = memref.load %arg4[%c1_131, %c16_132] : memref<16x20xf32, #tpu.memory_space<smem>>
    %322 = vector.broadcast %321 : f32 to vector<8x128xf32>
    %323 = arith.mulf %322, %150 : vector<8x128xf32>
    %324 = arith.addf %320, %323 : vector<8x128xf32>
    %c1_133 = arith.constant 1 : index
    %c17_134 = arith.constant 17 : index
    %325 = memref.load %arg4[%c1_133, %c17_134] : memref<16x20xf32, #tpu.memory_space<smem>>
    %326 = vector.broadcast %325 : f32 to vector<8x128xf32>
    %327 = arith.mulf %326, %144 : vector<8x128xf32>
    %328 = arith.addf %324, %327 : vector<8x128xf32>
    %c1_135 = arith.constant 1 : index
    %c18_136 = arith.constant 18 : index
    %329 = memref.load %arg4[%c1_135, %c18_136] : memref<16x20xf32, #tpu.memory_space<smem>>
    %330 = vector.broadcast %329 : f32 to vector<8x128xf32>
    %331 = arith.mulf %330, %153 : vector<8x128xf32>
    %332 = arith.addf %328, %331 : vector<8x128xf32>
    %c1_137 = arith.constant 1 : index
    %c19_138 = arith.constant 19 : index
    %333 = memref.load %arg4[%c1_137, %c19_138] : memref<16x20xf32, #tpu.memory_space<smem>>
    %334 = vector.broadcast %333 : f32 to vector<8x128xf32>
    %335 = arith.mulf %334, %156 : vector<8x128xf32>
    %336 = arith.addf %332, %335 : vector<8x128xf32>
    %c1_139 = arith.constant 1 : index
    %337 = memref.load %arg5[%c1_139] : memref<16xf32, #tpu.memory_space<smem>>
    %338 = vector.broadcast %337 : f32 to vector<8x128xf32>
    %339 = arith.addf %336, %338 : vector<8x128xf32>
    %cst_140 = arith.constant 0.000000e+00 : f32
    %340 = vector.broadcast %cst_140 : f32 to vector<8x128xf32>
    %341 = arith.maximumf %339, %340 : vector<8x128xf32>
    %cst_141 = arith.constant 0.000000e+00 : f32
    %342 = vector.broadcast %cst_141 : f32 to vector<8x1xf32>
    %343 = vector.extract_strided_slice %341 {offsets = [0, 1], sizes = [8, 127], strides = [1, 1]} : vector<8x128xf32> to vector<8x127xf32>
    %344 = tpu.concatenate %343, %342 in 1 : vector<8x127xf32>, vector<8x1xf32> -> vector<8x128xf32>
    %345 = arith.maximumf %341, %344 : vector<8x128xf32>
    %cst_142 = arith.constant 0.000000e+00 : f32
    %346 = vector.broadcast %cst_142 : f32 to vector<8x2xf32>
    %347 = vector.extract_strided_slice %341 {offsets = [0, 2], sizes = [8, 126], strides = [1, 1]} : vector<8x128xf32> to vector<8x126xf32>
    %348 = tpu.concatenate %347, %346 in 1 : vector<8x126xf32>, vector<8x2xf32> -> vector<8x128xf32>
    %cst_143 = arith.constant 0.000000e+00 : f32
    %349 = vector.broadcast %cst_143 : f32 to vector<8x3xf32>
    %350 = vector.extract_strided_slice %341 {offsets = [0, 3], sizes = [8, 125], strides = [1, 1]} : vector<8x128xf32> to vector<8x125xf32>
    %351 = tpu.concatenate %350, %349 in 1 : vector<8x125xf32>, vector<8x3xf32> -> vector<8x128xf32>
    %352 = arith.maximumf %348, %351 : vector<8x128xf32>
    %353 = arith.maximumf %345, %352 : vector<8x128xf32>
    %c1_144 = arith.constant 1 : index
    %c0_145 = arith.constant 0 : index
    %c0_146 = arith.constant 0 : index
    %354 = vector.load %arg6[%c1_144, %c0_145, %c0_146] : memref<16x128x256xf32, #tpu.memory_space<vmem>>, vector<1x128x256xf32>
    %355 = vector.shape_cast %354 : vector<1x128x256xf32> to vector<128x256xf32>
    %cst_147 = arith.constant dense<0.000000e+00> : vector<8x256xf32>
    %356 = tpu.matmul %353, %355, %cst_147 {dimension_numbers = #tpu.dot_dimension_numbers<[1], [0], [0], [1], [0, 0, 1, 1], [], []>} : vector<8x128xf32>, vector<128x256xf32>, vector<8x256xf32> -> vector<8x256xf32>
    %357 = arith.addf %257, %356 : vector<8x256xf32>
    %c2_148 = arith.constant 2 : index
    %c0_149 = arith.constant 0 : index
    %358 = memref.load %arg4[%c2_148, %c0_149] : memref<16x20xf32, #tpu.memory_space<smem>>
    %359 = vector.broadcast %358 : f32 to vector<8x128xf32>
    %360 = arith.mulf %359, %39 : vector<8x128xf32>
    %c2_150 = arith.constant 2 : index
    %c1_151 = arith.constant 1 : index
    %361 = memref.load %arg4[%c2_150, %c1_151] : memref<16x20xf32, #tpu.memory_space<smem>>
    %362 = vector.broadcast %361 : f32 to vector<8x128xf32>
    %363 = arith.mulf %362, %42 : vector<8x128xf32>
    %364 = arith.addf %360, %363 : vector<8x128xf32>
    %c2_152 = arith.constant 2 : index
    %c2_153 = arith.constant 2 : index
    %365 = memref.load %arg4[%c2_152, %c2_153] : memref<16x20xf32, #tpu.memory_space<smem>>
    %366 = vector.broadcast %365 : f32 to vector<8x128xf32>
    %367 = arith.mulf %366, %36 : vector<8x128xf32>
    %368 = arith.addf %364, %367 : vector<8x128xf32>
    %c2_154 = arith.constant 2 : index
    %c3_155 = arith.constant 3 : index
    %369 = memref.load %arg4[%c2_154, %c3_155] : memref<16x20xf32, #tpu.memory_space<smem>>
    %370 = vector.broadcast %369 : f32 to vector<8x128xf32>
    %371 = arith.mulf %370, %45 : vector<8x128xf32>
    %372 = arith.addf %368, %371 : vector<8x128xf32>
    %c2_156 = arith.constant 2 : index
    %c4_157 = arith.constant 4 : index
    %373 = memref.load %arg4[%c2_156, %c4_157] : memref<16x20xf32, #tpu.memory_space<smem>>
    %374 = vector.broadcast %373 : f32 to vector<8x128xf32>
    %375 = arith.mulf %374, %48 : vector<8x128xf32>
    %376 = arith.addf %372, %375 : vector<8x128xf32>
    %c2_158 = arith.constant 2 : index
    %c5_159 = arith.constant 5 : index
    %377 = memref.load %arg4[%c2_158, %c5_159] : memref<16x20xf32, #tpu.memory_space<smem>>
    %378 = vector.broadcast %377 : f32 to vector<8x128xf32>
    %379 = arith.mulf %378, %75 : vector<8x128xf32>
    %380 = arith.addf %376, %379 : vector<8x128xf32>
    %c2_160 = arith.constant 2 : index
    %c6_161 = arith.constant 6 : index
    %381 = memref.load %arg4[%c2_160, %c6_161] : memref<16x20xf32, #tpu.memory_space<smem>>
    %382 = vector.broadcast %381 : f32 to vector<8x128xf32>
    %383 = arith.mulf %382, %78 : vector<8x128xf32>
    %384 = arith.addf %380, %383 : vector<8x128xf32>
    %c2_162 = arith.constant 2 : index
    %c7_163 = arith.constant 7 : index
    %385 = memref.load %arg4[%c2_162, %c7_163] : memref<16x20xf32, #tpu.memory_space<smem>>
    %386 = vector.broadcast %385 : f32 to vector<8x128xf32>
    %387 = arith.mulf %386, %72 : vector<8x128xf32>
    %388 = arith.addf %384, %387 : vector<8x128xf32>
    %c2_164 = arith.constant 2 : index
    %c8_165 = arith.constant 8 : index
    %389 = memref.load %arg4[%c2_164, %c8_165] : memref<16x20xf32, #tpu.memory_space<smem>>
    %390 = vector.broadcast %389 : f32 to vector<8x128xf32>
    %391 = arith.mulf %390, %81 : vector<8x128xf32>
    %392 = arith.addf %388, %391 : vector<8x128xf32>
    %c2_166 = arith.constant 2 : index
    %c9_167 = arith.constant 9 : index
    %393 = memref.load %arg4[%c2_166, %c9_167] : memref<16x20xf32, #tpu.memory_space<smem>>
    %394 = vector.broadcast %393 : f32 to vector<8x128xf32>
    %395 = arith.mulf %394, %84 : vector<8x128xf32>
    %396 = arith.addf %392, %395 : vector<8x128xf32>
    %c2_168 = arith.constant 2 : index
    %c10_169 = arith.constant 10 : index
    %397 = memref.load %arg4[%c2_168, %c10_169] : memref<16x20xf32, #tpu.memory_space<smem>>
    %398 = vector.broadcast %397 : f32 to vector<8x128xf32>
    %399 = arith.mulf %398, %111 : vector<8x128xf32>
    %400 = arith.addf %396, %399 : vector<8x128xf32>
    %c2_170 = arith.constant 2 : index
    %c11_171 = arith.constant 11 : index
    %401 = memref.load %arg4[%c2_170, %c11_171] : memref<16x20xf32, #tpu.memory_space<smem>>
    %402 = vector.broadcast %401 : f32 to vector<8x128xf32>
    %403 = arith.mulf %402, %114 : vector<8x128xf32>
    %404 = arith.addf %400, %403 : vector<8x128xf32>
    %c2_172 = arith.constant 2 : index
    %c12_173 = arith.constant 12 : index
    %405 = memref.load %arg4[%c2_172, %c12_173] : memref<16x20xf32, #tpu.memory_space<smem>>
    %406 = vector.broadcast %405 : f32 to vector<8x128xf32>
    %407 = arith.mulf %406, %108 : vector<8x128xf32>
    %408 = arith.addf %404, %407 : vector<8x128xf32>
    %c2_174 = arith.constant 2 : index
    %c13_175 = arith.constant 13 : index
    %409 = memref.load %arg4[%c2_174, %c13_175] : memref<16x20xf32, #tpu.memory_space<smem>>
    %410 = vector.broadcast %409 : f32 to vector<8x128xf32>
    %411 = arith.mulf %410, %117 : vector<8x128xf32>
    %412 = arith.addf %408, %411 : vector<8x128xf32>
    %c2_176 = arith.constant 2 : index
    %c14_177 = arith.constant 14 : index
    %413 = memref.load %arg4[%c2_176, %c14_177] : memref<16x20xf32, #tpu.memory_space<smem>>
    %414 = vector.broadcast %413 : f32 to vector<8x128xf32>
    %415 = arith.mulf %414, %120 : vector<8x128xf32>
    %416 = arith.addf %412, %415 : vector<8x128xf32>
    %c2_178 = arith.constant 2 : index
    %c15_179 = arith.constant 15 : index
    %417 = memref.load %arg4[%c2_178, %c15_179] : memref<16x20xf32, #tpu.memory_space<smem>>
    %418 = vector.broadcast %417 : f32 to vector<8x128xf32>
    %419 = arith.mulf %418, %147 : vector<8x128xf32>
    %420 = arith.addf %416, %419 : vector<8x128xf32>
    %c2_180 = arith.constant 2 : index
    %c16_181 = arith.constant 16 : index
    %421 = memref.load %arg4[%c2_180, %c16_181] : memref<16x20xf32, #tpu.memory_space<smem>>
    %422 = vector.broadcast %421 : f32 to vector<8x128xf32>
    %423 = arith.mulf %422, %150 : vector<8x128xf32>
    %424 = arith.addf %420, %423 : vector<8x128xf32>
    %c2_182 = arith.constant 2 : index
    %c17_183 = arith.constant 17 : index
    %425 = memref.load %arg4[%c2_182, %c17_183] : memref<16x20xf32, #tpu.memory_space<smem>>
    %426 = vector.broadcast %425 : f32 to vector<8x128xf32>
    %427 = arith.mulf %426, %144 : vector<8x128xf32>
    %428 = arith.addf %424, %427 : vector<8x128xf32>
    %c2_184 = arith.constant 2 : index
    %c18_185 = arith.constant 18 : index
    %429 = memref.load %arg4[%c2_184, %c18_185] : memref<16x20xf32, #tpu.memory_space<smem>>
    %430 = vector.broadcast %429 : f32 to vector<8x128xf32>
    %431 = arith.mulf %430, %153 : vector<8x128xf32>
    %432 = arith.addf %428, %431 : vector<8x128xf32>
    %c2_186 = arith.constant 2 : index
    %c19_187 = arith.constant 19 : index
    %433 = memref.load %arg4[%c2_186, %c19_187] : memref<16x20xf32, #tpu.memory_space<smem>>
    %434 = vector.broadcast %433 : f32 to vector<8x128xf32>
    %435 = arith.mulf %434, %156 : vector<8x128xf32>
    %436 = arith.addf %432, %435 : vector<8x128xf32>
    %c2_188 = arith.constant 2 : index
    %437 = memref.load %arg5[%c2_188] : memref<16xf32, #tpu.memory_space<smem>>
    %438 = vector.broadcast %437 : f32 to vector<8x128xf32>
    %439 = arith.addf %436, %438 : vector<8x128xf32>
    %cst_189 = arith.constant 0.000000e+00 : f32
    %440 = vector.broadcast %cst_189 : f32 to vector<8x128xf32>
    %441 = arith.maximumf %439, %440 : vector<8x128xf32>
    %cst_190 = arith.constant 0.000000e+00 : f32
    %442 = vector.broadcast %cst_190 : f32 to vector<8x1xf32>
    %443 = vector.extract_strided_slice %441 {offsets = [0, 1], sizes = [8, 127], strides = [1, 1]} : vector<8x128xf32> to vector<8x127xf32>
    %444 = tpu.concatenate %443, %442 in 1 : vector<8x127xf32>, vector<8x1xf32> -> vector<8x128xf32>
    %445 = arith.maximumf %441, %444 : vector<8x128xf32>
    %cst_191 = arith.constant 0.000000e+00 : f32
    %446 = vector.broadcast %cst_191 : f32 to vector<8x2xf32>
    %447 = vector.extract_strided_slice %441 {offsets = [0, 2], sizes = [8, 126], strides = [1, 1]} : vector<8x128xf32> to vector<8x126xf32>
    %448 = tpu.concatenate %447, %446 in 1 : vector<8x126xf32>, vector<8x2xf32> -> vector<8x128xf32>
    %cst_192 = arith.constant 0.000000e+00 : f32
    %449 = vector.broadcast %cst_192 : f32 to vector<8x3xf32>
    %450 = vector.extract_strided_slice %441 {offsets = [0, 3], sizes = [8, 125], strides = [1, 1]} : vector<8x128xf32> to vector<8x125xf32>
    %451 = tpu.concatenate %450, %449 in 1 : vector<8x125xf32>, vector<8x3xf32> -> vector<8x128xf32>
    %452 = arith.maximumf %448, %451 : vector<8x128xf32>
    %453 = arith.maximumf %445, %452 : vector<8x128xf32>
    %c2_193 = arith.constant 2 : index
    %c0_194 = arith.constant 0 : index
    %c0_195 = arith.constant 0 : index
    %454 = vector.load %arg6[%c2_193, %c0_194, %c0_195] : memref<16x128x256xf32, #tpu.memory_space<vmem>>, vector<1x128x256xf32>
    %455 = vector.shape_cast %454 : vector<1x128x256xf32> to vector<128x256xf32>
    %cst_196 = arith.constant dense<0.000000e+00> : vector<8x256xf32>
    %456 = tpu.matmul %453, %455, %cst_196 {dimension_numbers = #tpu.dot_dimension_numbers<[1], [0], [0], [1], [0, 0, 1, 1], [], []>} : vector<8x128xf32>, vector<128x256xf32>, vector<8x256xf32> -> vector<8x256xf32>
    %457 = arith.addf %357, %456 : vector<8x256xf32>
    %c3_197 = arith.constant 3 : index
    %c0_198 = arith.constant 0 : index
    %458 = memref.load %arg4[%c3_197, %c0_198] : memref<16x20xf32, #tpu.memory_space<smem>>
    %459 = vector.broadcast %458 : f32 to vector<8x128xf32>
    %460 = arith.mulf %459, %39 : vector<8x128xf32>
    %c3_199 = arith.constant 3 : index
    %c1_200 = arith.constant 1 : index
    %461 = memref.load %arg4[%c3_199, %c1_200] : memref<16x20xf32, #tpu.memory_space<smem>>
    %462 = vector.broadcast %461 : f32 to vector<8x128xf32>
    %463 = arith.mulf %462, %42 : vector<8x128xf32>
    %464 = arith.addf %460, %463 : vector<8x128xf32>
    %c3_201 = arith.constant 3 : index
    %c2_202 = arith.constant 2 : index
    %465 = memref.load %arg4[%c3_201, %c2_202] : memref<16x20xf32, #tpu.memory_space<smem>>
    %466 = vector.broadcast %465 : f32 to vector<8x128xf32>
    %467 = arith.mulf %466, %36 : vector<8x128xf32>
    %468 = arith.addf %464, %467 : vector<8x128xf32>
    %c3_203 = arith.constant 3 : index
    %c3_204 = arith.constant 3 : index
    %469 = memref.load %arg4[%c3_203, %c3_204] : memref<16x20xf32, #tpu.memory_space<smem>>
    %470 = vector.broadcast %469 : f32 to vector<8x128xf32>
    %471 = arith.mulf %470, %45 : vector<8x128xf32>
    %472 = arith.addf %468, %471 : vector<8x128xf32>
    %c3_205 = arith.constant 3 : index
    %c4_206 = arith.constant 4 : index
    %473 = memref.load %arg4[%c3_205, %c4_206] : memref<16x20xf32, #tpu.memory_space<smem>>
    %474 = vector.broadcast %473 : f32 to vector<8x128xf32>
    %475 = arith.mulf %474, %48 : vector<8x128xf32>
    %476 = arith.addf %472, %475 : vector<8x128xf32>
    %c3_207 = arith.constant 3 : index
    %c5_208 = arith.constant 5 : index
    %477 = memref.load %arg4[%c3_207, %c5_208] : memref<16x20xf32, #tpu.memory_space<smem>>
    %478 = vector.broadcast %477 : f32 to vector<8x128xf32>
    %479 = arith.mulf %478, %75 : vector<8x128xf32>
    %480 = arith.addf %476, %479 : vector<8x128xf32>
    %c3_209 = arith.constant 3 : index
    %c6_210 = arith.constant 6 : index
    %481 = memref.load %arg4[%c3_209, %c6_210] : memref<16x20xf32, #tpu.memory_space<smem>>
    %482 = vector.broadcast %481 : f32 to vector<8x128xf32>
    %483 = arith.mulf %482, %78 : vector<8x128xf32>
    %484 = arith.addf %480, %483 : vector<8x128xf32>
    %c3_211 = arith.constant 3 : index
    %c7_212 = arith.constant 7 : index
    %485 = memref.load %arg4[%c3_211, %c7_212] : memref<16x20xf32, #tpu.memory_space<smem>>
    %486 = vector.broadcast %485 : f32 to vector<8x128xf32>
    %487 = arith.mulf %486, %72 : vector<8x128xf32>
    %488 = arith.addf %484, %487 : vector<8x128xf32>
    %c3_213 = arith.constant 3 : index
    %c8_214 = arith.constant 8 : index
    %489 = memref.load %arg4[%c3_213, %c8_214] : memref<16x20xf32, #tpu.memory_space<smem>>
    %490 = vector.broadcast %489 : f32 to vector<8x128xf32>
    %491 = arith.mulf %490, %81 : vector<8x128xf32>
    %492 = arith.addf %488, %491 : vector<8x128xf32>
    %c3_215 = arith.constant 3 : index
    %c9_216 = arith.constant 9 : index
    %493 = memref.load %arg4[%c3_215, %c9_216] : memref<16x20xf32, #tpu.memory_space<smem>>
    %494 = vector.broadcast %493 : f32 to vector<8x128xf32>
    %495 = arith.mulf %494, %84 : vector<8x128xf32>
    %496 = arith.addf %492, %495 : vector<8x128xf32>
    %c3_217 = arith.constant 3 : index
    %c10_218 = arith.constant 10 : index
    %497 = memref.load %arg4[%c3_217, %c10_218] : memref<16x20xf32, #tpu.memory_space<smem>>
    %498 = vector.broadcast %497 : f32 to vector<8x128xf32>
    %499 = arith.mulf %498, %111 : vector<8x128xf32>
    %500 = arith.addf %496, %499 : vector<8x128xf32>
    %c3_219 = arith.constant 3 : index
    %c11_220 = arith.constant 11 : index
    %501 = memref.load %arg4[%c3_219, %c11_220] : memref<16x20xf32, #tpu.memory_space<smem>>
    %502 = vector.broadcast %501 : f32 to vector<8x128xf32>
    %503 = arith.mulf %502, %114 : vector<8x128xf32>
    %504 = arith.addf %500, %503 : vector<8x128xf32>
    %c3_221 = arith.constant 3 : index
    %c12_222 = arith.constant 12 : index
    %505 = memref.load %arg4[%c3_221, %c12_222] : memref<16x20xf32, #tpu.memory_space<smem>>
    %506 = vector.broadcast %505 : f32 to vector<8x128xf32>
    %507 = arith.mulf %506, %108 : vector<8x128xf32>
    %508 = arith.addf %504, %507 : vector<8x128xf32>
    %c3_223 = arith.constant 3 : index
    %c13_224 = arith.constant 13 : index
    %509 = memref.load %arg4[%c3_223, %c13_224] : memref<16x20xf32, #tpu.memory_space<smem>>
    %510 = vector.broadcast %509 : f32 to vector<8x128xf32>
    %511 = arith.mulf %510, %117 : vector<8x128xf32>
    %512 = arith.addf %508, %511 : vector<8x128xf32>
    %c3_225 = arith.constant 3 : index
    %c14_226 = arith.constant 14 : index
    %513 = memref.load %arg4[%c3_225, %c14_226] : memref<16x20xf32, #tpu.memory_space<smem>>
    %514 = vector.broadcast %513 : f32 to vector<8x128xf32>
    %515 = arith.mulf %514, %120 : vector<8x128xf32>
    %516 = arith.addf %512, %515 : vector<8x128xf32>
    %c3_227 = arith.constant 3 : index
    %c15_228 = arith.constant 15 : index
    %517 = memref.load %arg4[%c3_227, %c15_228] : memref<16x20xf32, #tpu.memory_space<smem>>
    %518 = vector.broadcast %517 : f32 to vector<8x128xf32>
    %519 = arith.mulf %518, %147 : vector<8x128xf32>
    %520 = arith.addf %516, %519 : vector<8x128xf32>
    %c3_229 = arith.constant 3 : index
    %c16_230 = arith.constant 16 : index
    %521 = memref.load %arg4[%c3_229, %c16_230] : memref<16x20xf32, #tpu.memory_space<smem>>
    %522 = vector.broadcast %521 : f32 to vector<8x128xf32>
    %523 = arith.mulf %522, %150 : vector<8x128xf32>
    %524 = arith.addf %520, %523 : vector<8x128xf32>
    %c3_231 = arith.constant 3 : index
    %c17_232 = arith.constant 17 : index
    %525 = memref.load %arg4[%c3_231, %c17_232] : memref<16x20xf32, #tpu.memory_space<smem>>
    %526 = vector.broadcast %525 : f32 to vector<8x128xf32>
    %527 = arith.mulf %526, %144 : vector<8x128xf32>
    %528 = arith.addf %524, %527 : vector<8x128xf32>
    %c3_233 = arith.constant 3 : index
    %c18_234 = arith.constant 18 : index
    %529 = memref.load %arg4[%c3_233, %c18_234] : memref<16x20xf32, #tpu.memory_space<smem>>
    %530 = vector.broadcast %529 : f32 to vector<8x128xf32>
    %531 = arith.mulf %530, %153 : vector<8x128xf32>
    %532 = arith.addf %528, %531 : vector<8x128xf32>
    %c3_235 = arith.constant 3 : index
    %c19_236 = arith.constant 19 : index
    %533 = memref.load %arg4[%c3_235, %c19_236] : memref<16x20xf32, #tpu.memory_space<smem>>
    %534 = vector.broadcast %533 : f32 to vector<8x128xf32>
    %535 = arith.mulf %534, %156 : vector<8x128xf32>
    %536 = arith.addf %532, %535 : vector<8x128xf32>
    %c3_237 = arith.constant 3 : index
    %537 = memref.load %arg5[%c3_237] : memref<16xf32, #tpu.memory_space<smem>>
    %538 = vector.broadcast %537 : f32 to vector<8x128xf32>
    %539 = arith.addf %536, %538 : vector<8x128xf32>
    %cst_238 = arith.constant 0.000000e+00 : f32
    %540 = vector.broadcast %cst_238 : f32 to vector<8x128xf32>
    %541 = arith.maximumf %539, %540 : vector<8x128xf32>
    %cst_239 = arith.constant 0.000000e+00 : f32
    %542 = vector.broadcast %cst_239 : f32 to vector<8x1xf32>
    %543 = vector.extract_strided_slice %541 {offsets = [0, 1], sizes = [8, 127], strides = [1, 1]} : vector<8x128xf32> to vector<8x127xf32>
    %544 = tpu.concatenate %543, %542 in 1 : vector<8x127xf32>, vector<8x1xf32> -> vector<8x128xf32>
    %545 = arith.maximumf %541, %544 : vector<8x128xf32>
    %cst_240 = arith.constant 0.000000e+00 : f32
    %546 = vector.broadcast %cst_240 : f32 to vector<8x2xf32>
    %547 = vector.extract_strided_slice %541 {offsets = [0, 2], sizes = [8, 126], strides = [1, 1]} : vector<8x128xf32> to vector<8x126xf32>
    %548 = tpu.concatenate %547, %546 in 1 : vector<8x126xf32>, vector<8x2xf32> -> vector<8x128xf32>
    %cst_241 = arith.constant 0.000000e+00 : f32
    %549 = vector.broadcast %cst_241 : f32 to vector<8x3xf32>
    %550 = vector.extract_strided_slice %541 {offsets = [0, 3], sizes = [8, 125], strides = [1, 1]} : vector<8x128xf32> to vector<8x125xf32>
    %551 = tpu.concatenate %550, %549 in 1 : vector<8x125xf32>, vector<8x3xf32> -> vector<8x128xf32>
    %552 = arith.maximumf %548, %551 : vector<8x128xf32>
    %553 = arith.maximumf %545, %552 : vector<8x128xf32>
    %c3_242 = arith.constant 3 : index
    %c0_243 = arith.constant 0 : index
    %c0_244 = arith.constant 0 : index
    %554 = vector.load %arg6[%c3_242, %c0_243, %c0_244] : memref<16x128x256xf32, #tpu.memory_space<vmem>>, vector<1x128x256xf32>
    %555 = vector.shape_cast %554 : vector<1x128x256xf32> to vector<128x256xf32>
    %cst_245 = arith.constant dense<0.000000e+00> : vector<8x256xf32>
    %556 = tpu.matmul %553, %555, %cst_245 {dimension_numbers = #tpu.dot_dimension_numbers<[1], [0], [0], [1], [0, 0, 1, 1], [], []>} : vector<8x128xf32>, vector<128x256xf32>, vector<8x256xf32> -> vector<8x256xf32>
    %557 = arith.addf %457, %556 : vector<8x256xf32>
    %c4_246 = arith.constant 4 : index
    %c0_247 = arith.constant 0 : index
    %558 = memref.load %arg4[%c4_246, %c0_247] : memref<16x20xf32, #tpu.memory_space<smem>>
    %559 = vector.broadcast %558 : f32 to vector<8x128xf32>
    %560 = arith.mulf %559, %39 : vector<8x128xf32>
    %c4_248 = arith.constant 4 : index
    %c1_249 = arith.constant 1 : index
    %561 = memref.load %arg4[%c4_248, %c1_249] : memref<16x20xf32, #tpu.memory_space<smem>>
    %562 = vector.broadcast %561 : f32 to vector<8x128xf32>
    %563 = arith.mulf %562, %42 : vector<8x128xf32>
    %564 = arith.addf %560, %563 : vector<8x128xf32>
    %c4_250 = arith.constant 4 : index
    %c2_251 = arith.constant 2 : index
    %565 = memref.load %arg4[%c4_250, %c2_251] : memref<16x20xf32, #tpu.memory_space<smem>>
    %566 = vector.broadcast %565 : f32 to vector<8x128xf32>
    %567 = arith.mulf %566, %36 : vector<8x128xf32>
    %568 = arith.addf %564, %567 : vector<8x128xf32>
    %c4_252 = arith.constant 4 : index
    %c3_253 = arith.constant 3 : index
    %569 = memref.load %arg4[%c4_252, %c3_253] : memref<16x20xf32, #tpu.memory_space<smem>>
    %570 = vector.broadcast %569 : f32 to vector<8x128xf32>
    %571 = arith.mulf %570, %45 : vector<8x128xf32>
    %572 = arith.addf %568, %571 : vector<8x128xf32>
    %c4_254 = arith.constant 4 : index
    %c4_255 = arith.constant 4 : index
    %573 = memref.load %arg4[%c4_254, %c4_255] : memref<16x20xf32, #tpu.memory_space<smem>>
    %574 = vector.broadcast %573 : f32 to vector<8x128xf32>
    %575 = arith.mulf %574, %48 : vector<8x128xf32>
    %576 = arith.addf %572, %575 : vector<8x128xf32>
    %c4_256 = arith.constant 4 : index
    %c5_257 = arith.constant 5 : index
    %577 = memref.load %arg4[%c4_256, %c5_257] : memref<16x20xf32, #tpu.memory_space<smem>>
    %578 = vector.broadcast %577 : f32 to vector<8x128xf32>
    %579 = arith.mulf %578, %75 : vector<8x128xf32>
    %580 = arith.addf %576, %579 : vector<8x128xf32>
    %c4_258 = arith.constant 4 : index
    %c6_259 = arith.constant 6 : index
    %581 = memref.load %arg4[%c4_258, %c6_259] : memref<16x20xf32, #tpu.memory_space<smem>>
    %582 = vector.broadcast %581 : f32 to vector<8x128xf32>
    %583 = arith.mulf %582, %78 : vector<8x128xf32>
    %584 = arith.addf %580, %583 : vector<8x128xf32>
    %c4_260 = arith.constant 4 : index
    %c7_261 = arith.constant 7 : index
    %585 = memref.load %arg4[%c4_260, %c7_261] : memref<16x20xf32, #tpu.memory_space<smem>>
    %586 = vector.broadcast %585 : f32 to vector<8x128xf32>
    %587 = arith.mulf %586, %72 : vector<8x128xf32>
    %588 = arith.addf %584, %587 : vector<8x128xf32>
    %c4_262 = arith.constant 4 : index
    %c8_263 = arith.constant 8 : index
    %589 = memref.load %arg4[%c4_262, %c8_263] : memref<16x20xf32, #tpu.memory_space<smem>>
    %590 = vector.broadcast %589 : f32 to vector<8x128xf32>
    %591 = arith.mulf %590, %81 : vector<8x128xf32>
    %592 = arith.addf %588, %591 : vector<8x128xf32>
    %c4_264 = arith.constant 4 : index
    %c9_265 = arith.constant 9 : index
    %593 = memref.load %arg4[%c4_264, %c9_265] : memref<16x20xf32, #tpu.memory_space<smem>>
    %594 = vector.broadcast %593 : f32 to vector<8x128xf32>
    %595 = arith.mulf %594, %84 : vector<8x128xf32>
    %596 = arith.addf %592, %595 : vector<8x128xf32>
    %c4_266 = arith.constant 4 : index
    %c10_267 = arith.constant 10 : index
    %597 = memref.load %arg4[%c4_266, %c10_267] : memref<16x20xf32, #tpu.memory_space<smem>>
    %598 = vector.broadcast %597 : f32 to vector<8x128xf32>
    %599 = arith.mulf %598, %111 : vector<8x128xf32>
    %600 = arith.addf %596, %599 : vector<8x128xf32>
    %c4_268 = arith.constant 4 : index
    %c11_269 = arith.constant 11 : index
    %601 = memref.load %arg4[%c4_268, %c11_269] : memref<16x20xf32, #tpu.memory_space<smem>>
    %602 = vector.broadcast %601 : f32 to vector<8x128xf32>
    %603 = arith.mulf %602, %114 : vector<8x128xf32>
    %604 = arith.addf %600, %603 : vector<8x128xf32>
    %c4_270 = arith.constant 4 : index
    %c12_271 = arith.constant 12 : index
    %605 = memref.load %arg4[%c4_270, %c12_271] : memref<16x20xf32, #tpu.memory_space<smem>>
    %606 = vector.broadcast %605 : f32 to vector<8x128xf32>
    %607 = arith.mulf %606, %108 : vector<8x128xf32>
    %608 = arith.addf %604, %607 : vector<8x128xf32>
    %c4_272 = arith.constant 4 : index
    %c13_273 = arith.constant 13 : index
    %609 = memref.load %arg4[%c4_272, %c13_273] : memref<16x20xf32, #tpu.memory_space<smem>>
    %610 = vector.broadcast %609 : f32 to vector<8x128xf32>
    %611 = arith.mulf %610, %117 : vector<8x128xf32>
    %612 = arith.addf %608, %611 : vector<8x128xf32>
    %c4_274 = arith.constant 4 : index
    %c14_275 = arith.constant 14 : index
    %613 = memref.load %arg4[%c4_274, %c14_275] : memref<16x20xf32, #tpu.memory_space<smem>>
    %614 = vector.broadcast %613 : f32 to vector<8x128xf32>
    %615 = arith.mulf %614, %120 : vector<8x128xf32>
    %616 = arith.addf %612, %615 : vector<8x128xf32>
    %c4_276 = arith.constant 4 : index
    %c15_277 = arith.constant 15 : index
    %617 = memref.load %arg4[%c4_276, %c15_277] : memref<16x20xf32, #tpu.memory_space<smem>>
    %618 = vector.broadcast %617 : f32 to vector<8x128xf32>
    %619 = arith.mulf %618, %147 : vector<8x128xf32>
    %620 = arith.addf %616, %619 : vector<8x128xf32>
    %c4_278 = arith.constant 4 : index
    %c16_279 = arith.constant 16 : index
    %621 = memref.load %arg4[%c4_278, %c16_279] : memref<16x20xf32, #tpu.memory_space<smem>>
    %622 = vector.broadcast %621 : f32 to vector<8x128xf32>
    %623 = arith.mulf %622, %150 : vector<8x128xf32>
    %624 = arith.addf %620, %623 : vector<8x128xf32>
    %c4_280 = arith.constant 4 : index
    %c17_281 = arith.constant 17 : index
    %625 = memref.load %arg4[%c4_280, %c17_281] : memref<16x20xf32, #tpu.memory_space<smem>>
    %626 = vector.broadcast %625 : f32 to vector<8x128xf32>
    %627 = arith.mulf %626, %144 : vector<8x128xf32>
    %628 = arith.addf %624, %627 : vector<8x128xf32>
    %c4_282 = arith.constant 4 : index
    %c18_283 = arith.constant 18 : index
    %629 = memref.load %arg4[%c4_282, %c18_283] : memref<16x20xf32, #tpu.memory_space<smem>>
    %630 = vector.broadcast %629 : f32 to vector<8x128xf32>
    %631 = arith.mulf %630, %153 : vector<8x128xf32>
    %632 = arith.addf %628, %631 : vector<8x128xf32>
    %c4_284 = arith.constant 4 : index
    %c19_285 = arith.constant 19 : index
    %633 = memref.load %arg4[%c4_284, %c19_285] : memref<16x20xf32, #tpu.memory_space<smem>>
    %634 = vector.broadcast %633 : f32 to vector<8x128xf32>
    %635 = arith.mulf %634, %156 : vector<8x128xf32>
    %636 = arith.addf %632, %635 : vector<8x128xf32>
    %c4_286 = arith.constant 4 : index
    %637 = memref.load %arg5[%c4_286] : memref<16xf32, #tpu.memory_space<smem>>
    %638 = vector.broadcast %637 : f32 to vector<8x128xf32>
    %639 = arith.addf %636, %638 : vector<8x128xf32>
    %cst_287 = arith.constant 0.000000e+00 : f32
    %640 = vector.broadcast %cst_287 : f32 to vector<8x128xf32>
    %641 = arith.maximumf %639, %640 : vector<8x128xf32>
    %cst_288 = arith.constant 0.000000e+00 : f32
    %642 = vector.broadcast %cst_288 : f32 to vector<8x1xf32>
    %643 = vector.extract_strided_slice %641 {offsets = [0, 1], sizes = [8, 127], strides = [1, 1]} : vector<8x128xf32> to vector<8x127xf32>
    %644 = tpu.concatenate %643, %642 in 1 : vector<8x127xf32>, vector<8x1xf32> -> vector<8x128xf32>
    %645 = arith.maximumf %641, %644 : vector<8x128xf32>
    %cst_289 = arith.constant 0.000000e+00 : f32
    %646 = vector.broadcast %cst_289 : f32 to vector<8x2xf32>
    %647 = vector.extract_strided_slice %641 {offsets = [0, 2], sizes = [8, 126], strides = [1, 1]} : vector<8x128xf32> to vector<8x126xf32>
    %648 = tpu.concatenate %647, %646 in 1 : vector<8x126xf32>, vector<8x2xf32> -> vector<8x128xf32>
    %cst_290 = arith.constant 0.000000e+00 : f32
    %649 = vector.broadcast %cst_290 : f32 to vector<8x3xf32>
    %650 = vector.extract_strided_slice %641 {offsets = [0, 3], sizes = [8, 125], strides = [1, 1]} : vector<8x128xf32> to vector<8x125xf32>
    %651 = tpu.concatenate %650, %649 in 1 : vector<8x125xf32>, vector<8x3xf32> -> vector<8x128xf32>
    %652 = arith.maximumf %648, %651 : vector<8x128xf32>
    %653 = arith.maximumf %645, %652 : vector<8x128xf32>
    %c4_291 = arith.constant 4 : index
    %c0_292 = arith.constant 0 : index
    %c0_293 = arith.constant 0 : index
    %654 = vector.load %arg6[%c4_291, %c0_292, %c0_293] : memref<16x128x256xf32, #tpu.memory_space<vmem>>, vector<1x128x256xf32>
    %655 = vector.shape_cast %654 : vector<1x128x256xf32> to vector<128x256xf32>
    %cst_294 = arith.constant dense<0.000000e+00> : vector<8x256xf32>
    %656 = tpu.matmul %653, %655, %cst_294 {dimension_numbers = #tpu.dot_dimension_numbers<[1], [0], [0], [1], [0, 0, 1, 1], [], []>} : vector<8x128xf32>, vector<128x256xf32>, vector<8x256xf32> -> vector<8x256xf32>
    %657 = arith.addf %557, %656 : vector<8x256xf32>
    %c5_295 = arith.constant 5 : index
    %c0_296 = arith.constant 0 : index
    %658 = memref.load %arg4[%c5_295, %c0_296] : memref<16x20xf32, #tpu.memory_space<smem>>
    %659 = vector.broadcast %658 : f32 to vector<8x128xf32>
    %660 = arith.mulf %659, %39 : vector<8x128xf32>
    %c5_297 = arith.constant 5 : index
    %c1_298 = arith.constant 1 : index
    %661 = memref.load %arg4[%c5_297, %c1_298] : memref<16x20xf32, #tpu.memory_space<smem>>
    %662 = vector.broadcast %661 : f32 to vector<8x128xf32>
    %663 = arith.mulf %662, %42 : vector<8x128xf32>
    %664 = arith.addf %660, %663 : vector<8x128xf32>
    %c5_299 = arith.constant 5 : index
    %c2_300 = arith.constant 2 : index
    %665 = memref.load %arg4[%c5_299, %c2_300] : memref<16x20xf32, #tpu.memory_space<smem>>
    %666 = vector.broadcast %665 : f32 to vector<8x128xf32>
    %667 = arith.mulf %666, %36 : vector<8x128xf32>
    %668 = arith.addf %664, %667 : vector<8x128xf32>
    %c5_301 = arith.constant 5 : index
    %c3_302 = arith.constant 3 : index
    %669 = memref.load %arg4[%c5_301, %c3_302] : memref<16x20xf32, #tpu.memory_space<smem>>
    %670 = vector.broadcast %669 : f32 to vector<8x128xf32>
    %671 = arith.mulf %670, %45 : vector<8x128xf32>
    %672 = arith.addf %668, %671 : vector<8x128xf32>
    %c5_303 = arith.constant 5 : index
    %c4_304 = arith.constant 4 : index
    %673 = memref.load %arg4[%c5_303, %c4_304] : memref<16x20xf32, #tpu.memory_space<smem>>
    %674 = vector.broadcast %673 : f32 to vector<8x128xf32>
    %675 = arith.mulf %674, %48 : vector<8x128xf32>
    %676 = arith.addf %672, %675 : vector<8x128xf32>
    %c5_305 = arith.constant 5 : index
    %c5_306 = arith.constant 5 : index
    %677 = memref.load %arg4[%c5_305, %c5_306] : memref<16x20xf32, #tpu.memory_space<smem>>
    %678 = vector.broadcast %677 : f32 to vector<8x128xf32>
    %679 = arith.mulf %678, %75 : vector<8x128xf32>
    %680 = arith.addf %676, %679 : vector<8x128xf32>
    %c5_307 = arith.constant 5 : index
    %c6_308 = arith.constant 6 : index
    %681 = memref.load %arg4[%c5_307, %c6_308] : memref<16x20xf32, #tpu.memory_space<smem>>
    %682 = vector.broadcast %681 : f32 to vector<8x128xf32>
    %683 = arith.mulf %682, %78 : vector<8x128xf32>
    %684 = arith.addf %680, %683 : vector<8x128xf32>
    %c5_309 = arith.constant 5 : index
    %c7_310 = arith.constant 7 : index
    %685 = memref.load %arg4[%c5_309, %c7_310] : memref<16x20xf32, #tpu.memory_space<smem>>
    %686 = vector.broadcast %685 : f32 to vector<8x128xf32>
    %687 = arith.mulf %686, %72 : vector<8x128xf32>
    %688 = arith.addf %684, %687 : vector<8x128xf32>
    %c5_311 = arith.constant 5 : index
    %c8_312 = arith.constant 8 : index
    %689 = memref.load %arg4[%c5_311, %c8_312] : memref<16x20xf32, #tpu.memory_space<smem>>
    %690 = vector.broadcast %689 : f32 to vector<8x128xf32>
    %691 = arith.mulf %690, %81 : vector<8x128xf32>
    %692 = arith.addf %688, %691 : vector<8x128xf32>
    %c5_313 = arith.constant 5 : index
    %c9_314 = arith.constant 9 : index
    %693 = memref.load %arg4[%c5_313, %c9_314] : memref<16x20xf32, #tpu.memory_space<smem>>
    %694 = vector.broadcast %693 : f32 to vector<8x128xf32>
    %695 = arith.mulf %694, %84 : vector<8x128xf32>
    %696 = arith.addf %692, %695 : vector<8x128xf32>
    %c5_315 = arith.constant 5 : index
    %c10_316 = arith.constant 10 : index
    %697 = memref.load %arg4[%c5_315, %c10_316] : memref<16x20xf32, #tpu.memory_space<smem>>
    %698 = vector.broadcast %697 : f32 to vector<8x128xf32>
    %699 = arith.mulf %698, %111 : vector<8x128xf32>
    %700 = arith.addf %696, %699 : vector<8x128xf32>
    %c5_317 = arith.constant 5 : index
    %c11_318 = arith.constant 11 : index
    %701 = memref.load %arg4[%c5_317, %c11_318] : memref<16x20xf32, #tpu.memory_space<smem>>
    %702 = vector.broadcast %701 : f32 to vector<8x128xf32>
    %703 = arith.mulf %702, %114 : vector<8x128xf32>
    %704 = arith.addf %700, %703 : vector<8x128xf32>
    %c5_319 = arith.constant 5 : index
    %c12_320 = arith.constant 12 : index
    %705 = memref.load %arg4[%c5_319, %c12_320] : memref<16x20xf32, #tpu.memory_space<smem>>
    %706 = vector.broadcast %705 : f32 to vector<8x128xf32>
    %707 = arith.mulf %706, %108 : vector<8x128xf32>
    %708 = arith.addf %704, %707 : vector<8x128xf32>
    %c5_321 = arith.constant 5 : index
    %c13_322 = arith.constant 13 : index
    %709 = memref.load %arg4[%c5_321, %c13_322] : memref<16x20xf32, #tpu.memory_space<smem>>
    %710 = vector.broadcast %709 : f32 to vector<8x128xf32>
    %711 = arith.mulf %710, %117 : vector<8x128xf32>
    %712 = arith.addf %708, %711 : vector<8x128xf32>
    %c5_323 = arith.constant 5 : index
    %c14_324 = arith.constant 14 : index
    %713 = memref.load %arg4[%c5_323, %c14_324] : memref<16x20xf32, #tpu.memory_space<smem>>
    %714 = vector.broadcast %713 : f32 to vector<8x128xf32>
    %715 = arith.mulf %714, %120 : vector<8x128xf32>
    %716 = arith.addf %712, %715 : vector<8x128xf32>
    %c5_325 = arith.constant 5 : index
    %c15_326 = arith.constant 15 : index
    %717 = memref.load %arg4[%c5_325, %c15_326] : memref<16x20xf32, #tpu.memory_space<smem>>
    %718 = vector.broadcast %717 : f32 to vector<8x128xf32>
    %719 = arith.mulf %718, %147 : vector<8x128xf32>
    %720 = arith.addf %716, %719 : vector<8x128xf32>
    %c5_327 = arith.constant 5 : index
    %c16_328 = arith.constant 16 : index
    %721 = memref.load %arg4[%c5_327, %c16_328] : memref<16x20xf32, #tpu.memory_space<smem>>
    %722 = vector.broadcast %721 : f32 to vector<8x128xf32>
    %723 = arith.mulf %722, %150 : vector<8x128xf32>
    %724 = arith.addf %720, %723 : vector<8x128xf32>
    %c5_329 = arith.constant 5 : index
    %c17_330 = arith.constant 17 : index
    %725 = memref.load %arg4[%c5_329, %c17_330] : memref<16x20xf32, #tpu.memory_space<smem>>
    %726 = vector.broadcast %725 : f32 to vector<8x128xf32>
    %727 = arith.mulf %726, %144 : vector<8x128xf32>
    %728 = arith.addf %724, %727 : vector<8x128xf32>
    %c5_331 = arith.constant 5 : index
    %c18_332 = arith.constant 18 : index
    %729 = memref.load %arg4[%c5_331, %c18_332] : memref<16x20xf32, #tpu.memory_space<smem>>
    %730 = vector.broadcast %729 : f32 to vector<8x128xf32>
    %731 = arith.mulf %730, %153 : vector<8x128xf32>
    %732 = arith.addf %728, %731 : vector<8x128xf32>
    %c5_333 = arith.constant 5 : index
    %c19_334 = arith.constant 19 : index
    %733 = memref.load %arg4[%c5_333, %c19_334] : memref<16x20xf32, #tpu.memory_space<smem>>
    %734 = vector.broadcast %733 : f32 to vector<8x128xf32>
    %735 = arith.mulf %734, %156 : vector<8x128xf32>
    %736 = arith.addf %732, %735 : vector<8x128xf32>
    %c5_335 = arith.constant 5 : index
    %737 = memref.load %arg5[%c5_335] : memref<16xf32, #tpu.memory_space<smem>>
    %738 = vector.broadcast %737 : f32 to vector<8x128xf32>
    %739 = arith.addf %736, %738 : vector<8x128xf32>
    %cst_336 = arith.constant 0.000000e+00 : f32
    %740 = vector.broadcast %cst_336 : f32 to vector<8x128xf32>
    %741 = arith.maximumf %739, %740 : vector<8x128xf32>
    %cst_337 = arith.constant 0.000000e+00 : f32
    %742 = vector.broadcast %cst_337 : f32 to vector<8x1xf32>
    %743 = vector.extract_strided_slice %741 {offsets = [0, 1], sizes = [8, 127], strides = [1, 1]} : vector<8x128xf32> to vector<8x127xf32>
    %744 = tpu.concatenate %743, %742 in 1 : vector<8x127xf32>, vector<8x1xf32> -> vector<8x128xf32>
    %745 = arith.maximumf %741, %744 : vector<8x128xf32>
    %cst_338 = arith.constant 0.000000e+00 : f32
    %746 = vector.broadcast %cst_338 : f32 to vector<8x2xf32>
    %747 = vector.extract_strided_slice %741 {offsets = [0, 2], sizes = [8, 126], strides = [1, 1]} : vector<8x128xf32> to vector<8x126xf32>
    %748 = tpu.concatenate %747, %746 in 1 : vector<8x126xf32>, vector<8x2xf32> -> vector<8x128xf32>
    %cst_339 = arith.constant 0.000000e+00 : f32
    %749 = vector.broadcast %cst_339 : f32 to vector<8x3xf32>
    %750 = vector.extract_strided_slice %741 {offsets = [0, 3], sizes = [8, 125], strides = [1, 1]} : vector<8x128xf32> to vector<8x125xf32>
    %751 = tpu.concatenate %750, %749 in 1 : vector<8x125xf32>, vector<8x3xf32> -> vector<8x128xf32>
    %752 = arith.maximumf %748, %751 : vector<8x128xf32>
    %753 = arith.maximumf %745, %752 : vector<8x128xf32>
    %c5_340 = arith.constant 5 : index
    %c0_341 = arith.constant 0 : index
    %c0_342 = arith.constant 0 : index
    %754 = vector.load %arg6[%c5_340, %c0_341, %c0_342] : memref<16x128x256xf32, #tpu.memory_space<vmem>>, vector<1x128x256xf32>
    %755 = vector.shape_cast %754 : vector<1x128x256xf32> to vector<128x256xf32>
    %cst_343 = arith.constant dense<0.000000e+00> : vector<8x256xf32>
    %756 = tpu.matmul %753, %755, %cst_343 {dimension_numbers = #tpu.dot_dimension_numbers<[1], [0], [0], [1], [0, 0, 1, 1], [], []>} : vector<8x128xf32>, vector<128x256xf32>, vector<8x256xf32> -> vector<8x256xf32>
    %757 = arith.addf %657, %756 : vector<8x256xf32>
    %c6_344 = arith.constant 6 : index
    %c0_345 = arith.constant 0 : index
    %758 = memref.load %arg4[%c6_344, %c0_345] : memref<16x20xf32, #tpu.memory_space<smem>>
    %759 = vector.broadcast %758 : f32 to vector<8x128xf32>
    %760 = arith.mulf %759, %39 : vector<8x128xf32>
    %c6_346 = arith.constant 6 : index
    %c1_347 = arith.constant 1 : index
    %761 = memref.load %arg4[%c6_346, %c1_347] : memref<16x20xf32, #tpu.memory_space<smem>>
    %762 = vector.broadcast %761 : f32 to vector<8x128xf32>
    %763 = arith.mulf %762, %42 : vector<8x128xf32>
    %764 = arith.addf %760, %763 : vector<8x128xf32>
    %c6_348 = arith.constant 6 : index
    %c2_349 = arith.constant 2 : index
    %765 = memref.load %arg4[%c6_348, %c2_349] : memref<16x20xf32, #tpu.memory_space<smem>>
    %766 = vector.broadcast %765 : f32 to vector<8x128xf32>
    %767 = arith.mulf %766, %36 : vector<8x128xf32>
    %768 = arith.addf %764, %767 : vector<8x128xf32>
    %c6_350 = arith.constant 6 : index
    %c3_351 = arith.constant 3 : index
    %769 = memref.load %arg4[%c6_350, %c3_351] : memref<16x20xf32, #tpu.memory_space<smem>>
    %770 = vector.broadcast %769 : f32 to vector<8x128xf32>
    %771 = arith.mulf %770, %45 : vector<8x128xf32>
    %772 = arith.addf %768, %771 : vector<8x128xf32>
    %c6_352 = arith.constant 6 : index
    %c4_353 = arith.constant 4 : index
    %773 = memref.load %arg4[%c6_352, %c4_353] : memref<16x20xf32, #tpu.memory_space<smem>>
    %774 = vector.broadcast %773 : f32 to vector<8x128xf32>
    %775 = arith.mulf %774, %48 : vector<8x128xf32>
    %776 = arith.addf %772, %775 : vector<8x128xf32>
    %c6_354 = arith.constant 6 : index
    %c5_355 = arith.constant 5 : index
    %777 = memref.load %arg4[%c6_354, %c5_355] : memref<16x20xf32, #tpu.memory_space<smem>>
    %778 = vector.broadcast %777 : f32 to vector<8x128xf32>
    %779 = arith.mulf %778, %75 : vector<8x128xf32>
    %780 = arith.addf %776, %779 : vector<8x128xf32>
    %c6_356 = arith.constant 6 : index
    %c6_357 = arith.constant 6 : index
    %781 = memref.load %arg4[%c6_356, %c6_357] : memref<16x20xf32, #tpu.memory_space<smem>>
    %782 = vector.broadcast %781 : f32 to vector<8x128xf32>
    %783 = arith.mulf %782, %78 : vector<8x128xf32>
    %784 = arith.addf %780, %783 : vector<8x128xf32>
    %c6_358 = arith.constant 6 : index
    %c7_359 = arith.constant 7 : index
    %785 = memref.load %arg4[%c6_358, %c7_359] : memref<16x20xf32, #tpu.memory_space<smem>>
    %786 = vector.broadcast %785 : f32 to vector<8x128xf32>
    %787 = arith.mulf %786, %72 : vector<8x128xf32>
    %788 = arith.addf %784, %787 : vector<8x128xf32>
    %c6_360 = arith.constant 6 : index
    %c8_361 = arith.constant 8 : index
    %789 = memref.load %arg4[%c6_360, %c8_361] : memref<16x20xf32, #tpu.memory_space<smem>>
    %790 = vector.broadcast %789 : f32 to vector<8x128xf32>
    %791 = arith.mulf %790, %81 : vector<8x128xf32>
    %792 = arith.addf %788, %791 : vector<8x128xf32>
    %c6_362 = arith.constant 6 : index
    %c9_363 = arith.constant 9 : index
    %793 = memref.load %arg4[%c6_362, %c9_363] : memref<16x20xf32, #tpu.memory_space<smem>>
    %794 = vector.broadcast %793 : f32 to vector<8x128xf32>
    %795 = arith.mulf %794, %84 : vector<8x128xf32>
    %796 = arith.addf %792, %795 : vector<8x128xf32>
    %c6_364 = arith.constant 6 : index
    %c10_365 = arith.constant 10 : index
    %797 = memref.load %arg4[%c6_364, %c10_365] : memref<16x20xf32, #tpu.memory_space<smem>>
    %798 = vector.broadcast %797 : f32 to vector<8x128xf32>
    %799 = arith.mulf %798, %111 : vector<8x128xf32>
    %800 = arith.addf %796, %799 : vector<8x128xf32>
    %c6_366 = arith.constant 6 : index
    %c11_367 = arith.constant 11 : index
    %801 = memref.load %arg4[%c6_366, %c11_367] : memref<16x20xf32, #tpu.memory_space<smem>>
    %802 = vector.broadcast %801 : f32 to vector<8x128xf32>
    %803 = arith.mulf %802, %114 : vector<8x128xf32>
    %804 = arith.addf %800, %803 : vector<8x128xf32>
    %c6_368 = arith.constant 6 : index
    %c12_369 = arith.constant 12 : index
    %805 = memref.load %arg4[%c6_368, %c12_369] : memref<16x20xf32, #tpu.memory_space<smem>>
    %806 = vector.broadcast %805 : f32 to vector<8x128xf32>
    %807 = arith.mulf %806, %108 : vector<8x128xf32>
    %808 = arith.addf %804, %807 : vector<8x128xf32>
    %c6_370 = arith.constant 6 : index
    %c13_371 = arith.constant 13 : index
    %809 = memref.load %arg4[%c6_370, %c13_371] : memref<16x20xf32, #tpu.memory_space<smem>>
    %810 = vector.broadcast %809 : f32 to vector<8x128xf32>
    %811 = arith.mulf %810, %117 : vector<8x128xf32>
    %812 = arith.addf %808, %811 : vector<8x128xf32>
    %c6_372 = arith.constant 6 : index
    %c14_373 = arith.constant 14 : index
    %813 = memref.load %arg4[%c6_372, %c14_373] : memref<16x20xf32, #tpu.memory_space<smem>>
    %814 = vector.broadcast %813 : f32 to vector<8x128xf32>
    %815 = arith.mulf %814, %120 : vector<8x128xf32>
    %816 = arith.addf %812, %815 : vector<8x128xf32>
    %c6_374 = arith.constant 6 : index
    %c15_375 = arith.constant 15 : index
    %817 = memref.load %arg4[%c6_374, %c15_375] : memref<16x20xf32, #tpu.memory_space<smem>>
    %818 = vector.broadcast %817 : f32 to vector<8x128xf32>
    %819 = arith.mulf %818, %147 : vector<8x128xf32>
    %820 = arith.addf %816, %819 : vector<8x128xf32>
    %c6_376 = arith.constant 6 : index
    %c16_377 = arith.constant 16 : index
    %821 = memref.load %arg4[%c6_376, %c16_377] : memref<16x20xf32, #tpu.memory_space<smem>>
    %822 = vector.broadcast %821 : f32 to vector<8x128xf32>
    %823 = arith.mulf %822, %150 : vector<8x128xf32>
    %824 = arith.addf %820, %823 : vector<8x128xf32>
    %c6_378 = arith.constant 6 : index
    %c17_379 = arith.constant 17 : index
    %825 = memref.load %arg4[%c6_378, %c17_379] : memref<16x20xf32, #tpu.memory_space<smem>>
    %826 = vector.broadcast %825 : f32 to vector<8x128xf32>
    %827 = arith.mulf %826, %144 : vector<8x128xf32>
    %828 = arith.addf %824, %827 : vector<8x128xf32>
    %c6_380 = arith.constant 6 : index
    %c18_381 = arith.constant 18 : index
    %829 = memref.load %arg4[%c6_380, %c18_381] : memref<16x20xf32, #tpu.memory_space<smem>>
    %830 = vector.broadcast %829 : f32 to vector<8x128xf32>
    %831 = arith.mulf %830, %153 : vector<8x128xf32>
    %832 = arith.addf %828, %831 : vector<8x128xf32>
    %c6_382 = arith.constant 6 : index
    %c19_383 = arith.constant 19 : index
    %833 = memref.load %arg4[%c6_382, %c19_383] : memref<16x20xf32, #tpu.memory_space<smem>>
    %834 = vector.broadcast %833 : f32 to vector<8x128xf32>
    %835 = arith.mulf %834, %156 : vector<8x128xf32>
    %836 = arith.addf %832, %835 : vector<8x128xf32>
    %c6_384 = arith.constant 6 : index
    %837 = memref.load %arg5[%c6_384] : memref<16xf32, #tpu.memory_space<smem>>
    %838 = vector.broadcast %837 : f32 to vector<8x128xf32>
    %839 = arith.addf %836, %838 : vector<8x128xf32>
    %cst_385 = arith.constant 0.000000e+00 : f32
    %840 = vector.broadcast %cst_385 : f32 to vector<8x128xf32>
    %841 = arith.maximumf %839, %840 : vector<8x128xf32>
    %cst_386 = arith.constant 0.000000e+00 : f32
    %842 = vector.broadcast %cst_386 : f32 to vector<8x1xf32>
    %843 = vector.extract_strided_slice %841 {offsets = [0, 1], sizes = [8, 127], strides = [1, 1]} : vector<8x128xf32> to vector<8x127xf32>
    %844 = tpu.concatenate %843, %842 in 1 : vector<8x127xf32>, vector<8x1xf32> -> vector<8x128xf32>
    %845 = arith.maximumf %841, %844 : vector<8x128xf32>
    %cst_387 = arith.constant 0.000000e+00 : f32
    %846 = vector.broadcast %cst_387 : f32 to vector<8x2xf32>
    %847 = vector.extract_strided_slice %841 {offsets = [0, 2], sizes = [8, 126], strides = [1, 1]} : vector<8x128xf32> to vector<8x126xf32>
    %848 = tpu.concatenate %847, %846 in 1 : vector<8x126xf32>, vector<8x2xf32> -> vector<8x128xf32>
    %cst_388 = arith.constant 0.000000e+00 : f32
    %849 = vector.broadcast %cst_388 : f32 to vector<8x3xf32>
    %850 = vector.extract_strided_slice %841 {offsets = [0, 3], sizes = [8, 125], strides = [1, 1]} : vector<8x128xf32> to vector<8x125xf32>
    %851 = tpu.concatenate %850, %849 in 1 : vector<8x125xf32>, vector<8x3xf32> -> vector<8x128xf32>
    %852 = arith.maximumf %848, %851 : vector<8x128xf32>
    %853 = arith.maximumf %845, %852 : vector<8x128xf32>
    %c6_389 = arith.constant 6 : index
    %c0_390 = arith.constant 0 : index
    %c0_391 = arith.constant 0 : index
    %854 = vector.load %arg6[%c6_389, %c0_390, %c0_391] : memref<16x128x256xf32, #tpu.memory_space<vmem>>, vector<1x128x256xf32>
    %855 = vector.shape_cast %854 : vector<1x128x256xf32> to vector<128x256xf32>
    %cst_392 = arith.constant dense<0.000000e+00> : vector<8x256xf32>
    %856 = tpu.matmul %853, %855, %cst_392 {dimension_numbers = #tpu.dot_dimension_numbers<[1], [0], [0], [1], [0, 0, 1, 1], [], []>} : vector<8x128xf32>, vector<128x256xf32>, vector<8x256xf32> -> vector<8x256xf32>
    %857 = arith.addf %757, %856 : vector<8x256xf32>
    %c7_393 = arith.constant 7 : index
    %c0_394 = arith.constant 0 : index
    %858 = memref.load %arg4[%c7_393, %c0_394] : memref<16x20xf32, #tpu.memory_space<smem>>
    %859 = vector.broadcast %858 : f32 to vector<8x128xf32>
    %860 = arith.mulf %859, %39 : vector<8x128xf32>
    %c7_395 = arith.constant 7 : index
    %c1_396 = arith.constant 1 : index
    %861 = memref.load %arg4[%c7_395, %c1_396] : memref<16x20xf32, #tpu.memory_space<smem>>
    %862 = vector.broadcast %861 : f32 to vector<8x128xf32>
    %863 = arith.mulf %862, %42 : vector<8x128xf32>
    %864 = arith.addf %860, %863 : vector<8x128xf32>
    %c7_397 = arith.constant 7 : index
    %c2_398 = arith.constant 2 : index
    %865 = memref.load %arg4[%c7_397, %c2_398] : memref<16x20xf32, #tpu.memory_space<smem>>
    %866 = vector.broadcast %865 : f32 to vector<8x128xf32>
    %867 = arith.mulf %866, %36 : vector<8x128xf32>
    %868 = arith.addf %864, %867 : vector<8x128xf32>
    %c7_399 = arith.constant 7 : index
    %c3_400 = arith.constant 3 : index
    %869 = memref.load %arg4[%c7_399, %c3_400] : memref<16x20xf32, #tpu.memory_space<smem>>
    %870 = vector.broadcast %869 : f32 to vector<8x128xf32>
    %871 = arith.mulf %870, %45 : vector<8x128xf32>
    %872 = arith.addf %868, %871 : vector<8x128xf32>
    %c7_401 = arith.constant 7 : index
    %c4_402 = arith.constant 4 : index
    %873 = memref.load %arg4[%c7_401, %c4_402] : memref<16x20xf32, #tpu.memory_space<smem>>
    %874 = vector.broadcast %873 : f32 to vector<8x128xf32>
    %875 = arith.mulf %874, %48 : vector<8x128xf32>
    %876 = arith.addf %872, %875 : vector<8x128xf32>
    %c7_403 = arith.constant 7 : index
    %c5_404 = arith.constant 5 : index
    %877 = memref.load %arg4[%c7_403, %c5_404] : memref<16x20xf32, #tpu.memory_space<smem>>
    %878 = vector.broadcast %877 : f32 to vector<8x128xf32>
    %879 = arith.mulf %878, %75 : vector<8x128xf32>
    %880 = arith.addf %876, %879 : vector<8x128xf32>
    %c7_405 = arith.constant 7 : index
    %c6_406 = arith.constant 6 : index
    %881 = memref.load %arg4[%c7_405, %c6_406] : memref<16x20xf32, #tpu.memory_space<smem>>
    %882 = vector.broadcast %881 : f32 to vector<8x128xf32>
    %883 = arith.mulf %882, %78 : vector<8x128xf32>
    %884 = arith.addf %880, %883 : vector<8x128xf32>
    %c7_407 = arith.constant 7 : index
    %c7_408 = arith.constant 7 : index
    %885 = memref.load %arg4[%c7_407, %c7_408] : memref<16x20xf32, #tpu.memory_space<smem>>
    %886 = vector.broadcast %885 : f32 to vector<8x128xf32>
    %887 = arith.mulf %886, %72 : vector<8x128xf32>
    %888 = arith.addf %884, %887 : vector<8x128xf32>
    %c7_409 = arith.constant 7 : index
    %c8_410 = arith.constant 8 : index
    %889 = memref.load %arg4[%c7_409, %c8_410] : memref<16x20xf32, #tpu.memory_space<smem>>
    %890 = vector.broadcast %889 : f32 to vector<8x128xf32>
    %891 = arith.mulf %890, %81 : vector<8x128xf32>
    %892 = arith.addf %888, %891 : vector<8x128xf32>
    %c7_411 = arith.constant 7 : index
    %c9_412 = arith.constant 9 : index
    %893 = memref.load %arg4[%c7_411, %c9_412] : memref<16x20xf32, #tpu.memory_space<smem>>
    %894 = vector.broadcast %893 : f32 to vector<8x128xf32>
    %895 = arith.mulf %894, %84 : vector<8x128xf32>
    %896 = arith.addf %892, %895 : vector<8x128xf32>
    %c7_413 = arith.constant 7 : index
    %c10_414 = arith.constant 10 : index
    %897 = memref.load %arg4[%c7_413, %c10_414] : memref<16x20xf32, #tpu.memory_space<smem>>
    %898 = vector.broadcast %897 : f32 to vector<8x128xf32>
    %899 = arith.mulf %898, %111 : vector<8x128xf32>
    %900 = arith.addf %896, %899 : vector<8x128xf32>
    %c7_415 = arith.constant 7 : index
    %c11_416 = arith.constant 11 : index
    %901 = memref.load %arg4[%c7_415, %c11_416] : memref<16x20xf32, #tpu.memory_space<smem>>
    %902 = vector.broadcast %901 : f32 to vector<8x128xf32>
    %903 = arith.mulf %902, %114 : vector<8x128xf32>
    %904 = arith.addf %900, %903 : vector<8x128xf32>
    %c7_417 = arith.constant 7 : index
    %c12_418 = arith.constant 12 : index
    %905 = memref.load %arg4[%c7_417, %c12_418] : memref<16x20xf32, #tpu.memory_space<smem>>
    %906 = vector.broadcast %905 : f32 to vector<8x128xf32>
    %907 = arith.mulf %906, %108 : vector<8x128xf32>
    %908 = arith.addf %904, %907 : vector<8x128xf32>
    %c7_419 = arith.constant 7 : index
    %c13_420 = arith.constant 13 : index
    %909 = memref.load %arg4[%c7_419, %c13_420] : memref<16x20xf32, #tpu.memory_space<smem>>
    %910 = vector.broadcast %909 : f32 to vector<8x128xf32>
    %911 = arith.mulf %910, %117 : vector<8x128xf32>
    %912 = arith.addf %908, %911 : vector<8x128xf32>
    %c7_421 = arith.constant 7 : index
    %c14_422 = arith.constant 14 : index
    %913 = memref.load %arg4[%c7_421, %c14_422] : memref<16x20xf32, #tpu.memory_space<smem>>
    %914 = vector.broadcast %913 : f32 to vector<8x128xf32>
    %915 = arith.mulf %914, %120 : vector<8x128xf32>
    %916 = arith.addf %912, %915 : vector<8x128xf32>
    %c7_423 = arith.constant 7 : index
    %c15_424 = arith.constant 15 : index
    %917 = memref.load %arg4[%c7_423, %c15_424] : memref<16x20xf32, #tpu.memory_space<smem>>
    %918 = vector.broadcast %917 : f32 to vector<8x128xf32>
    %919 = arith.mulf %918, %147 : vector<8x128xf32>
    %920 = arith.addf %916, %919 : vector<8x128xf32>
    %c7_425 = arith.constant 7 : index
    %c16_426 = arith.constant 16 : index
    %921 = memref.load %arg4[%c7_425, %c16_426] : memref<16x20xf32, #tpu.memory_space<smem>>
    %922 = vector.broadcast %921 : f32 to vector<8x128xf32>
    %923 = arith.mulf %922, %150 : vector<8x128xf32>
    %924 = arith.addf %920, %923 : vector<8x128xf32>
    %c7_427 = arith.constant 7 : index
    %c17_428 = arith.constant 17 : index
    %925 = memref.load %arg4[%c7_427, %c17_428] : memref<16x20xf32, #tpu.memory_space<smem>>
    %926 = vector.broadcast %925 : f32 to vector<8x128xf32>
    %927 = arith.mulf %926, %144 : vector<8x128xf32>
    %928 = arith.addf %924, %927 : vector<8x128xf32>
    %c7_429 = arith.constant 7 : index
    %c18_430 = arith.constant 18 : index
    %929 = memref.load %arg4[%c7_429, %c18_430] : memref<16x20xf32, #tpu.memory_space<smem>>
    %930 = vector.broadcast %929 : f32 to vector<8x128xf32>
    %931 = arith.mulf %930, %153 : vector<8x128xf32>
    %932 = arith.addf %928, %931 : vector<8x128xf32>
    %c7_431 = arith.constant 7 : index
    %c19_432 = arith.constant 19 : index
    %933 = memref.load %arg4[%c7_431, %c19_432] : memref<16x20xf32, #tpu.memory_space<smem>>
    %934 = vector.broadcast %933 : f32 to vector<8x128xf32>
    %935 = arith.mulf %934, %156 : vector<8x128xf32>
    %936 = arith.addf %932, %935 : vector<8x128xf32>
    %c7_433 = arith.constant 7 : index
    %937 = memref.load %arg5[%c7_433] : memref<16xf32, #tpu.memory_space<smem>>
    %938 = vector.broadcast %937 : f32 to vector<8x128xf32>
    %939 = arith.addf %936, %938 : vector<8x128xf32>
    %cst_434 = arith.constant 0.000000e+00 : f32
    %940 = vector.broadcast %cst_434 : f32 to vector<8x128xf32>
    %941 = arith.maximumf %939, %940 : vector<8x128xf32>
    %cst_435 = arith.constant 0.000000e+00 : f32
    %942 = vector.broadcast %cst_435 : f32 to vector<8x1xf32>
    %943 = vector.extract_strided_slice %941 {offsets = [0, 1], sizes = [8, 127], strides = [1, 1]} : vector<8x128xf32> to vector<8x127xf32>
    %944 = tpu.concatenate %943, %942 in 1 : vector<8x127xf32>, vector<8x1xf32> -> vector<8x128xf32>
    %945 = arith.maximumf %941, %944 : vector<8x128xf32>
    %cst_436 = arith.constant 0.000000e+00 : f32
    %946 = vector.broadcast %cst_436 : f32 to vector<8x2xf32>
    %947 = vector.extract_strided_slice %941 {offsets = [0, 2], sizes = [8, 126], strides = [1, 1]} : vector<8x128xf32> to vector<8x126xf32>
    %948 = tpu.concatenate %947, %946 in 1 : vector<8x126xf32>, vector<8x2xf32> -> vector<8x128xf32>
    %cst_437 = arith.constant 0.000000e+00 : f32
    %949 = vector.broadcast %cst_437 : f32 to vector<8x3xf32>
    %950 = vector.extract_strided_slice %941 {offsets = [0, 3], sizes = [8, 125], strides = [1, 1]} : vector<8x128xf32> to vector<8x125xf32>
    %951 = tpu.concatenate %950, %949 in 1 : vector<8x125xf32>, vector<8x3xf32> -> vector<8x128xf32>
    %952 = arith.maximumf %948, %951 : vector<8x128xf32>
    %953 = arith.maximumf %945, %952 : vector<8x128xf32>
    %c7_438 = arith.constant 7 : index
    %c0_439 = arith.constant 0 : index
    %c0_440 = arith.constant 0 : index
    %954 = vector.load %arg6[%c7_438, %c0_439, %c0_440] : memref<16x128x256xf32, #tpu.memory_space<vmem>>, vector<1x128x256xf32>
    %955 = vector.shape_cast %954 : vector<1x128x256xf32> to vector<128x256xf32>
    %cst_441 = arith.constant dense<0.000000e+00> : vector<8x256xf32>
    %956 = tpu.matmul %953, %955, %cst_441 {dimension_numbers = #tpu.dot_dimension_numbers<[1], [0], [0], [1], [0, 0, 1, 1], [], []>} : vector<8x128xf32>, vector<128x256xf32>, vector<8x256xf32> -> vector<8x256xf32>
    %957 = arith.addf %857, %956 : vector<8x256xf32>
    %c8_442 = arith.constant 8 : index
    %c0_443 = arith.constant 0 : index
    %958 = memref.load %arg4[%c8_442, %c0_443] : memref<16x20xf32, #tpu.memory_space<smem>>
    %959 = vector.broadcast %958 : f32 to vector<8x128xf32>
    %960 = arith.mulf %959, %39 : vector<8x128xf32>
    %c8_444 = arith.constant 8 : index
    %c1_445 = arith.constant 1 : index
    %961 = memref.load %arg4[%c8_444, %c1_445] : memref<16x20xf32, #tpu.memory_space<smem>>
    %962 = vector.broadcast %961 : f32 to vector<8x128xf32>
    %963 = arith.mulf %962, %42 : vector<8x128xf32>
    %964 = arith.addf %960, %963 : vector<8x128xf32>
    %c8_446 = arith.constant 8 : index
    %c2_447 = arith.constant 2 : index
    %965 = memref.load %arg4[%c8_446, %c2_447] : memref<16x20xf32, #tpu.memory_space<smem>>
    %966 = vector.broadcast %965 : f32 to vector<8x128xf32>
    %967 = arith.mulf %966, %36 : vector<8x128xf32>
    %968 = arith.addf %964, %967 : vector<8x128xf32>
    %c8_448 = arith.constant 8 : index
    %c3_449 = arith.constant 3 : index
    %969 = memref.load %arg4[%c8_448, %c3_449] : memref<16x20xf32, #tpu.memory_space<smem>>
    %970 = vector.broadcast %969 : f32 to vector<8x128xf32>
    %971 = arith.mulf %970, %45 : vector<8x128xf32>
    %972 = arith.addf %968, %971 : vector<8x128xf32>
    %c8_450 = arith.constant 8 : index
    %c4_451 = arith.constant 4 : index
    %973 = memref.load %arg4[%c8_450, %c4_451] : memref<16x20xf32, #tpu.memory_space<smem>>
    %974 = vector.broadcast %973 : f32 to vector<8x128xf32>
    %975 = arith.mulf %974, %48 : vector<8x128xf32>
    %976 = arith.addf %972, %975 : vector<8x128xf32>
    %c8_452 = arith.constant 8 : index
    %c5_453 = arith.constant 5 : index
    %977 = memref.load %arg4[%c8_452, %c5_453] : memref<16x20xf32, #tpu.memory_space<smem>>
    %978 = vector.broadcast %977 : f32 to vector<8x128xf32>
    %979 = arith.mulf %978, %75 : vector<8x128xf32>
    %980 = arith.addf %976, %979 : vector<8x128xf32>
    %c8_454 = arith.constant 8 : index
    %c6_455 = arith.constant 6 : index
    %981 = memref.load %arg4[%c8_454, %c6_455] : memref<16x20xf32, #tpu.memory_space<smem>>
    %982 = vector.broadcast %981 : f32 to vector<8x128xf32>
    %983 = arith.mulf %982, %78 : vector<8x128xf32>
    %984 = arith.addf %980, %983 : vector<8x128xf32>
    %c8_456 = arith.constant 8 : index
    %c7_457 = arith.constant 7 : index
    %985 = memref.load %arg4[%c8_456, %c7_457] : memref<16x20xf32, #tpu.memory_space<smem>>
    %986 = vector.broadcast %985 : f32 to vector<8x128xf32>
    %987 = arith.mulf %986, %72 : vector<8x128xf32>
    %988 = arith.addf %984, %987 : vector<8x128xf32>
    %c8_458 = arith.constant 8 : index
    %c8_459 = arith.constant 8 : index
    %989 = memref.load %arg4[%c8_458, %c8_459] : memref<16x20xf32, #tpu.memory_space<smem>>
    %990 = vector.broadcast %989 : f32 to vector<8x128xf32>
    %991 = arith.mulf %990, %81 : vector<8x128xf32>
    %992 = arith.addf %988, %991 : vector<8x128xf32>
    %c8_460 = arith.constant 8 : index
    %c9_461 = arith.constant 9 : index
    %993 = memref.load %arg4[%c8_460, %c9_461] : memref<16x20xf32, #tpu.memory_space<smem>>
    %994 = vector.broadcast %993 : f32 to vector<8x128xf32>
    %995 = arith.mulf %994, %84 : vector<8x128xf32>
    %996 = arith.addf %992, %995 : vector<8x128xf32>
    %c8_462 = arith.constant 8 : index
    %c10_463 = arith.constant 10 : index
    %997 = memref.load %arg4[%c8_462, %c10_463] : memref<16x20xf32, #tpu.memory_space<smem>>
    %998 = vector.broadcast %997 : f32 to vector<8x128xf32>
    %999 = arith.mulf %998, %111 : vector<8x128xf32>
    %1000 = arith.addf %996, %999 : vector<8x128xf32>
    %c8_464 = arith.constant 8 : index
    %c11_465 = arith.constant 11 : index
    %1001 = memref.load %arg4[%c8_464, %c11_465] : memref<16x20xf32, #tpu.memory_space<smem>>
    %1002 = vector.broadcast %1001 : f32 to vector<8x128xf32>
    %1003 = arith.mulf %1002, %114 : vector<8x128xf32>
    %1004 = arith.addf %1000, %1003 : vector<8x128xf32>
    %c8_466 = arith.constant 8 : index
    %c12_467 = arith.constant 12 : index
    %1005 = memref.load %arg4[%c8_466, %c12_467] : memref<16x20xf32, #tpu.memory_space<smem>>
    %1006 = vector.broadcast %1005 : f32 to vector<8x128xf32>
    %1007 = arith.mulf %1006, %108 : vector<8x128xf32>
    %1008 = arith.addf %1004, %1007 : vector<8x128xf32>
    %c8_468 = arith.constant 8 : index
    %c13_469 = arith.constant 13 : index
    %1009 = memref.load %arg4[%c8_468, %c13_469] : memref<16x20xf32, #tpu.memory_space<smem>>
    %1010 = vector.broadcast %1009 : f32 to vector<8x128xf32>
    %1011 = arith.mulf %1010, %117 : vector<8x128xf32>
    %1012 = arith.addf %1008, %1011 : vector<8x128xf32>
    %c8_470 = arith.constant 8 : index
    %c14_471 = arith.constant 14 : index
    %1013 = memref.load %arg4[%c8_470, %c14_471] : memref<16x20xf32, #tpu.memory_space<smem>>
    %1014 = vector.broadcast %1013 : f32 to vector<8x128xf32>
    %1015 = arith.mulf %1014, %120 : vector<8x128xf32>
    %1016 = arith.addf %1012, %1015 : vector<8x128xf32>
    %c8_472 = arith.constant 8 : index
    %c15_473 = arith.constant 15 : index
    %1017 = memref.load %arg4[%c8_472, %c15_473] : memref<16x20xf32, #tpu.memory_space<smem>>
    %1018 = vector.broadcast %1017 : f32 to vector<8x128xf32>
    %1019 = arith.mulf %1018, %147 : vector<8x128xf32>
    %1020 = arith.addf %1016, %1019 : vector<8x128xf32>
    %c8_474 = arith.constant 8 : index
    %c16_475 = arith.constant 16 : index
    %1021 = memref.load %arg4[%c8_474, %c16_475] : memref<16x20xf32, #tpu.memory_space<smem>>
    %1022 = vector.broadcast %1021 : f32 to vector<8x128xf32>
    %1023 = arith.mulf %1022, %150 : vector<8x128xf32>
    %1024 = arith.addf %1020, %1023 : vector<8x128xf32>
    %c8_476 = arith.constant 8 : index
    %c17_477 = arith.constant 17 : index
    %1025 = memref.load %arg4[%c8_476, %c17_477] : memref<16x20xf32, #tpu.memory_space<smem>>
    %1026 = vector.broadcast %1025 : f32 to vector<8x128xf32>
    %1027 = arith.mulf %1026, %144 : vector<8x128xf32>
    %1028 = arith.addf %1024, %1027 : vector<8x128xf32>
    %c8_478 = arith.constant 8 : index
    %c18_479 = arith.constant 18 : index
    %1029 = memref.load %arg4[%c8_478, %c18_479] : memref<16x20xf32, #tpu.memory_space<smem>>
    %1030 = vector.broadcast %1029 : f32 to vector<8x128xf32>
    %1031 = arith.mulf %1030, %153 : vector<8x128xf32>
    %1032 = arith.addf %1028, %1031 : vector<8x128xf32>
    %c8_480 = arith.constant 8 : index
    %c19_481 = arith.constant 19 : index
    %1033 = memref.load %arg4[%c8_480, %c19_481] : memref<16x20xf32, #tpu.memory_space<smem>>
    %1034 = vector.broadcast %1033 : f32 to vector<8x128xf32>
    %1035 = arith.mulf %1034, %156 : vector<8x128xf32>
    %1036 = arith.addf %1032, %1035 : vector<8x128xf32>
    %c8_482 = arith.constant 8 : index
    %1037 = memref.load %arg5[%c8_482] : memref<16xf32, #tpu.memory_space<smem>>
    %1038 = vector.broadcast %1037 : f32 to vector<8x128xf32>
    %1039 = arith.addf %1036, %1038 : vector<8x128xf32>
    %cst_483 = arith.constant 0.000000e+00 : f32
    %1040 = vector.broadcast %cst_483 : f32 to vector<8x128xf32>
    %1041 = arith.maximumf %1039, %1040 : vector<8x128xf32>
    %cst_484 = arith.constant 0.000000e+00 : f32
    %1042 = vector.broadcast %cst_484 : f32 to vector<8x1xf32>
    %1043 = vector.extract_strided_slice %1041 {offsets = [0, 1], sizes = [8, 127], strides = [1, 1]} : vector<8x128xf32> to vector<8x127xf32>
    %1044 = tpu.concatenate %1043, %1042 in 1 : vector<8x127xf32>, vector<8x1xf32> -> vector<8x128xf32>
    %1045 = arith.maximumf %1041, %1044 : vector<8x128xf32>
    %cst_485 = arith.constant 0.000000e+00 : f32
    %1046 = vector.broadcast %cst_485 : f32 to vector<8x2xf32>
    %1047 = vector.extract_strided_slice %1041 {offsets = [0, 2], sizes = [8, 126], strides = [1, 1]} : vector<8x128xf32> to vector<8x126xf32>
    %1048 = tpu.concatenate %1047, %1046 in 1 : vector<8x126xf32>, vector<8x2xf32> -> vector<8x128xf32>
    %cst_486 = arith.constant 0.000000e+00 : f32
    %1049 = vector.broadcast %cst_486 : f32 to vector<8x3xf32>
    %1050 = vector.extract_strided_slice %1041 {offsets = [0, 3], sizes = [8, 125], strides = [1, 1]} : vector<8x128xf32> to vector<8x125xf32>
    %1051 = tpu.concatenate %1050, %1049 in 1 : vector<8x125xf32>, vector<8x3xf32> -> vector<8x128xf32>
    %1052 = arith.maximumf %1048, %1051 : vector<8x128xf32>
    %1053 = arith.maximumf %1045, %1052 : vector<8x128xf32>
    %c8_487 = arith.constant 8 : index
    %c0_488 = arith.constant 0 : index
    %c0_489 = arith.constant 0 : index
    %1054 = vector.load %arg6[%c8_487, %c0_488, %c0_489] : memref<16x128x256xf32, #tpu.memory_space<vmem>>, vector<1x128x256xf32>
    %1055 = vector.shape_cast %1054 : vector<1x128x256xf32> to vector<128x256xf32>
    %cst_490 = arith.constant dense<0.000000e+00> : vector<8x256xf32>
    %1056 = tpu.matmul %1053, %1055, %cst_490 {dimension_numbers = #tpu.dot_dimension_numbers<[1], [0], [0], [1], [0, 0, 1, 1], [], []>} : vector<8x128xf32>, vector<128x256xf32>, vector<8x256xf32> -> vector<8x256xf32>
    %1057 = arith.addf %957, %1056 : vector<8x256xf32>
    %c9_491 = arith.constant 9 : index
    %c0_492 = arith.constant 0 : index
    %1058 = memref.load %arg4[%c9_491, %c0_492] : memref<16x20xf32, #tpu.memory_space<smem>>
    %1059 = vector.broadcast %1058 : f32 to vector<8x128xf32>
    %1060 = arith.mulf %1059, %39 : vector<8x128xf32>
    %c9_493 = arith.constant 9 : index
    %c1_494 = arith.constant 1 : index
    %1061 = memref.load %arg4[%c9_493, %c1_494] : memref<16x20xf32, #tpu.memory_space<smem>>
    %1062 = vector.broadcast %1061 : f32 to vector<8x128xf32>
    %1063 = arith.mulf %1062, %42 : vector<8x128xf32>
    %1064 = arith.addf %1060, %1063 : vector<8x128xf32>
    %c9_495 = arith.constant 9 : index
    %c2_496 = arith.constant 2 : index
    %1065 = memref.load %arg4[%c9_495, %c2_496] : memref<16x20xf32, #tpu.memory_space<smem>>
    %1066 = vector.broadcast %1065 : f32 to vector<8x128xf32>
    %1067 = arith.mulf %1066, %36 : vector<8x128xf32>
    %1068 = arith.addf %1064, %1067 : vector<8x128xf32>
    %c9_497 = arith.constant 9 : index
    %c3_498 = arith.constant 3 : index
    %1069 = memref.load %arg4[%c9_497, %c3_498] : memref<16x20xf32, #tpu.memory_space<smem>>
    %1070 = vector.broadcast %1069 : f32 to vector<8x128xf32>
    %1071 = arith.mulf %1070, %45 : vector<8x128xf32>
    %1072 = arith.addf %1068, %1071 : vector<8x128xf32>
    %c9_499 = arith.constant 9 : index
    %c4_500 = arith.constant 4 : index
    %1073 = memref.load %arg4[%c9_499, %c4_500] : memref<16x20xf32, #tpu.memory_space<smem>>
    %1074 = vector.broadcast %1073 : f32 to vector<8x128xf32>
    %1075 = arith.mulf %1074, %48 : vector<8x128xf32>
    %1076 = arith.addf %1072, %1075 : vector<8x128xf32>
    %c9_501 = arith.constant 9 : index
    %c5_502 = arith.constant 5 : index
    %1077 = memref.load %arg4[%c9_501, %c5_502] : memref<16x20xf32, #tpu.memory_space<smem>>
    %1078 = vector.broadcast %1077 : f32 to vector<8x128xf32>
    %1079 = arith.mulf %1078, %75 : vector<8x128xf32>
    %1080 = arith.addf %1076, %1079 : vector<8x128xf32>
    %c9_503 = arith.constant 9 : index
    %c6_504 = arith.constant 6 : index
    %1081 = memref.load %arg4[%c9_503, %c6_504] : memref<16x20xf32, #tpu.memory_space<smem>>
    %1082 = vector.broadcast %1081 : f32 to vector<8x128xf32>
    %1083 = arith.mulf %1082, %78 : vector<8x128xf32>
    %1084 = arith.addf %1080, %1083 : vector<8x128xf32>
    %c9_505 = arith.constant 9 : index
    %c7_506 = arith.constant 7 : index
    %1085 = memref.load %arg4[%c9_505, %c7_506] : memref<16x20xf32, #tpu.memory_space<smem>>
    %1086 = vector.broadcast %1085 : f32 to vector<8x128xf32>
    %1087 = arith.mulf %1086, %72 : vector<8x128xf32>
    %1088 = arith.addf %1084, %1087 : vector<8x128xf32>
    %c9_507 = arith.constant 9 : index
    %c8_508 = arith.constant 8 : index
    %1089 = memref.load %arg4[%c9_507, %c8_508] : memref<16x20xf32, #tpu.memory_space<smem>>
    %1090 = vector.broadcast %1089 : f32 to vector<8x128xf32>
    %1091 = arith.mulf %1090, %81 : vector<8x128xf32>
    %1092 = arith.addf %1088, %1091 : vector<8x128xf32>
    %c9_509 = arith.constant 9 : index
    %c9_510 = arith.constant 9 : index
    %1093 = memref.load %arg4[%c9_509, %c9_510] : memref<16x20xf32, #tpu.memory_space<smem>>
    %1094 = vector.broadcast %1093 : f32 to vector<8x128xf32>
    %1095 = arith.mulf %1094, %84 : vector<8x128xf32>
    %1096 = arith.addf %1092, %1095 : vector<8x128xf32>
    %c9_511 = arith.constant 9 : index
    %c10_512 = arith.constant 10 : index
    %1097 = memref.load %arg4[%c9_511, %c10_512] : memref<16x20xf32, #tpu.memory_space<smem>>
    %1098 = vector.broadcast %1097 : f32 to vector<8x128xf32>
    %1099 = arith.mulf %1098, %111 : vector<8x128xf32>
    %1100 = arith.addf %1096, %1099 : vector<8x128xf32>
    %c9_513 = arith.constant 9 : index
    %c11_514 = arith.constant 11 : index
    %1101 = memref.load %arg4[%c9_513, %c11_514] : memref<16x20xf32, #tpu.memory_space<smem>>
    %1102 = vector.broadcast %1101 : f32 to vector<8x128xf32>
    %1103 = arith.mulf %1102, %114 : vector<8x128xf32>
    %1104 = arith.addf %1100, %1103 : vector<8x128xf32>
    %c9_515 = arith.constant 9 : index
    %c12_516 = arith.constant 12 : index
    %1105 = memref.load %arg4[%c9_515, %c12_516] : memref<16x20xf32, #tpu.memory_space<smem>>
    %1106 = vector.broadcast %1105 : f32 to vector<8x128xf32>
    %1107 = arith.mulf %1106, %108 : vector<8x128xf32>
    %1108 = arith.addf %1104, %1107 : vector<8x128xf32>
    %c9_517 = arith.constant 9 : index
    %c13_518 = arith.constant 13 : index
    %1109 = memref.load %arg4[%c9_517, %c13_518] : memref<16x20xf32, #tpu.memory_space<smem>>
    %1110 = vector.broadcast %1109 : f32 to vector<8x128xf32>
    %1111 = arith.mulf %1110, %117 : vector<8x128xf32>
    %1112 = arith.addf %1108, %1111 : vector<8x128xf32>
    %c9_519 = arith.constant 9 : index
    %c14_520 = arith.constant 14 : index
    %1113 = memref.load %arg4[%c9_519, %c14_520] : memref<16x20xf32, #tpu.memory_space<smem>>
    %1114 = vector.broadcast %1113 : f32 to vector<8x128xf32>
    %1115 = arith.mulf %1114, %120 : vector<8x128xf32>
    %1116 = arith.addf %1112, %1115 : vector<8x128xf32>
    %c9_521 = arith.constant 9 : index
    %c15_522 = arith.constant 15 : index
    %1117 = memref.load %arg4[%c9_521, %c15_522] : memref<16x20xf32, #tpu.memory_space<smem>>
    %1118 = vector.broadcast %1117 : f32 to vector<8x128xf32>
    %1119 = arith.mulf %1118, %147 : vector<8x128xf32>
    %1120 = arith.addf %1116, %1119 : vector<8x128xf32>
    %c9_523 = arith.constant 9 : index
    %c16_524 = arith.constant 16 : index
    %1121 = memref.load %arg4[%c9_523, %c16_524] : memref<16x20xf32, #tpu.memory_space<smem>>
    %1122 = vector.broadcast %1121 : f32 to vector<8x128xf32>
    %1123 = arith.mulf %1122, %150 : vector<8x128xf32>
    %1124 = arith.addf %1120, %1123 : vector<8x128xf32>
    %c9_525 = arith.constant 9 : index
    %c17_526 = arith.constant 17 : index
    %1125 = memref.load %arg4[%c9_525, %c17_526] : memref<16x20xf32, #tpu.memory_space<smem>>
    %1126 = vector.broadcast %1125 : f32 to vector<8x128xf32>
    %1127 = arith.mulf %1126, %144 : vector<8x128xf32>
    %1128 = arith.addf %1124, %1127 : vector<8x128xf32>
    %c9_527 = arith.constant 9 : index
    %c18_528 = arith.constant 18 : index
    %1129 = memref.load %arg4[%c9_527, %c18_528] : memref<16x20xf32, #tpu.memory_space<smem>>
    %1130 = vector.broadcast %1129 : f32 to vector<8x128xf32>
    %1131 = arith.mulf %1130, %153 : vector<8x128xf32>
    %1132 = arith.addf %1128, %1131 : vector<8x128xf32>
    %c9_529 = arith.constant 9 : index
    %c19_530 = arith.constant 19 : index
    %1133 = memref.load %arg4[%c9_529, %c19_530] : memref<16x20xf32, #tpu.memory_space<smem>>
    %1134 = vector.broadcast %1133 : f32 to vector<8x128xf32>
    %1135 = arith.mulf %1134, %156 : vector<8x128xf32>
    %1136 = arith.addf %1132, %1135 : vector<8x128xf32>
    %c9_531 = arith.constant 9 : index
    %1137 = memref.load %arg5[%c9_531] : memref<16xf32, #tpu.memory_space<smem>>
    %1138 = vector.broadcast %1137 : f32 to vector<8x128xf32>
    %1139 = arith.addf %1136, %1138 : vector<8x128xf32>
    %cst_532 = arith.constant 0.000000e+00 : f32
    %1140 = vector.broadcast %cst_532 : f32 to vector<8x128xf32>
    %1141 = arith.maximumf %1139, %1140 : vector<8x128xf32>
    %cst_533 = arith.constant 0.000000e+00 : f32
    %1142 = vector.broadcast %cst_533 : f32 to vector<8x1xf32>
    %1143 = vector.extract_strided_slice %1141 {offsets = [0, 1], sizes = [8, 127], strides = [1, 1]} : vector<8x128xf32> to vector<8x127xf32>
    %1144 = tpu.concatenate %1143, %1142 in 1 : vector<8x127xf32>, vector<8x1xf32> -> vector<8x128xf32>
    %1145 = arith.maximumf %1141, %1144 : vector<8x128xf32>
    %cst_534 = arith.constant 0.000000e+00 : f32
    %1146 = vector.broadcast %cst_534 : f32 to vector<8x2xf32>
    %1147 = vector.extract_strided_slice %1141 {offsets = [0, 2], sizes = [8, 126], strides = [1, 1]} : vector<8x128xf32> to vector<8x126xf32>
    %1148 = tpu.concatenate %1147, %1146 in 1 : vector<8x126xf32>, vector<8x2xf32> -> vector<8x128xf32>
    %cst_535 = arith.constant 0.000000e+00 : f32
    %1149 = vector.broadcast %cst_535 : f32 to vector<8x3xf32>
    %1150 = vector.extract_strided_slice %1141 {offsets = [0, 3], sizes = [8, 125], strides = [1, 1]} : vector<8x128xf32> to vector<8x125xf32>
    %1151 = tpu.concatenate %1150, %1149 in 1 : vector<8x125xf32>, vector<8x3xf32> -> vector<8x128xf32>
    %1152 = arith.maximumf %1148, %1151 : vector<8x128xf32>
    %1153 = arith.maximumf %1145, %1152 : vector<8x128xf32>
    %c9_536 = arith.constant 9 : index
    %c0_537 = arith.constant 0 : index
    %c0_538 = arith.constant 0 : index
    %1154 = vector.load %arg6[%c9_536, %c0_537, %c0_538] : memref<16x128x256xf32, #tpu.memory_space<vmem>>, vector<1x128x256xf32>
    %1155 = vector.shape_cast %1154 : vector<1x128x256xf32> to vector<128x256xf32>
    %cst_539 = arith.constant dense<0.000000e+00> : vector<8x256xf32>
    %1156 = tpu.matmul %1153, %1155, %cst_539 {dimension_numbers = #tpu.dot_dimension_numbers<[1], [0], [0], [1], [0, 0, 1, 1], [], []>} : vector<8x128xf32>, vector<128x256xf32>, vector<8x256xf32> -> vector<8x256xf32>
    %1157 = arith.addf %1057, %1156 : vector<8x256xf32>
    %c10_540 = arith.constant 10 : index
    %c0_541 = arith.constant 0 : index
    %1158 = memref.load %arg4[%c10_540, %c0_541] : memref<16x20xf32, #tpu.memory_space<smem>>
    %1159 = vector.broadcast %1158 : f32 to vector<8x128xf32>
    %1160 = arith.mulf %1159, %39 : vector<8x128xf32>
    %c10_542 = arith.constant 10 : index
    %c1_543 = arith.constant 1 : index
    %1161 = memref.load %arg4[%c10_542, %c1_543] : memref<16x20xf32, #tpu.memory_space<smem>>
    %1162 = vector.broadcast %1161 : f32 to vector<8x128xf32>
    %1163 = arith.mulf %1162, %42 : vector<8x128xf32>
    %1164 = arith.addf %1160, %1163 : vector<8x128xf32>
    %c10_544 = arith.constant 10 : index
    %c2_545 = arith.constant 2 : index
    %1165 = memref.load %arg4[%c10_544, %c2_545] : memref<16x20xf32, #tpu.memory_space<smem>>
    %1166 = vector.broadcast %1165 : f32 to vector<8x128xf32>
    %1167 = arith.mulf %1166, %36 : vector<8x128xf32>
    %1168 = arith.addf %1164, %1167 : vector<8x128xf32>
    %c10_546 = arith.constant 10 : index
    %c3_547 = arith.constant 3 : index
    %1169 = memref.load %arg4[%c10_546, %c3_547] : memref<16x20xf32, #tpu.memory_space<smem>>
    %1170 = vector.broadcast %1169 : f32 to vector<8x128xf32>
    %1171 = arith.mulf %1170, %45 : vector<8x128xf32>
    %1172 = arith.addf %1168, %1171 : vector<8x128xf32>
    %c10_548 = arith.constant 10 : index
    %c4_549 = arith.constant 4 : index
    %1173 = memref.load %arg4[%c10_548, %c4_549] : memref<16x20xf32, #tpu.memory_space<smem>>
    %1174 = vector.broadcast %1173 : f32 to vector<8x128xf32>
    %1175 = arith.mulf %1174, %48 : vector<8x128xf32>
    %1176 = arith.addf %1172, %1175 : vector<8x128xf32>
    %c10_550 = arith.constant 10 : index
    %c5_551 = arith.constant 5 : index
    %1177 = memref.load %arg4[%c10_550, %c5_551] : memref<16x20xf32, #tpu.memory_space<smem>>
    %1178 = vector.broadcast %1177 : f32 to vector<8x128xf32>
    %1179 = arith.mulf %1178, %75 : vector<8x128xf32>
    %1180 = arith.addf %1176, %1179 : vector<8x128xf32>
    %c10_552 = arith.constant 10 : index
    %c6_553 = arith.constant 6 : index
    %1181 = memref.load %arg4[%c10_552, %c6_553] : memref<16x20xf32, #tpu.memory_space<smem>>
    %1182 = vector.broadcast %1181 : f32 to vector<8x128xf32>
    %1183 = arith.mulf %1182, %78 : vector<8x128xf32>
    %1184 = arith.addf %1180, %1183 : vector<8x128xf32>
    %c10_554 = arith.constant 10 : index
    %c7_555 = arith.constant 7 : index
    %1185 = memref.load %arg4[%c10_554, %c7_555] : memref<16x20xf32, #tpu.memory_space<smem>>
    %1186 = vector.broadcast %1185 : f32 to vector<8x128xf32>
    %1187 = arith.mulf %1186, %72 : vector<8x128xf32>
    %1188 = arith.addf %1184, %1187 : vector<8x128xf32>
    %c10_556 = arith.constant 10 : index
    %c8_557 = arith.constant 8 : index
    %1189 = memref.load %arg4[%c10_556, %c8_557] : memref<16x20xf32, #tpu.memory_space<smem>>
    %1190 = vector.broadcast %1189 : f32 to vector<8x128xf32>
    %1191 = arith.mulf %1190, %81 : vector<8x128xf32>
    %1192 = arith.addf %1188, %1191 : vector<8x128xf32>
    %c10_558 = arith.constant 10 : index
    %c9_559 = arith.constant 9 : index
    %1193 = memref.load %arg4[%c10_558, %c9_559] : memref<16x20xf32, #tpu.memory_space<smem>>
    %1194 = vector.broadcast %1193 : f32 to vector<8x128xf32>
    %1195 = arith.mulf %1194, %84 : vector<8x128xf32>
    %1196 = arith.addf %1192, %1195 : vector<8x128xf32>
    %c10_560 = arith.constant 10 : index
    %c10_561 = arith.constant 10 : index
    %1197 = memref.load %arg4[%c10_560, %c10_561] : memref<16x20xf32, #tpu.memory_space<smem>>
    %1198 = vector.broadcast %1197 : f32 to vector<8x128xf32>
    %1199 = arith.mulf %1198, %111 : vector<8x128xf32>
    %1200 = arith.addf %1196, %1199 : vector<8x128xf32>
    %c10_562 = arith.constant 10 : index
    %c11_563 = arith.constant 11 : index
    %1201 = memref.load %arg4[%c10_562, %c11_563] : memref<16x20xf32, #tpu.memory_space<smem>>
    %1202 = vector.broadcast %1201 : f32 to vector<8x128xf32>
    %1203 = arith.mulf %1202, %114 : vector<8x128xf32>
    %1204 = arith.addf %1200, %1203 : vector<8x128xf32>
    %c10_564 = arith.constant 10 : index
    %c12_565 = arith.constant 12 : index
    %1205 = memref.load %arg4[%c10_564, %c12_565] : memref<16x20xf32, #tpu.memory_space<smem>>
    %1206 = vector.broadcast %1205 : f32 to vector<8x128xf32>
    %1207 = arith.mulf %1206, %108 : vector<8x128xf32>
    %1208 = arith.addf %1204, %1207 : vector<8x128xf32>
    %c10_566 = arith.constant 10 : index
    %c13_567 = arith.constant 13 : index
    %1209 = memref.load %arg4[%c10_566, %c13_567] : memref<16x20xf32, #tpu.memory_space<smem>>
    %1210 = vector.broadcast %1209 : f32 to vector<8x128xf32>
    %1211 = arith.mulf %1210, %117 : vector<8x128xf32>
    %1212 = arith.addf %1208, %1211 : vector<8x128xf32>
    %c10_568 = arith.constant 10 : index
    %c14_569 = arith.constant 14 : index
    %1213 = memref.load %arg4[%c10_568, %c14_569] : memref<16x20xf32, #tpu.memory_space<smem>>
    %1214 = vector.broadcast %1213 : f32 to vector<8x128xf32>
    %1215 = arith.mulf %1214, %120 : vector<8x128xf32>
    %1216 = arith.addf %1212, %1215 : vector<8x128xf32>
    %c10_570 = arith.constant 10 : index
    %c15_571 = arith.constant 15 : index
    %1217 = memref.load %arg4[%c10_570, %c15_571] : memref<16x20xf32, #tpu.memory_space<smem>>
    %1218 = vector.broadcast %1217 : f32 to vector<8x128xf32>
    %1219 = arith.mulf %1218, %147 : vector<8x128xf32>
    %1220 = arith.addf %1216, %1219 : vector<8x128xf32>
    %c10_572 = arith.constant 10 : index
    %c16_573 = arith.constant 16 : index
    %1221 = memref.load %arg4[%c10_572, %c16_573] : memref<16x20xf32, #tpu.memory_space<smem>>
    %1222 = vector.broadcast %1221 : f32 to vector<8x128xf32>
    %1223 = arith.mulf %1222, %150 : vector<8x128xf32>
    %1224 = arith.addf %1220, %1223 : vector<8x128xf32>
    %c10_574 = arith.constant 10 : index
    %c17_575 = arith.constant 17 : index
    %1225 = memref.load %arg4[%c10_574, %c17_575] : memref<16x20xf32, #tpu.memory_space<smem>>
    %1226 = vector.broadcast %1225 : f32 to vector<8x128xf32>
    %1227 = arith.mulf %1226, %144 : vector<8x128xf32>
    %1228 = arith.addf %1224, %1227 : vector<8x128xf32>
    %c10_576 = arith.constant 10 : index
    %c18_577 = arith.constant 18 : index
    %1229 = memref.load %arg4[%c10_576, %c18_577] : memref<16x20xf32, #tpu.memory_space<smem>>
    %1230 = vector.broadcast %1229 : f32 to vector<8x128xf32>
    %1231 = arith.mulf %1230, %153 : vector<8x128xf32>
    %1232 = arith.addf %1228, %1231 : vector<8x128xf32>
    %c10_578 = arith.constant 10 : index
    %c19_579 = arith.constant 19 : index
    %1233 = memref.load %arg4[%c10_578, %c19_579] : memref<16x20xf32, #tpu.memory_space<smem>>
    %1234 = vector.broadcast %1233 : f32 to vector<8x128xf32>
    %1235 = arith.mulf %1234, %156 : vector<8x128xf32>
    %1236 = arith.addf %1232, %1235 : vector<8x128xf32>
    %c10_580 = arith.constant 10 : index
    %1237 = memref.load %arg5[%c10_580] : memref<16xf32, #tpu.memory_space<smem>>
    %1238 = vector.broadcast %1237 : f32 to vector<8x128xf32>
    %1239 = arith.addf %1236, %1238 : vector<8x128xf32>
    %cst_581 = arith.constant 0.000000e+00 : f32
    %1240 = vector.broadcast %cst_581 : f32 to vector<8x128xf32>
    %1241 = arith.maximumf %1239, %1240 : vector<8x128xf32>
    %cst_582 = arith.constant 0.000000e+00 : f32
    %1242 = vector.broadcast %cst_582 : f32 to vector<8x1xf32>
    %1243 = vector.extract_strided_slice %1241 {offsets = [0, 1], sizes = [8, 127], strides = [1, 1]} : vector<8x128xf32> to vector<8x127xf32>
    %1244 = tpu.concatenate %1243, %1242 in 1 : vector<8x127xf32>, vector<8x1xf32> -> vector<8x128xf32>
    %1245 = arith.maximumf %1241, %1244 : vector<8x128xf32>
    %cst_583 = arith.constant 0.000000e+00 : f32
    %1246 = vector.broadcast %cst_583 : f32 to vector<8x2xf32>
    %1247 = vector.extract_strided_slice %1241 {offsets = [0, 2], sizes = [8, 126], strides = [1, 1]} : vector<8x128xf32> to vector<8x126xf32>
    %1248 = tpu.concatenate %1247, %1246 in 1 : vector<8x126xf32>, vector<8x2xf32> -> vector<8x128xf32>
    %cst_584 = arith.constant 0.000000e+00 : f32
    %1249 = vector.broadcast %cst_584 : f32 to vector<8x3xf32>
    %1250 = vector.extract_strided_slice %1241 {offsets = [0, 3], sizes = [8, 125], strides = [1, 1]} : vector<8x128xf32> to vector<8x125xf32>
    %1251 = tpu.concatenate %1250, %1249 in 1 : vector<8x125xf32>, vector<8x3xf32> -> vector<8x128xf32>
    %1252 = arith.maximumf %1248, %1251 : vector<8x128xf32>
    %1253 = arith.maximumf %1245, %1252 : vector<8x128xf32>
    %c10_585 = arith.constant 10 : index
    %c0_586 = arith.constant 0 : index
    %c0_587 = arith.constant 0 : index
    %1254 = vector.load %arg6[%c10_585, %c0_586, %c0_587] : memref<16x128x256xf32, #tpu.memory_space<vmem>>, vector<1x128x256xf32>
    %1255 = vector.shape_cast %1254 : vector<1x128x256xf32> to vector<128x256xf32>
    %cst_588 = arith.constant dense<0.000000e+00> : vector<8x256xf32>
    %1256 = tpu.matmul %1253, %1255, %cst_588 {dimension_numbers = #tpu.dot_dimension_numbers<[1], [0], [0], [1], [0, 0, 1, 1], [], []>} : vector<8x128xf32>, vector<128x256xf32>, vector<8x256xf32> -> vector<8x256xf32>
    %1257 = arith.addf %1157, %1256 : vector<8x256xf32>
    %c11_589 = arith.constant 11 : index
    %c0_590 = arith.constant 0 : index
    %1258 = memref.load %arg4[%c11_589, %c0_590] : memref<16x20xf32, #tpu.memory_space<smem>>
    %1259 = vector.broadcast %1258 : f32 to vector<8x128xf32>
    %1260 = arith.mulf %1259, %39 : vector<8x128xf32>
    %c11_591 = arith.constant 11 : index
    %c1_592 = arith.constant 1 : index
    %1261 = memref.load %arg4[%c11_591, %c1_592] : memref<16x20xf32, #tpu.memory_space<smem>>
    %1262 = vector.broadcast %1261 : f32 to vector<8x128xf32>
    %1263 = arith.mulf %1262, %42 : vector<8x128xf32>
    %1264 = arith.addf %1260, %1263 : vector<8x128xf32>
    %c11_593 = arith.constant 11 : index
    %c2_594 = arith.constant 2 : index
    %1265 = memref.load %arg4[%c11_593, %c2_594] : memref<16x20xf32, #tpu.memory_space<smem>>
    %1266 = vector.broadcast %1265 : f32 to vector<8x128xf32>
    %1267 = arith.mulf %1266, %36 : vector<8x128xf32>
    %1268 = arith.addf %1264, %1267 : vector<8x128xf32>
    %c11_595 = arith.constant 11 : index
    %c3_596 = arith.constant 3 : index
    %1269 = memref.load %arg4[%c11_595, %c3_596] : memref<16x20xf32, #tpu.memory_space<smem>>
    %1270 = vector.broadcast %1269 : f32 to vector<8x128xf32>
    %1271 = arith.mulf %1270, %45 : vector<8x128xf32>
    %1272 = arith.addf %1268, %1271 : vector<8x128xf32>
    %c11_597 = arith.constant 11 : index
    %c4_598 = arith.constant 4 : index
    %1273 = memref.load %arg4[%c11_597, %c4_598] : memref<16x20xf32, #tpu.memory_space<smem>>
    %1274 = vector.broadcast %1273 : f32 to vector<8x128xf32>
    %1275 = arith.mulf %1274, %48 : vector<8x128xf32>
    %1276 = arith.addf %1272, %1275 : vector<8x128xf32>
    %c11_599 = arith.constant 11 : index
    %c5_600 = arith.constant 5 : index
    %1277 = memref.load %arg4[%c11_599, %c5_600] : memref<16x20xf32, #tpu.memory_space<smem>>
    %1278 = vector.broadcast %1277 : f32 to vector<8x128xf32>
    %1279 = arith.mulf %1278, %75 : vector<8x128xf32>
    %1280 = arith.addf %1276, %1279 : vector<8x128xf32>
    %c11_601 = arith.constant 11 : index
    %c6_602 = arith.constant 6 : index
    %1281 = memref.load %arg4[%c11_601, %c6_602] : memref<16x20xf32, #tpu.memory_space<smem>>
    %1282 = vector.broadcast %1281 : f32 to vector<8x128xf32>
    %1283 = arith.mulf %1282, %78 : vector<8x128xf32>
    %1284 = arith.addf %1280, %1283 : vector<8x128xf32>
    %c11_603 = arith.constant 11 : index
    %c7_604 = arith.constant 7 : index
    %1285 = memref.load %arg4[%c11_603, %c7_604] : memref<16x20xf32, #tpu.memory_space<smem>>
    %1286 = vector.broadcast %1285 : f32 to vector<8x128xf32>
    %1287 = arith.mulf %1286, %72 : vector<8x128xf32>
    %1288 = arith.addf %1284, %1287 : vector<8x128xf32>
    %c11_605 = arith.constant 11 : index
    %c8_606 = arith.constant 8 : index
    %1289 = memref.load %arg4[%c11_605, %c8_606] : memref<16x20xf32, #tpu.memory_space<smem>>
    %1290 = vector.broadcast %1289 : f32 to vector<8x128xf32>
    %1291 = arith.mulf %1290, %81 : vector<8x128xf32>
    %1292 = arith.addf %1288, %1291 : vector<8x128xf32>
    %c11_607 = arith.constant 11 : index
    %c9_608 = arith.constant 9 : index
    %1293 = memref.load %arg4[%c11_607, %c9_608] : memref<16x20xf32, #tpu.memory_space<smem>>
    %1294 = vector.broadcast %1293 : f32 to vector<8x128xf32>
    %1295 = arith.mulf %1294, %84 : vector<8x128xf32>
    %1296 = arith.addf %1292, %1295 : vector<8x128xf32>
    %c11_609 = arith.constant 11 : index
    %c10_610 = arith.constant 10 : index
    %1297 = memref.load %arg4[%c11_609, %c10_610] : memref<16x20xf32, #tpu.memory_space<smem>>
    %1298 = vector.broadcast %1297 : f32 to vector<8x128xf32>
    %1299 = arith.mulf %1298, %111 : vector<8x128xf32>
    %1300 = arith.addf %1296, %1299 : vector<8x128xf32>
    %c11_611 = arith.constant 11 : index
    %c11_612 = arith.constant 11 : index
    %1301 = memref.load %arg4[%c11_611, %c11_612] : memref<16x20xf32, #tpu.memory_space<smem>>
    %1302 = vector.broadcast %1301 : f32 to vector<8x128xf32>
    %1303 = arith.mulf %1302, %114 : vector<8x128xf32>
    %1304 = arith.addf %1300, %1303 : vector<8x128xf32>
    %c11_613 = arith.constant 11 : index
    %c12_614 = arith.constant 12 : index
    %1305 = memref.load %arg4[%c11_613, %c12_614] : memref<16x20xf32, #tpu.memory_space<smem>>
    %1306 = vector.broadcast %1305 : f32 to vector<8x128xf32>
    %1307 = arith.mulf %1306, %108 : vector<8x128xf32>
    %1308 = arith.addf %1304, %1307 : vector<8x128xf32>
    %c11_615 = arith.constant 11 : index
    %c13_616 = arith.constant 13 : index
    %1309 = memref.load %arg4[%c11_615, %c13_616] : memref<16x20xf32, #tpu.memory_space<smem>>
    %1310 = vector.broadcast %1309 : f32 to vector<8x128xf32>
    %1311 = arith.mulf %1310, %117 : vector<8x128xf32>
    %1312 = arith.addf %1308, %1311 : vector<8x128xf32>
    %c11_617 = arith.constant 11 : index
    %c14_618 = arith.constant 14 : index
    %1313 = memref.load %arg4[%c11_617, %c14_618] : memref<16x20xf32, #tpu.memory_space<smem>>
    %1314 = vector.broadcast %1313 : f32 to vector<8x128xf32>
    %1315 = arith.mulf %1314, %120 : vector<8x128xf32>
    %1316 = arith.addf %1312, %1315 : vector<8x128xf32>
    %c11_619 = arith.constant 11 : index
    %c15_620 = arith.constant 15 : index
    %1317 = memref.load %arg4[%c11_619, %c15_620] : memref<16x20xf32, #tpu.memory_space<smem>>
    %1318 = vector.broadcast %1317 : f32 to vector<8x128xf32>
    %1319 = arith.mulf %1318, %147 : vector<8x128xf32>
    %1320 = arith.addf %1316, %1319 : vector<8x128xf32>
    %c11_621 = arith.constant 11 : index
    %c16_622 = arith.constant 16 : index
    %1321 = memref.load %arg4[%c11_621, %c16_622] : memref<16x20xf32, #tpu.memory_space<smem>>
    %1322 = vector.broadcast %1321 : f32 to vector<8x128xf32>
    %1323 = arith.mulf %1322, %150 : vector<8x128xf32>
    %1324 = arith.addf %1320, %1323 : vector<8x128xf32>
    %c11_623 = arith.constant 11 : index
    %c17_624 = arith.constant 17 : index
    %1325 = memref.load %arg4[%c11_623, %c17_624] : memref<16x20xf32, #tpu.memory_space<smem>>
    %1326 = vector.broadcast %1325 : f32 to vector<8x128xf32>
    %1327 = arith.mulf %1326, %144 : vector<8x128xf32>
    %1328 = arith.addf %1324, %1327 : vector<8x128xf32>
    %c11_625 = arith.constant 11 : index
    %c18_626 = arith.constant 18 : index
    %1329 = memref.load %arg4[%c11_625, %c18_626] : memref<16x20xf32, #tpu.memory_space<smem>>
    %1330 = vector.broadcast %1329 : f32 to vector<8x128xf32>
    %1331 = arith.mulf %1330, %153 : vector<8x128xf32>
    %1332 = arith.addf %1328, %1331 : vector<8x128xf32>
    %c11_627 = arith.constant 11 : index
    %c19_628 = arith.constant 19 : index
    %1333 = memref.load %arg4[%c11_627, %c19_628] : memref<16x20xf32, #tpu.memory_space<smem>>
    %1334 = vector.broadcast %1333 : f32 to vector<8x128xf32>
    %1335 = arith.mulf %1334, %156 : vector<8x128xf32>
    %1336 = arith.addf %1332, %1335 : vector<8x128xf32>
    %c11_629 = arith.constant 11 : index
    %1337 = memref.load %arg5[%c11_629] : memref<16xf32, #tpu.memory_space<smem>>
    %1338 = vector.broadcast %1337 : f32 to vector<8x128xf32>
    %1339 = arith.addf %1336, %1338 : vector<8x128xf32>
    %cst_630 = arith.constant 0.000000e+00 : f32
    %1340 = vector.broadcast %cst_630 : f32 to vector<8x128xf32>
    %1341 = arith.maximumf %1339, %1340 : vector<8x128xf32>
    %cst_631 = arith.constant 0.000000e+00 : f32
    %1342 = vector.broadcast %cst_631 : f32 to vector<8x1xf32>
    %1343 = vector.extract_strided_slice %1341 {offsets = [0, 1], sizes = [8, 127], strides = [1, 1]} : vector<8x128xf32> to vector<8x127xf32>
    %1344 = tpu.concatenate %1343, %1342 in 1 : vector<8x127xf32>, vector<8x1xf32> -> vector<8x128xf32>
    %1345 = arith.maximumf %1341, %1344 : vector<8x128xf32>
    %cst_632 = arith.constant 0.000000e+00 : f32
    %1346 = vector.broadcast %cst_632 : f32 to vector<8x2xf32>
    %1347 = vector.extract_strided_slice %1341 {offsets = [0, 2], sizes = [8, 126], strides = [1, 1]} : vector<8x128xf32> to vector<8x126xf32>
    %1348 = tpu.concatenate %1347, %1346 in 1 : vector<8x126xf32>, vector<8x2xf32> -> vector<8x128xf32>
    %cst_633 = arith.constant 0.000000e+00 : f32
    %1349 = vector.broadcast %cst_633 : f32 to vector<8x3xf32>
    %1350 = vector.extract_strided_slice %1341 {offsets = [0, 3], sizes = [8, 125], strides = [1, 1]} : vector<8x128xf32> to vector<8x125xf32>
    %1351 = tpu.concatenate %1350, %1349 in 1 : vector<8x125xf32>, vector<8x3xf32> -> vector<8x128xf32>
    %1352 = arith.maximumf %1348, %1351 : vector<8x128xf32>
    %1353 = arith.maximumf %1345, %1352 : vector<8x128xf32>
    %c11_634 = arith.constant 11 : index
    %c0_635 = arith.constant 0 : index
    %c0_636 = arith.constant 0 : index
    %1354 = vector.load %arg6[%c11_634, %c0_635, %c0_636] : memref<16x128x256xf32, #tpu.memory_space<vmem>>, vector<1x128x256xf32>
    %1355 = vector.shape_cast %1354 : vector<1x128x256xf32> to vector<128x256xf32>
    %cst_637 = arith.constant dense<0.000000e+00> : vector<8x256xf32>
    %1356 = tpu.matmul %1353, %1355, %cst_637 {dimension_numbers = #tpu.dot_dimension_numbers<[1], [0], [0], [1], [0, 0, 1, 1], [], []>} : vector<8x128xf32>, vector<128x256xf32>, vector<8x256xf32> -> vector<8x256xf32>
    %1357 = arith.addf %1257, %1356 : vector<8x256xf32>
    %c12_638 = arith.constant 12 : index
    %c0_639 = arith.constant 0 : index
    %1358 = memref.load %arg4[%c12_638, %c0_639] : memref<16x20xf32, #tpu.memory_space<smem>>
    %1359 = vector.broadcast %1358 : f32 to vector<8x128xf32>
    %1360 = arith.mulf %1359, %39 : vector<8x128xf32>
    %c12_640 = arith.constant 12 : index
    %c1_641 = arith.constant 1 : index
    %1361 = memref.load %arg4[%c12_640, %c1_641] : memref<16x20xf32, #tpu.memory_space<smem>>
    %1362 = vector.broadcast %1361 : f32 to vector<8x128xf32>
    %1363 = arith.mulf %1362, %42 : vector<8x128xf32>
    %1364 = arith.addf %1360, %1363 : vector<8x128xf32>
    %c12_642 = arith.constant 12 : index
    %c2_643 = arith.constant 2 : index
    %1365 = memref.load %arg4[%c12_642, %c2_643] : memref<16x20xf32, #tpu.memory_space<smem>>
    %1366 = vector.broadcast %1365 : f32 to vector<8x128xf32>
    %1367 = arith.mulf %1366, %36 : vector<8x128xf32>
    %1368 = arith.addf %1364, %1367 : vector<8x128xf32>
    %c12_644 = arith.constant 12 : index
    %c3_645 = arith.constant 3 : index
    %1369 = memref.load %arg4[%c12_644, %c3_645] : memref<16x20xf32, #tpu.memory_space<smem>>
    %1370 = vector.broadcast %1369 : f32 to vector<8x128xf32>
    %1371 = arith.mulf %1370, %45 : vector<8x128xf32>
    %1372 = arith.addf %1368, %1371 : vector<8x128xf32>
    %c12_646 = arith.constant 12 : index
    %c4_647 = arith.constant 4 : index
    %1373 = memref.load %arg4[%c12_646, %c4_647] : memref<16x20xf32, #tpu.memory_space<smem>>
    %1374 = vector.broadcast %1373 : f32 to vector<8x128xf32>
    %1375 = arith.mulf %1374, %48 : vector<8x128xf32>
    %1376 = arith.addf %1372, %1375 : vector<8x128xf32>
    %c12_648 = arith.constant 12 : index
    %c5_649 = arith.constant 5 : index
    %1377 = memref.load %arg4[%c12_648, %c5_649] : memref<16x20xf32, #tpu.memory_space<smem>>
    %1378 = vector.broadcast %1377 : f32 to vector<8x128xf32>
    %1379 = arith.mulf %1378, %75 : vector<8x128xf32>
    %1380 = arith.addf %1376, %1379 : vector<8x128xf32>
    %c12_650 = arith.constant 12 : index
    %c6_651 = arith.constant 6 : index
    %1381 = memref.load %arg4[%c12_650, %c6_651] : memref<16x20xf32, #tpu.memory_space<smem>>
    %1382 = vector.broadcast %1381 : f32 to vector<8x128xf32>
    %1383 = arith.mulf %1382, %78 : vector<8x128xf32>
    %1384 = arith.addf %1380, %1383 : vector<8x128xf32>
    %c12_652 = arith.constant 12 : index
    %c7_653 = arith.constant 7 : index
    %1385 = memref.load %arg4[%c12_652, %c7_653] : memref<16x20xf32, #tpu.memory_space<smem>>
    %1386 = vector.broadcast %1385 : f32 to vector<8x128xf32>
    %1387 = arith.mulf %1386, %72 : vector<8x128xf32>
    %1388 = arith.addf %1384, %1387 : vector<8x128xf32>
    %c12_654 = arith.constant 12 : index
    %c8_655 = arith.constant 8 : index
    %1389 = memref.load %arg4[%c12_654, %c8_655] : memref<16x20xf32, #tpu.memory_space<smem>>
    %1390 = vector.broadcast %1389 : f32 to vector<8x128xf32>
    %1391 = arith.mulf %1390, %81 : vector<8x128xf32>
    %1392 = arith.addf %1388, %1391 : vector<8x128xf32>
    %c12_656 = arith.constant 12 : index
    %c9_657 = arith.constant 9 : index
    %1393 = memref.load %arg4[%c12_656, %c9_657] : memref<16x20xf32, #tpu.memory_space<smem>>
    %1394 = vector.broadcast %1393 : f32 to vector<8x128xf32>
    %1395 = arith.mulf %1394, %84 : vector<8x128xf32>
    %1396 = arith.addf %1392, %1395 : vector<8x128xf32>
    %c12_658 = arith.constant 12 : index
    %c10_659 = arith.constant 10 : index
    %1397 = memref.load %arg4[%c12_658, %c10_659] : memref<16x20xf32, #tpu.memory_space<smem>>
    %1398 = vector.broadcast %1397 : f32 to vector<8x128xf32>
    %1399 = arith.mulf %1398, %111 : vector<8x128xf32>
    %1400 = arith.addf %1396, %1399 : vector<8x128xf32>
    %c12_660 = arith.constant 12 : index
    %c11_661 = arith.constant 11 : index
    %1401 = memref.load %arg4[%c12_660, %c11_661] : memref<16x20xf32, #tpu.memory_space<smem>>
    %1402 = vector.broadcast %1401 : f32 to vector<8x128xf32>
    %1403 = arith.mulf %1402, %114 : vector<8x128xf32>
    %1404 = arith.addf %1400, %1403 : vector<8x128xf32>
    %c12_662 = arith.constant 12 : index
    %c12_663 = arith.constant 12 : index
    %1405 = memref.load %arg4[%c12_662, %c12_663] : memref<16x20xf32, #tpu.memory_space<smem>>
    %1406 = vector.broadcast %1405 : f32 to vector<8x128xf32>
    %1407 = arith.mulf %1406, %108 : vector<8x128xf32>
    %1408 = arith.addf %1404, %1407 : vector<8x128xf32>
    %c12_664 = arith.constant 12 : index
    %c13_665 = arith.constant 13 : index
    %1409 = memref.load %arg4[%c12_664, %c13_665] : memref<16x20xf32, #tpu.memory_space<smem>>
    %1410 = vector.broadcast %1409 : f32 to vector<8x128xf32>
    %1411 = arith.mulf %1410, %117 : vector<8x128xf32>
    %1412 = arith.addf %1408, %1411 : vector<8x128xf32>
    %c12_666 = arith.constant 12 : index
    %c14_667 = arith.constant 14 : index
    %1413 = memref.load %arg4[%c12_666, %c14_667] : memref<16x20xf32, #tpu.memory_space<smem>>
    %1414 = vector.broadcast %1413 : f32 to vector<8x128xf32>
    %1415 = arith.mulf %1414, %120 : vector<8x128xf32>
    %1416 = arith.addf %1412, %1415 : vector<8x128xf32>
    %c12_668 = arith.constant 12 : index
    %c15_669 = arith.constant 15 : index
    %1417 = memref.load %arg4[%c12_668, %c15_669] : memref<16x20xf32, #tpu.memory_space<smem>>
    %1418 = vector.broadcast %1417 : f32 to vector<8x128xf32>
    %1419 = arith.mulf %1418, %147 : vector<8x128xf32>
    %1420 = arith.addf %1416, %1419 : vector<8x128xf32>
    %c12_670 = arith.constant 12 : index
    %c16_671 = arith.constant 16 : index
    %1421 = memref.load %arg4[%c12_670, %c16_671] : memref<16x20xf32, #tpu.memory_space<smem>>
    %1422 = vector.broadcast %1421 : f32 to vector<8x128xf32>
    %1423 = arith.mulf %1422, %150 : vector<8x128xf32>
    %1424 = arith.addf %1420, %1423 : vector<8x128xf32>
    %c12_672 = arith.constant 12 : index
    %c17_673 = arith.constant 17 : index
    %1425 = memref.load %arg4[%c12_672, %c17_673] : memref<16x20xf32, #tpu.memory_space<smem>>
    %1426 = vector.broadcast %1425 : f32 to vector<8x128xf32>
    %1427 = arith.mulf %1426, %144 : vector<8x128xf32>
    %1428 = arith.addf %1424, %1427 : vector<8x128xf32>
    %c12_674 = arith.constant 12 : index
    %c18_675 = arith.constant 18 : index
    %1429 = memref.load %arg4[%c12_674, %c18_675] : memref<16x20xf32, #tpu.memory_space<smem>>
    %1430 = vector.broadcast %1429 : f32 to vector<8x128xf32>
    %1431 = arith.mulf %1430, %153 : vector<8x128xf32>
    %1432 = arith.addf %1428, %1431 : vector<8x128xf32>
    %c12_676 = arith.constant 12 : index
    %c19_677 = arith.constant 19 : index
    %1433 = memref.load %arg4[%c12_676, %c19_677] : memref<16x20xf32, #tpu.memory_space<smem>>
    %1434 = vector.broadcast %1433 : f32 to vector<8x128xf32>
    %1435 = arith.mulf %1434, %156 : vector<8x128xf32>
    %1436 = arith.addf %1432, %1435 : vector<8x128xf32>
    %c12_678 = arith.constant 12 : index
    %1437 = memref.load %arg5[%c12_678] : memref<16xf32, #tpu.memory_space<smem>>
    %1438 = vector.broadcast %1437 : f32 to vector<8x128xf32>
    %1439 = arith.addf %1436, %1438 : vector<8x128xf32>
    %cst_679 = arith.constant 0.000000e+00 : f32
    %1440 = vector.broadcast %cst_679 : f32 to vector<8x128xf32>
    %1441 = arith.maximumf %1439, %1440 : vector<8x128xf32>
    %cst_680 = arith.constant 0.000000e+00 : f32
    %1442 = vector.broadcast %cst_680 : f32 to vector<8x1xf32>
    %1443 = vector.extract_strided_slice %1441 {offsets = [0, 1], sizes = [8, 127], strides = [1, 1]} : vector<8x128xf32> to vector<8x127xf32>
    %1444 = tpu.concatenate %1443, %1442 in 1 : vector<8x127xf32>, vector<8x1xf32> -> vector<8x128xf32>
    %1445 = arith.maximumf %1441, %1444 : vector<8x128xf32>
    %cst_681 = arith.constant 0.000000e+00 : f32
    %1446 = vector.broadcast %cst_681 : f32 to vector<8x2xf32>
    %1447 = vector.extract_strided_slice %1441 {offsets = [0, 2], sizes = [8, 126], strides = [1, 1]} : vector<8x128xf32> to vector<8x126xf32>
    %1448 = tpu.concatenate %1447, %1446 in 1 : vector<8x126xf32>, vector<8x2xf32> -> vector<8x128xf32>
    %cst_682 = arith.constant 0.000000e+00 : f32
    %1449 = vector.broadcast %cst_682 : f32 to vector<8x3xf32>
    %1450 = vector.extract_strided_slice %1441 {offsets = [0, 3], sizes = [8, 125], strides = [1, 1]} : vector<8x128xf32> to vector<8x125xf32>
    %1451 = tpu.concatenate %1450, %1449 in 1 : vector<8x125xf32>, vector<8x3xf32> -> vector<8x128xf32>
    %1452 = arith.maximumf %1448, %1451 : vector<8x128xf32>
    %1453 = arith.maximumf %1445, %1452 : vector<8x128xf32>
    %c12_683 = arith.constant 12 : index
    %c0_684 = arith.constant 0 : index
    %c0_685 = arith.constant 0 : index
    %1454 = vector.load %arg6[%c12_683, %c0_684, %c0_685] : memref<16x128x256xf32, #tpu.memory_space<vmem>>, vector<1x128x256xf32>
    %1455 = vector.shape_cast %1454 : vector<1x128x256xf32> to vector<128x256xf32>
    %cst_686 = arith.constant dense<0.000000e+00> : vector<8x256xf32>
    %1456 = tpu.matmul %1453, %1455, %cst_686 {dimension_numbers = #tpu.dot_dimension_numbers<[1], [0], [0], [1], [0, 0, 1, 1], [], []>} : vector<8x128xf32>, vector<128x256xf32>, vector<8x256xf32> -> vector<8x256xf32>
    %1457 = arith.addf %1357, %1456 : vector<8x256xf32>
    %c13_687 = arith.constant 13 : index
    %c0_688 = arith.constant 0 : index
    %1458 = memref.load %arg4[%c13_687, %c0_688] : memref<16x20xf32, #tpu.memory_space<smem>>
    %1459 = vector.broadcast %1458 : f32 to vector<8x128xf32>
    %1460 = arith.mulf %1459, %39 : vector<8x128xf32>
    %c13_689 = arith.constant 13 : index
    %c1_690 = arith.constant 1 : index
    %1461 = memref.load %arg4[%c13_689, %c1_690] : memref<16x20xf32, #tpu.memory_space<smem>>
    %1462 = vector.broadcast %1461 : f32 to vector<8x128xf32>
    %1463 = arith.mulf %1462, %42 : vector<8x128xf32>
    %1464 = arith.addf %1460, %1463 : vector<8x128xf32>
    %c13_691 = arith.constant 13 : index
    %c2_692 = arith.constant 2 : index
    %1465 = memref.load %arg4[%c13_691, %c2_692] : memref<16x20xf32, #tpu.memory_space<smem>>
    %1466 = vector.broadcast %1465 : f32 to vector<8x128xf32>
    %1467 = arith.mulf %1466, %36 : vector<8x128xf32>
    %1468 = arith.addf %1464, %1467 : vector<8x128xf32>
    %c13_693 = arith.constant 13 : index
    %c3_694 = arith.constant 3 : index
    %1469 = memref.load %arg4[%c13_693, %c3_694] : memref<16x20xf32, #tpu.memory_space<smem>>
    %1470 = vector.broadcast %1469 : f32 to vector<8x128xf32>
    %1471 = arith.mulf %1470, %45 : vector<8x128xf32>
    %1472 = arith.addf %1468, %1471 : vector<8x128xf32>
    %c13_695 = arith.constant 13 : index
    %c4_696 = arith.constant 4 : index
    %1473 = memref.load %arg4[%c13_695, %c4_696] : memref<16x20xf32, #tpu.memory_space<smem>>
    %1474 = vector.broadcast %1473 : f32 to vector<8x128xf32>
    %1475 = arith.mulf %1474, %48 : vector<8x128xf32>
    %1476 = arith.addf %1472, %1475 : vector<8x128xf32>
    %c13_697 = arith.constant 13 : index
    %c5_698 = arith.constant 5 : index
    %1477 = memref.load %arg4[%c13_697, %c5_698] : memref<16x20xf32, #tpu.memory_space<smem>>
    %1478 = vector.broadcast %1477 : f32 to vector<8x128xf32>
    %1479 = arith.mulf %1478, %75 : vector<8x128xf32>
    %1480 = arith.addf %1476, %1479 : vector<8x128xf32>
    %c13_699 = arith.constant 13 : index
    %c6_700 = arith.constant 6 : index
    %1481 = memref.load %arg4[%c13_699, %c6_700] : memref<16x20xf32, #tpu.memory_space<smem>>
    %1482 = vector.broadcast %1481 : f32 to vector<8x128xf32>
    %1483 = arith.mulf %1482, %78 : vector<8x128xf32>
    %1484 = arith.addf %1480, %1483 : vector<8x128xf32>
    %c13_701 = arith.constant 13 : index
    %c7_702 = arith.constant 7 : index
    %1485 = memref.load %arg4[%c13_701, %c7_702] : memref<16x20xf32, #tpu.memory_space<smem>>
    %1486 = vector.broadcast %1485 : f32 to vector<8x128xf32>
    %1487 = arith.mulf %1486, %72 : vector<8x128xf32>
    %1488 = arith.addf %1484, %1487 : vector<8x128xf32>
    %c13_703 = arith.constant 13 : index
    %c8_704 = arith.constant 8 : index
    %1489 = memref.load %arg4[%c13_703, %c8_704] : memref<16x20xf32, #tpu.memory_space<smem>>
    %1490 = vector.broadcast %1489 : f32 to vector<8x128xf32>
    %1491 = arith.mulf %1490, %81 : vector<8x128xf32>
    %1492 = arith.addf %1488, %1491 : vector<8x128xf32>
    %c13_705 = arith.constant 13 : index
    %c9_706 = arith.constant 9 : index
    %1493 = memref.load %arg4[%c13_705, %c9_706] : memref<16x20xf32, #tpu.memory_space<smem>>
    %1494 = vector.broadcast %1493 : f32 to vector<8x128xf32>
    %1495 = arith.mulf %1494, %84 : vector<8x128xf32>
    %1496 = arith.addf %1492, %1495 : vector<8x128xf32>
    %c13_707 = arith.constant 13 : index
    %c10_708 = arith.constant 10 : index
    %1497 = memref.load %arg4[%c13_707, %c10_708] : memref<16x20xf32, #tpu.memory_space<smem>>
    %1498 = vector.broadcast %1497 : f32 to vector<8x128xf32>
    %1499 = arith.mulf %1498, %111 : vector<8x128xf32>
    %1500 = arith.addf %1496, %1499 : vector<8x128xf32>
    %c13_709 = arith.constant 13 : index
    %c11_710 = arith.constant 11 : index
    %1501 = memref.load %arg4[%c13_709, %c11_710] : memref<16x20xf32, #tpu.memory_space<smem>>
    %1502 = vector.broadcast %1501 : f32 to vector<8x128xf32>
    %1503 = arith.mulf %1502, %114 : vector<8x128xf32>
    %1504 = arith.addf %1500, %1503 : vector<8x128xf32>
    %c13_711 = arith.constant 13 : index
    %c12_712 = arith.constant 12 : index
    %1505 = memref.load %arg4[%c13_711, %c12_712] : memref<16x20xf32, #tpu.memory_space<smem>>
    %1506 = vector.broadcast %1505 : f32 to vector<8x128xf32>
    %1507 = arith.mulf %1506, %108 : vector<8x128xf32>
    %1508 = arith.addf %1504, %1507 : vector<8x128xf32>
    %c13_713 = arith.constant 13 : index
    %c13_714 = arith.constant 13 : index
    %1509 = memref.load %arg4[%c13_713, %c13_714] : memref<16x20xf32, #tpu.memory_space<smem>>
    %1510 = vector.broadcast %1509 : f32 to vector<8x128xf32>
    %1511 = arith.mulf %1510, %117 : vector<8x128xf32>
    %1512 = arith.addf %1508, %1511 : vector<8x128xf32>
    %c13_715 = arith.constant 13 : index
    %c14_716 = arith.constant 14 : index
    %1513 = memref.load %arg4[%c13_715, %c14_716] : memref<16x20xf32, #tpu.memory_space<smem>>
    %1514 = vector.broadcast %1513 : f32 to vector<8x128xf32>
    %1515 = arith.mulf %1514, %120 : vector<8x128xf32>
    %1516 = arith.addf %1512, %1515 : vector<8x128xf32>
    %c13_717 = arith.constant 13 : index
    %c15_718 = arith.constant 15 : index
    %1517 = memref.load %arg4[%c13_717, %c15_718] : memref<16x20xf32, #tpu.memory_space<smem>>
    %1518 = vector.broadcast %1517 : f32 to vector<8x128xf32>
    %1519 = arith.mulf %1518, %147 : vector<8x128xf32>
    %1520 = arith.addf %1516, %1519 : vector<8x128xf32>
    %c13_719 = arith.constant 13 : index
    %c16_720 = arith.constant 16 : index
    %1521 = memref.load %arg4[%c13_719, %c16_720] : memref<16x20xf32, #tpu.memory_space<smem>>
    %1522 = vector.broadcast %1521 : f32 to vector<8x128xf32>
    %1523 = arith.mulf %1522, %150 : vector<8x128xf32>
    %1524 = arith.addf %1520, %1523 : vector<8x128xf32>
    %c13_721 = arith.constant 13 : index
    %c17_722 = arith.constant 17 : index
    %1525 = memref.load %arg4[%c13_721, %c17_722] : memref<16x20xf32, #tpu.memory_space<smem>>
    %1526 = vector.broadcast %1525 : f32 to vector<8x128xf32>
    %1527 = arith.mulf %1526, %144 : vector<8x128xf32>
    %1528 = arith.addf %1524, %1527 : vector<8x128xf32>
    %c13_723 = arith.constant 13 : index
    %c18_724 = arith.constant 18 : index
    %1529 = memref.load %arg4[%c13_723, %c18_724] : memref<16x20xf32, #tpu.memory_space<smem>>
    %1530 = vector.broadcast %1529 : f32 to vector<8x128xf32>
    %1531 = arith.mulf %1530, %153 : vector<8x128xf32>
    %1532 = arith.addf %1528, %1531 : vector<8x128xf32>
    %c13_725 = arith.constant 13 : index
    %c19_726 = arith.constant 19 : index
    %1533 = memref.load %arg4[%c13_725, %c19_726] : memref<16x20xf32, #tpu.memory_space<smem>>
    %1534 = vector.broadcast %1533 : f32 to vector<8x128xf32>
    %1535 = arith.mulf %1534, %156 : vector<8x128xf32>
    %1536 = arith.addf %1532, %1535 : vector<8x128xf32>
    %c13_727 = arith.constant 13 : index
    %1537 = memref.load %arg5[%c13_727] : memref<16xf32, #tpu.memory_space<smem>>
    %1538 = vector.broadcast %1537 : f32 to vector<8x128xf32>
    %1539 = arith.addf %1536, %1538 : vector<8x128xf32>
    %cst_728 = arith.constant 0.000000e+00 : f32
    %1540 = vector.broadcast %cst_728 : f32 to vector<8x128xf32>
    %1541 = arith.maximumf %1539, %1540 : vector<8x128xf32>
    %cst_729 = arith.constant 0.000000e+00 : f32
    %1542 = vector.broadcast %cst_729 : f32 to vector<8x1xf32>
    %1543 = vector.extract_strided_slice %1541 {offsets = [0, 1], sizes = [8, 127], strides = [1, 1]} : vector<8x128xf32> to vector<8x127xf32>
    %1544 = tpu.concatenate %1543, %1542 in 1 : vector<8x127xf32>, vector<8x1xf32> -> vector<8x128xf32>
    %1545 = arith.maximumf %1541, %1544 : vector<8x128xf32>
    %cst_730 = arith.constant 0.000000e+00 : f32
    %1546 = vector.broadcast %cst_730 : f32 to vector<8x2xf32>
    %1547 = vector.extract_strided_slice %1541 {offsets = [0, 2], sizes = [8, 126], strides = [1, 1]} : vector<8x128xf32> to vector<8x126xf32>
    %1548 = tpu.concatenate %1547, %1546 in 1 : vector<8x126xf32>, vector<8x2xf32> -> vector<8x128xf32>
    %cst_731 = arith.constant 0.000000e+00 : f32
    %1549 = vector.broadcast %cst_731 : f32 to vector<8x3xf32>
    %1550 = vector.extract_strided_slice %1541 {offsets = [0, 3], sizes = [8, 125], strides = [1, 1]} : vector<8x128xf32> to vector<8x125xf32>
    %1551 = tpu.concatenate %1550, %1549 in 1 : vector<8x125xf32>, vector<8x3xf32> -> vector<8x128xf32>
    %1552 = arith.maximumf %1548, %1551 : vector<8x128xf32>
    %1553 = arith.maximumf %1545, %1552 : vector<8x128xf32>
    %c13_732 = arith.constant 13 : index
    %c0_733 = arith.constant 0 : index
    %c0_734 = arith.constant 0 : index
    %1554 = vector.load %arg6[%c13_732, %c0_733, %c0_734] : memref<16x128x256xf32, #tpu.memory_space<vmem>>, vector<1x128x256xf32>
    %1555 = vector.shape_cast %1554 : vector<1x128x256xf32> to vector<128x256xf32>
    %cst_735 = arith.constant dense<0.000000e+00> : vector<8x256xf32>
    %1556 = tpu.matmul %1553, %1555, %cst_735 {dimension_numbers = #tpu.dot_dimension_numbers<[1], [0], [0], [1], [0, 0, 1, 1], [], []>} : vector<8x128xf32>, vector<128x256xf32>, vector<8x256xf32> -> vector<8x256xf32>
    %1557 = arith.addf %1457, %1556 : vector<8x256xf32>
    %c14_736 = arith.constant 14 : index
    %c0_737 = arith.constant 0 : index
    %1558 = memref.load %arg4[%c14_736, %c0_737] : memref<16x20xf32, #tpu.memory_space<smem>>
    %1559 = vector.broadcast %1558 : f32 to vector<8x128xf32>
    %1560 = arith.mulf %1559, %39 : vector<8x128xf32>
    %c14_738 = arith.constant 14 : index
    %c1_739 = arith.constant 1 : index
    %1561 = memref.load %arg4[%c14_738, %c1_739] : memref<16x20xf32, #tpu.memory_space<smem>>
    %1562 = vector.broadcast %1561 : f32 to vector<8x128xf32>
    %1563 = arith.mulf %1562, %42 : vector<8x128xf32>
    %1564 = arith.addf %1560, %1563 : vector<8x128xf32>
    %c14_740 = arith.constant 14 : index
    %c2_741 = arith.constant 2 : index
    %1565 = memref.load %arg4[%c14_740, %c2_741] : memref<16x20xf32, #tpu.memory_space<smem>>
    %1566 = vector.broadcast %1565 : f32 to vector<8x128xf32>
    %1567 = arith.mulf %1566, %36 : vector<8x128xf32>
    %1568 = arith.addf %1564, %1567 : vector<8x128xf32>
    %c14_742 = arith.constant 14 : index
    %c3_743 = arith.constant 3 : index
    %1569 = memref.load %arg4[%c14_742, %c3_743] : memref<16x20xf32, #tpu.memory_space<smem>>
    %1570 = vector.broadcast %1569 : f32 to vector<8x128xf32>
    %1571 = arith.mulf %1570, %45 : vector<8x128xf32>
    %1572 = arith.addf %1568, %1571 : vector<8x128xf32>
    %c14_744 = arith.constant 14 : index
    %c4_745 = arith.constant 4 : index
    %1573 = memref.load %arg4[%c14_744, %c4_745] : memref<16x20xf32, #tpu.memory_space<smem>>
    %1574 = vector.broadcast %1573 : f32 to vector<8x128xf32>
    %1575 = arith.mulf %1574, %48 : vector<8x128xf32>
    %1576 = arith.addf %1572, %1575 : vector<8x128xf32>
    %c14_746 = arith.constant 14 : index
    %c5_747 = arith.constant 5 : index
    %1577 = memref.load %arg4[%c14_746, %c5_747] : memref<16x20xf32, #tpu.memory_space<smem>>
    %1578 = vector.broadcast %1577 : f32 to vector<8x128xf32>
    %1579 = arith.mulf %1578, %75 : vector<8x128xf32>
    %1580 = arith.addf %1576, %1579 : vector<8x128xf32>
    %c14_748 = arith.constant 14 : index
    %c6_749 = arith.constant 6 : index
    %1581 = memref.load %arg4[%c14_748, %c6_749] : memref<16x20xf32, #tpu.memory_space<smem>>
    %1582 = vector.broadcast %1581 : f32 to vector<8x128xf32>
    %1583 = arith.mulf %1582, %78 : vector<8x128xf32>
    %1584 = arith.addf %1580, %1583 : vector<8x128xf32>
    %c14_750 = arith.constant 14 : index
    %c7_751 = arith.constant 7 : index
    %1585 = memref.load %arg4[%c14_750, %c7_751] : memref<16x20xf32, #tpu.memory_space<smem>>
    %1586 = vector.broadcast %1585 : f32 to vector<8x128xf32>
    %1587 = arith.mulf %1586, %72 : vector<8x128xf32>
    %1588 = arith.addf %1584, %1587 : vector<8x128xf32>
    %c14_752 = arith.constant 14 : index
    %c8_753 = arith.constant 8 : index
    %1589 = memref.load %arg4[%c14_752, %c8_753] : memref<16x20xf32, #tpu.memory_space<smem>>
    %1590 = vector.broadcast %1589 : f32 to vector<8x128xf32>
    %1591 = arith.mulf %1590, %81 : vector<8x128xf32>
    %1592 = arith.addf %1588, %1591 : vector<8x128xf32>
    %c14_754 = arith.constant 14 : index
    %c9_755 = arith.constant 9 : index
    %1593 = memref.load %arg4[%c14_754, %c9_755] : memref<16x20xf32, #tpu.memory_space<smem>>
    %1594 = vector.broadcast %1593 : f32 to vector<8x128xf32>
    %1595 = arith.mulf %1594, %84 : vector<8x128xf32>
    %1596 = arith.addf %1592, %1595 : vector<8x128xf32>
    %c14_756 = arith.constant 14 : index
    %c10_757 = arith.constant 10 : index
    %1597 = memref.load %arg4[%c14_756, %c10_757] : memref<16x20xf32, #tpu.memory_space<smem>>
    %1598 = vector.broadcast %1597 : f32 to vector<8x128xf32>
    %1599 = arith.mulf %1598, %111 : vector<8x128xf32>
    %1600 = arith.addf %1596, %1599 : vector<8x128xf32>
    %c14_758 = arith.constant 14 : index
    %c11_759 = arith.constant 11 : index
    %1601 = memref.load %arg4[%c14_758, %c11_759] : memref<16x20xf32, #tpu.memory_space<smem>>
    %1602 = vector.broadcast %1601 : f32 to vector<8x128xf32>
    %1603 = arith.mulf %1602, %114 : vector<8x128xf32>
    %1604 = arith.addf %1600, %1603 : vector<8x128xf32>
    %c14_760 = arith.constant 14 : index
    %c12_761 = arith.constant 12 : index
    %1605 = memref.load %arg4[%c14_760, %c12_761] : memref<16x20xf32, #tpu.memory_space<smem>>
    %1606 = vector.broadcast %1605 : f32 to vector<8x128xf32>
    %1607 = arith.mulf %1606, %108 : vector<8x128xf32>
    %1608 = arith.addf %1604, %1607 : vector<8x128xf32>
    %c14_762 = arith.constant 14 : index
    %c13_763 = arith.constant 13 : index
    %1609 = memref.load %arg4[%c14_762, %c13_763] : memref<16x20xf32, #tpu.memory_space<smem>>
    %1610 = vector.broadcast %1609 : f32 to vector<8x128xf32>
    %1611 = arith.mulf %1610, %117 : vector<8x128xf32>
    %1612 = arith.addf %1608, %1611 : vector<8x128xf32>
    %c14_764 = arith.constant 14 : index
    %c14_765 = arith.constant 14 : index
    %1613 = memref.load %arg4[%c14_764, %c14_765] : memref<16x20xf32, #tpu.memory_space<smem>>
    %1614 = vector.broadcast %1613 : f32 to vector<8x128xf32>
    %1615 = arith.mulf %1614, %120 : vector<8x128xf32>
    %1616 = arith.addf %1612, %1615 : vector<8x128xf32>
    %c14_766 = arith.constant 14 : index
    %c15_767 = arith.constant 15 : index
    %1617 = memref.load %arg4[%c14_766, %c15_767] : memref<16x20xf32, #tpu.memory_space<smem>>
    %1618 = vector.broadcast %1617 : f32 to vector<8x128xf32>
    %1619 = arith.mulf %1618, %147 : vector<8x128xf32>
    %1620 = arith.addf %1616, %1619 : vector<8x128xf32>
    %c14_768 = arith.constant 14 : index
    %c16_769 = arith.constant 16 : index
    %1621 = memref.load %arg4[%c14_768, %c16_769] : memref<16x20xf32, #tpu.memory_space<smem>>
    %1622 = vector.broadcast %1621 : f32 to vector<8x128xf32>
    %1623 = arith.mulf %1622, %150 : vector<8x128xf32>
    %1624 = arith.addf %1620, %1623 : vector<8x128xf32>
    %c14_770 = arith.constant 14 : index
    %c17_771 = arith.constant 17 : index
    %1625 = memref.load %arg4[%c14_770, %c17_771] : memref<16x20xf32, #tpu.memory_space<smem>>
    %1626 = vector.broadcast %1625 : f32 to vector<8x128xf32>
    %1627 = arith.mulf %1626, %144 : vector<8x128xf32>
    %1628 = arith.addf %1624, %1627 : vector<8x128xf32>
    %c14_772 = arith.constant 14 : index
    %c18_773 = arith.constant 18 : index
    %1629 = memref.load %arg4[%c14_772, %c18_773] : memref<16x20xf32, #tpu.memory_space<smem>>
    %1630 = vector.broadcast %1629 : f32 to vector<8x128xf32>
    %1631 = arith.mulf %1630, %153 : vector<8x128xf32>
    %1632 = arith.addf %1628, %1631 : vector<8x128xf32>
    %c14_774 = arith.constant 14 : index
    %c19_775 = arith.constant 19 : index
    %1633 = memref.load %arg4[%c14_774, %c19_775] : memref<16x20xf32, #tpu.memory_space<smem>>
    %1634 = vector.broadcast %1633 : f32 to vector<8x128xf32>
    %1635 = arith.mulf %1634, %156 : vector<8x128xf32>
    %1636 = arith.addf %1632, %1635 : vector<8x128xf32>
    %c14_776 = arith.constant 14 : index
    %1637 = memref.load %arg5[%c14_776] : memref<16xf32, #tpu.memory_space<smem>>
    %1638 = vector.broadcast %1637 : f32 to vector<8x128xf32>
    %1639 = arith.addf %1636, %1638 : vector<8x128xf32>
    %cst_777 = arith.constant 0.000000e+00 : f32
    %1640 = vector.broadcast %cst_777 : f32 to vector<8x128xf32>
    %1641 = arith.maximumf %1639, %1640 : vector<8x128xf32>
    %cst_778 = arith.constant 0.000000e+00 : f32
    %1642 = vector.broadcast %cst_778 : f32 to vector<8x1xf32>
    %1643 = vector.extract_strided_slice %1641 {offsets = [0, 1], sizes = [8, 127], strides = [1, 1]} : vector<8x128xf32> to vector<8x127xf32>
    %1644 = tpu.concatenate %1643, %1642 in 1 : vector<8x127xf32>, vector<8x1xf32> -> vector<8x128xf32>
    %1645 = arith.maximumf %1641, %1644 : vector<8x128xf32>
    %cst_779 = arith.constant 0.000000e+00 : f32
    %1646 = vector.broadcast %cst_779 : f32 to vector<8x2xf32>
    %1647 = vector.extract_strided_slice %1641 {offsets = [0, 2], sizes = [8, 126], strides = [1, 1]} : vector<8x128xf32> to vector<8x126xf32>
    %1648 = tpu.concatenate %1647, %1646 in 1 : vector<8x126xf32>, vector<8x2xf32> -> vector<8x128xf32>
    %cst_780 = arith.constant 0.000000e+00 : f32
    %1649 = vector.broadcast %cst_780 : f32 to vector<8x3xf32>
    %1650 = vector.extract_strided_slice %1641 {offsets = [0, 3], sizes = [8, 125], strides = [1, 1]} : vector<8x128xf32> to vector<8x125xf32>
    %1651 = tpu.concatenate %1650, %1649 in 1 : vector<8x125xf32>, vector<8x3xf32> -> vector<8x128xf32>
    %1652 = arith.maximumf %1648, %1651 : vector<8x128xf32>
    %1653 = arith.maximumf %1645, %1652 : vector<8x128xf32>
    %c14_781 = arith.constant 14 : index
    %c0_782 = arith.constant 0 : index
    %c0_783 = arith.constant 0 : index
    %1654 = vector.load %arg6[%c14_781, %c0_782, %c0_783] : memref<16x128x256xf32, #tpu.memory_space<vmem>>, vector<1x128x256xf32>
    %1655 = vector.shape_cast %1654 : vector<1x128x256xf32> to vector<128x256xf32>
    %cst_784 = arith.constant dense<0.000000e+00> : vector<8x256xf32>
    %1656 = tpu.matmul %1653, %1655, %cst_784 {dimension_numbers = #tpu.dot_dimension_numbers<[1], [0], [0], [1], [0, 0, 1, 1], [], []>} : vector<8x128xf32>, vector<128x256xf32>, vector<8x256xf32> -> vector<8x256xf32>
    %1657 = arith.addf %1557, %1656 : vector<8x256xf32>
    %c15_785 = arith.constant 15 : index
    %c0_786 = arith.constant 0 : index
    %1658 = memref.load %arg4[%c15_785, %c0_786] : memref<16x20xf32, #tpu.memory_space<smem>>
    %1659 = vector.broadcast %1658 : f32 to vector<8x128xf32>
    %1660 = arith.mulf %1659, %39 : vector<8x128xf32>
    %c15_787 = arith.constant 15 : index
    %c1_788 = arith.constant 1 : index
    %1661 = memref.load %arg4[%c15_787, %c1_788] : memref<16x20xf32, #tpu.memory_space<smem>>
    %1662 = vector.broadcast %1661 : f32 to vector<8x128xf32>
    %1663 = arith.mulf %1662, %42 : vector<8x128xf32>
    %1664 = arith.addf %1660, %1663 : vector<8x128xf32>
    %c15_789 = arith.constant 15 : index
    %c2_790 = arith.constant 2 : index
    %1665 = memref.load %arg4[%c15_789, %c2_790] : memref<16x20xf32, #tpu.memory_space<smem>>
    %1666 = vector.broadcast %1665 : f32 to vector<8x128xf32>
    %1667 = arith.mulf %1666, %36 : vector<8x128xf32>
    %1668 = arith.addf %1664, %1667 : vector<8x128xf32>
    %c15_791 = arith.constant 15 : index
    %c3_792 = arith.constant 3 : index
    %1669 = memref.load %arg4[%c15_791, %c3_792] : memref<16x20xf32, #tpu.memory_space<smem>>
    %1670 = vector.broadcast %1669 : f32 to vector<8x128xf32>
    %1671 = arith.mulf %1670, %45 : vector<8x128xf32>
    %1672 = arith.addf %1668, %1671 : vector<8x128xf32>
    %c15_793 = arith.constant 15 : index
    %c4_794 = arith.constant 4 : index
    %1673 = memref.load %arg4[%c15_793, %c4_794] : memref<16x20xf32, #tpu.memory_space<smem>>
    %1674 = vector.broadcast %1673 : f32 to vector<8x128xf32>
    %1675 = arith.mulf %1674, %48 : vector<8x128xf32>
    %1676 = arith.addf %1672, %1675 : vector<8x128xf32>
    %c15_795 = arith.constant 15 : index
    %c5_796 = arith.constant 5 : index
    %1677 = memref.load %arg4[%c15_795, %c5_796] : memref<16x20xf32, #tpu.memory_space<smem>>
    %1678 = vector.broadcast %1677 : f32 to vector<8x128xf32>
    %1679 = arith.mulf %1678, %75 : vector<8x128xf32>
    %1680 = arith.addf %1676, %1679 : vector<8x128xf32>
    %c15_797 = arith.constant 15 : index
    %c6_798 = arith.constant 6 : index
    %1681 = memref.load %arg4[%c15_797, %c6_798] : memref<16x20xf32, #tpu.memory_space<smem>>
    %1682 = vector.broadcast %1681 : f32 to vector<8x128xf32>
    %1683 = arith.mulf %1682, %78 : vector<8x128xf32>
    %1684 = arith.addf %1680, %1683 : vector<8x128xf32>
    %c15_799 = arith.constant 15 : index
    %c7_800 = arith.constant 7 : index
    %1685 = memref.load %arg4[%c15_799, %c7_800] : memref<16x20xf32, #tpu.memory_space<smem>>
    %1686 = vector.broadcast %1685 : f32 to vector<8x128xf32>
    %1687 = arith.mulf %1686, %72 : vector<8x128xf32>
    %1688 = arith.addf %1684, %1687 : vector<8x128xf32>
    %c15_801 = arith.constant 15 : index
    %c8_802 = arith.constant 8 : index
    %1689 = memref.load %arg4[%c15_801, %c8_802] : memref<16x20xf32, #tpu.memory_space<smem>>
    %1690 = vector.broadcast %1689 : f32 to vector<8x128xf32>
    %1691 = arith.mulf %1690, %81 : vector<8x128xf32>
    %1692 = arith.addf %1688, %1691 : vector<8x128xf32>
    %c15_803 = arith.constant 15 : index
    %c9_804 = arith.constant 9 : index
    %1693 = memref.load %arg4[%c15_803, %c9_804] : memref<16x20xf32, #tpu.memory_space<smem>>
    %1694 = vector.broadcast %1693 : f32 to vector<8x128xf32>
    %1695 = arith.mulf %1694, %84 : vector<8x128xf32>
    %1696 = arith.addf %1692, %1695 : vector<8x128xf32>
    %c15_805 = arith.constant 15 : index
    %c10_806 = arith.constant 10 : index
    %1697 = memref.load %arg4[%c15_805, %c10_806] : memref<16x20xf32, #tpu.memory_space<smem>>
    %1698 = vector.broadcast %1697 : f32 to vector<8x128xf32>
    %1699 = arith.mulf %1698, %111 : vector<8x128xf32>
    %1700 = arith.addf %1696, %1699 : vector<8x128xf32>
    %c15_807 = arith.constant 15 : index
    %c11_808 = arith.constant 11 : index
    %1701 = memref.load %arg4[%c15_807, %c11_808] : memref<16x20xf32, #tpu.memory_space<smem>>
    %1702 = vector.broadcast %1701 : f32 to vector<8x128xf32>
    %1703 = arith.mulf %1702, %114 : vector<8x128xf32>
    %1704 = arith.addf %1700, %1703 : vector<8x128xf32>
    %c15_809 = arith.constant 15 : index
    %c12_810 = arith.constant 12 : index
    %1705 = memref.load %arg4[%c15_809, %c12_810] : memref<16x20xf32, #tpu.memory_space<smem>>
    %1706 = vector.broadcast %1705 : f32 to vector<8x128xf32>
    %1707 = arith.mulf %1706, %108 : vector<8x128xf32>
    %1708 = arith.addf %1704, %1707 : vector<8x128xf32>
    %c15_811 = arith.constant 15 : index
    %c13_812 = arith.constant 13 : index
    %1709 = memref.load %arg4[%c15_811, %c13_812] : memref<16x20xf32, #tpu.memory_space<smem>>
    %1710 = vector.broadcast %1709 : f32 to vector<8x128xf32>
    %1711 = arith.mulf %1710, %117 : vector<8x128xf32>
    %1712 = arith.addf %1708, %1711 : vector<8x128xf32>
    %c15_813 = arith.constant 15 : index
    %c14_814 = arith.constant 14 : index
    %1713 = memref.load %arg4[%c15_813, %c14_814] : memref<16x20xf32, #tpu.memory_space<smem>>
    %1714 = vector.broadcast %1713 : f32 to vector<8x128xf32>
    %1715 = arith.mulf %1714, %120 : vector<8x128xf32>
    %1716 = arith.addf %1712, %1715 : vector<8x128xf32>
    %c15_815 = arith.constant 15 : index
    %c15_816 = arith.constant 15 : index
    %1717 = memref.load %arg4[%c15_815, %c15_816] : memref<16x20xf32, #tpu.memory_space<smem>>
    %1718 = vector.broadcast %1717 : f32 to vector<8x128xf32>
    %1719 = arith.mulf %1718, %147 : vector<8x128xf32>
    %1720 = arith.addf %1716, %1719 : vector<8x128xf32>
    %c15_817 = arith.constant 15 : index
    %c16_818 = arith.constant 16 : index
    %1721 = memref.load %arg4[%c15_817, %c16_818] : memref<16x20xf32, #tpu.memory_space<smem>>
    %1722 = vector.broadcast %1721 : f32 to vector<8x128xf32>
    %1723 = arith.mulf %1722, %150 : vector<8x128xf32>
    %1724 = arith.addf %1720, %1723 : vector<8x128xf32>
    %c15_819 = arith.constant 15 : index
    %c17_820 = arith.constant 17 : index
    %1725 = memref.load %arg4[%c15_819, %c17_820] : memref<16x20xf32, #tpu.memory_space<smem>>
    %1726 = vector.broadcast %1725 : f32 to vector<8x128xf32>
    %1727 = arith.mulf %1726, %144 : vector<8x128xf32>
    %1728 = arith.addf %1724, %1727 : vector<8x128xf32>
    %c15_821 = arith.constant 15 : index
    %c18_822 = arith.constant 18 : index
    %1729 = memref.load %arg4[%c15_821, %c18_822] : memref<16x20xf32, #tpu.memory_space<smem>>
    %1730 = vector.broadcast %1729 : f32 to vector<8x128xf32>
    %1731 = arith.mulf %1730, %153 : vector<8x128xf32>
    %1732 = arith.addf %1728, %1731 : vector<8x128xf32>
    %c15_823 = arith.constant 15 : index
    %c19_824 = arith.constant 19 : index
    %1733 = memref.load %arg4[%c15_823, %c19_824] : memref<16x20xf32, #tpu.memory_space<smem>>
    %1734 = vector.broadcast %1733 : f32 to vector<8x128xf32>
    %1735 = arith.mulf %1734, %156 : vector<8x128xf32>
    %1736 = arith.addf %1732, %1735 : vector<8x128xf32>
    %c15_825 = arith.constant 15 : index
    %1737 = memref.load %arg5[%c15_825] : memref<16xf32, #tpu.memory_space<smem>>
    %1738 = vector.broadcast %1737 : f32 to vector<8x128xf32>
    %1739 = arith.addf %1736, %1738 : vector<8x128xf32>
    %cst_826 = arith.constant 0.000000e+00 : f32
    %1740 = vector.broadcast %cst_826 : f32 to vector<8x128xf32>
    %1741 = arith.maximumf %1739, %1740 : vector<8x128xf32>
    %cst_827 = arith.constant 0.000000e+00 : f32
    %1742 = vector.broadcast %cst_827 : f32 to vector<8x1xf32>
    %1743 = vector.extract_strided_slice %1741 {offsets = [0, 1], sizes = [8, 127], strides = [1, 1]} : vector<8x128xf32> to vector<8x127xf32>
    %1744 = tpu.concatenate %1743, %1742 in 1 : vector<8x127xf32>, vector<8x1xf32> -> vector<8x128xf32>
    %1745 = arith.maximumf %1741, %1744 : vector<8x128xf32>
    %cst_828 = arith.constant 0.000000e+00 : f32
    %1746 = vector.broadcast %cst_828 : f32 to vector<8x2xf32>
    %1747 = vector.extract_strided_slice %1741 {offsets = [0, 2], sizes = [8, 126], strides = [1, 1]} : vector<8x128xf32> to vector<8x126xf32>
    %1748 = tpu.concatenate %1747, %1746 in 1 : vector<8x126xf32>, vector<8x2xf32> -> vector<8x128xf32>
    %cst_829 = arith.constant 0.000000e+00 : f32
    %1749 = vector.broadcast %cst_829 : f32 to vector<8x3xf32>
    %1750 = vector.extract_strided_slice %1741 {offsets = [0, 3], sizes = [8, 125], strides = [1, 1]} : vector<8x128xf32> to vector<8x125xf32>
    %1751 = tpu.concatenate %1750, %1749 in 1 : vector<8x125xf32>, vector<8x3xf32> -> vector<8x128xf32>
    %1752 = arith.maximumf %1748, %1751 : vector<8x128xf32>
    %1753 = arith.maximumf %1745, %1752 : vector<8x128xf32>
    %c15_830 = arith.constant 15 : index
    %c0_831 = arith.constant 0 : index
    %c0_832 = arith.constant 0 : index
    %1754 = vector.load %arg6[%c15_830, %c0_831, %c0_832] : memref<16x128x256xf32, #tpu.memory_space<vmem>>, vector<1x128x256xf32>
    %1755 = vector.shape_cast %1754 : vector<1x128x256xf32> to vector<128x256xf32>
    %cst_833 = arith.constant dense<0.000000e+00> : vector<8x256xf32>
    %1756 = tpu.matmul %1753, %1755, %cst_833 {dimension_numbers = #tpu.dot_dimension_numbers<[1], [0], [0], [1], [0, 0, 1, 1], [], []>} : vector<8x128xf32>, vector<128x256xf32>, vector<8x256xf32> -> vector<8x256xf32>
    %1757 = arith.addf %1657, %1756 : vector<8x256xf32>
    %c0_834 = arith.constant 0 : index
    %c0_835 = arith.constant 0 : index
    %1758 = vector.load %arg7[%c0_834, %c0_835] : memref<1x256xf32, #tpu.memory_space<vmem>>, vector<1x256xf32>
    %1759 = vector.broadcast %1758 : vector<1x256xf32> to vector<8x256xf32>
    %1760 = arith.addf %1757, %1759 : vector<8x256xf32>
    %cst_836 = arith.constant 0.000000e+00 : f32
    %1761 = vector.broadcast %cst_836 : f32 to vector<8x256xf32>
    %1762 = arith.maximumf %1760, %1761 : vector<8x256xf32>
    %c0_837 = arith.constant 0 : index
    %c0_838 = arith.constant 0 : index
    %1763 = vector.load %arg8[%c0_837, %c0_838] : memref<256x128xf32, #tpu.memory_space<vmem>>, vector<256x128xf32>
    %cst_839 = arith.constant dense<0.000000e+00> : vector<8x128xf32>
    %1764 = tpu.matmul %1762, %1763, %cst_839 {dimension_numbers = #tpu.dot_dimension_numbers<[1], [0], [0], [1], [0, 0, 1, 1], [], []>} : vector<8x256xf32>, vector<256x128xf32>, vector<8x128xf32> -> vector<8x128xf32>
    %c0_840 = arith.constant 0 : index
    %c0_841 = arith.constant 0 : index
    %1765 = vector.load %arg9[%c0_840, %c0_841] : memref<1x128xf32, #tpu.memory_space<vmem>>, vector<1x128xf32>
    %1766 = vector.broadcast %1765 : vector<1x128xf32> to vector<8x128xf32>
    %1767 = arith.addf %1764, %1766 : vector<8x128xf32>
    %cst_842 = arith.constant 0.000000e+00 : f32
    %1768 = vector.broadcast %cst_842 : f32 to vector<8x128xf32>
    %1769 = arith.maximumf %1767, %1768 : vector<8x128xf32>
    %c0_843 = arith.constant 0 : index
    %c0_844 = arith.constant 0 : index
    %1770 = vector.load %arg10[%c0_843, %c0_844] : memref<128x32xf32, #tpu.memory_space<vmem>>, vector<128x32xf32>
    %cst_845 = arith.constant dense<0.000000e+00> : vector<8x32xf32>
    %1771 = tpu.matmul %1769, %1770, %cst_845 {dimension_numbers = #tpu.dot_dimension_numbers<[1], [0], [0], [1], [0, 0, 1, 1], [], []>} : vector<8x128xf32>, vector<128x32xf32>, vector<8x32xf32> -> vector<8x32xf32>
    %c0_846 = arith.constant 0 : index
    %c0_847 = arith.constant 0 : index
    %1772 = vector.load %arg11[%c0_846, %c0_847] : memref<1x32xf32, #tpu.memory_space<vmem>>, vector<1x32xf32>
    %1773 = vector.broadcast %1772 : vector<1x32xf32> to vector<8x32xf32>
    %1774 = arith.addf %1771, %1773 : vector<8x32xf32>
    %1775 = math.tanh %1774 : vector<8x32xf32>
    %c0_848 = arith.constant 0 : index
    %c0_849 = arith.constant 0 : index
    %1776 = vector.load %arg12[%c0_848, %c0_849] : memref<8x32xf32, #tpu.memory_space<vmem>>, vector<8x32xf32>
    tpu.vector_store %arg12[%c0_848, %c0_849], %1775 {strides = array<i32>} : memref<8x32xf32, #tpu.memory_space<vmem>>, vector<8x32xf32>,
    return
  }
  func.func @transform_0(%arg0: i32) -> (i32, i32) {
    %c0_i32 = arith.constant 0 : i32
    %c0_i32_0 = arith.constant 0 : i32
    return %arg0, %c0_i32 : i32, i32
  }
  func.func @transform_1(%arg0: i32) -> (i32, i32) {
    %c0_i32 = arith.constant 0 : i32
    %c0_i32_0 = arith.constant 0 : i32
    %c0_i32_1 = arith.constant 0 : i32
    return %c0_i32, %c0_i32_0 : i32, i32
  }
  func.func @transform_2(%arg0: i32) -> i32 {
    %c0_i32 = arith.constant 0 : i32
    %c0_i32_0 = arith.constant 0 : i32
    return %c0_i32 : i32
  }
  func.func @transform_3(%arg0: i32) -> (i32, i32) {
    %c0_i32 = arith.constant 0 : i32
    %c0_i32_0 = arith.constant 0 : i32
    %c0_i32_1 = arith.constant 0 : i32
    return %c0_i32, %c0_i32_0 : i32, i32
  }
  func.func @transform_4(%arg0: i32) -> i32 {
    %c0_i32 = arith.constant 0 : i32
    %c0_i32_0 = arith.constant 0 : i32
    return %c0_i32 : i32
  }
  func.func @transform_5(%arg0: i32) -> (i32, i32, i32) {
    %c0_i32 = arith.constant 0 : i32
    %c0_i32_0 = arith.constant 0 : i32
    %c0_i32_1 = arith.constant 0 : i32
    %c0_i32_2 = arith.constant 0 : i32
    return %c0_i32, %c0_i32_0, %c0_i32_1 : i32, i32, i32
  }
  func.func @transform_6(%arg0: i32) -> (i32, i32) {
    %c0_i32 = arith.constant 0 : i32
    %c0_i32_0 = arith.constant 0 : i32
    %c0_i32_1 = arith.constant 0 : i32
    return %c0_i32, %c0_i32_0 : i32, i32
  }
  func.func @transform_7(%arg0: i32) -> (i32, i32) {
    %c0_i32 = arith.constant 0 : i32
    %c0_i32_0 = arith.constant 0 : i32
    %c0_i32_1 = arith.constant 0 : i32
    return %c0_i32, %c0_i32_0 : i32, i32
  }
  func.func @transform_8(%arg0: i32) -> (i32, i32) {
    %c0_i32 = arith.constant 0 : i32
    %c0_i32_0 = arith.constant 0 : i32
    %c0_i32_1 = arith.constant 0 : i32
    return %c0_i32, %c0_i32_0 : i32, i32
  }
  func.func @transform_9(%arg0: i32) -> (i32, i32) {
    %c0_i32 = arith.constant 0 : i32
    %c0_i32_0 = arith.constant 0 : i32
    %c0_i32_1 = arith.constant 0 : i32
    return %c0_i32, %c0_i32_0 : i32, i32
  }
  func.func @transform_10(%arg0: i32) -> (i32, i32) {
    %c0_i32 = arith.constant 0 : i32
    %c0_i32_0 = arith.constant 0 : i32
    %c0_i32_1 = arith.constant 0 : i32
    return %c0_i32, %c0_i32_0 : i32, i32
  }
  func.func @transform_11(%arg0: i32) -> (i32, i32) {
    %c0_i32 = arith.constant 0 : i32
    %c0_i32_0 = arith.constant 0 : i32
    return %arg0, %c0_i32 : i32, i32
  }
}

</mosaic_0001>

<bundles_post_ra>
// kernel: encoder_cnn_forward.1
= control target key start
LH: loop header
LB: loop body
LE: loop exit
PB: predicated region body
PF: predicated region fallthrough
CT: control target
= control target key end

     0   :  { %s8898_s0 = inlined_call_operand.vmem [shape: f32[8,128], index: 0, kind: input, shape index: {}]   ;;  %s8899_s1 = inlined_call_operand.vmem [shape: f32[4,5], index: 1, kind: input, shape index: {}]   ;;  %s8900_s2 = inlined_call_operand.vmem [shape: f32[4], index: 2, kind: input, shape index: {}]   ;;  %s8901_s3 = inlined_call_operand.vmem [shape: f32[16,20], index: 3, kind: input, shape index: {}]   ;;  %s8902_s4 = inlined_call_operand.vmem [shape: f32[16], index: 4, kind: input, shape index: {}]   ;;  %s8903_s5 = inlined_call_operand.vmem [shape: f32[16,128,256], index: 5, kind: input, shape index: {}]   ;;  %s8904_s6 = inlined_call_operand.vmem [shape: f32[1,256], index: 6, kind: input, shape index: {}]   ;;  %s8905_s7 = inlined_call_operand.vmem [shape: f32[256,128], index: 7, kind: input, shape index: {}]   ;;  %s8906_s8 = inlined_call_operand.vmem [shape: f32[1,128], index: 8, kind: input, shape index: {}]   ;;  %s8907_s9 = inlined_call_operand.vmem [shape: f32[128,32], index: 9, kind: input, shape index: {}]   ;;  %s8908_s10 = inlined_call_operand.vmem [shape: f32[1,32], index: 10, kind: input, shape index: {}]   ;;  %s8909_s11 = inlined_call_operand.vmem [shape: f32[8,32], index: 11, kind: output, shape index: {}]  }
   0x1   :  { %9096 = sst [smem:[#allocation134_spill]] %s8903_s5 }
   0x2   :  { %9097 = sst [smem:[#allocation135_spill]] %s8904_s6 }
   0x3   :  { %9098 = sst [smem:[#allocation136_spill]] %s8905_s7 }
   0x4   :  { %9099 = sst [smem:[#allocation137_spill]] %s8906_s8 }
   0x5   :  { %9100 = sst [smem:[#allocation138_spill]] %s8907_s9 }
   0x6   :  { %9101 = sst [smem:[#allocation139_spill]] %s8908_s10 }
   0x7   :  { %9102 = sst [smem:[#allocation140_spill]] %s8909_s11 }
   0x8   :  { %16 = vsyncpa [#allocation3], 0 }
   0x9   :  { %17 = vsyncpa [#allocation5], 0  ;;  %s37_s19 = sshll.u32 %s8900_s2, 4  ;;  %s38_s19 = int_to_ptr.vmem [resolvable:$true] %s37_s19 }
   0xa   :  { %18 = vsyncpa [#allocation8], 0  ;;  %s27_s22 = sshll.u32 %s8899_s1, 4  ;;  %s4795_s23 = scalar_lea.vmem %s38_s19, 16  ;;  %s28_s22 = int_to_ptr.vmem [resolvable:$true] %s27_s22 }
   0xb   :  { %p4796_p0 = scmp.ne.s32.totalorder %s38_s19, %s4795_s23  ;;  %p4800_p1 = scmp.lt.s32.totalorder %s38_s19, %s38_s19 }
   0xc   :  { %p4801_p2 = scmp.lt.s32.totalorder %s4795_s23, %s4795_s23 }
   0xe   :  { %p4802_p3 = por %p4801_p2, %p4800_p1 }
  0x10   :  { %p4803_p4 = pnand %p4802_p3, %p4796_p0 }
  0x12   :  { %4806 = shalt.err (!%p4803_p4)
}
  0x13   :  { %s4849_s24 = smov [#allocation4]   ;;  %s4807_s25 = scalar_lea.vmem %s28_s22, 64 }
  0x14   :  { %40 = dma.vmem_to_smem %s38_s19, 16, %s4849_s24, [#allocation5]  }
  0x15   :  { %p4808_p5 = scmp.ne.s32.totalorder %s28_s22, %s4807_s25  ;;  %p4812_p6 = scmp.lt.s32.totalorder %s28_s22, %s28_s22 }
  0x16   :  { %p4813_p7 = scmp.lt.s32.totalorder %s4807_s25, %s4807_s25 }
  0x18   :  { %p4814_p8 = por %p4813_p7, %p4812_p6 }
  0x1a   :  { %p4815_p9 = pnand %p4814_p8, %p4808_p5 }
  0x1c   :  { %4818 = shalt.err (!%p4815_p9)
}
  0x1d   :  { %s4850_s2 = smov [#allocation2]   ;;  %s46_s27 = sshll.u32 %s8901_s3, 4  ;;  %s47_s27 = int_to_ptr.vmem [resolvable:$true] %s46_s27 }
  0x1e   :  { %30 = dma.vmem_to_smem %s28_s22, 64, %s4850_s2, [#allocation3]  }
  0x1f   :  { %s59_s30 = sshll.u32 %s8902_s4, 4  ;;  %s4819_s12 = scalar_lea.vmem %s47_s27, 256  ;;  %s60_s30 = int_to_ptr.vmem [resolvable:$true] %s59_s30 }
  0x20   :  { %p4820_p10 = scmp.ne.s32.totalorder %s47_s27, %s4819_s12  ;;  %p4824_p11 = scmp.lt.s32.totalorder %s47_s27, %s47_s27 }
  0x21   :  { %p4825_p12 = scmp.lt.s32.totalorder %s4819_s12, %s4819_s12 }
  0x23   :  { %p4826_p13 = por %p4825_p12, %p4824_p11 }
  0x25   :  { %p4827_p0 = pnand %p4826_p13, %p4820_p10 }
  0x27   :  { %4830 = shalt.err (!%p4827_p0)
}
  0x28   :  { %s4851_s13 = smov [#allocation6]   ;;  %s4852_s14 = smov 128  }
  0x29   :  { %s4853_s15 = smov 8   ;;  %s4831_s16 = scalar_lea.vmem %s60_s30, 16 }
  0x2a   :  { %52 = dma.vmem_to_smem %s47_s27, 256, %s4851_s13, [#allocation5], %s4852_s14, %s4852_s14, %s4853_s15  }
  0x2b   :  { %p4832_p1 = scmp.ne.s32.totalorder %s60_s30, %s4831_s16  ;;  %p4836_p2 = scmp.lt.s32.totalorder %s60_s30, %s60_s30 }
  0x2c   :  { %p4837_p3 = scmp.lt.s32.totalorder %s4831_s16, %s4831_s16 }
  0x2e   :  { %p4838_p4 = por %p4837_p3, %p4836_p2 }
  0x30   :  { %p4839_p5 = pnand %p4838_p4, %p4832_p1 }
  0x32   :  { %4842 = shalt.err (!%p4839_p5)
}
  0x33   :  { %s4854_s3 = smov [#allocation7]  }
  0x34   :  { %62 = dma.vmem_to_smem %s60_s30, 16, %s4854_s3, [#allocation8]  }
  0x35   :  { %4843 = dma.done.wait [#allocation3], 64  }
  0x36   :  { %4844 = vsyncadd [#allocation3], 4294967232 }
  0x37   :  { %4845 = dma.done.wait [#allocation5], 272  }
  0x38   :  { %4846 = vsyncadd [#allocation5], 4294967024 }
  0x39   :  { %4847 = dma.done.wait [#allocation8], 16  }
  0x3a   :  { %4848 = vsyncadd [#allocation8], 4294967280 }
  0x3b   :  { %87 = sfence }
  0x3c   :  { %v4937_v0 = vld [vmem:[%s8898_s0] sm:$0xff]  ;;  %s8914_s18 = smov 2   ;;  %s8910_s19 = smov 127   ;;  %vm93_vm0 = vcmask 15360   ;;  %vm98_vm1 = vcmask 7168   ;;  %vm103_vm2 = vcmask 1039360  }
  0x3d   :  { %90 = vrot.lane.b32.xlu0 %v4937_v0, %s8914_s18  ;;  %100 = vrot.lane.b32.xlu1 %v4937_v0, %s8910_s19  ;;  %s8916_s20 = smov 1   ;;  %s8912_s21 = smov 126   ;;  %vm108_vm3 = vcmask 1031168   ;;  %vm366_vm4 = vcmask 1022976   ;;  %vm4861_vm5 = vmmov 0   ;;  %vm3766_vm6 = vcmask 261120  }
  0x3e   :  { %s4947_s22 = sld [smem:[#allocation2]] }
  0x3f   :  { %s4949_s0 = sld [smem:[#allocation2 + $0x80]] }
  0x40   :  { %s4951_s23 = sld [smem:[#allocation2 + $0x100]] }
  0x41   :  { %95 = vrot.lane.b32.xlu0 %v4937_v0, %s8916_s20  ;;  %105 = vrot.lane.b32.xlu1 %v4937_v0, %s8912_s21  ;;  %s4953_s24 = sld [smem:[#allocation2 + $0x180]] }
  0x42   :  { %s4955_s25 = sld [smem:[#allocation2 + $0x1]] }
  0x43   :  { %s4957_s2 = sld [smem:[#allocation2 + $0x81]] }
  0x44   :  { %s4959_s1 = sld [smem:[#allocation2 + $0x101]]  ;;  %v111_v3 = vstv %s4947_s22 }
  0x45   :  { %s4961_s26 = sld [smem:[#allocation2 + $0x181]]  ;;  %v151_v7 = vstv %s4949_s0 }
  0x46   :  { %s4963_s27 = sld [smem:[#allocation2 + $0x2]]  ;;  %v191_v26 = vstv %s4951_s23 }
  0x47   :  { %s4965_s28 = sld [smem:[#allocation2 + $0x3]]  ;;  %v231_v46 = vstv %s4953_s24  ;;  %s9153_s24 = smov 1  }
  0x48   :  { %s4967_s29 = sld [smem:[#allocation2 + $0x82]]  ;;  %v114_v8 = vstv %s4955_s25 }
  0x49   :  { %s4969_s30 = sld [smem:[#allocation2 + $0x83]]  ;;  %v154_v9 = vstv %s4957_s2 }
  0x4a   :  { %s4971_s12 = sld [smem:[#allocation2 + $0x102]]  ;;  %v194_v21 = vstv %s4959_s1 }
  0x4b   :  { %s4973_s13 = sld [smem:[#allocation2 + $0x103]]  ;;  %v234_v44 = vstv %s4961_s26 }
  0x4c   :  { %s4975_s14 = sld [smem:[#allocation2 + $0x182]]  ;;  %v118_v5 = vstv %s4963_s27 }
  0x4d   :  { %s4977_s15 = sld [smem:[#allocation2 + $0x183]]  ;;  %v122_v11 = vstv %s4965_s28  ;;  %v119_v14 = vmul.f32 %v118_v5, %v4937_v0 }
  0x4e   :  { %s4979_s16 = sld [smem:[#allocation2 + $0x4]]  ;;  %v158_v6 = vstv %s4967_s29 }
  0x4f   :  { %s4981_s3 = sld [smem:[#allocation4]]  ;;  %v159_v15 = vmul.f32 %v158_v6, %v4937_v0  ;;  %v162_v27 = vstv %s4969_s30 }
  0x50   :  { %s4983_s4 = sld [smem:[#allocation2 + $0x84]]  ;;  %v198_v28 = vstv %s4971_s12 }
  0x51   :  { %s4985_s17 = sld [smem:[#allocation4 + $0x1]]  ;;  %v199_v38 = vmul.f32 %v198_v28, %v4937_v0  ;;  %v202_v47 = vstv %s4973_s13  ;;  %s9154_s13 = smov 2  }
  0x52   :  { %s4987_s19 = sld [smem:[#allocation2 + $0x104]]  ;;  %v238_v48 = vstv %s4975_s14 }
  0x53   :  { %9103 = sst [smem:[#allocation12_spill]] %s4977_s15  ;;  %v239_v57 = vmul.f32 %v238_v48, %v4937_v0 }
  0x54   :  { %s4989_s21 = sld [smem:[#allocation4 + $0x2]]  ;;  %v126_v22 = vstv %s4979_s16 }
  0x55   :  { %s4991_s18 = sld [smem:[#allocation2 + $0x184]]  ;;  %v130_v39 = vstv %s4981_s3 }
  0x56   :  { %s4993_s20 = sld [smem:[#allocation4 + $0x3]]  ;;  %v166_v34 = vstv %s4983_s4 }
  0x57   :  { %s4995_s11 = sld [smem:[#allocation6 + $0x2]]  ;;  %v170_v53 = vstv %s4985_s17 }
  0x58   :  { %s4997_s10 = sld [smem:[#allocation6 + $0x7]]  ;;  %v206_v54 = vstv %s4987_s19 }
  0x59   :  { %s4999_s8 = sld [smem:[#allocation6 + $0xc]] }
  0x5a   :  { %9104 = sst [smem:[#allocation13_spill]] %s4989_s21 }
  0x5b   :  { %9105 = sst [smem:[#allocation14_spill]] %s4991_s18 }
  0x5c   :  { %9106 = sst [smem:[#allocation15_spill]] %s4993_s20 }
  0x5d   :  { %9107 = sst [smem:[#allocation16_spill]] %s4995_s11 }
  0x5e   :  { %9108 = sst [smem:[#allocation17_spill]] %s4997_s10 }
  0x5f   :  { %9109 = sst [smem:[#allocation18_spill]] %s4999_s8 }
  0x60   :  { %s5001_s6 = sld [smem:[#allocation6 + $0x11]] }
  0x61   :  { %s5003_s9 = sld [smem:[#allocation6 + $0x82]] }
  0x62   :  { %s5005_s7 = sld [smem:[#allocation6 + $0x87]] }
  0x63   :  { %s5007_s5 = sld [smem:[#allocation6 + $0x8c]] }
  0x64   :  { %s5009_s15 = sld [smem:[#allocation6 + $0x91]] }
  0x65   :  { %s5011_s21 = sld [smem:[#allocation6 + $0x102]] }
  0x66   :  { %9110 = sst [smem:[#allocation19_spill]] %s5001_s6 }
  0x67   :  { %9111 = sst [smem:[#allocation20_spill]] %s5003_s9 }
  0x68   :  { %9112 = sst [smem:[#allocation21_spill]] %s5005_s7 }
  0x69   :  { %9113 = sst [smem:[#allocation22_spill]] %s5007_s5 }
  0x6a   :  { %s5013_s18 = sld [smem:[#allocation6 + $0x107]] }
  0x6b   :  { %9114 = sst [smem:[#allocation23_spill]] %s5011_s21 }
  0x6c   :  { %s5015_s20 = sld [smem:[#allocation6 + $0x10c]] }
  0x6d   :  { %s5017_s11 = sld [smem:[#allocation6 + $0x111]] }
  0x6e   :  { %s5019_s10 = sld [smem:[#allocation6 + $0x182]] }
  0x6f   :  { %s5021_s8 = sld [smem:[#allocation6 + $0x187]] }
  0x70   :  { %9115 = sst [smem:[#allocation24_spill]] %s5013_s18 }
  0x71   :  { %s5023_s6 = sld [smem:[#allocation6 + $0x18c]] }
  0x72   :  { %9116 = sst [smem:[#allocation25_spill]] %s5015_s20 }
  0x73   :  { %s5025_s9 = sld [smem:[#allocation6 + $0x191]] }
  0x74   :  { %9117 = sst [smem:[#allocation26_spill]] %s5019_s10 }
  0x75   :  { %9118 = sst [smem:[#allocation27_spill]] %s5021_s8 }
  0x76   :  { %s5027_s7 = sld [smem:[#allocation6 + $0x202]] }
  0x77   :  { %9119 = sst [smem:[#allocation28_spill]] %s5023_s6 }
  0x78   :  { %s5029_s5 = sld [smem:[#allocation6 + $0x207]] }
  0x79   :  { %9120 = sst [smem:[#allocation29_spill]] %s5025_s9  ;;  %v949_v28 = vstv %s5025_s9 }
  0x7a   :  { %s5031_s21 = sld [smem:[#allocation6 + $0x20c]] }
  0x7b   :  { %s5033_s18 = sld [smem:[#allocation6 + $0x211]] }
  0x7c   :  { %9121 = sst [smem:[#allocation30_spill]] %s5027_s7 }
  0x7d   :  { %s5035_s20 = sld [smem:[#allocation6 + $0x282]] }
  0x7e   :  { %9122 = sst [smem:[#allocation31_spill]] %s5029_s5 }
  0x7f   :  { %s5037_s10 = sld [smem:[#allocation6 + $0x287]] }
  0x80   :  { %9123 = sst [smem:[#allocation32_spill]] %s5031_s21 }
  0x81   :  { %9124 = sst [smem:[#allocation33_spill]] %s5033_s18 }
  0x82   :  { %s5039_s8 = sld [smem:[#allocation6 + $0x28c]] }
  0x83   :  { %9125 = sst [smem:[#allocation34_spill]] %s5035_s20 }
  0x84   :  { %s5041_s6 = sld [smem:[#allocation6 + $0x291]] }
  0x85   :  { %9126 = sst [smem:[#allocation35_spill]] %s5037_s10 }
  0x86   :  { %s5043_s7 = sld [smem:[#allocation6 + $0x302]] }
  0x87   :  { %s5045_s5 = sld [smem:[#allocation6 + $0x307]] }
  0x88   :  { %9127 = sst [smem:[#allocation36_spill]] %s5039_s8 }
  0x89   :  { %s5047_s21 = sld [smem:[#allocation6 + $0x30c]] }
  0x8a   :  { %9128 = sst [smem:[#allocation37_spill]] %s5041_s6 }
  0x8b   :  { %s5049_s20 = sld [smem:[#allocation6 + $0x311]] }
  0x8c   :  { %9129 = sst [smem:[#allocation38_spill]] %s5043_s7 }
  0x8d   :  { %9130 = sst [smem:[#allocation39_spill]] %s5045_s5 }
  0x8e   :  { %s5051_s10 = sld [smem:[#allocation6 + $0x382]] }
  0x8f   :  { %9131 = sst [smem:[#allocation40_spill]] %s5047_s21 }
  0x90   :  { %s5059_s7 = sld [smem:[#allocation6 + $0x387]] }
  0x91   :  { %9132 = sst [smem:[#allocation41_spill]] %s5049_s20 }
  0x92   :  { %s5064_s21 = sld [smem:[#allocation6 + $0x38c]] }
  0x93   :  { %s5073_s22 = sld [smem:[#allocation6 + $0x402]] }
  0x94   :  { %9133 = sst [smem:[#allocation42_spill]] %s5051_s10 }
  0x95   :  { %s5067_s10 = sld [smem:[#allocation6 + $0x391]] }
  0x96   :  { %9134 = sst [smem:[#allocation43_spill]] %s5059_s7 }
  0x97   :  { %s5079_s0 = sld [smem:[#allocation6 + $0x407]] }
  0x98   :  { %9135 = sst [smem:[#allocation44_spill]] %s5064_s21 }
  0x99   :  { %s5086_s25 = sld [smem:[#allocation6 + $0x40c]] }
  0x9a   :  { %s5088_s2 = sld [smem:[#allocation6 + $0x411]] }
  0x9b   :  { %9136 = sst [smem:[#allocation45_spill]] %s5067_s10 }
  0x9c   :  { %s5094_s27 = sld [smem:[#allocation6 + $0x482]] }
  0x9d   :  { %9137 = sst [smem:[#allocation46_spill]] %s5079_s0 }
  0x9e   :  { %s5097_s1 = sld [smem:[#allocation6 + $0x487]] }
  0x9f   :  { %9138 = sst [smem:[#allocation47_spill]] %s5086_s25 }
  0xa0   :  { %9139 = sst [smem:[#allocation48_spill]] %s5088_s2 }
  0xa1   :  { %s5100_s28 = sld [smem:[#allocation6 + $0x48c]] }
  0xa2   :  { %9140 = sst [smem:[#allocation49_spill]] %s5094_s27 }
  0xa3   :  { %s5104_s23 = sld [smem:[#allocation6 + $0x491]] }
  0xa4   :  { %9141 = sst [smem:[#allocation50_spill]] %s5097_s1 }
  0xa5   :  { %s5108_s29 = sld [smem:[#allocation6 + $0x502]] }
  0xa6   :  { %s5111_s30 = sld [smem:[#allocation6 + $0x507]] }
  0xa7   :  { %9142 = sst [smem:[#allocation51_spill]] %s5100_s28 }
  0xa8   :  { %s5114_s12 = sld [smem:[#allocation6 + $0x50c]] }
  0xa9   :  { %9143 = sst [smem:[#allocation52_spill]] %s5104_s23 }
  0xaa   :  { %s5116_s16 = sld [smem:[#allocation6 + $0x511]] }
  0xab   :  { %9144 = sst [smem:[#allocation53_spill]] %s5108_s29 }
  0xac   :  { %9145 = sst [smem:[#allocation54_spill]] %s5111_s30  ;;  %s9162_s30 = smov 127  }
  0xad   :  { %s5121_s3 = sld [smem:[#allocation6]] }
  0xae   :  { %9146 = sst [smem:[#allocation55_spill]] %s5114_s12  ;;  %s9161_s12 = smov 126  }
  0xaf   :  { %v91_v1 = vpop.permute.xlu0 %90  ;;  %v101_v2 = vpop.permute.xlu1 %100  ;;  %s5125_s4 = sld [smem:[#allocation6 + $0x1]] }
  0xb0   :  { %v5055_v4 = vsel %vm93_vm0, 0.0, %v91_v1  ;;  %v5077_v20 = vsel %vm103_vm2, %v101_v2, 0.0  ;;  %9147 = sst [smem:[#allocation56_spill]] %s5116_s16 }
  0xb1   :  { %v112_v12 = vmul.f32 %v111_v3, %v5055_v4  ;;  %v152_v17 = vmul.f32 %v151_v7, %v5055_v4  ;;  %v123_v29 = vmul.f32 %v122_v11, %v5077_v20  ;;  %v192_v35 = vmul.f32 %v191_v26, %v5055_v4  ;;  %s5129_s26 = sld [smem:[#allocation6 + $0x80]] }
  0xb2   :  { %v163_v37 = vmul.f32 %v162_v27, %v5077_v20  ;;  %v232_v55 = vmul.f32 %v231_v46, %v5055_v4  ;;  %s9152_s16 = sld [smem:[#allocation12_spill]]  ;;  %v203_v56 = vmul.f32 %v202_v47, %v5077_v20 }
  0xb3   :  { %v96_v10 = vpop.permute.xlu0 %95  ;;  %v106_v16 = vpop.permute.xlu1 %105  ;;  %9148 = sst [smem:[#allocation57_spill]] %s5121_s3 }
  0xb4   :  { %v99_v13 = vsel %vm98_vm1, 0.0, %v96_v10  ;;  %v5084_v23 = vsel %vm108_vm3, %v106_v16, 0.0  ;;  %s5137_s14 = sld [smem:[#allocation6 + $0x81]] }
  0xb5   :  { %v115_v18 = vmul.f32 %v114_v8, %v99_v13  ;;  %v155_v19 = vmul.f32 %v154_v9, %v99_v13  ;;  %v195_v30 = vmul.f32 %v194_v21, %v99_v13  ;;  %v127_v33 = vmul.f32 %v126_v22, %v5084_v23  ;;  %9150 = sst [smem:[#allocation59_spill]] %s5125_s4 }
  0xb6   :  { %v167_v43 = vmul.f32 %v166_v34, %v5084_v23  ;;  %v235_v49 = vmul.f32 %v234_v44, %v99_v13  ;;  %s5140_s4 = sld [smem:[#allocation6 + $0x3]]  ;;  %v207_v61 = vmul.f32 %v206_v54, %v5084_v23  ;;  %v1769_v44 = vstv %s5067_s10 }
  0xb7   :  { %v116_v24 = vadd.f32 %v115_v18, %v112_v12  ;;  %v156_v25 = vadd.f32 %v155_v19, %v152_v17  ;;  %v196_v40 = vadd.f32 %v195_v30, %v192_v35  ;;  %9151 = sst [smem:[#allocation60_spill]] %s5129_s26  ;;  %v1339_v35 = vstv %s5039_s8 }
  0xb8   :  { %s9157_s19 = sld [smem:[#allocation13_spill]]  ;;  %v236_v58 = vadd.f32 %v235_v49, %v232_v55  ;;  %v242_v62 = vstv %s9152_s16 }
  0xb9   :  { %v120_v31 = vadd.f32 %v119_v14, %v116_v24  ;;  %v160_v32 = vadd.f32 %v159_v15, %v156_v25  ;;  %v200_v50 = vadd.f32 %v199_v38, %v196_v40  ;;  %s9158_s17 = sld [smem:[#allocation14_spill]]  ;;  %v243_v4 = vmul.f32 %v242_v62, %v5077_v20 }
  0xba   :  { %9155 = sst [smem:[#allocation12_spill]] %s5137_s14  ;;  %v240_v63 = vadd.f32 %v239_v57, %v236_v58  ;;  %v470_v20 = vstv %s5009_s15  ;;  %v744_v24 = vstv %s5017_s11  ;;  %v1524_v38 = vstv %s5045_s5 }
  0xbb   :  { %v124_v36 = vadd.f32 %v123_v29, %v120_v31  ;;  %v164_v41 = vadd.f32 %v163_v37, %v160_v32  ;;  %v204_v59 = vadd.f32 %v203_v56, %v200_v50  ;;  %s5143_s26 = sld [smem:[#allocation6 + $0x4]]  ;;  %v1154_v32 = vstv %s5033_s18 }
  0xbc   :  { %9156 = sst [smem:[#allocation61_spill]] %s5140_s4  ;;  %v244_v5 = vadd.f32 %v243_v4, %v240_v63  ;;  %v1564_v40 = vstv %s5049_s20 }
  0xbd   :  { %v128_v42 = vadd.f32 %v127_v33, %v124_v36  ;;  %v168_v52 = vadd.f32 %v167_v43, %v164_v41  ;;  %s5145_s3 = sld [smem:[#allocation6 + $0x83]]  ;;  %v208_v1 = vadd.f32 %v207_v61, %v204_v59  ;;  %v1359_v36 = vstv %s5041_s6 }
  0xbe   :  { %s5151_s14 = sld [smem:[#allocation6 + $0x84]]  ;;  %v210_v2 = vstv %s9157_s19  ;;  %v1749_v43 = vstv %s5064_s21 }
  0xbf   :  { %v131_v45 = vadd.f32 %v130_v39, %v128_v42  ;;  %v171_v60 = vadd.f32 %v170_v53, %v168_v52  ;;  %s5154_s4 = sld [smem:[#allocation6 + $0x5]]  ;;  %v246_v3 = vstv %s9158_s17  ;;  %v211_v6 = vadd.f32 %v210_v2, %v208_v1 }
  0xc0   :  { %s5158_s29 = sld [smem:[#allocation6 + $0x6]]  ;;  %v247_v7 = vmul.f32 %v246_v3, %v5084_v23  ;;  %v1729_v42 = vstv %s5059_s7 }
  0xc1   :  { %v5123_v51 = vmax.f32 %v131_v45, 0.0  ;;  %9159 = sst [smem:[#allocation13_spill]] %s5143_s26  ;;  %v5156_v0 = vmax.f32 %v171_v60, 0.0  ;;  %v5186_v8 = vmax.f32 %v211_v6, 0.0  ;;  %v1914_v45 = vstv %s5073_s22 }
  0xc2   :  { %s9168_s16 = sld [smem:[#allocation15_spill]]  ;;  %v248_v9 = vadd.f32 %v247_v7, %v244_v5 }
  0xc3   :  { %9149 = vst [vmem:[#allocation58_spill] sm:$0xff] %v5123_v51  ;;  %138 = vrot.lane.b32.xlu1 %v5123_v51, %s9153_s24  ;;  %134 = vrot.lane.b32.xlu0 %v5123_v51, %s9154_s13  ;;  %9160 = sst [smem:[#allocation14_spill]] %s5145_s3  ;;  %9165 = vst [vmem:[#allocation64_spill] sm:$0xff] %v5156_v0 }
  0xc4   :  { %9163 = sst [smem:[#allocation62_spill]] %s5151_s14 }
  0xc5   :  { %9164 = sst [smem:[#allocation63_spill]] %s5154_s4 }
  0xc6   :  { %9166 = sst [smem:[#allocation65_spill]] %s5158_s29 }
  0xc7   :  { %146 = vrot.lane.b32.xlu1 %v5123_v51, %s9161_s12  ;;  %142 = vrot.lane.b32.xlu0 %v5123_v51, %s9162_s30  ;;  %s5162_s3 = sld [smem:[#allocation6 + $0x85]] }
  0xc8   :  { %s5169_s14 = sld [smem:[#allocation6 + $0x86]]  ;;  %v250_v10 = vstv %s9168_s16 }
  0xc9   :  { %s5171_s4 = sld [smem:[#allocation6 + $0x8]]  ;;  %v251_v11 = vadd.f32 %v250_v10, %v248_v9 }
  0xca   :  { %s5174_s19 = sld [smem:[#allocation6 + $0x9]] }
  0xcb   :  { %178 = vrot.lane.b32.xlu1 %v5156_v0, %s9153_s24  ;;  %174 = vrot.lane.b32.xlu0 %v5156_v0, %s9154_s13  ;;  %s5176_s17 = sld [smem:[#allocation6 + $0x88]]  ;;  %v5213_v12 = vmax.f32 %v251_v11, 0.0 }
  0xcc   :  { %s5184_s29 = sld [smem:[#allocation6 + $0xa]] }
  0xcd   :  { %9167 = sst [smem:[#allocation66_spill]] %s5162_s3  ;;  %9183 = vst [vmem:[#allocation80_spill] sm:$0xff] %v5213_v12  ;;  %v5444_v9 = vmul.f32 %v470_v20, %v5213_v12  ;;  %v5467_v20 = vmul.f32 %v744_v24, %v5213_v12  ;;  %v5490_v24 = vmul.f32 %v949_v28, %v5213_v12 }
  0xce   :  { %9169 = sst [smem:[#allocation15_spill]] %s5169_s14 }
  0xcf   :  { %9170 = sst [smem:[#allocation67_spill]] %s5171_s4  ;;  %186 = vrot.lane.b32.xlu1 %v5156_v0, %s9161_s12  ;;  %182 = vrot.lane.b32.xlu0 %v5156_v0, %s9162_s30 }
  0xd0   :  { %9171 = sst [smem:[#allocation68_spill]] %s5174_s19 }
  0xd1   :  { %9172 = sst [smem:[#allocation69_spill]] %s5176_s17 }
  0xd2   :  { %s5182_s3 = sld [smem:[#allocation6 + $0x89]] }
  0xd3   :  { %9174 = sst [smem:[#allocation71_spill]] %s5184_s29  ;;  %218 = vrot.lane.b32.xlu1 %v5186_v8, %s9153_s24  ;;  %214 = vrot.lane.b32.xlu0 %v5186_v8, %s9154_s13 }
  0xd4   :  { %s5188_s14 = sld [smem:[#allocation6 + $0xb]] }
  0xd5   :  { %s5191_s4 = sld [smem:[#allocation6 + $0x8a]] }
  0xd6   :  { %s5197_s17 = sld [smem:[#allocation6 + $0x8b]] }
  0xd7   :  { %s5199_s19 = sld [smem:[#allocation6 + $0xd]]  ;;  %226 = vrot.lane.b32.xlu1 %v5186_v8, %s9161_s12  ;;  %222 = vrot.lane.b32.xlu0 %v5186_v8, %s9162_s30 }
  0xd8   :  { %9173 = sst [smem:[#allocation70_spill]] %s5182_s3 }
  0xd9   :  { %s5201_s29 = sld [smem:[#allocation6 + $0xe]] }
  0xda   :  { %9175 = sst [smem:[#allocation72_spill]] %s5188_s14 }
  0xdb   :  { %9176 = sst [smem:[#allocation73_spill]] %s5191_s4  ;;  %258 = vrot.lane.b32.xlu1 %v5213_v12, %s9153_s24  ;;  %254 = vrot.lane.b32.xlu0 %v5213_v12, %s9154_s13 }
  0xdc   :  { %9177 = sst [smem:[#allocation74_spill]] %s5197_s17 }
  0xdd   :  { %9178 = sst [smem:[#allocation75_spill]] %s5199_s19 }
  0xde   :  { %s5203_s3 = sld [smem:[#allocation6 + $0x8d]] }
  0xdf   :  { %9179 = sst [smem:[#allocation76_spill]] %s5201_s29  ;;  %266 = vrot.lane.b32.xlu1 %v5213_v12, %s9161_s12  ;;  %262 = vrot.lane.b32.xlu0 %v5213_v12, %s9162_s30 }
  0xe0   :  { %s5209_s16 = sld [smem:[#allocation6 + $0x8e]] }
  0xe1   :  { %s5211_s4 = sld [smem:[#allocation6 + $0xf]] }
  0xe2   :  { %s5215_s17 = sld [smem:[#allocation6 + $0x10]] }
  0xe3   :  { %s5217_s19 = sld [smem:[#allocation6 + $0x8f]] }
  0xe4   :  { %9180 = sst [smem:[#allocation77_spill]] %s5203_s3 }
  0xe5   :  { %s5223_s3 = sld [smem:[#allocation6 + $0x90]] }
  0xe6   :  { %9181 = sst [smem:[#allocation78_spill]] %s5209_s16 }
  0xe7   :  { %9182 = sst [smem:[#allocation79_spill]] %s5211_s4 }
  0xe8   :  { %9184 = sst [smem:[#allocation81_spill]] %s5215_s17 }
  0xe9   :  { %9185 = sst [smem:[#allocation82_spill]] %s5217_s19 }
  0xea   :  { %s5225_s29 = sld [smem:[#allocation6 + $0x100]] }
  0xeb   :  { %9186 = sst [smem:[#allocation83_spill]] %s5223_s3 }
  0xec   :  { %s5227_s14 = sld [smem:[#allocation6 + $0x12]] }
  0xed   :  { %s5229_s16 = sld [smem:[#allocation6 + $0x13]] }
  0xee   :  { %s5235_s19 = sld [smem:[#allocation6 + $0x92]] }
  0xef   :  { %s5237_s24 = sld [smem:[#allocation6 + $0x93]] }
  0xf0   :  { %9187 = sst [smem:[#allocation84_spill]] %s5225_s29 }
  0xf1   :  { %s5239_s17 = sld [smem:[#allocation6 + $0x101]] }
  0xf2   :  { %9188 = sst [smem:[#allocation85_spill]] %s5227_s14 }
  0xf3   :  { %9189 = sst [smem:[#allocation86_spill]] %s5229_s16 }
  0xf4   :  { %9190 = sst [smem:[#allocation87_spill]] %s5235_s19 }
  0xf5   :  { %9191 = sst [smem:[#allocation88_spill]] %s5237_s24 }
  0xf6   :  { %s5241_s13 = sld [smem:[#allocation6 + $0x103]] }
  0xf7   :  { %9192 = sst [smem:[#allocation89_spill]] %s5239_s17 }
  0xf8   :  { %s5243_s3 = sld [smem:[#allocation6 + $0x104]] }
  0xf9   :  { %s5245_s29 = sld [smem:[#allocation6 + $0x105]] }
  0xfa   :  { %s5247_s14 = sld [smem:[#allocation6 + $0x106]] }
  0xfb   :  { %s5249_s16 = sld [smem:[#allocation6 + $0x108]] }
  0xfc   :  { %9193 = sst [smem:[#allocation90_spill]] %s5241_s13 }
  0xfd   :  { %s5251_s12 = sld [smem:[#allocation6 + $0x109]] }
  0xfe   :  { %9194 = sst [smem:[#allocation91_spill]] %s5243_s3 }
  0xff   :  { %9195 = sst [smem:[#allocation92_spill]] %s5245_s29 }
 0x100   :  { %9196 = sst [smem:[#allocation93_spill]] %s5247_s14 }
 0x101   :  { %9197 = sst [smem:[#allocation94_spill]] %s5249_s16 }
 0x102   :  { %s5253_s4 = sld [smem:[#allocation6 + $0x10a]] }
 0x103   :  { %9198 = sst [smem:[#allocation95_spill]] %s5251_s12 }
 0x104   :  { %s5255_s30 = sld [smem:[#allocation7]] }
 0x105   :  { %s5257_s19 = sld [smem:[#allocation7 + $0x1]] }
 0x106   :  { %s5259_s24 = sld [smem:[#allocation6 + $0x10b]] }
 0x107   :  { %s5261_s17 = sld [smem:[#allocation6 + $0x10d]] }
 0x108   :  { %9199 = sst [smem:[#allocation96_spill]] %s5253_s4 }
 0x109   :  { %s5263_s13 = sld [smem:[#allocation6 + $0x10e]] }
 0x10a   :  { %9200 = sst [smem:[#allocation97_spill]] %s5255_s30 }
 0x10b   :  { %9201 = sst [smem:[#allocation98_spill]] %s5257_s19 }
 0x10c   :  { %9202 = sst [smem:[#allocation99_spill]] %s5259_s24 }
 0x10d   :  { %9203 = sst [smem:[#allocation100_spill]] %s5261_s17 }
 0x10e   :  { %s5265_s3 = sld [smem:[#allocation6 + $0x10f]] }
 0x10f   :  { %9204 = sst [smem:[#allocation101_spill]] %s5263_s13 }
 0x110   :  { %s5267_s29 = sld [smem:[#allocation6 + $0x110]] }
 0x111   :  { %s5269_s14 = sld [smem:[#allocation6 + $0x112]] }
 0x112   :  { %s5271_s16 = sld [smem:[#allocation6 + $0x113]] }
 0x113   :  { %s5273_s12 = sld [smem:[#allocation7 + $0x2]] }
 0x114   :  { %9205 = sst [smem:[#allocation102_spill]] %s5265_s3 }
 0x115   :  { %s5275_s4 = sld [smem:[#allocation6 + $0x180]] }
 0x116   :  { %9206 = sst [smem:[#allocation103_spill]] %s5267_s29 }
 0x117   :  { %9207 = sst [smem:[#allocation104_spill]] %s5269_s14 }
 0x118   :  { %9208 = sst [smem:[#allocation105_spill]] %s5271_s16 }
 0x119   :  { %9209 = sst [smem:[#allocation106_spill]] %s5273_s12 }
 0x11a   :  { %s5277_s30 = sld [smem:[#allocation6 + $0x181]] }
 0x11b   :  { %9210 = sst [smem:[#allocation107_spill]] %s5275_s4 }
 0x11c   :  { %s5279_s19 = sld [smem:[#allocation6 + $0x183]] }
 0x11d   :  { %s9213_s24 = sld [smem:[#allocation16_spill]] }
 0x11e   :  { %s5281_s17 = sld [smem:[#allocation6 + $0x184]] }
 0x11f   :  { %s9215_s13 = sld [smem:[#allocation17_spill]] }
 0x120   :  { %9211 = sst [smem:[#allocation108_spill]] %s5277_s30 }
 0x121   :  { %s5283_s26 = sld [smem:[#allocation6 + $0x185]] }
 0x122   :  { %9212 = sst [smem:[#allocation109_spill]] %s5279_s19 }
 0x123   :  { %s9217_s3 = sld [smem:[#allocation18_spill]]  ;;  %v278_v13 = vstv %s9213_s24 }
 0x124   :  { %9214 = sst [smem:[#allocation16_spill]] %s5281_s17  ;;  %v5397_v6 = vmul.f32 %v278_v13, %v5123_v51 }
 0x125   :  { %s5285_s29 = sld [smem:[#allocation6 + $0x186]]  ;;  %v298_v14 = vstv %s9215_s13 }
 0x126   :  { %s5287_s14 = sld [smem:[#allocation6 + $0x188]]  ;;  %v5402_v7 = vmul.f32 %v298_v14, %v5156_v0 }
 0x127   :  { %9216 = sst [smem:[#allocation110_spill]] %s5283_s26 }
 0x128   :  { %s9220_s16 = sld [smem:[#allocation19_spill]] }
 0x129   :  { %s5289_s23 = sld [smem:[#allocation6 + $0x189]]  ;;  %v318_v15 = vstv %s9217_s3 }
 0x12a   :  { %s9222_s12 = sld [smem:[#allocation20_spill]]  ;;  %v5412_v60 = vmul.f32 %v318_v15, %v5186_v8 }
 0x12b   :  { %9218 = sst [smem:[#allocation111_spill]] %s5285_s29 }
 0x12c   :  { %9219 = sst [smem:[#allocation112_spill]] %s5287_s14 }
 0x12d   :  { %s5291_s4 = sld [smem:[#allocation6 + $0x18a]] }
 0x12e   :  { %s9224_s30 = sld [smem:[#allocation21_spill]]  ;;  %v338_v16 = vstv %s9220_s16 }
 0x12f   :  { %9221 = sst [smem:[#allocation19_spill]] %s5289_s23  ;;  %v5417_v13 = vmul.f32 %v338_v16, %v5213_v12 }
 0x130   :  { %s5293_s28 = sld [smem:[#allocation6 + $0x18b]]  ;;  %v410_v17 = vstv %s9222_s12 }
 0x131   :  { %s9226_s19 = sld [smem:[#allocation22_spill]]  ;;  %v5422_v14 = vmul.f32 %v410_v17, %v5123_v51 }
 0x132   :  { %s5295_s1 = sld [smem:[#allocation6 + $0x18d]] }
 0x133   :  { %9223 = sst [smem:[#allocation20_spill]] %s5291_s4 }
 0x134   :  { %s5297_s17 = sld [smem:[#allocation6 + $0x18e]]  ;;  %v430_v18 = vstv %s9224_s30 }
 0x135   :  { %s5299_s26 = sld [smem:[#allocation6 + $0x18f]]  ;;  %v5429_v56 = vmul.f32 %v430_v18, %v5156_v0  ;;  %v139_v1 = vpop.permute.xlu1 %138  ;;  %v135_v4 = vpop.permute.xlu0 %134 }
 0x136   :  { %9225 = sst [smem:[#allocation113_spill]] %s5293_s28  ;;  %v5763_v2 = vsel %vm98_vm1, 0.0, %v139_v1  ;;  %v5766_v5 = vsel %vm93_vm0, 0.0, %v135_v4 }
 0x137   :  { %s9230_s29 = sld [smem:[#allocation23_spill]]  ;;  %v450_v19 = vstv %s9226_s19 }
 0x138   :  { %9227 = sst [smem:[#allocation114_spill]] %s5295_s1  ;;  %v5436_v16 = vmul.f32 %v450_v19, %v5186_v8 }
 0x139   :  { %s5301_s27 = sld [smem:[#allocation6 + $0x190]] }
 0x13a   :  { %9228 = sst [smem:[#allocation115_spill]] %s5297_s17 }
 0x13b   :  { %9229 = sst [smem:[#allocation116_spill]] %s5299_s26 }
 0x13c   :  { %s9232_s14 = sld [smem:[#allocation24_spill]] }
 0x13d   :  { %s5303_s2 = sld [smem:[#allocation6 + $0x192]]  ;;  %v684_v21 = vstv %s9230_s29 }
 0x13e   :  { %s9234_s23 = sld [smem:[#allocation25_spill]]  ;;  %v5449_v18 = vmul.f32 %v684_v21, %v5123_v51 }
 0x13f   :  { %9231 = sst [smem:[#allocation23_spill]] %s5301_s27 }
 0x140   :  { %s5305_s25 = sld [smem:[#allocation6 + $0x193]] }
 0x141   :  { %s5307_s4 = sld [smem:[#allocation7 + $0x3]] }
 0x142   :  { %s5309_s28 = sld [smem:[#allocation6 + $0x200]]  ;;  %v704_v22 = vstv %s9232_s14 }
 0x143   :  { %9233 = sst [smem:[#allocation117_spill]] %s5303_s2  ;;  %v5454_v11 = vmul.f32 %v704_v22, %v5156_v0 }
 0x144   :  { %s9238_s1 = sld [smem:[#allocation26_spill]]  ;;  %v724_v23 = vstv %s9234_s23 }
 0x145   :  { %s9239_s17 = sld [smem:[#allocation27_spill]]  ;;  %v5462_v17 = vmul.f32 %v724_v23, %v5186_v8 }
 0x146   :  { %9235 = sst [smem:[#allocation25_spill]] %s5305_s25 }
 0x147   :  { %9236 = sst [smem:[#allocation118_spill]] %s5307_s4 }
 0x148   :  { %9237 = sst [smem:[#allocation119_spill]] %s5309_s28 }
 0x149   :  { %s9240_s0 = sld [smem:[#allocation28_spill]] }
 0x14a   :  { %s5314_s26 = sld [smem:[#allocation6 + $0x201]]  ;;  %v889_v25 = vstv %s9238_s1 }
 0x14b   :  { %s9242_s27 = sld [smem:[#allocation30_spill]]  ;;  %v909_v26 = vstv %s9239_s17  ;;  %v5472_v21 = vmul.f32 %v889_v25, %v5123_v51  ;;  %v5516_v25 = vmul.f32 %v1154_v32, %v5213_v12  ;;  %v5536_v32 = vmul.f32 %v1339_v35, %v5186_v8 }
 0x14c   :  { %s9243_s2 = sld [smem:[#allocation31_spill]]  ;;  %v5480_v19 = vmul.f32 %v909_v26, %v5156_v0 }
 0x14d   :  { %s9244_s25 = sld [smem:[#allocation32_spill]] }
 0x14e   :  { %s5320_s4 = sld [smem:[#allocation6 + $0x203]] }
 0x14f   :  { %s9246_s28 = sld [smem:[#allocation34_spill]]  ;;  %v929_v27 = vstv %s9240_s0 }
 0x150   :  { %9241 = sst [smem:[#allocation120_spill]] %s5314_s26  ;;  %v5485_v23 = vmul.f32 %v929_v27, %v5186_v8 }
 0x151   :  { %s9247_s13 = sld [smem:[#allocation35_spill]]  ;;  %v1094_v29 = vstv %s9242_s27 }
 0x152   :  { %s5326_s3 = sld [smem:[#allocation6 + $0x204]]  ;;  %v1114_v30 = vstv %s9243_s2  ;;  %v5498_v22 = vmul.f32 %v1094_v29, %v5123_v51 }
 0x153   :  { %s9249_s26 = sld [smem:[#allocation38_spill]]  ;;  %v1134_v31 = vstv %s9244_s25  ;;  %v5503_v26 = vmul.f32 %v1114_v30, %v5156_v0 }
 0x154   :  { %9245 = sst [smem:[#allocation121_spill]] %s5320_s4  ;;  %v5508_v27 = vmul.f32 %v1134_v31, %v5186_v8  ;;  %v5554_v31 = vmul.f32 %v1524_v38, %v5156_v0  ;;  %v5577_v38 = vmul.f32 %v1729_v42, %v5156_v0 }
 0x155   :  { %s9250_s19 = sld [smem:[#allocation40_spill]]  ;;  %v1299_v33 = vstv %s9246_s28 }
 0x156   :  { %s5332_s30 = sld [smem:[#allocation6 + $0x205]]  ;;  %v5521_v29 = vmul.f32 %v1299_v33, %v5123_v51  ;;  %v5541_v33 = vmul.f32 %v1359_v36, %v5213_v12  ;;  %v5564_v36 = vmul.f32 %v1564_v40, %v5213_v12 }
 0x157   :  { %s9252_s4 = sld [smem:[#allocation42_spill]]  ;;  %v1319_v34 = vstv %s9247_s13 }
 0x158   :  { %9248 = sst [smem:[#allocation122_spill]] %s5326_s3  ;;  %v5528_v30 = vmul.f32 %v1319_v34, %v5156_v0 }
 0x159   :  { %s5336_s14 = sld [smem:[#allocation6 + $0x206]]  ;;  %v1504_v37 = vstv %s9249_s26 }
 0x15a   :  { %s5340_s3 = sld [smem:[#allocation6 + $0x208]]  ;;  %v5546_v28 = vmul.f32 %v1504_v37, %v5123_v51  ;;  %v5590_v37 = vmul.f32 %v1769_v44, %v5213_v12 }
 0x15b   :  { %s9255_s0 = sld [smem:[#allocation46_spill]]  ;;  %v1544_v39 = vstv %s9250_s19 }
 0x15c   :  { %9251 = sst [smem:[#allocation123_spill]] %s5332_s30  ;;  %v5559_v35 = vmul.f32 %v1544_v39, %v5186_v8  ;;  %v5582_v39 = vmul.f32 %v1749_v43, %v5186_v8 }
 0x15d   :  { %s9256_s17 = sld [smem:[#allocation47_spill]]  ;;  %v1709_v41 = vstv %s9252_s4 }
 0x15e   :  { %s5346_s30 = sld [smem:[#allocation6 + $0x209]]  ;;  %v5572_v34 = vmul.f32 %v1709_v41, %v5123_v51  ;;  %v5595_v41 = vmul.f32 %v1914_v45, %v5123_v51 }
 0x15f   :  { %9253 = sst [smem:[#allocation124_spill]] %s5336_s14 }
 0x160   :  { %9254 = sst [smem:[#allocation125_spill]] %s5340_s3 }
 0x161   :  { %s9258_s27 = sld [smem:[#allocation48_spill]]  ;;  %v1934_v46 = vstv %s9255_s0 }
 0x162   :  { %s9259_s9 = sld [smem:[#allocation49_spill]]  ;;  %v5600_v42 = vmul.f32 %v1934_v46, %v5156_v0 }
 0x163   :  { %s9260_s14 = sld [smem:[#allocation50_spill]]  ;;  %v1954_v47 = vstv %s9256_s17 }
 0x164   :  { %9257 = sst [smem:[#allocation126_spill]] %s5346_s30  ;;  %v5608_v44 = vmul.f32 %v1954_v47, %v5186_v8 }
 0x165   :  { %s9261_s2 = sld [smem:[#allocation51_spill]] }
 0x166   :  { %s5352_s25 = sld [smem:[#allocation6 + $0x20a]] }
 0x167   :  { %s9263_s3 = sld [smem:[#allocation52_spill]]  ;;  %v1974_v48 = vstv %s9258_s27 }
 0x168   :  { %s9264_s18 = sld [smem:[#allocation53_spill]]  ;;  %v2119_v49 = vstv %s9259_s9  ;;  %v5613_v45 = vmul.f32 %v1974_v48, %v5213_v12 }
 0x169   :  { %s9265_s28 = sld [smem:[#allocation54_spill]]  ;;  %v2139_v50 = vstv %s9260_s14  ;;  %v5618_v40 = vmul.f32 %v2119_v49, %v5123_v51 }
 0x16a   :  { %s9267_s8 = sld [smem:[#allocation57_spill]]  ;;  %9347 = vst [vmem:[#allocation128_spill] sm:$0xff] %v5613_v45  ;;  %v5626_v43 = vmul.f32 %v2139_v50, %v5156_v0 }
 0x16b   :  { %s5358_s30 = sld [smem:[#allocation6 + $0x20b]]  ;;  %v2159_v52 = vstv %s9261_s2 }
 0x16c   :  { %9262 = sst [smem:[#allocation50_spill]] %s5352_s25  ;;  %9352 = vst [vmem:[#allocation129_spill] sm:$0xff] %v5626_v43  ;;  %v5631_v47 = vmul.f32 %v2159_v52, %v5186_v8 }
 0x16d   :  { %s9269_s6 = sld [smem:[#allocation59_spill]]  ;;  %v2179_v53 = vstv %s9263_s3 }
 0x16e   :  { %s5364_s25 = sld [smem:[#allocation6 + $0x20d]]  ;;  %v2324_v54 = vstv %s9264_s18  ;;  %9354 = vst [vmem:[#allocation130_spill] sm:$0xff] %v5631_v47  ;;  %v5636_v48 = vmul.f32 %v2179_v53, %v5213_v12 }
 0x16f   :  { %s9274_s20 = sld [smem:[#allocation60_spill]]  ;;  %v2344_v55 = vstv %s9265_s28  ;;  %v5645_v50 = vmul.f32 %v2324_v54, %v5123_v51 }
 0x170   :  { %s9275_s4 = sld [smem:[#allocation12_spill]]  ;;  %v271_v57 = vstv %s9267_s8  ;;  %9355 = vst [vmem:[#allocation131_spill] sm:$0xff] %v5636_v48  ;;  %v5650_v52 = vmul.f32 %v2344_v55, %v5156_v0 }
 0x171   :  { %9268 = sst [smem:[#allocation52_spill]] %s5358_s30  ;;  %9361 = vst [vmem:[#allocation132_spill] sm:$0xff] %v5645_v50  ;;  %v272_v54 = vmul.f32 %v271_v57, %v5766_v5 }
 0x172   :  { %s5370_s1 = sld [smem:[#allocation6 + $0x20e]]  ;;  %9362 = vst [vmem:[#allocation133_spill] sm:$0xff] %v5650_v52 }
 0x173   :  { %v274_v58 = vstv %s9269_s6  ;;  %s5379_s17 = sld [smem:[#allocation6 + $0x20f]] }
 0x174   :  { %9273 = sst [smem:[#allocation53_spill]] %s5364_s25  ;;  %v275_v55 = vmul.f32 %v274_v58, %v5763_v2 }
 0x175   :  { %v403_v62 = vstv %s9274_s20  ;;  %s5386_s28 = sld [smem:[#allocation6 + $0x210]] }
 0x176   :  { %v406_v63 = vstv %s9275_s4  ;;  %s5406_s30 = sld [smem:[#allocation6 + $0x213]]  ;;  %v404_v61 = vmul.f32 %v403_v62, %v5766_v5  ;;  %v147_v62 = vpop.permute.xlu1 %146  ;;  %v276_v49 = vadd.f32 %v275_v55, %v272_v54 }
 0x177   :  { %s5424_s24 = sld [smem:[#allocation7 + $0x4]]  ;;  %v407_v1 = vmul.f32 %v406_v63, %v5763_v2  ;;  %v143_v63 = vpop.permute.xlu0 %142 }
 0x178   :  { %9278 = sst [smem:[#allocation127_spill]] %s5370_s1  ;;  %v280_v48 = vadd.f32 %v5397_v6, %v276_v49 }
 0x179   :  { %9285 = sst [smem:[#allocation17_spill]] %s5379_s17  ;;  %v408_v59 = vadd.f32 %v407_v1, %v404_v61 }
 0x17a   :  { %s5392_s17 = sld [smem:[#allocation6 + $0x212]] }
 0x17b   :  { %9288 = sst [smem:[#allocation18_spill]] %s5386_s28 }
 0x17c   :  { %9296 = sst [smem:[#allocation22_spill]] %s5406_s30 }
 0x17d   :  { %9299 = sst [smem:[#allocation24_spill]] %s5424_s24 }
 0x17e   :  { %s5438_s12 = sld [smem:[#allocation6 + $0x280]] }
 0x17f   :  { %s5456_s6 = sld [smem:[#allocation6 + $0x281]] }
 0x180   :  { %9293 = sst [smem:[#allocation21_spill]] %s5392_s17 }
 0x181   :  { %s5474_s5 = sld [smem:[#allocation6 + $0x283]] }
 0x182   :  { %s5492_s10 = sld [smem:[#allocation6 + $0x284]] }
 0x183   :  { %s5510_s2 = sld [smem:[#allocation6 + $0x285]] }
 0x184   :  { %s5523_s9 = sld [smem:[#allocation6 + $0x286]] }
 0x185   :  { %s5531_s8 = sld [smem:[#allocation6 + $0x288]] }
 0x186   :  { %s5549_s7 = sld [smem:[#allocation6 + $0x289]] }
 0x187   :  { %s5567_s19 = sld [smem:[#allocation6 + $0x28a]] }
 0x188   :  { %s9339_s16 = sld [smem:[#allocation84_spill]] }
 0x189   :  { %9320 = sst [smem:[#allocation26_spill]] %s5510_s2 }
 0x18a   :  { %9324 = sst [smem:[#allocation27_spill]] %s5523_s9 }
 0x18b   :  { %9327 = sst [smem:[#allocation28_spill]] %s5531_s8 }
 0x18c   :  { %9331 = sst [smem:[#allocation29_spill]] %s5549_s7 }
 0x18d   :  { %9336 = sst [smem:[#allocation30_spill]] %s5567_s19 }
 0x18e   :  { %s5585_s4 = sld [smem:[#allocation6 + $0x28b]]  ;;  %v677_v46 = vstv %s9339_s16 }
 0x18f   :  { %s5603_s20 = sld [smem:[#allocation6 + $0x28d]]  ;;  %v678_v4 = vmul.f32 %v677_v46, %v5766_v5 }
 0x190   :  { %s9348_s29 = sld [smem:[#allocation89_spill]] }
 0x191   :  { %s5656_s16 = sld [smem:[#allocation6 + $0x290]] }
 0x192   :  { %s5662_s0 = sld [smem:[#allocation6 + $0x292]] }
 0x193   :  { %s5668_s22 = sld [smem:[#allocation6 + $0x293]] }
 0x194   :  { %9340 = sst [smem:[#allocation31_spill]] %s5585_s4 }
 0x195   :  { %9344 = sst [smem:[#allocation32_spill]] %s5603_s20 }
 0x196   :  { %s5621_s4 = sld [smem:[#allocation6 + $0x28e]]  ;;  %v680_v3 = vstv %s9348_s29 }
 0x197   :  { %9367 = sst [smem:[#allocation35_spill]] %s5656_s16  ;;  %v681_v15 = vmul.f32 %v680_v3, %v5763_v2  ;;  %v5801_v3 = vsel %vm108_vm3, %v147_v62, 0.0  ;;  %v412_v62 = vadd.f32 %v5422_v14, %v408_v59 }
 0x198   :  { %9372 = sst [smem:[#allocation36_spill]] %s5662_s0 }
 0x199   :  { %9377 = sst [smem:[#allocation37_spill]] %s5668_s22  ;;  %v682_v0 = vadd.f32 %v681_v15, %v678_v4 }
 0x19a   :  { %s5674_s11 = sld [smem:[#allocation7 + $0x5]] }
 0x19b   :  { %s5680_s14 = sld [smem:[#allocation6 + $0x300]]  ;;  %v686_v6 = vadd.f32 %v5449_v18, %v682_v0 }
 0x19c   :  { %9350 = sst [smem:[#allocation33_spill]] %s5621_s4 }
 0x19d   :  { %s5640_s4 = sld [smem:[#allocation6 + $0x28f]] }
 0x19e   :  { %s5686_s1 = sld [smem:[#allocation6 + $0x301]] }
 0x19f   :  { %s9396_s7 = sld [smem:[#allocation119_spill]] }
 0x1a0   :  { %9382 = sst [smem:[#allocation38_spill]] %s5674_s11 }
 0x1a1   :  { %9387 = sst [smem:[#allocation39_spill]] %s5680_s14 }
 0x1a2   :  { %s5692_s9 = sld [smem:[#allocation6 + $0x303]] }
 0x1a3   :  { %9359 = sst [smem:[#allocation34_spill]] %s5640_s4 }
 0x1a4   :  { %9392 = sst [smem:[#allocation40_spill]] %s5686_s1 }
 0x1a5   :  { %s5698_s15 = sld [smem:[#allocation6 + $0x304]] }
 0x1a6   :  { %s5704_s23 = sld [smem:[#allocation6 + $0x305]] }
 0x1a7   :  { %s5710_s20 = sld [smem:[#allocation6 + $0x306]] }
 0x1a8   :  { %9397 = sst [smem:[#allocation41_spill]] %s5692_s9 }
 0x1a9   :  { %s5716_s19 = sld [smem:[#allocation6 + $0x308]] }
 0x1aa   :  { %s9412_s18 = sld [smem:[#allocation26_spill]] }
 0x1ab   :  { %s5722_s4 = sld [smem:[#allocation6 + $0x309]] }
 0x1ac   :  { %s9414_s11 = sld [smem:[#allocation27_spill]] }
 0x1ad   :  { %9410 = sst [smem:[#allocation42_spill]] %s5710_s20 }
 0x1ae   :  { %s5728_s13 = sld [smem:[#allocation6 + $0x30a]] }
 0x1af   :  { %9411 = sst [smem:[#allocation43_spill]] %s5716_s19 }
 0x1b0   :  { %s9427_s8 = sld [smem:[#allocation39_spill]] }
 0x1b1   :  { %9413 = sst [smem:[#allocation44_spill]] %s5722_s4 }
 0x1b2   :  { %s5738_s25 = sld [smem:[#allocation6 + $0x30b]] }
 0x1b3   :  { %s9429_s14 = sld [smem:[#allocation40_spill]] }
 0x1b4   :  { %9418 = sst [smem:[#allocation45_spill]] %s5728_s13 }
 0x1b5   :  { %s9430_s28 = sld [smem:[#allocation41_spill]] }
 0x1b6   :  { %s5744_s30 = sld [smem:[#allocation6 + $0x30d]] }
 0x1b7   :  { %s9438_s1 = sld [smem:[#allocation107_spill]] }
 0x1b8   :  { %9428 = sst [smem:[#allocation46_spill]] %s5738_s25 }
 0x1b9   :  { %s9439_s21 = sld [smem:[#allocation108_spill]] }
 0x1ba   :  { %s5782_s0 = sld [smem:[#allocation6 + $0x30e]] }
 0x1bb   :  { %s9442_s24 = sld [smem:[#allocation61_spill]] }
 0x1bc   :  { %9431 = sst [smem:[#allocation47_spill]] %s5744_s30 }
 0x1bd   :  { %v9441_v10 = vstv %s9438_s1  ;;  %s9444_s17 = sld [smem:[#allocation13_spill]] }
 0x1be   :  { %v883_v57 = vmul.f32 %v9441_v10, %v5766_v5  ;;  %s5796_s27 = sld [smem:[#allocation6 + $0x30f]]  ;;  %v5804_v10 = vsel %vm103_vm2, %v143_v63, 0.0 }
 0x1bf   :  { %v9443_v58 = vstv %s9439_s21  ;;  %s9446_s3 = sld [smem:[#allocation14_spill]] }
 0x1c0   :  { %9440 = sst [smem:[#allocation48_spill]] %s5782_s0  ;;  %v886_v53 = vmul.f32 %v9443_v58, %v5763_v2 }
 0x1c1   :  { %s9447_s13 = sld [smem:[#allocation62_spill]]  ;;  %v9452_v54 = vstv %s9442_s24 }
 0x1c2   :  { %s9448_s26 = sld [smem:[#allocation90_spill]]  ;;  %v887_v58 = vadd.f32 %v886_v53, %v883_v57  ;;  %v283_v61 = vmul.f32 %v9452_v54, %v5804_v10  ;;  %v179_v54 = vpop.permute.xlu1 %178 }
 0x1c3   :  { %s9449_s21 = sld [smem:[#allocation91_spill]]  ;;  %v9453_v55 = vstv %s9444_s17 }
 0x1c4   :  { %9445 = sst [smem:[#allocation49_spill]] %s5796_s27  ;;  %v287_v1 = vmul.f32 %v9453_v55, %v5801_v3  ;;  %v175_v55 = vpop.permute.xlu0 %174  ;;  %v284_v59 = vadd.f32 %v283_v61, %v280_v48 }
 0x1c5   :  { %s9450_s1 = sld [smem:[#allocation109_spill]]  ;;  %v9455_v63 = vstv %s9446_s3  ;;  %v5839_v0 = vsel %vm93_vm0, 0.0, %v175_v55 }
 0x1c6   :  { %s5806_s22 = sld [smem:[#allocation6 + $0x310]]  ;;  %v415_v15 = vmul.f32 %v9455_v63, %v5804_v10  ;;  %v891_v63 = vadd.f32 %v5472_v21, %v887_v58  ;;  %v288_v48 = vadd.f32 %v287_v1, %v284_v59  ;;  %v187_v1 = vpop.permute.xlu1 %186 }
 0x1c7   :  { %s5816_s30 = sld [smem:[#allocation6 + $0x312]]  ;;  %v9457_v53 = vstv %s9447_s13 }
 0x1c8   :  { %s9456_s25 = sld [smem:[#allocation63_spill]]  ;;  %v419_v4 = vmul.f32 %v9457_v53, %v5801_v3  ;;  %v9459_v49 = vstv %s9448_s26  ;;  %v5836_v53 = vsel %vm98_vm1, 0.0, %v179_v54  ;;  %v416_v18 = vadd.f32 %v415_v15, %v412_v62  ;;  %v183_v15 = vpop.permute.xlu0 %182 }
 0x1c9   :  { %s9458_s4 = sld [smem:[#allocation66_spill]]  ;;  %v689_v57 = vmul.f32 %v9459_v49, %v5804_v10  ;;  %v9461_v14 = vstv %s9449_s21 }
 0x1ca   :  { %s9460_s24 = sld [smem:[#allocation92_spill]]  ;;  %v693_v12 = vmul.f32 %v9461_v14, %v5801_v3 }
 0x1cb   :  { %v9462_v46 = vstv %s9450_s1  ;;  %s9463_s13 = sld [smem:[#allocation65_spill]]  ;;  %v690_v49 = vadd.f32 %v689_v57, %v686_v6 }
 0x1cc   :  { %9451 = sst [smem:[#allocation51_spill]] %s5806_s22  ;;  %v894_v51 = vmul.f32 %v9462_v46, %v5804_v10  ;;  %v420_v46 = vadd.f32 %v419_v4, %v416_v18 }
 0x1cd   :  { %9454 = sst [smem:[#allocation54_spill]] %s5816_s30  ;;  %v694_v54 = vadd.f32 %v693_v12, %v690_v49  ;;  %v5863_v12 = vsel %vm103_vm2, %v183_v15, 0.0 }
 0x1ce   :  { %s9464_s17 = sld [smem:[#allocation15_spill]]  ;;  %v9465_v61 = vstv %s9456_s25  ;;  %v895_v58 = vadd.f32 %v894_v51, %v891_v63  ;;  %v5874_v51 = vsel %vm108_vm3, %v187_v1, 0.0 }
 0x1cf   :  { %v291_v52 = vmul.f32 %v9465_v61, %v5839_v0  ;;  %v9466_v14 = vstv %s9458_s4  ;;  %s9467_s3 = sld [smem:[#allocation93_spill]] }
 0x1d0   :  { %v423_v21 = vmul.f32 %v9466_v14, %v5839_v0  ;;  %s5848_s26 = sld [smem:[#allocation6 + $0x313]]  ;;  %v9470_v55 = vstv %s9460_s24 }
 0x1d1   :  { %s9469_s21 = sld [smem:[#allocation16_spill]]  ;;  %v697_v47 = vmul.f32 %v9470_v55, %v5839_v0  ;;  %v292_v6 = vadd.f32 %v291_v52, %v288_v48  ;;  %v9472_v57 = vstv %s9463_s13 }
 0x1d2   :  { %s9471_s1 = sld [smem:[#allocation67_spill]]  ;;  %v295_v59 = vmul.f32 %v9472_v57, %v5836_v53  ;;  %v424_v4 = vadd.f32 %v423_v21, %v420_v46  ;;  %v219_v46 = vpop.permute.xlu1 %218 }
 0x1d3   :  { %s5860_s4 = sld [smem:[#allocation7 + $0x6]]  ;;  %v698_v18 = vadd.f32 %v697_v47, %v694_v54  ;;  %v215_v54 = vpop.permute.xlu0 %214 }
 0x1d4   :  { %v9473_v61 = vstv %s9464_s17  ;;  %s9475_s25 = sld [smem:[#allocation69_spill]]  ;;  %v296_v52 = vadd.f32 %v295_v59, %v292_v6 }
 0x1d5   :  { %v427_v14 = vmul.f32 %v9473_v61, %v5836_v53  ;;  %v9476_v49 = vstv %s9467_s3  ;;  %s9477_s24 = sld [smem:[#allocation110_spill]] }
 0x1d6   :  { %9468 = sst [smem:[#allocation119_spill]] %s5848_s26  ;;  %v701_v55 = vmul.f32 %v9476_v49, %v5836_v53  ;;  %v300_v6 = vadd.f32 %v5402_v7, %v296_v52 }
 0x1d7   :  { %v9478_v48 = vstv %s9469_s21  ;;  %s9479_s13 = sld [smem:[#allocation94_spill]]  ;;  %v428_v21 = vadd.f32 %v427_v14, %v424_v4  ;;  %v5891_v14 = vsel %vm93_vm0, 0.0, %v215_v54  ;;  %v5906_v54 = vsel %vm98_vm1, 0.0, %v219_v46 }
 0x1d8   :  { %v898_v57 = vmul.f32 %v9478_v48, %v5801_v3  ;;  %v9480_v63 = vstv %s9471_s1  ;;  %s9481_s17 = sld [smem:[#allocation68_spill]]  ;;  %v702_v47 = vadd.f32 %v701_v55, %v698_v18 }
 0x1d9   :  { %9474 = sst [smem:[#allocation26_spill]] %s5860_s4  ;;  %v303_v15 = vmul.f32 %v9480_v63, %v5863_v12  ;;  %v432_v4 = vadd.f32 %v5429_v56, %v428_v21 }
 0x1da   :  { %s9482_s27 = sld [smem:[#allocation70_spill]]  ;;  %v9483_v59 = vstv %s9475_s25  ;;  %v899_v1 = vadd.f32 %v898_v57, %v895_v58  ;;  %v706_v18 = vadd.f32 %v5454_v11, %v702_v47 }
 0x1db   :  { %s5879_s3 = sld [smem:[#allocation6 + $0x380]]  ;;  %v435_v61 = vmul.f32 %v9483_v59, %v5863_v12  ;;  %v9485_v49 = vstv %s9477_s24  ;;  %v304_v52 = vadd.f32 %v303_v15, %v300_v6  ;;  %v227_v15 = vpop.permute.xlu1 %226  ;;  %v223_v6 = vpop.permute.xlu0 %222 }
 0x1dc   :  { %s9484_s21 = sld [smem:[#allocation95_spill]]  ;;  %v902_v48 = vmul.f32 %v9485_v49, %v5839_v0 }
 0x1dd   :  { %s5888_s1 = sld [smem:[#allocation6 + $0x381]]  ;;  %v9487_v7 = vstv %s9479_s13  ;;  %v436_v56 = vadd.f32 %v435_v61, %v432_v4 }
 0x1de   :  { %s9486_s30 = sld [smem:[#allocation71_spill]]  ;;  %v709_v55 = vmul.f32 %v9487_v7, %v5863_v12  ;;  %v9489_v58 = vstv %s9481_s17 }
 0x1df   :  { %s9488_s25 = sld [smem:[#allocation73_spill]]  ;;  %v307_v57 = vmul.f32 %v9489_v58, %v5874_v51 }
 0x1e0   :  { %v9490_v63 = vstv %s9482_s27  ;;  %s9491_s24 = sld [smem:[#allocation96_spill]]  ;;  %v710_v11 = vadd.f32 %v709_v55, %v706_v18 }
 0x1e1   :  { %v439_v59 = vmul.f32 %v9490_v63, %v5874_v51  ;;  %s9492_s22 = sld [smem:[#allocation72_spill]]  ;;  %v308_v7 = vadd.f32 %v307_v57, %v304_v52  ;;  %v903_v63 = vadd.f32 %v902_v48, %v899_v1 }
 0x1e2   :  { %s9493_s0 = sld [smem:[#allocation74_spill]]  ;;  %v9495_v21 = vstv %s9484_s21 }
 0x1e3   :  { %s9494_s19 = sld [smem:[#allocation111_spill]]  ;;  %v713_v47 = vmul.f32 %v9495_v21, %v5874_v51  ;;  %v440_v62 = vadd.f32 %v439_v59, %v436_v56  ;;  %v5931_v59 = vsel %vm103_vm2, %v223_v6, 0.0 }
 0x1e4   :  { %s9496_s13 = sld [smem:[#allocation99_spill]]  ;;  %v9497_v58 = vstv %s9486_s30 }
 0x1e5   :  { %v311_v45 = vmul.f32 %v9497_v58, %v5891_v14  ;;  %v9498_v46 = vstv %s9488_s25  ;;  %v714_v61 = vadd.f32 %v713_v47, %v710_v11  ;;  %s9503_s30 = sld [smem:[#allocation75_spill]]  ;;  %v255_v58 = vpop.permute.xlu0 %254 }
 0x1e6   :  { %v443_v50 = vmul.f32 %v9498_v46, %v5891_v14  ;;  %v9499_v4 = vstv %s9491_s24  ;;  %s9504_s27 = sld [smem:[#allocation77_spill]] }
 0x1e7   :  { %v717_v18 = vmul.f32 %v9499_v4, %v5891_v14  ;;  %v312_v55 = vadd.f32 %v311_v45, %v308_v7  ;;  %v9500_v21 = vstv %s9492_s22  ;;  %s9505_s17 = sld [smem:[#allocation100_spill]]  ;;  %v259_v7 = vpop.permute.xlu1 %258 }
 0x1e8   :  { %v315_v43 = vmul.f32 %v9500_v21, %v5906_v54  ;;  %v9501_v52 = vstv %s9493_s0  ;;  %v444_v56 = vadd.f32 %v443_v50, %v440_v62  ;;  %s9507_s0 = sld [smem:[#allocation76_spill]]  ;;  %v9509_v50 = vstv %s9396_s7 }
 0x1e9   :  { %v447_v57 = vmul.f32 %v9501_v52, %v5906_v54  ;;  %v9502_v1 = vstv %s9494_s19  ;;  %v718_v11 = vadd.f32 %v717_v18, %v714_v61  ;;  %s9508_s19 = sld [smem:[#allocation120_spill]]  ;;  %v1088_v62 = vmul.f32 %v9509_v50, %v5766_v5 }
 0x1ea   :  { %v906_v48 = vmul.f32 %v9502_v1, %v5836_v53  ;;  %v9506_v45 = vstv %s9496_s13  ;;  %v316_v46 = vadd.f32 %v315_v43, %v312_v55  ;;  %v5939_v1 = vsel %vm108_vm3, %v227_v15, 0.0  ;;  %s9510_s22 = sld [smem:[#allocation78_spill]] }
 0x1eb   :  { %v721_v47 = vmul.f32 %v9506_v45, %v5906_v54  ;;  %v448_v6 = vadd.f32 %v447_v57, %v444_v56  ;;  %v9511_v18 = vstv %s9503_s30  ;;  %s9513_s21 = sld [smem:[#allocation101_spill]]  ;;  %v5955_v57 = vsel %vm98_vm1, 0.0, %v259_v7 }
 0x1ec   :  { %v907_v4 = vadd.f32 %v906_v48, %v903_v63  ;;  %v320_v61 = vadd.f32 %v5412_v60, %v316_v46  ;;  %v323_v45 = vmul.f32 %v9511_v18, %v5931_v59  ;;  %v9512_v43 = vstv %s9504_s27  ;;  %s9515_s25 = sld [smem:[#allocation79_spill]] }
 0x1ed   :  { %v722_v49 = vadd.f32 %v721_v47, %v718_v11  ;;  %v455_v63 = vmul.f32 %v9512_v43, %v5931_v59  ;;  %v9514_v55 = vstv %s9505_s17  ;;  %s9516_s7 = sld [smem:[#allocation81_spill]]  ;;  %v5958_v48 = vsel %vm93_vm0, 0.0, %v255_v58  ;;  %v263_v58 = vpop.permute.xlu0 %262 }
 0x1ee   :  { %v729_v15 = vmul.f32 %v9514_v55, %v5931_v59  ;;  %s9517_s24 = sld [smem:[#allocation112_spill]]  ;;  %v452_v60 = vadd.f32 %v5436_v16, %v448_v6  ;;  %v324_v11 = vadd.f32 %v323_v45, %v320_v61  ;;  %v9520_v47 = vstv %s9507_s0 }
 0x1ef   :  { %v726_v56 = vadd.f32 %v5462_v17, %v722_v49  ;;  %s5962_s13 = sld [smem:[#allocation6 + $0x383]]  ;;  %v327_v46 = vmul.f32 %v9520_v47, %v5939_v1  ;;  %v911_v7 = vadd.f32 %v5480_v19, %v907_v4  ;;  %v9522_v50 = vstv %s9508_s19 }
 0x1f0   :  { %s9519_s30 = sld [smem:[#allocation82_spill]]  ;;  %v1091_v18 = vmul.f32 %v9522_v50, %v5763_v2  ;;  %v456_v43 = vadd.f32 %v455_v63, %v452_v60  ;;  %v9523_v55 = vstv %s9510_s22  ;;  %v267_v60 = vpop.permute.xlu1 %266 }
 0x1f1   :  { %s9521_s27 = sld [smem:[#allocation102_spill]]  ;;  %v459_v16 = vmul.f32 %v9523_v55, %v5939_v1  ;;  %v730_v17 = vadd.f32 %v729_v15, %v726_v56  ;;  %v9525_v49 = vstv %s9513_s21  ;;  %v328_v61 = vadd.f32 %v327_v46, %v324_v11 }
 0x1f2   :  { %s9524_s17 = sld [smem:[#allocation19_spill]]  ;;  %v733_v6 = vmul.f32 %v9525_v49, %v5939_v1  ;;  %v9526_v45 = vstv %s9515_s25  ;;  %v5995_v46 = vsel %vm103_vm2, %v263_v58, 0.0 }
 0x1f3   :  { %s9527_s0 = sld [smem:[#allocation83_spill]]  ;;  %v331_v47 = vmul.f32 %v9526_v45, %v5958_v48  ;;  %v9528_v19 = vstv %s9516_s7  ;;  %v460_v52 = vadd.f32 %v459_v16, %v456_v43 }
 0x1f4   :  { %v335_v4 = vmul.f32 %v9528_v19, %v5955_v57  ;;  %v9529_v50 = vstv %s9517_s24  ;;  %s9530_s19 = sld [smem:[#allocation103_spill]]  ;;  %v734_v56 = vadd.f32 %v733_v6, %v730_v17 }
 0x1f5   :  { %9518 = sst [smem:[#allocation27_spill]] %s5962_s13  ;;  %v914_v63 = vmul.f32 %v9529_v50, %v5863_v12  ;;  %v332_v45 = vadd.f32 %v331_v47, %v328_v61 }
 0x1f6   :  { %v9531_v55 = vstv %s9519_s30  ;;  %s9533_s22 = sld [smem:[#allocation20_spill]] }
 0x1f7   :  { %v463_v15 = vmul.f32 %v9531_v55, %v5958_v48  ;;  %v9532_v49 = vstv %s9521_s27  ;;  %s5992_s21 = sld [smem:[#allocation6 + $0x384]]  ;;  %v915_v19 = vadd.f32 %v914_v63, %v911_v7  ;;  %v6011_v7 = vsel %vm108_vm3, %v267_v60, 0.0 }
 0x1f8   :  { %v737_v11 = vmul.f32 %v9532_v49, %v5958_v48  ;;  %s9534_s25 = sld [smem:[#allocation85_spill]]  ;;  %v9535_v50 = vstv %s9524_s17  ;;  %v336_v58 = vadd.f32 %v335_v4, %v332_v45 }
 0x1f9   :  { %v918_v43 = vmul.f32 %v9535_v50, %v5874_v51  ;;  %s6000_s7 = sld [smem:[#allocation6 + $0x385]]  ;;  %v464_v16 = vadd.f32 %v463_v15, %v460_v52  ;;  %v9536_v17 = vstv %s9527_s0  ;;  %v1713_v50 = vstv %s5962_s13 }
 0x1fa   :  { %v467_v6 = vmul.f32 %v9536_v17, %v5955_v57  ;;  %s9537_s24 = sld [smem:[#allocation113_spill]]  ;;  %v738_v55 = vadd.f32 %v737_v11, %v734_v56  ;;  %v9538_v49 = vstv %s9530_s19  ;;  %v340_v60 = vadd.f32 %v5417_v13, %v336_v58 }
 0x1fb   :  { %v741_v21 = vmul.f32 %v9538_v49, %v5955_v57  ;;  %s6008_s30 = sld [smem:[#allocation6 + $0x386]]  ;;  %v919_v61 = vadd.f32 %v918_v43, %v915_v19  ;;  %v1092_v43 = vadd.f32 %v1091_v18, %v1088_v62 }
 0x1fc   :  { %s9539_s27 = sld [smem:[#allocation86_spill]]  ;;  %v9541_v47 = vstv %s9533_s22  ;;  %v468_v56 = vadd.f32 %v467_v6, %v464_v16 }
 0x1fd   :  { %s9540_s17 = sld [smem:[#allocation87_spill]]  ;;  %v922_v52 = vmul.f32 %v9541_v47, %v5891_v14  ;;  %v742_v11 = vadd.f32 %v741_v21, %v738_v55  ;;  %v1096_v47 = vadd.f32 %v5498_v22, %v1092_v43 }
 0x1fe   :  { %s9542_s4 = sld [smem:[#allocation121_spill]]  ;;  %v9544_v63 = vstv %s9534_s25  ;;  %v472_v16 = vadd.f32 %v5444_v9, %v468_v56 }
 0x1ff   :  { %s6016_s0 = sld [smem:[#allocation6 + $0x388]]  ;;  %v343_v15 = vmul.f32 %v9544_v63, %v5995_v46  ;;  %v923_v4 = vadd.f32 %v922_v52, %v919_v61  ;;  %v746_v52 = vadd.f32 %v5467_v20, %v742_v11 }
 0x200   :  { %s9545_s19 = sld [smem:[#allocation88_spill]]  ;;  %v9546_v45 = vstv %s9537_s24 }
 0x201   :  { %s6022_s26 = sld [smem:[#allocation6 + $0x389]]  ;;  %v926_v19 = vmul.f32 %v9546_v45, %v5906_v54  ;;  %v344_v58 = vadd.f32 %v343_v15, %v340_v60 }
 0x202   :  { %s9547_s20 = sld [smem:[#allocation114_spill]]  ;;  %v9549_v17 = vstv %s9539_s27 }
 0x203   :  { %s9548_s22 = sld [smem:[#allocation122_spill]]  ;;  %v347_v49 = vmul.f32 %v9549_v17, %v6011_v7  ;;  %v9550_v21 = vstv %s9540_s17  ;;  %v927_v18 = vadd.f32 %v926_v19, %v923_v4 }
 0x204   :  { %s6028_s9 = sld [smem:[#allocation6 + $0x38a]]  ;;  %v475_v6 = vmul.f32 %v9550_v21, %v5995_v46  ;;  %v9551_v55 = vstv %s9542_s4 }
 0x205   :  { %9543 = sst [smem:[#allocation39_spill]] %s6016_s0  ;;  %v1099_v13 = vmul.f32 %v9551_v55, %v5804_v10  ;;  %v348_v4 = vadd.f32 %v347_v49, %v344_v58  ;;  %v931_v45 = vadd.f32 %v5485_v23, %v927_v18 }
 0x206   :  { %s9552_s25 = sld [smem:[#allocation123_spill]]  ;;  %v9553_v61 = vstv %s9545_s19  ;;  %v476_v9 = vadd.f32 %v475_v6, %v472_v16  ;;  %v1717_v16 = vstv %s5992_s21 }
 0x207   :  { %s6040_s2 = sld [smem:[#allocation6 + $0x38b]]  ;;  %v479_v62 = vmul.f32 %v9553_v61, %v6011_v7  ;;  %v1100_v22 = vadd.f32 %v1099_v13, %v1096_v47 }
 0x208   :  { %s9554_s24 = sld [smem:[#allocation104_spill]]  ;;  %v9556_v63 = vstv %s9547_s20 }
 0x209   :  { %s6046_s27 = sld [smem:[#allocation6 + $0x38d]]  ;;  %v934_v56 = vmul.f32 %v9556_v63, %v5931_v59  ;;  %v9558_v15 = vstv %s9548_s22  ;;  %v480_v20 = vadd.f32 %v479_v62, %v476_v9 }
 0x20a   :  { %s9555_s17 = sld [smem:[#allocation97_spill]]  ;;  %v1103_v60 = vmul.f32 %v9558_v15, %v5801_v3 }
 0x20b   :  { %s9557_s4 = sld [smem:[#allocation115_spill]]  ;;  %v935_v23 = vadd.f32 %v934_v56, %v931_v45 }
 0x20c   :  { %s6055_s19 = sld [smem:[#allocation6 + $0x38e]]  ;;  %v9562_v19 = vstv %s9552_s25  ;;  %v1104_v58 = vadd.f32 %v1103_v60, %v1100_v22 }
 0x20d   :  { %s9560_s13 = sld [smem:[#allocation98_spill]]  ;;  %v1107_v43 = vmul.f32 %v9562_v19, %v5839_v0 }
 0x20e   :  { %s9561_s29 = sld [smem:[#allocation116_spill]]  ;;  %v9564_v11 = vstv %s9554_s24 }
 0x20f   :  { %s6061_s16 = sld [smem:[#allocation6 + $0x38f]]  ;;  %v749_v17 = vmul.f32 %v9564_v11, %v5995_v46 }
 0x210   :  { %s9565_s20 = sld [smem:[#allocation124_spill]]  ;;  %v9567_v49 = vstv %s9555_s17 }
 0x211   :  { %s6068_s22 = sld [smem:[#allocation6 + $0x390]]  ;;  %v351_v6 = vadd.f32 %v9567_v49, %v348_v4  ;;  %v9569_v55 = vstv %s9557_s4  ;;  %v750_v18 = vadd.f32 %v749_v17, %v746_v52  ;;  %v1108_v4 = vadd.f32 %v1107_v43, %v1104_v58 }
 0x212   :  { %9559 = sst [smem:[#allocation40_spill]] %s6055_s19  ;;  %v938_v13 = vmul.f32 %v9569_v55, %v5939_v1  ;;  %v9583_v55 = vstv %s5456_s6 }
 0x213   :  { %s9568_s19 = sld [smem:[#allocation105_spill]]  ;;  %v9572_v61 = vstv %s9560_s13  ;;  %v6085_v56 = vmax.f32 %v351_v6, 0.0  ;;  %v9581_v6 = vstv %s5438_s12 }
 0x214   :  { %s9570_s25 = sld [smem:[#allocation23_spill]]  ;;  %v483_v62 = vadd.f32 %v9572_v61, %v480_v20  ;;  %v9573_v47 = vstv %s9561_s29  ;;  %v939_v15 = vadd.f32 %v938_v13, %v935_v23  ;;  %v1293_v23 = vmul.f32 %v9581_v6, %v5766_v5 }
 0x215   :  { %9563 = sst [smem:[#allocation41_spill]] %s6061_s16  ;;  %v942_v9 = vmul.f32 %v9573_v47, %v5958_v48  ;;  %v1296_v13 = vmul.f32 %v9583_v55, %v5763_v2 }
 0x216   :  { %s6075_s16 = sld [smem:[#allocation6 + $0x392]]  ;;  %v9576_v60 = vstv %s9565_s20  ;;  %v6092_v22 = vmax.f32 %v483_v62, 0.0 }
 0x217   :  { %9566 = sst [smem:[#allocation57_spill]] %s6068_s22  ;;  %v1111_v45 = vmul.f32 %v9576_v60, %v5836_v53  ;;  %v943_v49 = vadd.f32 %v942_v9, %v939_v15  ;;  %v9587_v60 = vstv %s5474_s5  ;;  %s9591_s22 = smov 126  }
 0x218   :  { %s6083_s24 = sld [smem:[#allocation6 + $0x393]]  ;;  %v4718_v58 = vpack.i.bf16 %v6085_v56, %v6092_v22 }
 0x219   :  { %s9575_s17 = sld [smem:[#allocation125_spill]]  ;;  %v9578_v52 = vstv %s9568_s19  ;;  %v1112_v43 = vadd.f32 %v1111_v45, %v1108_v4  ;;  %v1297_v4 = vadd.f32 %v1296_v13, %v1293_v23  ;;  %v1304_v45 = vmul.f32 %v9587_v60, %v5804_v10 }
 0x21a   :  { %s6090_s4 = sld [smem:[#allocation7 + $0x7]]  ;;  %v753_v19 = vmul.f32 %v9578_v52, %v6011_v7  ;;  %v9579_v20 = vstv %s9570_s25  ;;  %4719 = vrot.lane.b32.xlu1 %v4718_v58, %s9591_s22 }
 0x21b   :  { %v946_v11 = vmul.f32 %v9579_v20, %v5955_v57  ;;  %s6101_s29 = sld [smem:[#allocation6 + $0x400]]  ;;  %v1116_v15 = vadd.f32 %v5503_v26, %v1112_v43  ;;  %v1301_v55 = vadd.f32 %v5521_v29, %v1297_v4 }
 0x21c   :  { %9571 = sst [smem:[#allocation59_spill]] %s6075_s16  ;;  %v754_v61 = vadd.f32 %v753_v19, %v750_v18 }
 0x21d   :  { %s9580_s13 = sld [smem:[#allocation117_spill]]  ;;  %v947_v9 = vadd.f32 %v946_v11, %v943_v49  ;;  %v1305_v4 = vadd.f32 %v1304_v45, %v1301_v55 }
 0x21e   :  { %9574 = sst [smem:[#allocation60_spill]] %s6083_s24 }
 0x21f   :  { %s9582_s20 = sld [smem:[#allocation25_spill]]  ;;  %v9584_v62 = vstv %s9575_s17  ;;  %s9592_s17 = smov 127   ;;  %v951_v49 = vadd.f32 %v5490_v24, %v947_v9 }
 0x220   :  { %9577 = sst [smem:[#allocation12_spill]] %s6090_s4  ;;  %v1119_v47 = vmul.f32 %v9584_v62, %v5863_v12  ;;  %4714 = vrot.lane.b32.xlu0 %v4718_v58, %s9592_s17 }
 0x221   :  { %s6109_s19 = sld [smem:[#allocation6 + $0x401]] }
 0x222   :  { %s9585_s25 = sld [smem:[#allocation126_spill]]  ;;  %v1120_v43 = vadd.f32 %v1119_v47, %v1116_v15  ;;  %v9602_v47 = vstv %s5492_s10 }
 0x223   :  { %s6116_s4 = sld [smem:[#allocation6 + $0x403]]  ;;  %v9593_v18 = vstv %s9580_s13  ;;  %v1308_v9 = vmul.f32 %v9602_v47, %v5801_v3  ;;  %v9616_v47 = vstv %s9429_s14 }
 0x224   :  { %s9586_s12 = sld [smem:[#allocation106_spill]]  ;;  %v954_v52 = vmul.f32 %v9593_v18, %v5995_v46 }
 0x225   :  { %s9588_s6 = sld [smem:[#allocation50_spill]]  ;;  %v9594_v19 = vstv %s9582_s20 }
 0x226   :  { %s9589_s24 = sld [smem:[#allocation52_spill]]  ;;  %v958_v26 = vmul.f32 %v9594_v19, %v6011_v7  ;;  %v955_v15 = vadd.f32 %v954_v52, %v951_v49  ;;  %v9604_v19 = vstv %s9412_s18 }
 0x227   :  { %s6122_s16 = sld [smem:[#allocation6 + $0x404]] }
 0x228   :  { %s6134_s5 = sld [smem:[#allocation6 + $0x405]]  ;;  %v9595_v6 = vstv %s9585_s25 }
 0x229   :  { %v1123_v23 = vmul.f32 %v9595_v6, %v5874_v51  ;;  %s9597_s0 = sld [smem:[#allocation127_spill]]  ;;  %v1312_v6 = vmul.f32 %v9604_v19, %v5839_v0  ;;  %v1501_v19 = vmul.f32 %v9616_v47, %v5763_v2 }
 0x22a   :  { %s6141_s13 = sld [smem:[#allocation6 + $0x406]]  ;;  %v9599_v13 = vstv %s9586_s12 }
 0x22b   :  { %v757_v58 = vadd.f32 %v9599_v13, %v754_v61  ;;  %v9600_v62 = vstv %s9588_s6  ;;  %s6154_s20 = sld [smem:[#allocation6 + $0x408]]  ;;  %v1124_v29 = vadd.f32 %v1123_v23, %v1120_v43  ;;  %v9611_v43 = vstv %s9427_s8 }
 0x22c   :  { %v1127_v60 = vmul.f32 %v9600_v62, %v5891_v14  ;;  %v9601_v18 = vstv %s9589_s24  ;;  %s9605_s25 = sld [smem:[#allocation17_spill]]  ;;  %v1498_v23 = vmul.f32 %v9611_v43, %v5766_v5  ;;  %v959_v13 = vadd.f32 %v958_v26, %v955_v15 }
 0x22d   :  { %9590 = sst [smem:[#allocation84_spill]] %s6122_s16  ;;  %v1131_v24 = vmul.f32 %v9601_v18, %v5906_v54  ;;  %v1309_v18 = vadd.f32 %v1308_v9, %v1305_v4  ;;  %v9620_v26 = vstv %s9414_s11 }
 0x22e   :  { %s9596_s16 = sld [smem:[#allocation53_spill]]  ;;  %v1128_v62 = vadd.f32 %v1127_v60, %v1124_v29  ;;  %v1316_v15 = vmul.f32 %v9620_v26, %v5836_v53 }
 0x22f   :  { %s6159_s12 = sld [smem:[#allocation6 + $0x409]]  ;;  %v9610_v45 = vstv %s9597_s0  ;;  %v1313_v4 = vadd.f32 %v1312_v6, %v1309_v18 }
 0x230   :  { %9598 = sst [smem:[#allocation89_spill]] %s6141_s13  ;;  %s9086_s13 = smov 125   ;;  %v1143_v49 = vmul.f32 %v9610_v45, %v5939_v1  ;;  %v1132_v29 = vadd.f32 %v1131_v24, %v1128_v62 }
 0x231   :  { %9603 = sst [smem:[#allocation107_spill]] %s6154_s20  ;;  %363 = vrot.lane.b32.xlu1 %v6085_v56, %s9086_s13  ;;  %495 = vrot.lane.b32.xlu0 %v6092_v22, %s9086_s13  ;;  %v1317_v62 = vadd.f32 %v1316_v15, %v1313_v4  ;;  %v9641_v4 = vstv %s5698_s15 }
 0x232   :  { %s9607_s6 = sld [smem:[#allocation18_spill]]  ;;  %v9618_v45 = vstv %s9605_s25 }
 0x233   :  { %s9609_s10 = sld [smem:[#allocation118_spill]]  ;;  %v1147_v43 = vmul.f32 %v9618_v45, %v5958_v48  ;;  %v1321_v15 = vadd.f32 %v5528_v30, %v1317_v62  ;;  %v1753_v62 = vstv %s6046_s27 }
 0x234   :  { %v9608_v61 = vstv %s9596_s16  ;;  %s6175_s18 = sld [smem:[#allocation6 + $0x40a]] }
 0x235   :  { %9606 = sst [smem:[#allocation108_spill]] %s6159_s12  ;;  %v1139_v52 = vmul.f32 %v9608_v61, %v5931_v59  ;;  %v6182_v61 = vmax.f32 %v757_v58, 0.0  ;;  %v1502_v58 = vadd.f32 %v1501_v19, %v1498_v23  ;;  %v1136_v23 = vadd.f32 %v5508_v27, %v1132_v29 }
 0x236   :  { %s9613_s24 = sld [smem:[#allocation21_spill]] }
 0x237   :  { %s9614_s12 = sld [smem:[#allocation22_spill]]  ;;  %v1506_v18 = vadd.f32 %v5546_v28, %v1502_v58  ;;  %v1140_v28 = vadd.f32 %v1139_v52, %v1136_v23  ;;  %v1513_v58 = vmul.f32 %v9641_v4, %v5801_v3 }
 0x238   :  { %s9615_s20 = sld [smem:[#allocation28_spill]]  ;;  %v9619_v55 = vstv %s9607_s6 }
 0x239   :  { %s6180_s16 = sld [smem:[#allocation6 + $0x40b]]  ;;  %v1151_v11 = vmul.f32 %v9619_v55, %v5955_v57  ;;  %v9621_v60 = vstv %s9609_s10  ;;  %v1144_v30 = vadd.f32 %v1143_v49, %v1140_v28 }
 0x23a   :  { %9612 = sst [smem:[#allocation61_spill]] %s6175_s18  ;;  %v962_v9 = vadd.f32 %v9621_v60, %v959_v13  ;;  %v9629_v13 = vstv %s9430_s28 }
 0x23b   :  { %s6193_s8 = sld [smem:[#allocation6 + $0x40d]]  ;;  %v1509_v24 = vmul.f32 %v9629_v13, %v5804_v10 }
 0x23c   :  { %s9622_s0 = sld [smem:[#allocation29_spill]]  ;;  %v9626_v47 = vstv %s9613_s24  ;;  %v6217_v6 = vmax.f32 %v962_v9, 0.0  ;;  %s9660_s24 = smov 125  }
 0x23d   :  { %s9623_s14 = sld [smem:[#allocation30_spill]]  ;;  %v6202_v45 = vmul.f32 %v9626_v47, %v5995_v46  ;;  %v9627_v55 = vstv %s9614_s12  ;;  %v1510_v29 = vadd.f32 %v1509_v24, %v1506_v18  ;;  %v9648_v24 = vstv %s5888_s1 }
 0x23e   :  { %s9624_s13 = sld [smem:[#allocation31_spill]]  ;;  %v6207_v26 = vmul.f32 %v9627_v55, %v6011_v7  ;;  %v9628_v20 = vstv %s9615_s20  ;;  %v4728_v27 = vpack.i.bf16 %v6217_v6, %v6182_v61  ;;  %v1706_v23 = vmul.f32 %v9648_v24, %v5763_v2 }
 0x23f   :  { %9617 = sst [smem:[#allocation13_spill]] %s6180_s16  ;;  %v1324_v17 = vmul.f32 %v9628_v20, %v5863_v12  ;;  %v1514_v49 = vadd.f32 %v1513_v58, %v1510_v29  ;;  %v1714_v24 = vmul.f32 %v1713_v50, %v5804_v10 }
 0x240   :  { %s9625_s16 = sld [smem:[#allocation32_spill]]  ;;  %4729 = vrot.lane.b32.xlu1 %v4728_v27, %s9591_s22  ;;  %4724 = vrot.lane.b32.xlu0 %v4728_v27, %s9592_s17 }
 0x241   :  { %s6197_s18 = sld [smem:[#allocation6 + $0x40e]]  ;;  %v1325_v52 = vadd.f32 %v1324_v17, %v1321_v15  ;;  %v1148_v17 = vadd.f32 %v1147_v43, %v1144_v30 }
 0x242   :  { %s6215_s11 = sld [smem:[#allocation6 + $0x40f]]  ;;  %v9632_v19 = vstv %s9622_s0 }
 0x243   :  { %s6221_s25 = sld [smem:[#allocation6 + $0x410]]  ;;  %v1328_v20 = vmul.f32 %v9632_v19, %v5874_v51  ;;  %v9633_v60 = vstv %s9623_s14  ;;  %v9642_v19 = vstv %s5704_s23  ;;  %v1152_v50 = vadd.f32 %v1151_v11, %v1148_v17 }
 0x244   :  { %v1332_v47 = vmul.f32 %v9633_v60, %v5891_v14  ;;  %v9634_v55 = vstv %s9624_s13  ;;  %s6237_s28 = sld [smem:[#allocation6 + $0x412]]  ;;  %v1517_v60 = vmul.f32 %v9642_v19, %v5839_v0  ;;  %974 = vrot.lane.b32.xlu1 %v6217_v6, %s9660_s24  ;;  %769 = vrot.lane.b32.xlu0 %v6182_v61, %s9660_s24  ;;  %v1718_v17 = vmul.f32 %v1717_v16, %v5801_v3 }
 0x245   :  { %v1336_v13 = vmul.f32 %v9634_v55, %v5906_v54  ;;  %s9637_s20 = sld [smem:[#allocation33_spill]]  ;;  %v9643_v55 = vstv %s5879_s3  ;;  %v1329_v28 = vadd.f32 %v1328_v20, %v1325_v52  ;;  %v1156_v16 = vadd.f32 %v5516_v25, %v1152_v50 }
 0x246   :  { %v9635_v9 = vstv %s9625_s16  ;;  %s9638_s12 = sld [smem:[#allocation34_spill]]  ;;  %v1907_v50 = vstv %s6101_s29 }
 0x247   :  { %v6235_v63 = vmul.f32 %v9635_v9, %v5931_v59  ;;  %s9639_s6 = sld [smem:[#allocation35_spill]]  ;;  %v1703_v9 = vmul.f32 %v9643_v55, %v5766_v5 }
 0x248   :  { %9630 = sst [smem:[#allocation14_spill]] %s6215_s11 }
 0x249   :  { %9631 = sst [smem:[#allocation62_spill]] %s6221_s25  ;;  %v1707_v15 = vadd.f32 %v1706_v23, %v1703_v9  ;;  %v1333_v9 = vadd.f32 %v1332_v47, %v1329_v28  ;;  %v9670_v28 = vstv %s6000_s7 }
 0x24a   :  { %9636 = sst [smem:[#allocation90_spill]] %s6237_s28 }
 0x24b   :  { %s6242_s10 = sld [smem:[#allocation6 + $0x413]]  ;;  %v9650_v18 = vstv %s9637_s20  ;;  %v1711_v30 = vadd.f32 %v5572_v34, %v1707_v15  ;;  %v1337_v47 = vadd.f32 %v1336_v13, %v1333_v9  ;;  %v1722_v15 = vmul.f32 %v9670_v28, %v5839_v0 }
 0x24c   :  { %s6253_s13 = sld [smem:[#allocation7 + $0x8]]  ;;  %v1348_v4 = vmul.f32 %v9650_v18, %v5939_v1  ;;  %v9651_v19 = vstv %s9638_s12 }
 0x24d   :  { %s9646_s16 = sld [smem:[#allocation36_spill]]  ;;  %v6269_v55 = vmul.f32 %v9651_v19, %v5958_v48  ;;  %v9652_v27 = vstv %s9639_s6  ;;  %v1715_v34 = vadd.f32 %v1714_v24, %v1711_v30  ;;  %v1341_v30 = vadd.f32 %v5536_v32, %v1337_v47 }
 0x24e   :  { %s9647_s0 = sld [smem:[#allocation37_spill]]  ;;  %v6274_v21 = vmul.f32 %v9652_v27, %v5955_v57  ;;  %v1518_v27 = vadd.f32 %v1517_v60, %v1514_v49  ;;  %v1918_v60 = vstv %s6116_s4 }
 0x24f   :  { %s9649_s15 = sld [smem:[#allocation42_spill]]  ;;  %v1345_v32 = vadd.f32 %v6235_v63, %v1341_v30  ;;  %v1160_v63 = vadd.f32 %v6202_v45, %v1156_v16 }
 0x250   :  { %s6261_s23 = sld [smem:[#allocation6 + $0x480]] }
 0x251   :  { %9640 = sst [smem:[#allocation91_spill]] %s6242_s10 }
 0x252   :  { %9644 = sst [smem:[#allocation109_spill]] %s6253_s13 }
 0x253   :  { %s6276_s3 = sld [smem:[#allocation6 + $0x481]]  ;;  %v9656_v18 = vstv %s9646_s16 }
 0x254   :  { %s9653_s1 = sld [smem:[#allocation40_spill]]  ;;  %v6286_v19 = vmul.f32 %v9656_v18, %v5995_v46  ;;  %v9658_v29 = vstv %s9647_s0 }
 0x255   :  { %s9654_s14 = sld [smem:[#allocation43_spill]]  ;;  %v6291_v58 = vmul.f32 %v9658_v29, %v6011_v7  ;;  %v9659_v43 = vstv %s9649_s15 }
 0x256   :  { %s9655_s20 = sld [smem:[#allocation44_spill]]  ;;  %v1521_v20 = vmul.f32 %v9659_v43, %v5836_v53 }
 0x257   :  { %s6281_s13 = sld [smem:[#allocation6 + $0x483]] }
 0x258   :  { %s9657_s12 = sld [smem:[#allocation45_spill]]  ;;  %v1522_v52 = vadd.f32 %v1521_v20, %v1518_v27 }
 0x259   :  { %s6296_s6 = sld [smem:[#allocation6 + $0x484]] }
 0x25a   :  { %s9661_s16 = sld [smem:[#allocation46_spill]]  ;;  %v1526_v27 = vadd.f32 %v5554_v31, %v1522_v52 }
 0x25b   :  { %s9662_s0 = sld [smem:[#allocation47_spill]]  ;;  %v9664_v23 = vstv %s9654_s14 }
 0x25c   :  { %s9663_s10 = sld [smem:[#allocation48_spill]]  ;;  %v1529_v49 = vmul.f32 %v9664_v23, %v5863_v12  ;;  %v9665_v18 = vstv %s9655_s20 }
 0x25d   :  { %s6304_s15 = sld [smem:[#allocation6 + $0x485]]  ;;  %v1533_v29 = vmul.f32 %v9665_v18, %v5874_v51 }
 0x25e   :  { %s9666_s28 = sld [smem:[#allocation49_spill]]  ;;  %v9667_v43 = vstv %s9657_s12  ;;  %v1530_v28 = vadd.f32 %v1529_v49, %v1526_v27  ;;  %v1908_v49 = vmul.f32 %v1907_v50, %v5766_v5 }
 0x25f   :  { %v1537_v11 = vmul.f32 %v9667_v43, %v5891_v14  ;;  %s6315_s24 = sld [smem:[#allocation6 + $0x486]]  ;;  %v1719_v43 = vadd.f32 %v1718_v17, %v1715_v34  ;;  %v9679_v34 = vstv %s6008_s30 }
 0x260   :  { %s9668_s25 = sld [smem:[#allocation51_spill]]  ;;  %v9671_v20 = vstv %s9661_s16  ;;  %v1726_v17 = vmul.f32 %v9679_v34, %v5836_v53  ;;  %v1534_v27 = vadd.f32 %v1533_v29, %v1530_v28  ;;  %v1919_v34 = vmul.f32 %v1918_v60, %v5804_v10 }
 0x261   :  { %s9669_s11 = sld [smem:[#allocation54_spill]]  ;;  %v1541_v23 = vmul.f32 %v9671_v20, %v5906_v54  ;;  %v9672_v18 = vstv %s9662_s0  ;;  %v1723_v47 = vadd.f32 %v1722_v15, %v1719_v43  ;;  %v1349_v15 = vadd.f32 %v1348_v4, %v1345_v32 }
 0x262   :  { %s6323_s14 = sld [smem:[#allocation6 + $0x488]]  ;;  %v1549_v13 = vmul.f32 %v9672_v18, %v5931_v59  ;;  %v9673_v24 = vstv %s9663_s10  ;;  %v1538_v29 = vadd.f32 %v1537_v11, %v1534_v27  ;;  %v1926_v32 = vstv %s6134_s5 }
 0x263   :  { %v6335_v9 = vmul.f32 %v9673_v24, %v5939_v1  ;;  %s6337_s21 = sld [smem:[#allocation6 + $0x489]]  ;;  %v1727_v30 = vadd.f32 %v1726_v17, %v1723_v47  ;;  %v1353_v45 = vadd.f32 %v6269_v55, %v1349_v15  ;;  %v9687_v11 = vstv %s6022_s26 }
 0x264   :  { %s9674_s7 = sld [smem:[#allocation119_spill]]  ;;  %v9675_v31 = vstv %s9666_s28  ;;  %v1542_v47 = vadd.f32 %v1541_v23, %v1538_v29  ;;  %v1738_v17 = vmul.f32 %v9687_v11, %v5874_v51  ;;  %v9688_v27 = vstv %s6028_s9 }
 0x265   :  { %v6344_v52 = vmul.f32 %v9675_v31, %v5958_v48  ;;  %s6346_s20 = sld [smem:[#allocation6 + $0x48a]]  ;;  %v1731_v4 = vadd.f32 %v5577_v38, %v1727_v30  ;;  %v1164_v55 = vadd.f32 %v6207_v26, %v1160_v63  ;;  %v1357_v38 = vadd.f32 %v6274_v21, %v1353_v45 }
 0x266   :  { %v9676_v20 = vstv %s9668_s25  ;;  %s6359_s10 = sld [smem:[#allocation6 + $0x48b]]  ;;  %v1546_v15 = vadd.f32 %v5559_v35, %v1542_v47  ;;  %v1927_v29 = vmul.f32 %v1926_v32, %v5839_v0  ;;  %v1754_v35 = vmul.f32 %v1753_v62, %v5931_v59 }
 0x267   :  { %v6351_v18 = vmul.f32 %v9676_v20, %v5955_v57  ;;  %v9677_v24 = vstv %s9669_s11  ;;  %s9678_s28 = sld [smem:[#allocation39_spill]]  ;;  %v1361_v26 = vadd.f32 %v5541_v33, %v1357_v38 }
 0x268   :  { %v6356_v25 = vmul.f32 %v9677_v24, %v5995_v46  ;;  %s9680_s12 = sld [smem:[#allocation84_spill]]  ;;  %v1910_v24 = vstv %s6109_s19 }
 0x269   :  { %s6366_s25 = sld [smem:[#allocation6 + $0x48d]]  ;;  %v1911_v43 = vmul.f32 %v1910_v24, %v5763_v2  ;;  %v1742_v24 = vmul.f32 %v9688_v27, %v5891_v14 }
 0x26a   :  { %v9681_v31 = vstv %s9674_s7  ;;  %s6375_s29 = sld [smem:[#allocation6 + $0x48e]] }
 0x26b   :  { %v6371_v20 = vmul.f32 %v9681_v31, %v6011_v7  ;;  %s9682_s30 = sld [smem:[#allocation41_spill]]  ;;  %v1912_v16 = vadd.f32 %v1911_v43, %v1908_v49 }
 0x26c   :  { %s6379_s11 = sld [smem:[#allocation6 + $0x48f]] }
 0x26d   :  { %v9683_v28 = vstv %s9678_s28  ;;  %s6386_s4 = sld [smem:[#allocation6 + $0x490]]  ;;  %v1916_v23 = vadd.f32 %v5595_v41, %v1912_v16  ;;  %v1550_v41 = vadd.f32 %v1549_v13, %v1546_v15 }
 0x26e   :  { %v1734_v50 = vmul.f32 %v9683_v28, %v5863_v12  ;;  %v1922_v31 = vstv %s9680_s12  ;;  %s9685_s19 = sld [smem:[#allocation57_spill]] }
 0x26f   :  { %s6391_s16 = sld [smem:[#allocation6 + $0x492]]  ;;  %v1923_v43 = vmul.f32 %v1922_v31, %v5801_v3  ;;  %v1920_v63 = vadd.f32 %v1919_v34, %v1916_v23  ;;  %v9695_v31 = vstv %s9653_s1  ;;  %v1365_v34 = vadd.f32 %v6286_v19, %v1361_v26 }
 0x270   :  { %s9689_s0 = sld [smem:[#allocation89_spill]]  ;;  %v1735_v49 = vadd.f32 %v1734_v50, %v1731_v4  ;;  %v9694_v50 = vstv %s6040_s2  ;;  %v1758_v4 = vmul.f32 %v9695_v31, %v5939_v1  ;;  %v1554_v47 = vadd.f32 %v6335_v9, %v1550_v41 }
 0x271   :  { %v1761_v60 = vstv %s9682_s30  ;;  %s6400_s7 = sld [smem:[#allocation6 + $0x493]]  ;;  %v1746_v45 = vmul.f32 %v9694_v50, %v5906_v54  ;;  %v1924_v13 = vadd.f32 %v1923_v43, %v1920_v63  ;;  %v1369_v27 = vadd.f32 %v6291_v58, %v1365_v34 }
 0x272   :  { %s6405_s5 = sld [smem:[#allocation7 + $0x9]]  ;;  %v1739_v21 = vadd.f32 %v1738_v17, %v1735_v49  ;;  %v1762_v62 = vmul.f32 %v1761_v60, %v5958_v48  ;;  %v1558_v38 = vadd.f32 %v6344_v52, %v1554_v47  ;;  %v2115_v31 = vstv %s6276_s3 }
 0x273   :  { %9684 = sst [smem:[#allocation63_spill]] %s6386_s4  ;;  %v1928_v19 = vadd.f32 %v1927_v29, %v1924_v13 }
 0x274   :  { %s9692_s26 = sld [smem:[#allocation24_spill]]  ;;  %v1765_v30 = vstv %s9685_s19  ;;  %v1743_v32 = vadd.f32 %v1742_v24, %v1739_v21  ;;  %v1562_v52 = vadd.f32 %v6351_v18, %v1558_v38  ;;  %v2123_v18 = vstv %s6281_s13 }
 0x275   :  { %9686 = sst [smem:[#allocation66_spill]] %s6391_s16  ;;  %v1766_v9 = vmul.f32 %v1765_v30, %v5955_v57  ;;  %v2131_v38 = vstv %s6304_s15 }
 0x276   :  { %s6411_s9 = sld [smem:[#allocation6 + $0x500]]  ;;  %v1930_v28 = vstv %s9689_s0 }
 0x277   :  { %9690 = sst [smem:[#allocation92_spill]] %s6400_s7  ;;  %v1931_v11 = vmul.f32 %v1930_v28, %v5836_v53 }
 0x278   :  { %9691 = sst [smem:[#allocation65_spill]] %s6405_s5 }
 0x279   :  { %s9693_s28 = sld [smem:[#allocation107_spill]]  ;;  %v1932_v29 = vadd.f32 %v1931_v11, %v1928_v19  ;;  %v1958_v11 = vstv %s6193_s8 }
 0x27a   :  { %s6415_s12 = sld [smem:[#allocation6 + $0x501]]  ;;  %v9697_v33 = vstv %s9692_s26 }
 0x27b   :  { %s9696_s30 = sld [smem:[#allocation108_spill]]  ;;  %v1167_v16 = vadd.f32 %v9697_v33, %v1164_v55  ;;  %v1747_v55 = vadd.f32 %v1746_v45, %v1743_v32  ;;  %v1936_v41 = vadd.f32 %v5600_v42, %v1932_v29  ;;  %v2112_v45 = vstv %s6261_s23 }
 0x27c   :  { %s6426_s19 = sld [smem:[#allocation6 + $0x503]]  ;;  %v2116_v32 = vmul.f32 %v2115_v31, %v5763_v2 }
 0x27d   :  { %s9698_s0 = sld [smem:[#allocation59_spill]]  ;;  %v6449_v23 = vmax.f32 %v1167_v16, 0.0  ;;  %v1751_v43 = vadd.f32 %v5582_v39, %v1747_v55  ;;  %v1566_v39 = vadd.f32 %v5564_v36, %v1562_v52  ;;  %v2113_v36 = vmul.f32 %v2112_v45, %v5766_v5 }
 0x27e   :  { %s9699_s5 = sld [smem:[#allocation60_spill]]  ;;  %v2127_v55 = vstv %s6296_s6 }
 0x27f   :  { %s6431_s7 = sld [smem:[#allocation6 + $0x504]]  ;;  %v1938_v17 = vstv %s9693_s28  ;;  %v1755_v28 = vadd.f32 %v1754_v35, %v1751_v43  ;;  %v1570_v42 = vadd.f32 %v6356_v25, %v1566_v39 }
 0x280   :  { %s9700_s2 = sld [smem:[#allocation38_spill]]  ;;  %v1939_v30 = vmul.f32 %v1938_v17, %v5863_v12  ;;  %v2117_v17 = vadd.f32 %v2116_v32, %v2113_v36 }
 0x281   :  { %s6437_s27 = sld [smem:[#allocation6 + $0x505]]  ;;  %v1942_v24 = vstv %s9696_s30  ;;  %v1759_v16 = vadd.f32 %v1758_v4, %v1755_v28  ;;  %v1574_v19 = vadd.f32 %v6371_v20, %v1570_v42 }
 0x282   :  { %s9701_s1 = sld [smem:[#allocation61_spill]]  ;;  %v1943_v26 = vmul.f32 %v1942_v24, %v5874_v51  ;;  %v1940_v34 = vadd.f32 %v1939_v30, %v1936_v41  ;;  %v2121_v43 = vadd.f32 %v5618_v40, %v2117_v17  ;;  %v2128_v30 = vmul.f32 %v2127_v55, %v5801_v3 }
 0x283   :  { %s6441_s26 = sld [smem:[#allocation6 + $0x506]]  ;;  %v1773_v49 = vstv %s9698_s0  ;;  %v1763_v4 = vadd.f32 %v1762_v62, %v1759_v16 }
 0x284   :  { %s9702_s16 = sld [smem:[#allocation13_spill]]  ;;  %v1777_v60 = vstv %s9699_s5  ;;  %v1774_v35 = vmul.f32 %v1773_v49, %v5995_v46  ;;  %v1944_v13 = vadd.f32 %v1943_v26, %v1940_v34  ;;  %v2132_v26 = vmul.f32 %v2131_v38, %v5839_v0 }
 0x285   :  { %s6447_s4 = sld [smem:[#allocation6 + $0x508]]  ;;  %v1767_v62 = vadd.f32 %v1766_v9, %v1763_v4  ;;  %v1778_v49 = vmul.f32 %v1777_v60, %v6011_v7  ;;  %v2151_v38 = vstv %s6346_s20 }
 0x286   :  { %v9703_v15 = vstv %s9700_s2  ;;  %s6454_s28 = sld [smem:[#allocation6 + $0x509]] }
 0x287   :  { %v1372_v58 = vadd.f32 %v9703_v15, %v1369_v27  ;;  %s6460_s5 = sld [smem:[#allocation6 + $0x50a]]  ;;  %v2124_v27 = vmul.f32 %v2123_v18, %v5804_v10  ;;  %v1959_v15 = vmul.f32 %v1958_v11, %v5931_v59  ;;  %v1771_v20 = vadd.f32 %v5590_v37, %v1767_v62 }
 0x288   :  { %v1946_v21 = vstv %s9701_s1  ;;  %s6466_s30 = sld [smem:[#allocation6 + $0x50b]] }
 0x289   :  { %v6462_v63 = vmax.f32 %v1372_v58, 0.0  ;;  %s6472_s0 = sld [smem:[#allocation6 + $0x50d]]  ;;  %v1947_v47 = vmul.f32 %v1946_v21, %v5891_v14  ;;  %v1962_v58 = vstv %s6197_s18  ;;  %v2125_v40 = vadd.f32 %v2124_v27, %v2121_v43 }
 0x28a   :  { %v1950_v50 = vstv %s9702_s16  ;;  %s6476_s2 = sld [smem:[#allocation6 + $0x50e]]  ;;  %v1775_v41 = vadd.f32 %v1774_v35, %v1771_v20  ;;  %v1963_v45 = vmul.f32 %v1962_v58, %v5939_v1  ;;  %v9723_v58 = vld [vmem:[#allocation129_spill] sm:$0xff]  ;;  %v2320_v20 = vstv %s6415_s12 }
 0x28b   :  { %v4738_v33 = vpack.i.bf16 %v6462_v63, %v6449_v23  ;;  %s6482_s13 = sld [smem:[#allocation6 + $0x50f]]  ;;  %v1951_v25 = vmul.f32 %v1950_v50, %v5906_v54  ;;  %v1948_v24 = vadd.f32 %v1947_v47, %v1944_v13  ;;  %v2135_v50 = vstv %s6315_s24 }
 0x28c   :  { %s6488_s23 = sld [smem:[#allocation6 + $0x510]]  ;;  %v2129_v31 = vadd.f32 %v2128_v30, %v2125_v40  ;;  %v1779_v16 = vadd.f32 %v1778_v49, %v1775_v41  ;;  %v2136_v4 = vmul.f32 %v2135_v50, %v5836_v53  ;;  %v2321_v40 = vmul.f32 %v2320_v20, %v5763_v2 }
 0x28d   :  { %4739 = vrot.lane.b32.xlu1 %v4738_v33, %s9591_s22  ;;  %4734 = vrot.lane.b32.xlu0 %v4738_v33, %s9592_s17  ;;  %s9707_s3 = sld [smem:[#allocation14_spill]]  ;;  %v1952_v9 = vadd.f32 %v1951_v25, %v1948_v24  ;;  %v2147_v24 = vstv %s6337_s21  ;;  %v2163_v50 = vstv %s6366_s25 }
 0x28e   :  { %s6493_s16 = sld [smem:[#allocation6 + $0x512]]  ;;  %v2133_v32 = vadd.f32 %v2132_v26, %v2129_v31  ;;  %v2148_v41 = vmul.f32 %v2147_v24, %v5874_v51  ;;  %v2152_v31 = vmul.f32 %v2151_v38, %v5891_v14  ;;  %v2164_v38 = vmul.f32 %v2163_v50, %v5931_v59 }
 0x28f   :  { %s9709_s1 = sld [smem:[#allocation62_spill]]  ;;  %v1956_v37 = vadd.f32 %v5608_v44, %v1952_v9  ;;  %v2143_v44 = vstv %s6323_s14  ;;  %v2328_v9 = vstv %s6426_s19 }
 0x290   :  { %9704 = sst [smem:[#allocation15_spill]] %s6476_s2  ;;  %v2137_v27 = vadd.f32 %v2136_v4, %v2133_v32  ;;  %v2144_v55 = vmul.f32 %v2143_v44, %v5863_v12  ;;  %v2332_v4 = vstv %s6431_s7 }
 0x291   :  { %9705 = sst [smem:[#allocation93_spill]] %s6482_s13  ;;  %v1960_v34 = vadd.f32 %v1959_v15, %v1956_v37  ;;  %v2155_v37 = vstv %s6359_s10 }
 0x292   :  { %9706 = sst [smem:[#allocation16_spill]] %s6488_s23  ;;  %v2141_v43 = vadd.f32 %v9723_v58, %v2137_v27  ;;  %v2171_v27 = vstv %s6379_s11 }
 0x293   :  { %s9710_s13 = sld [smem:[#allocation90_spill]]  ;;  %v1966_v60 = vstv %s9707_s3  ;;  %v1964_v11 = vadd.f32 %v1963_v45, %v1960_v34 }
 0x294   :  { %9708 = sst [smem:[#allocation67_spill]] %s6493_s16  ;;  %s9714_s16 = smov 125   ;;  %v1967_v42 = vmul.f32 %v1966_v60, %v5958_v48 }
 0x295   :  { %s6497_s2 = sld [smem:[#allocation6 + $0x513]]  ;;  %1384 = vrot.lane.b32.xlu1 %v6462_v63, %s9714_s16  ;;  %1179 = vrot.lane.b32.xlu0 %v6449_v23, %s9714_s16  ;;  %v1970_v29 = vstv %s9709_s1 }
 0x296   :  { %s9712_s8 = sld [smem:[#allocation26_spill]]  ;;  %v1971_v35 = vmul.f32 %v1970_v29, %v5955_v57  ;;  %v1968_v15 = vadd.f32 %v1967_v42, %v1964_v11  ;;  %v2156_v11 = vmul.f32 %v2155_v37, %v5906_v54 }
 0x297   :  { %s6503_s6 = sld [smem:[#allocation7 + $0xa]] }
 0x298   :  { %s9715_s15 = sld [smem:[#allocation12_spill]]  ;;  %v1972_v44 = vadd.f32 %v1971_v35, %v1968_v15 }
 0x299   :  { %s6512_s23 = sld [smem:[#allocation6 + $0x580]]  ;;  %v1978_v52 = vstv %s9710_s13 }
 0x29a   :  { %s6517_s18 = sld [smem:[#allocation6 + $0x581]]  ;;  %v6540_v36 = vmul.f32 %v1978_v52, %v5995_v46 }
 0x29b   :  { %9711 = sst [smem:[#allocation69_spill]] %s6497_s2 }
 0x29c   :  { %s9716_s2 = sld [smem:[#allocation55_spill]]  ;;  %v9717_v21 = vstv %s9712_s8 }
 0x29d   :  { %9713 = sst [smem:[#allocation110_spill]] %s6503_s6  ;;  %v1577_v28 = vadd.f32 %v9717_v21, %v1574_v19  ;;  %v2317_v19 = vstv %s6411_s9 }
 0x29e   :  { %s6523_s3 = sld [smem:[#allocation6 + $0x582]]  ;;  %v1781_v39 = vstv %s9715_s15  ;;  %v2318_v49 = vmul.f32 %v2317_v19, %v5766_v5 }
 0x29f   :  { %s9719_s13 = sld [smem:[#allocation91_spill]]  ;;  %v6545_v13 = vmax.f32 %v1577_v28, 0.0  ;;  %v1782_v47 = vadd.f32 %v1781_v39, %v1779_v16  ;;  %v2145_v28 = vadd.f32 %v2144_v55, %v2141_v43  ;;  %v2329_v16 = vmul.f32 %v2328_v9, %v5804_v10  ;;  %v9729_v55 = vld [vmem:[#allocation132_spill] sm:$0xff] }
 0x2a0   :  { %s6532_s1 = sld [smem:[#allocation6 + $0x583]]  ;;  %v2333_v9 = vmul.f32 %v2332_v4, %v5801_v3 }
 0x2a1   :  { %s9720_s6 = sld [smem:[#allocation109_spill]]  ;;  %v6555_v62 = vmax.f32 %v1782_v47, 0.0  ;;  %v2149_v32 = vadd.f32 %v2148_v41, %v2145_v28  ;;  %v2336_v47 = vstv %s6437_s27  ;;  %v2340_v41 = vstv %s6441_s26 }
 0x2a2   :  { %v9718_v18 = vstv %s9716_s2  ;;  %s6536_s24 = sld [smem:[#allocation6 + $0x584]] }
 0x2a3   :  { %v6530_v33 = vmul.f32 %v9718_v18, %v5186_v8  ;;  %s6543_s2 = sld [smem:[#allocation6 + $0x585]]  ;;  %v4748_v29 = vpack.i.bf16 %v6555_v62, %v6545_v13  ;;  %v2322_v18 = vadd.f32 %v2321_v40, %v2318_v49  ;;  %v2153_v24 = vadd.f32 %v2152_v31, %v2149_v32 }
 0x2a4   :  { %s6548_s14 = sld [smem:[#allocation6 + $0x586]] }
 0x2a5   :  { %v1982_v25 = vstv %s9719_s13  ;;  %s6553_s8 = sld [smem:[#allocation6 + $0x587]]  ;;  %4749 = vrot.lane.b32.xlu1 %v4748_v29, %s9591_s22  ;;  %4744 = vrot.lane.b32.xlu0 %v4748_v29, %s9592_s17  ;;  %v2326_v19 = vadd.f32 %v9729_v55, %v2322_v18  ;;  %v2348_v18 = vstv %s6447_s4 }
 0x2a6   :  { %s6560_s15 = sld [smem:[#allocation6 + $0x588]]  ;;  %v6573_v52 = vmul.f32 %v1982_v25, %v6011_v7  ;;  %v2167_v25 = vstv %s6375_s29 }
 0x2a7   :  { %v1986_v17 = vstv %s9720_s6  ;;  %s6565_s13 = sld [smem:[#allocation6 + $0x589]]  ;;  %v2330_v20 = vadd.f32 %v2329_v16, %v2326_v19  ;;  %v2341_v19 = vmul.f32 %v2340_v41, %v5836_v53  ;;  %v2533_v41 = vstv %s6532_s1 }
 0x2a8   :  { %s6576_s21 = sld [smem:[#allocation6 + $0x58a]] }
 0x2a9   :  { %s6602_s10 = sld [smem:[#allocation6 + $0x58c]]  ;;  %1794 = vrot.lane.b32.xlu1 %v6555_v62, %s9714_s16  ;;  %1589 = vrot.lane.b32.xlu0 %v6545_v13, %s9714_s16  ;;  %v2334_v31 = vadd.f32 %v2333_v9, %v2330_v20  ;;  %v2522_v20 = vstv %s6512_s23 }
 0x2aa   :  { %9721 = sst [smem:[#allocation94_spill]] %s6548_s14 }
 0x2ab   :  { %9722 = sst [smem:[#allocation68_spill]] %s6553_s8 }
 0x2ac   :  { %s9725_s8 = sld [smem:[#allocation134_spill]] }
 0x2ad   :  { %9724 = sst [smem:[#allocation70_spill]] %s6565_s13 }
 0x2ae   :  { %9726 = sst [smem:[#allocation95_spill]] %s6576_s21 }
 0x2af   :  { %s6590_s21 = sld [smem:[#allocation6 + $0x58b]] }
 0x2b0   :  { %s9727_s12 = sld [smem:[#allocation63_spill]] }
 0x2b1   :  { %s9728_s13 = sld [smem:[#allocation66_spill]] }
 0x2b2   :  { %v3868_v60 = vld [vmem:[%s9725_s8 + $0x1f8] sm:$0xff]  ;;  %v3867_v26 = vld [vmem:[%s9725_s8 + $0x1f0] sm:$0xff]  ;;  %v3866_v39 = vld [vmem:[%s9725_s8 + $0x1e8] sm:$0xff]  ;;  %s6612_s19 = sld [smem:[#allocation6 + $0x58d]] }
 0x2b3   :  { %534 = vmatprep.subr.mxu0 %v3868_v60  ;;  %v401_v30 = vld [vmem:[%s9725_s8 + $0xf8] sm:$0xff]  ;;  %v400_v21 = vld [vmem:[%s9725_s8 + $0xf0] sm:$0xff]  ;;  %v399_v45 = vld [vmem:[%s9725_s8 + $0xe8] sm:$0xff]  ;;  %s6618_s25 = sld [smem:[#allocation6 + $0x58e]]  ;;  %v2337_v60 = vmul.f32 %v2336_v47, %v5839_v0 }
 0x2b4   :  { %605 = vmatprep.subr.mxu1 %v401_v30  ;;  %535 = vmatpush1.msra.mxu0 %v3867_v26  ;;  %v3865_v34 = vld [vmem:[%s9725_s8 + $0x1e0] sm:$0xff]  ;;  %v3864_v35 = vld [vmem:[%s9725_s8 + $0x1d8] sm:$0xff]  ;;  %s9731_s7 = sld [smem:[#allocation92_spill]]  ;;  %v3863_v43 = vld [vmem:[%s9725_s8 + $0x1d0] sm:$0xff] }
 0x2b5   :  { %v398_v42 = vld [vmem:[%s9725_s8 + $0xe0] sm:$0xff]  ;;  %606 = vmatpush1.msra.mxu1 %v400_v21  ;;  %536 = vmatprep.subr.mxu0 %v3866_v39  ;;  %s6626_s27 = sld [smem:[#allocation6 + $0x58f]]  ;;  %v397_v58 = vld [vmem:[%s9725_s8 + $0xd8] sm:$0xff]  ;;  %v396_v29 = vld [vmem:[%s9725_s8 + $0xd0] sm:$0xff]  ;;  %v2157_v21 = vadd.f32 %v2156_v11, %v2153_v24  ;;  %v2168_v39 = vmul.f32 %v2167_v25, %v5939_v1  ;;  %v2338_v55 = vadd.f32 %v2337_v60, %v2334_v31 }
 0x2b6   :  { %607 = vmatprep.subr.mxu1 %v399_v45  ;;  %v2175_v49 = vstv %s9727_s12  ;;  %537 = vmatpush1.msra.mxu0 %v3865_v34  ;;  %s6640_s12 = sld [smem:[#allocation6 + $0x590]]  ;;  %v3862_v40 = vld [vmem:[%s9725_s8 + $0x1c8] sm:$0xff]  ;;  %v9733_v30 = vld [vmem:[#allocation128_spill] sm:$0xff]  ;;  %v3861_v50 = vld [vmem:[%s9725_s8 + $0x1c0] sm:$0xff]  ;;  %v2172_v45 = vmul.f32 %v2171_v27, %v5958_v48 }
 0x2b7   :  { %v2183_v15 = vstv %s9728_s13  ;;  %608 = vmatpush1.msra.mxu1 %v398_v42  ;;  %v1976_v26 = vadd.f32 %v9733_v30, %v1972_v44  ;;  %s6651_s29 = sld [smem:[#allocation6 + $0x591]]  ;;  %538 = vmatprep.subr.mxu0 %v3864_v35  ;;  %v395_v37 = vld [vmem:[%s9725_s8 + $0xc8] sm:$0xff]  ;;  %v394_v16 = vld [vmem:[%s9725_s8 + $0xc0] sm:$0xff]  ;;  %v3860_v34 = vld [vmem:[%s9725_s8 + $0x1b8] sm:$0xff]  ;;  %v6672_v32 = vmul.f32 %v2175_v49, %v5955_v57 }
 0x2b8   :  { %s9734_s11 = sld [smem:[#allocation65_spill]]  ;;  %609 = vmatprep.subr.mxu1 %v397_v58  ;;  %539 = vmatpush1.msra.mxu0 %v3863_v43  ;;  %v9735_v42 = vld [vmem:[#allocation130_spill] sm:$0xff]  ;;  %v6675_v4 = vmul.f32 %v2183_v15, %v5995_v46  ;;  %v393_v11 = vld [vmem:[%s9725_s8 + $0xb8] sm:$0xff]  ;;  %v3859_v25 = vld [vmem:[%s9725_s8 + $0x1b0] sm:$0xff]  ;;  %v2352_v35 = vstv %s6454_s28  ;;  %v2349_v43 = vmul.f32 %v2348_v18, %v5863_v12 }
 0x2b9   :  { %9730 = sst [smem:[#allocation71_spill]] %s6618_s25  ;;  %v2161_v44 = vadd.f32 %v9735_v42, %v2157_v21  ;;  %610 = vmatpush1.msra.mxu1 %v396_v29  ;;  %540 = vmatprep.subr.mxu0 %v3862_v40  ;;  %v392_v24 = vld [vmem:[%s9725_s8 + $0xb0] sm:$0xff]  ;;  %v3858_v49 = vld [vmem:[%s9725_s8 + $0x1a8] sm:$0xff]  ;;  %v1980_v15 = vadd.f32 %v6540_v36, %v1976_v26  ;;  %v3857_v60 = vld [vmem:[%s9725_s8 + $0x1a0] sm:$0xff]  ;;  %v2342_v29 = vadd.f32 %v2341_v19, %v2338_v55  ;;  %v2529_v40 = vstv %s6523_s3 }
 0x2ba   :  { %v2187_v28 = vstv %s9731_s7  ;;  %s6662_s7 = sld [smem:[#allocation6 + $0x592]]  ;;  %611 = vmatprep.subr.mxu1 %v395_v37  ;;  %541 = vmatpush1.msra.mxu0 %v3861_v50  ;;  %v391_v9 = vld [vmem:[%s9725_s8 + $0xa8] sm:$0xff]  ;;  %v2523_v36 = vmul.f32 %v2522_v20, %v5766_v5  ;;  %v390_v30 = vld [vmem:[%s9725_s8 + $0xa0] sm:$0xff]  ;;  %v2353_v21 = vmul.f32 %v2352_v35, %v5874_v51  ;;  %v3856_v37 = vld [vmem:[%s9725_s8 + $0x198] sm:$0xff]  ;;  %v2534_v19 = vmul.f32 %v2533_v41, %v5804_v10 }
 0x2bb   :  { %s6678_s4 = sld [smem:[#allocation6 + $0x593]]  ;;  %v6687_v27 = vmul.f32 %v2187_v28, %v6011_v7  ;;  %v2165_v58 = vadd.f32 %v2164_v38, %v2161_v44  ;;  %612 = vmatpush1.msra.mxu1 %v394_v16  ;;  %542 = vmatprep.subr.mxu0 %v3860_v34  ;;  %v2525_v38 = vstv %s6517_s18  ;;  %v389_v50 = vld [vmem:[%s9725_s8 + $0x98] sm:$0xff]  ;;  %v9738_v31 = vld [vmem:[#allocation133_spill] sm:$0xff]  ;;  %v2360_v16 = vstv %s6466_s30  ;;  %v3855_v42 = vld [vmem:[%s9725_s8 + $0x190] sm:$0xff] }
 0x2bc   :  { %9732 = sst [smem:[#allocation73_spill]] %s6640_s12  ;;  %613 = vmatprep.subr.mxu1 %v393_v11  ;;  %543 = vmatpush1.msra.mxu0 %v3859_v25  ;;  %v2526_v28 = vmul.f32 %v2525_v38, %v5763_v2  ;;  %v2346_v18 = vadd.f32 %v9738_v31, %v2342_v29  ;;  %v2368_v34 = vstv %s6472_s0  ;;  %v9739_v25 = vld [vmem:[#allocation58_spill] sm:$0xff]  ;;  %v388_v35 = vld [vmem:[%s9725_s8 + $0x90] sm:$0xff]  ;;  %v2541_v20 = vstv %s6543_s2  ;;  %v385_v31 = vld [vmem:[%s9725_s8 + $0x78] sm:$0xff] }
 0x2bd   :  { %s6691_s26 = sld [smem:[#allocation7 + $0xb]]  ;;  %v2169_v26 = vadd.f32 %v2168_v39, %v2165_v58  ;;  %614 = vmatpush1.msra.mxu1 %v392_v24  ;;  %544 = vmatprep.subr.mxu0 %v3858_v49  ;;  %v2356_v39 = vstv %s6460_s5  ;;  %v2530_v55 = vmul.f32 %v2529_v40, %v9739_v25  ;;  %v3854_v24 = vld [vmem:[%s9725_s8 + $0x188] sm:$0xff]  ;;  %v1984_v49 = vadd.f32 %v6573_v52, %v1980_v15  ;;  %v3853_v52 = vld [vmem:[%s9725_s8 + $0x180] sm:$0xff] }
 0x2be   :  { %v2191_v47 = vstv %s9734_s11  ;;  %s6702_s28 = sld [smem:[#allocation6 + $0x600]]  ;;  %615 = vmatprep.subr.mxu1 %v391_v9  ;;  %545 = vmatpush1.msra.mxu0 %v3857_v60  ;;  %v2527_v11 = vadd.f32 %v2526_v28, %v2523_v36  ;;  %v2537_v58 = vstv %s6536_s24  ;;  %v387_v9 = vld [vmem:[%s9725_s8 + $0x88] sm:$0xff]  ;;  %v2357_v29 = vmul.f32 %v2356_v39, %v5891_v14  ;;  %v386_v15 = vld [vmem:[%s9725_s8 + $0x80] sm:$0xff]  ;;  %v9744_v28 = vld [vmem:[#allocation131_spill] sm:$0xff] }
 0x2bf   :  { %s6713_s23 = sld [smem:[#allocation6 + $0x601]]  ;;  %v2173_v44 = vadd.f32 %v2172_v45, %v2169_v26  ;;  %616 = vmatpush1.msra.mxu1 %v390_v30  ;;  %v2350_v45 = vadd.f32 %v2349_v43, %v2346_v18  ;;  %546 = vmatprep.subr.mxu0 %v3856_v37  ;;  %v2361_v40 = vmul.f32 %v2360_v16, %v5906_v54  ;;  %v3852_v26 = vld [vmem:[%s9725_s8 + $0x178] sm:$0xff]  ;;  %v3851_v18 = vld [vmem:[%s9725_s8 + $0x170] sm:$0xff] }
 0x2c0   :  { %s6721_s12 = sld [smem:[#allocation6 + $0x602]]  ;;  %617 = vmatprep.subr.mxu1 %v389_v50  ;;  %v2531_v38 = vadd.f32 %v2530_v55, %v2527_v11  ;;  %547 = vmatpush1.msra.mxu0 %v3855_v42  ;;  %v2538_v50 = vmul.f32 %v2537_v58, %v5801_v3  ;;  %v1987_v39 = vadd.f32 %v1986_v17, %v1984_v49  ;;  %v384_v11 = vld [vmem:[%s9725_s8 + $0x70] sm:$0xff]  ;;  %v2553_v58 = vstv %s6560_s15 }
 0x2c1   :  { %9736 = sst [smem:[#allocation96_spill]] %s6678_s4  ;;  %v2177_v60 = vadd.f32 %v6672_v32, %v2173_v44  ;;  %v2354_v43 = vadd.f32 %v2353_v21, %v2350_v45  ;;  %618 = vmatpush1.msra.mxu1 %v388_v35  ;;  %548 = vmatprep.subr.mxu0 %v3854_v24  ;;  %v2542_v21 = vmul.f32 %v2541_v20, %v5839_v0  ;;  %v383_v24 = vld [vmem:[%s9725_s8 + $0x68] sm:$0xff]  ;;  %v3849_v20 = vld [vmem:[%s9725_s8 + $0x160] sm:$0xff] }
 0x2c2   :  { %s6733_s1 = sld [smem:[#allocation6 + $0x603]]  ;;  %v2535_v37 = vadd.f32 %v2534_v19, %v2531_v38  ;;  %619 = vmatprep.subr.mxu1 %v387_v9  ;;  %v2369_v42 = vmul.f32 %v2368_v34, %v5931_v59  ;;  %549 = vmatpush1.msra.mxu0 %v3853_v52  ;;  %v3850_v34 = vld [vmem:[%s9725_s8 + $0x168] sm:$0xff]  ;;  %v382_v38 = vld [vmem:[%s9725_s8 + $0x60] sm:$0xff]  ;;  %v3848_v52 = vld [vmem:[%s9725_s8 + $0x158] sm:$0xff] }
 0x2c3   :  { %9737 = sst [smem:[#allocation72_spill]] %s6691_s26  ;;  %v2181_v41 = vadd.f32 %v9744_v28, %v2177_v60  ;;  %v2358_v16 = vadd.f32 %v2357_v29, %v2354_v43  ;;  %620 = vmatpush1.msra.mxu1 %v386_v15  ;;  %550 = vmatprep.subr.mxu0 %v3852_v26  ;;  %v6829_v15 = vmax.f32 %v1987_v39, 0.0  ;;  %v2565_v39 = vstv %s6590_s21 }
 0x2c4   :  { %s9740_s16 = sld [smem:[#allocation15_spill]]  ;;  %v2539_v35 = vadd.f32 %v2538_v50, %v2535_v37  ;;  %621 = vmatprep.subr.mxu1 %v385_v31  ;;  %551 = vmatpush1.msra.mxu0 %v3851_v18  ;;  %v2554_v37 = vmul.f32 %v2553_v58, %v5863_v12  ;;  %v380_v50 = vld [vmem:[%s9725_s8 + $0x50] sm:$0xff] }
 0x2c5   :  { %s6740_s5 = sld [smem:[#allocation6 + $0x604]]  ;;  %v2185_v55 = vadd.f32 %v6675_v4, %v2181_v41  ;;  %v2362_v49 = vadd.f32 %v2361_v40, %v2358_v16  ;;  %622 = vmatpush1.msra.mxu1 %v384_v11  ;;  %552 = vmatprep.subr.mxu0 %v3850_v34  ;;  %v379_v16 = vld [vmem:[%s9725_s8 + $0x48] sm:$0xff]  ;;  %v378_v34 = vld [vmem:[%s9725_s8 + $0x40] sm:$0xff] }
 0x2c6   :  { %s9741_s3 = sld [smem:[#allocation93_spill]]  ;;  %v2543_v60 = vadd.f32 %v2542_v21, %v2539_v35  ;;  %623 = vmatprep.subr.mxu1 %v383_v24  ;;  %553 = vmatpush1.msra.mxu0 %v3849_v20  ;;  %v3846_v21 = vld [vmem:[%s9725_s8 + $0x148] sm:$0xff]  ;;  %v2727_v35 = vstv %s6702_s28  ;;  %v2734_v58 = vstv %s6721_s12 }
 0x2c7   :  { %s9742_s9 = sld [smem:[#allocation16_spill]]  ;;  %v2189_v9 = vadd.f32 %v6687_v27, %v2185_v55  ;;  %v2366_v27 = vadd.f32 %v6530_v33, %v2362_v49  ;;  %v9753_v33 = vld [vmem:[#allocation64_spill] sm:$0xff]  ;;  %624 = vmatpush1.msra.mxu1 %v382_v38  ;;  %554 = vmatprep.subr.mxu0 %v3848_v52  ;;  %v2569_v55 = vstv %s6602_s10  ;;  %v2728_v49 = vmul.f32 %v2727_v35, %v5766_v5 }
 0x2c8   :  { %s6751_s20 = sld [smem:[#allocation6 + $0x605]]  ;;  %v2735_v52 = vmul.f32 %v2734_v58, %v9739_v25 }
 0x2c9   :  { %s6759_s30 = sld [smem:[#allocation6 + $0x606]]  ;;  %v2192_v26 = vadd.f32 %v2191_v47, %v2189_v9  ;;  %v2370_v31 = vadd.f32 %v2369_v42, %v2366_v27  ;;  %v3845_v42 = vld [vmem:[%s9725_s8 + $0x140] sm:$0xff]  ;;  %v2738_v27 = vstv %s6733_s1 }
 0x2ca   :  { %v2372_v36 = vstv %s9740_s16  ;;  %s9743_s18 = sld [smem:[#allocation94_spill]] }
 0x2cb   :  { %s6770_s16 = sld [smem:[#allocation6 + $0x607]]  ;;  %v2373_v19 = vmul.f32 %v2372_v36, %v5939_v1 }
 0x2cc   :  { %v2376_v32 = vstv %s9741_s3  ;;  %s6778_s24 = sld [smem:[#allocation6 + $0x608]] }
 0x2cd   :  { %v2380_v30 = vstv %s9742_s9  ;;  %s9745_s25 = sld [smem:[#allocation68_spill]]  ;;  %v6798_v17 = vmul.f32 %v2376_v32, %v5958_v48  ;;  %v381_v32 = vld [vmem:[%s9725_s8 + $0x58] sm:$0xff]  ;;  %v2374_v24 = vadd.f32 %v2373_v19, %v2370_v31  ;;  %v9756_v31 = vld [vmem:[#allocation80_spill] sm:$0xff] }
 0x2ce   :  { %s6790_s13 = sld [smem:[#allocation6 + $0x609]]  ;;  %v6809_v4 = vmul.f32 %v2380_v30, %v5955_v57  ;;  %v3847_v30 = vld [vmem:[%s9725_s8 + $0x150] sm:$0xff]  ;;  %625 = vmatprep.subr.mxu1 %v381_v32  ;;  %v3844_v19 = vld [vmem:[%s9725_s8 + $0x138] sm:$0xff] }
 0x2cf   :  { %s9747_s6 = sld [smem:[#allocation70_spill]]  ;;  %555 = vmatpush1.msra.mxu0 %v3847_v30  ;;  %626 = vmatpush1.msra.mxu1 %v380_v50  ;;  %v3843_v32 = vld [vmem:[%s9725_s8 + $0x130] sm:$0xff]  ;;  %v3842_v30 = vld [vmem:[%s9725_s8 + $0x128] sm:$0xff] }
 0x2d0   :  { %v2545_v44 = vstv %s9743_s18  ;;  %s6800_s3 = sld [smem:[#allocation6 + $0x60a]]  ;;  %556 = vmatprep.subr.mxu0 %v3846_v21  ;;  %627 = vmatprep.subr.mxu1 %v379_v16  ;;  %v375_v50 = vld [vmem:[%s9725_s8 + $0x28] sm:$0xff] }
 0x2d1   :  { %s9749_s26 = sld [smem:[#allocation67_spill]]  ;;  %v2546_v29 = vmul.f32 %v2545_v44, %v5836_v53  ;;  %v6862_v44 = vmax.f32 %v2192_v26, 0.0  ;;  %557 = vmatpush1.msra.mxu0 %v3845_v42  ;;  %628 = vmatpush1.msra.mxu1 %v378_v34  ;;  %v2566_v42 = vmul.f32 %v2565_v39, %v5906_v54  ;;  %v2573_v34 = vstv %s6612_s19 }
 0x2d2   :  { %s9750_s14 = sld [smem:[#allocation69_spill]]  ;;  %558 = vmatprep.subr.mxu0 %v3844_v19  ;;  %v2570_v39 = vmul.f32 %v2569_v55, %v5186_v8  ;;  %v3839_v55 = vld [vmem:[%s9725_s8 + $0x110] sm:$0xff] }
 0x2d3   :  { %v2549_v45 = vstv %s9745_s25  ;;  %s6813_s4 = sld [smem:[#allocation6 + $0x60b]]  ;;  %v2547_v28 = vadd.f32 %v2546_v29, %v2543_v60  ;;  %v4758_v20 = vpack.i.bf16 %v6862_v44, %v6829_v15  ;;  %v377_v29 = vld [vmem:[%s9725_s8 + $0x38] sm:$0xff]  ;;  %559 = vmatpush1.msra.mxu0 %v3843_v32  ;;  %v2581_v32 = vstv %s6626_s27 }
 0x2d4   :  { %9746 = sst [smem:[#allocation74_spill]] %s6790_s13  ;;  %v2550_v41 = vmul.f32 %v2549_v45, %v9753_v33  ;;  %v2730_v45 = vstv %s6713_s23  ;;  %629 = vmatprep.subr.mxu1 %v377_v29  ;;  %560 = vmatprep.subr.mxu0 %v3842_v30  ;;  %v2750_v29 = vstv %s6759_s30 }
 0x2d5   :  { %v2557_v36 = vstv %s9747_s6  ;;  %s6821_s18 = sld [smem:[#allocation6 + $0x60c]]  ;;  %v2731_v60 = vmul.f32 %v2730_v45, %v5763_v2  ;;  %4759 = vrot.lane.b32.xlu1 %v4758_v20, %s9591_s22  ;;  %4754 = vrot.lane.b32.xlu0 %v4758_v20, %s9592_s17  ;;  %v3840_v20 = vld [vmem:[%s9725_s8 + $0x118] sm:$0xff] }
 0x2d6   :  { %9748 = sst [smem:[#allocation111_spill]] %s6800_s3  ;;  %v2558_v47 = vmul.f32 %v2557_v36, %v5874_v51  ;;  %v2551_v11 = vadd.f32 %v2550_v41, %v2547_v28  ;;  %v2378_v36 = vadd.f32 %v6798_v17, %v2374_v24  ;;  %v376_v17 = vld [vmem:[%s9725_s8 + $0x30] sm:$0xff]  ;;  %v2739_v41 = vmul.f32 %v2738_v27, %v5804_v10 }
 0x2d7   :  { %v2388_v43 = vstv %s9749_s26  ;;  %s9751_s13 = sld [smem:[#allocation95_spill]]  ;;  %v2732_v28 = vadd.f32 %v2731_v60, %v2728_v49  ;;  %630 = vmatpush1.msra.mxu1 %v376_v17  ;;  %v2574_v27 = vmul.f32 %v2573_v34, %v5931_v59  ;;  %v3838_v17 = vld [vmem:[%s9725_s8 + $0x108] sm:$0xff] }
 0x2d8   :  { %v2392_v40 = vstv %s9750_s14  ;;  %s6834_s3 = sld [smem:[#allocation6 + $0x60d]]  ;;  %v2555_v9 = vadd.f32 %v2554_v37, %v2551_v11  ;;  %v2742_v37 = vstv %s6740_s5  ;;  %v2382_v21 = vadd.f32 %v6809_v4, %v2378_v36  ;;  %v3841_v4 = vld [vmem:[%s9725_s8 + $0x120] sm:$0xff]  ;;  %631 = vmatprep.subr.mxu1 %v375_v50  ;;  %v372_v36 = vld [vmem:[%s9725_s8 + $0x10] sm:$0xff] }
 0x2d9   :  { %s6846_s9 = sld [smem:[#allocation6 + $0x60e]]  ;;  %v6921_v11 = vmul.f32 %v2388_v43, %v5995_v46  ;;  %v2736_v24 = vadd.f32 %v2735_v52, %v2732_v28  ;;  %v374_v43 = vld [vmem:[%s9725_s8 + $0x20] sm:$0xff]  ;;  %v6939_v49 = vmul.f32 %v2392_v40, %v6011_v7  ;;  %v2743_v58 = vmul.f32 %v2742_v37, %v5801_v3  ;;  %v373_v40 = vld [vmem:[%s9725_s8 + $0x18] sm:$0xff]  ;;  %561 = vmatpush1.msra.mxu0 %v3841_v4  ;;  %v371_v37 = vld [vmem:[%s9725_s8 + $0x8] sm:$0xff] }
 0x2da   :  { %s6857_s11 = sld [smem:[#allocation6 + $0x60f]]  ;;  %v2559_v26 = vadd.f32 %v2558_v47, %v2555_v9  ;;  %v2746_v47 = vstv %s6751_s20  ;;  %632 = vmatpush1.msra.mxu1 %v374_v43  ;;  %562 = vmatprep.subr.mxu0 %v3840_v20  ;;  %v3837_v50 = vld [vmem:[%s9725_s8 + $0x100] sm:$0xff]  ;;  %v3921_v43 = vld [vmem:[%s9725_s8 + $0x2f8] sm:$0xff] }
 0x2db   :  { %s6877_s10 = sld [smem:[#allocation6 + $0x611]]  ;;  %v2740_v60 = vadd.f32 %v2739_v41, %v2736_v24  ;;  %v2747_v19 = vmul.f32 %v2746_v47, %v5839_v0  ;;  %633 = vmatprep.subr.mxu1 %v373_v40  ;;  %v2754_v47 = vstv %s6770_s16  ;;  %563 = vmatpush1.msra.mxu0 %v3839_v55  ;;  %v2758_v24 = vstv %s6778_s24  ;;  %s9767_s16 = smov 125  }
 0x2dc   :  { %s6882_s28 = sld [smem:[#allocation6 + $0x612]]  ;;  %634 = vmatpush1.msra.mxu1 %v372_v36  ;;  %564 = vmatprep.subr.mxu0 %v3838_v17  ;;  %v2759_v36 = vmul.f32 %v2758_v24, %v5863_v12 }
 0x2dd   :  { %v2561_v18 = vstv %s9751_s13  ;;  %s9754_s12 = sld [smem:[#allocation56_spill]]  ;;  %v2744_v41 = vadd.f32 %v2743_v58, %v2740_v60  ;;  %v2582_v58 = vmul.f32 %v2581_v32, %v5958_v48  ;;  %635 = vmatprep.subr.mxu1 %v371_v37  ;;  %565 = vmatpush1.msra.mxu0 %v3837_v50 }
 0x2de   :  { %9752 = sst [smem:[#allocation99_spill]] %s6834_s3  ;;  %v2562_v38 = vmul.f32 %v2561_v18, %v5891_v14  ;;  %808 = vmatprep.subr.mxu0 %v3921_v43 }
 0x2df   :  { %s6866_s3 = sld [smem:[#allocation6 + $0x610]]  ;;  %v2748_v34 = vadd.f32 %v2747_v19, %v2744_v41  ;;  %v2755_v19 = vmul.f32 %v2754_v47, %v9753_v33  ;;  %v2774_v47 = vstv %s6821_s18 }
 0x2e0   :  { %s6894_s21 = sld [smem:[#allocation6 + $0x613]]  ;;  %v2563_v35 = vadd.f32 %v2562_v38, %v2559_v26 }
 0x2e1   :  { %s6909_s1 = sld [smem:[#allocation7 + $0xc]] }
 0x2e2   :  { %s9758_s2 = sld [smem:[#allocation71_spill]]  ;;  %v2567_v9 = vadd.f32 %v2566_v42, %v2563_v35  ;;  %v370_v35 = vld [vmem:[%s9725_s8] sm:$0xff] }
 0x2e3   :  { %v9757_v18 = vstv %s9754_s12  ;;  %s6924_s6 = sld [smem:[#allocation6 + $0x680]]  ;;  %636 = vmatpush1.msra.mxu1 %v370_v35 }
 0x2e4   :  { %v2385_v16 = vmul.f32 %v9757_v18, %v9756_v31  ;;  %s6928_s5 = sld [smem:[#allocation6 + $0x681]]  ;;  %v2571_v30 = vadd.f32 %v2570_v39, %v2567_v9  ;;  %v2593_v18 = vstv %s6662_s7  ;;  %v3974_v39 = vld [vmem:[%s9725_s8 + $0x3f8] sm:$0xff] }
 0x2e5   :  { %s9759_s19 = sld [smem:[#allocation110_spill]]  ;;  %1013 = vmatprep.subr.mxu1 %v3974_v39 }
 0x2e6   :  { %s6944_s20 = sld [smem:[#allocation6 + $0x682]]  ;;  %v2386_v38 = vadd.f32 %v2385_v16, %v2382_v21  ;;  %v2589_v21 = vstv %s6651_s29  ;;  %v2751_v16 = vmul.f32 %v2750_v29, %v5836_v53  ;;  %v2575_v42 = vadd.f32 %v2574_v27, %v2571_v30 }
 0x2e7   :  { %9755 = sst [smem:[#allocation75_spill]] %s6909_s1  ;;  %v2590_v9 = vmul.f32 %v2589_v21, %v9756_v31  ;;  %v2770_v30 = vstv %s6813_s4 }
 0x2e8   :  { %v2577_v45 = vstv %s9758_s2  ;;  %s9760_s2 = smov 125   ;;  %s9761_s26 = sld [smem:[#allocation73_spill]]  ;;  %v2752_v60 = vadd.f32 %v2751_v16, %v2748_v34 }
 0x2e9   :  { %2204 = vrot.lane.b32.xlu1 %v6862_v44, %s9760_s2  ;;  %1999 = vrot.lane.b32.xlu0 %v6829_v15, %s9760_s2  ;;  %s6961_s15 = sld [smem:[#allocation6 + $0x683]]  ;;  %v2578_v26 = vmul.f32 %v2577_v45, %v5939_v1  ;;  %v2390_v45 = vadd.f32 %v6921_v11, %v2386_v38  ;;  %v2594_v11 = vmul.f32 %v2593_v18, %v5995_v46 }
 0x2ea   :  { %s6969_s13 = sld [smem:[#allocation6 + $0x684]]  ;;  %v2756_v32 = vadd.f32 %v2755_v19, %v2752_v60  ;;  %v2935_v41 = vstv %s6928_s5 }
 0x2eb   :  { %v2396_v52 = vstv %s9759_s19  ;;  %s6976_s12 = sld [smem:[#allocation6 + $0x685]]  ;;  %v2579_v55 = vadd.f32 %v2578_v26, %v2575_v42  ;;  %v2394_v26 = vadd.f32 %v6939_v49, %v2390_v45  ;;  %v2936_v16 = vmul.f32 %v2935_v41, %v5763_v2 }
 0x2ec   :  { %s9762_s0 = sld [smem:[#allocation74_spill]]  ;;  %v2939_v37 = vstv %s6944_s20  ;;  %v2760_v21 = vadd.f32 %v2759_v36, %v2756_v32  ;;  %v2775_v36 = vmul.f32 %v2774_v47, %v5186_v8  ;;  %v2794_v47 = vstv %s6877_s10 }
 0x2ed   :  { %s6988_s14 = sld [smem:[#allocation6 + $0x686]]  ;;  %v2583_v27 = vadd.f32 %v2582_v58, %v2579_v55  ;;  %v2940_v35 = vmul.f32 %v2939_v37, %v9739_v25  ;;  %v2397_v39 = vadd.f32 %v2396_v52, %v2394_v26  ;;  %v2771_v58 = vmul.f32 %v2770_v30, %v5906_v54 }
 0x2ee   :  { %v2585_v28 = vstv %s9761_s26  ;;  %s9763_s26 = sld [smem:[#allocation111_spill]]  ;;  %v2786_v26 = vstv %s6857_s11 }
 0x2ef   :  { %s6995_s1 = sld [smem:[#allocation6 + $0x687]]  ;;  %v2586_v20 = vmul.f32 %v2585_v28, %v5955_v57  ;;  %v2932_v28 = vstv %s6924_s6  ;;  %v2943_v49 = vstv %s6961_s15 }
 0x2f0   :  { %s9764_s25 = sld [smem:[#allocation96_spill]]  ;;  %v2933_v18 = vmul.f32 %v2932_v28, %v5766_v5  ;;  %v2947_v42 = vstv %s6969_s13  ;;  %v2944_v43 = vmul.f32 %v2943_v49, %v5804_v10 }
 0x2f1   :  { %s7007_s24 = sld [smem:[#allocation6 + $0x688]]  ;;  %v2587_v50 = vadd.f32 %v2586_v20, %v2583_v27  ;;  %v2951_v20 = vstv %s6976_s12  ;;  %v2948_v52 = vmul.f32 %v2947_v42, %v5801_v3 }
 0x2f2   :  { %v2762_v4 = vstv %s9762_s0  ;;  %s7011_s2 = sld [smem:[#allocation6 + $0x689]]  ;;  %v2952_v32 = vmul.f32 %v2951_v20, %v5839_v0 }
 0x2f3   :  { %v2763_v38 = vmul.f32 %v2762_v4, %v5874_v51  ;;  %s7017_s0 = sld [smem:[#allocation6 + $0x68a]]  ;;  %v2591_v34 = vadd.f32 %v2590_v9, %v2587_v50  ;;  %v2937_v4 = vadd.f32 %v2936_v16, %v2933_v18  ;;  %v2955_v28 = vstv %s6988_s14 }
 0x2f4   :  { %v2766_v40 = vstv %s9763_s26  ;;  %s7021_s23 = sld [smem:[#allocation6 + $0x68b]]  ;;  %v2790_v16 = vstv %s6866_s3 }
 0x2f5   :  { %v2767_v17 = vmul.f32 %v2766_v40, %v5891_v14  ;;  %s7027_s26 = sld [smem:[#allocation6 + $0x68c]]  ;;  %v2764_v24 = vadd.f32 %v2763_v38, %v2760_v21  ;;  %v2595_v40 = vadd.f32 %v2594_v11, %v2591_v34  ;;  %v2941_v60 = vadd.f32 %v2940_v35, %v2937_v4 }
 0x2f6   :  { %v2597_v29 = vstv %s9764_s25  ;;  %s7031_s30 = sld [smem:[#allocation6 + $0x68d]]  ;;  %v2782_v38 = vstv %s6846_s9  ;;  %v2959_v21 = vstv %s6995_s1  ;;  %v2956_v34 = vmul.f32 %v2955_v28, %v5836_v53 }
 0x2f7   :  { %s9765_s4 = sld [smem:[#allocation99_spill]]  ;;  %v2598_v45 = vmul.f32 %v2597_v29, %v6011_v7  ;;  %v2768_v55 = vadd.f32 %v2767_v17, %v2764_v24  ;;  %v2945_v11 = vadd.f32 %v2944_v43, %v2941_v60  ;;  %v7061_v17 = vmax.f32 %v2397_v39, 0.0 }
 0x2f8   :  { %s7037_s6 = sld [smem:[#allocation6 + $0x68e]]  ;;  %v2783_v18 = vmul.f32 %v2782_v38, %v5939_v1  ;;  %v2787_v24 = vmul.f32 %v2786_v26, %v5958_v48  ;;  %v2798_v4 = vstv %s6882_s28  ;;  %v2960_v43 = vmul.f32 %v2959_v21, %v9753_v33 }
 0x2f9   :  { %s9766_s5 = sld [smem:[#allocation72_spill]]  ;;  %v2599_v29 = vadd.f32 %v2598_v45, %v2595_v40  ;;  %v2772_v27 = vadd.f32 %v2771_v58, %v2768_v55  ;;  %v2949_v50 = vadd.f32 %v2948_v52, %v2945_v11  ;;  %v2963_v39 = vstv %s7007_s24 }
 0x2fa   :  { %s7040_s20 = sld [smem:[#allocation6 + $0x68f]]  ;;  %v2791_v40 = vmul.f32 %v2790_v16, %v5955_v57  ;;  %v2795_v55 = vmul.f32 %v2794_v47, %v9756_v31  ;;  %v2967_v60 = vstv %s7011_s2  ;;  %v2964_v38 = vmul.f32 %v2963_v39, %v5863_v12 }
 0x2fb   :  { %s7047_s18 = sld [smem:[#allocation6 + $0x690]]  ;;  %v2776_v37 = vadd.f32 %v2775_v36, %v2772_v27  ;;  %v2953_v42 = vadd.f32 %v2952_v32, %v2949_v50  ;;  %v2971_v52 = vstv %s7017_s0  ;;  %v2968_v26 = vmul.f32 %v2967_v60, %v5874_v51 }
 0x2fc   :  { %s7050_s15 = sld [smem:[#allocation6 + $0x691]]  ;;  %v2972_v50 = vmul.f32 %v2971_v52, %v5891_v14  ;;  %v2975_v21 = vstv %s7021_s23  ;;  %v2979_v47 = vstv %s7027_s26 }
 0x2fd   :  { %v2778_v9 = vstv %s9765_s4  ;;  %s7056_s19 = sld [smem:[#allocation6 + $0x700]]  ;;  %v2957_v20 = vadd.f32 %v2956_v34, %v2953_v42  ;;  %v2980_v60 = vmul.f32 %v2979_v47, %v5186_v8 }
 0x2fe   :  { %s7059_s13 = sld [smem:[#allocation6 + $0x701]]  ;;  %v2779_v30 = vmul.f32 %v2778_v9, %v5931_v59  ;;  %v2802_v9 = vstv %s6894_s21 }
 0x2ff   :  { %v2601_v19 = vstv %s9766_s5  ;;  %s7066_s9 = sld [smem:[#allocation6 + $0x702]]  ;;  %v2961_v36 = vadd.f32 %v2960_v43, %v2957_v20  ;;  %v2803_v34 = vmul.f32 %v2802_v9, %v6011_v7  ;;  %v2987_v9 = vstv %s7037_s6 }
 0x300   :  { %v2602_v41 = vadd.f32 %v2601_v19, %v2599_v29  ;;  %s7069_s12 = sld [smem:[#allocation6 + $0x692]]  ;;  %v2780_v49 = vadd.f32 %v2779_v30, %v2776_v37  ;;  %v2799_v29 = vmul.f32 %v2798_v4, %v5995_v46 }
 0x301   :  { %s7074_s29 = sld [smem:[#allocation6 + $0x703]]  ;;  %v2965_v30 = vadd.f32 %v2964_v38, %v2961_v36 }
 0x302   :  { %v7076_v35 = vmax.f32 %v2602_v41, 0.0  ;;  %s7079_s11 = sld [smem:[#allocation6 + $0x704]]  ;;  %v2784_v58 = vadd.f32 %v2783_v18, %v2780_v49 }
 0x303   :  { %s7085_s3 = sld [smem:[#allocation6 + $0x705]]  ;;  %v3137_v27 = vstv %s7056_s19  ;;  %v2969_v16 = vadd.f32 %v2968_v26, %v2965_v30 }
 0x304   :  { %v4768_v45 = vpack.i.bf16 %v7076_v35, %v7061_v17  ;;  %s7089_s10 = sld [smem:[#allocation6 + $0x693]]  ;;  %v2788_v19 = vadd.f32 %v2787_v24, %v2784_v58  ;;  %v3140_v11 = vstv %s7059_s13  ;;  %v3138_v28 = vmul.f32 %v3137_v27, %v5766_v5 }
 0x305   :  { %s7095_s28 = sld [smem:[#allocation7 + $0xd]]  ;;  %v3144_v32 = vstv %s7066_s9  ;;  %v3141_v41 = vmul.f32 %v3140_v11, %v5763_v2  ;;  %v2973_v39 = vadd.f32 %v2972_v50, %v2969_v16  ;;  %v2983_v58 = vstv %s7031_s30 }
 0x306   :  { %4769 = vrot.lane.b32.xlu1 %v4768_v45, %s9591_s22  ;;  %4764 = vrot.lane.b32.xlu0 %v4768_v45, %s9592_s17  ;;  %s7101_s14 = sld [smem:[#allocation6 + $0x706]]  ;;  %v2792_v37 = vadd.f32 %v2791_v40, %v2788_v19  ;;  %v3145_v42 = vmul.f32 %v3144_v32, %v9739_v25  ;;  %v2976_v45 = vmul.f32 %v2975_v21, %v5906_v54  ;;  %v2991_v19 = vstv %s7040_s20 }
 0x307   :  { %s7107_s21 = sld [smem:[#allocation6 + $0x707]]  ;;  %v3148_v18 = vstv %s7074_s29  ;;  %v3142_v49 = vadd.f32 %v3141_v41, %v3138_v28  ;;  %v2995_v32 = vstv %s7047_s18  ;;  %v2988_v28 = vmul.f32 %v2987_v9, %v5939_v1 }
 0x308   :  { %s7112_s1 = sld [smem:[#allocation6 + $0x708]]  ;;  %v3149_v24 = vmul.f32 %v3148_v18, %v5804_v10  ;;  %v3152_v4 = vstv %s7079_s11  ;;  %v2796_v40 = vadd.f32 %v2795_v55, %v2792_v37  ;;  %v2977_v36 = vadd.f32 %v2976_v45, %v2973_v39 }
 0x309   :  { %s7117_s7 = sld [smem:[#allocation6 + $0x709]]  ;;  %v3156_v43 = vstv %s7085_s3  ;;  %v3146_v20 = vadd.f32 %v3145_v42, %v3142_v49  ;;  %v3153_v52 = vmul.f32 %v3152_v4, %v5801_v3  ;;  %v2984_v55 = vmul.f32 %v2983_v58, %v5931_v59 }
 0x30a   :  { %2614 = vrot.lane.b32.xlu1 %v7076_v35, %s9767_s16  ;;  %2409 = vrot.lane.b32.xlu0 %v7061_v17, %s9767_s16  ;;  %s7125_s27 = sld [smem:[#allocation6 + $0x70a]]  ;;  %v3157_v27 = vmul.f32 %v3156_v43, %v5839_v0  ;;  %v2981_v26 = vadd.f32 %v2980_v60, %v2977_v36  ;;  %v2999_v41 = vstv %s7050_s15  ;;  %v2800_v50 = vadd.f32 %v2799_v29, %v2796_v40 }
 0x30b   :  { %s7131_s25 = sld [smem:[#allocation6 + $0x70b]]  ;;  %v3150_v38 = vadd.f32 %v3149_v24, %v3146_v20  ;;  %v2992_v21 = vmul.f32 %v2991_v19, %v5958_v48  ;;  %v3003_v18 = vstv %s7069_s12  ;;  %v2996_v49 = vmul.f32 %v2995_v32, %v5955_v57 }
 0x30c   :  { %s9768_s24 = sld [smem:[#allocation75_spill]]  ;;  %v3160_v30 = vstv %s7101_s14  ;;  %v2985_v47 = vadd.f32 %v2984_v55, %v2981_v26  ;;  %v3000_v4 = vmul.f32 %v2999_v41, %v9756_v31  ;;  %v3007_v29 = vstv %s7089_s10 }
 0x30d   :  { %s7135_s2 = sld [smem:[#allocation6 + $0x780]]  ;;  %v3154_v37 = vadd.f32 %v3153_v52, %v3150_v38  ;;  %v3164_v16 = vstv %s7107_s21  ;;  %v3161_v24 = vmul.f32 %v3160_v30, %v5836_v53  ;;  %v3004_v58 = vmul.f32 %v3003_v18, %v5995_v46 }
 0x30e   :  { %s7140_s0 = sld [smem:[#allocation6 + $0x781]]  ;;  %v3168_v43 = vstv %s7112_s1  ;;  %v2989_v45 = vadd.f32 %v2988_v28, %v2985_v47  ;;  %v3165_v40 = vmul.f32 %v3164_v16, %v9753_v33  ;;  %v2804_v60 = vadd.f32 %v2803_v34, %v2800_v50 }
 0x30f   :  { %s7144_s23 = sld [smem:[#allocation6 + $0x782]]  ;;  %v3158_v42 = vadd.f32 %v3157_v27, %v3154_v37  ;;  %v3172_v39 = vstv %s7117_s7  ;;  %v3011_v9 = vstv %s7095_s28  ;;  %v3169_v27 = vmul.f32 %v3168_v43, %v5863_v12 }
 0x310   :  { %s7150_s26 = sld [smem:[#allocation6 + $0x783]]  ;;  %v3176_v19 = vstv %s7125_s27  ;;  %v2993_v38 = vadd.f32 %v2992_v21, %v2989_v45  ;;  %v3173_v55 = vmul.f32 %v3172_v39, %v5874_v51  ;;  %v3008_v43 = vmul.f32 %v3007_v29, %v6011_v7 }
 0x311   :  { %s7154_s30 = sld [smem:[#allocation6 + $0x70c]]  ;;  %v3162_v20 = vadd.f32 %v3161_v24, %v3158_v42  ;;  %v3180_v37 = vstv %s7131_s25  ;;  %v3177_v21 = vmul.f32 %v3176_v19, %v5891_v14 }
 0x312   :  { %v2806_v11 = vstv %s9768_s24  ;;  %s7159_s4 = sld [smem:[#allocation6 + $0x70d]]  ;;  %v2997_v28 = vadd.f32 %v2996_v49, %v2993_v38  ;;  %v3181_v39 = vmul.f32 %v3180_v37, %v5906_v54 }
 0x313   :  { %s7163_s6 = sld [smem:[#allocation6 + $0x784]]  ;;  %v3342_v36 = vstv %s7135_s2  ;;  %v3166_v52 = vadd.f32 %v3165_v40, %v3162_v20 }
 0x314   :  { %s7169_s5 = sld [smem:[#allocation6 + $0x785]]  ;;  %v3343_v32 = vmul.f32 %v3342_v36, %v5766_v5  ;;  %v3345_v30 = vstv %s7140_s0  ;;  %v3001_v47 = vadd.f32 %v3000_v4, %v2997_v28 }
 0x315   :  { %s7173_s20 = sld [smem:[#allocation6 + $0x70e]]  ;;  %v3349_v34 = vstv %s7144_s23  ;;  %v3170_v41 = vadd.f32 %v3169_v27, %v3166_v52  ;;  %v3346_v50 = vmul.f32 %v3345_v30, %v5763_v2  ;;  %v2807_v2 = vadd.f32 %v2806_v11, %v2804_v60 }
 0x316   :  { %s7178_s18 = sld [smem:[#allocation6 + $0x786]]  ;;  %v3353_v26 = vstv %s7150_s26  ;;  %v3350_v5 = vmul.f32 %v3349_v34, %v9739_v25  ;;  %v3005_v20 = vadd.f32 %v3004_v58, %v3001_v47 }
 0x317   :  { %s7182_s15 = sld [smem:[#allocation6 + $0x70f]]  ;;  %v3184_v18 = vstv %s7154_s30  ;;  %v3354_v16 = vmul.f32 %v3353_v26, %v5804_v10  ;;  %v3174_v49 = vadd.f32 %v3173_v55, %v3170_v41  ;;  %v3347_v42 = vadd.f32 %v3346_v50, %v3343_v32  ;;  %v4720_v55 = vpop.permute.xlu1 %4719 }
 0x318   :  { %s7190_s19 = sld [smem:[#allocation6 + $0x787]]  ;;  %v3188_v40 = vstv %s7159_s4  ;;  %v3185_v4 = vmul.f32 %v3184_v18, %v5186_v8  ;;  %v3009_v11 = vadd.f32 %v3008_v43, %v3005_v20  ;;  %v7216_v58 = vmax.f32 %v2807_v2, 0.0 }
 0x319   :  { %s7194_s13 = sld [smem:[#allocation6 + $0x710]]  ;;  %v3357_v24 = vstv %s7163_s6  ;;  %v3178_v25 = vadd.f32 %v3177_v21, %v3174_v49  ;;  %v3351_v10 = vadd.f32 %v3350_v5, %v3347_v42  ;;  %v3189_v27 = vmul.f32 %v3188_v40, %v5931_v59 }
 0x31a   :  { %s7199_s9 = sld [smem:[#allocation6 + $0x788]]  ;;  %v3361_v45 = vstv %s7169_s5  ;;  %v3358_v36 = vmul.f32 %v3357_v24, %v5801_v3  ;;  %v3012_v3 = vadd.f32 %v3011_v9, %v3009_v11  ;;  %v4721_v40 = vunpack.i.l.bf16 %v4720_v55 }
 0x31b   :  { %s7204_s12 = sld [smem:[#allocation6 + $0x789]]  ;;  %v3192_v19 = vstv %s7173_s20  ;;  %v3182_v29 = vadd.f32 %v3181_v39, %v3178_v25  ;;  %v3355_v60 = vadd.f32 %v3354_v16, %v3351_v10  ;;  %v3362_v52 = vmul.f32 %v3361_v45, %v5839_v0  ;;  %v4715_v0 = vpop.permute.xlu0 %4714  ;;  %v364_v39 = vpop.permute.xlu1 %363 }
 0x31c   :  { %v3365_v38 = vstv %s7178_s18  ;;  %s7211_s29 = sld [smem:[#allocation6 + $0x78a]]  ;;  %v3193_v26 = vmul.f32 %v3192_v19, %v5939_v1  ;;  %v7224_v50 = vmax.f32 %v3012_v3, 0.0  ;;  %v4722_v25 = vunpack.i.h.bf16 %v4720_v55 }
 0x31d   :  { %s7214_s11 = sld [smem:[#allocation6 + $0x78b]]  ;;  %v3186_v32 = vadd.f32 %v3185_v4, %v3182_v29  ;;  %v3359_v30 = vadd.f32 %v3358_v36, %v3355_v60  ;;  %v3196_v28 = vstv %s7182_s15  ;;  %v3366_v37 = vmul.f32 %v3365_v38, %v5836_v53 }
 0x31e   :  { %v3369_v34 = vstv %s7190_s19  ;;  %s7226_s3 = sld [smem:[#allocation6 + $0x711]]  ;;  %v4778_v47 = vpack.i.bf16 %v7224_v50, %v7216_v58  ;;  %v3197_v42 = vmul.f32 %v3196_v28, %v5958_v48  ;;  %v4717_v10 = vunpack.i.h.bf16 %v4715_v0 }
 0x31f   :  { %v3200_v41 = vstv %s7194_s13  ;;  %v3190_v21 = vadd.f32 %v3189_v27, %v3186_v32  ;;  %v3363_v18 = vadd.f32 %v3362_v52, %v3359_v30  ;;  %v3370_v9 = vmul.f32 %v3369_v34, %v9753_v33  ;;  %s7231_s10 = sld [smem:[#allocation6 + $0x78c]]  ;;  %v496_v4 = vpop.permute.xlu0 %495 }
 0x320   :  { %v3373_v5 = vstv %s7199_s9  ;;  %v3201_v24 = vmul.f32 %v3200_v41, %v5955_v57  ;;  %s7239_s28 = sld [smem:[#allocation6 + $0x78d]]  ;;  %4779 = vrot.lane.b32.xlu1 %v4778_v47, %s9591_s22  ;;  %4774 = vrot.lane.b32.xlu0 %v4778_v47, %s9592_s17  ;;  %v362_v38 = vsel %vm108_vm3, %v4722_v25, 0.0  ;;  %v367_v11 = vsel %vm366_vm4, %v364_v39, 0.0  ;;  %v3919_v47 = vld [vmem:[%s9725_s8 + $0x2e8] sm:$0xff] }
 0x321   :  { %v3377_v16 = vstv %s7204_s12  ;;  %v3194_v49 = vadd.f32 %v3193_v26, %v3190_v21  ;;  %v3367_v53 = vadd.f32 %v3366_v37, %v3363_v18  ;;  %v3374_v2 = vmul.f32 %v3373_v5, %v5863_v12  ;;  %s7243_s14 = sld [smem:[#allocation6 + $0x712]]  ;;  %v3920_v18 = vld [vmem:[%s9725_s8 + $0x2f0] sm:$0xff] }
 0x322   :  { %v3381_v43 = vstv %s7211_s29  ;;  %v3378_v45 = vmul.f32 %v3377_v16, %v5874_v51  ;;  %s7247_s21 = sld [smem:[#allocation6 + $0x78e]]  ;;  %v4716_v12 = vunpack.i.l.bf16 %v4715_v0  ;;  %v357_v51 = vsel %vm103_vm2, %v4717_v10, 0.0  ;;  %v3969_v25 = vld [vmem:[%s9725_s8 + $0x3d0] sm:$0xff] }
 0x323   :  { %v3371_v33 = vadd.f32 %v3370_v9, %v3367_v53  ;;  %v3385_v20 = vstv %s7214_s11  ;;  %v3198_v19 = vadd.f32 %v3197_v42, %v3194_v49  ;;  %v3382_v29 = vmul.f32 %v3381_v43, %v5891_v14  ;;  %s7252_s1 = sld [smem:[#allocation6 + $0x78f]]  ;;  %v3972_v49 = vld [vmem:[%s9725_s8 + $0x3e8] sm:$0xff] }
 0x324   :  { %v489_v60 = vsel %vm103_vm2, %v4716_v12, 0.0  ;;  %v368_v52 = vmax.f32 %v362_v38, %v367_v11  ;;  %3024 = vrot.lane.b32.xlu1 %v7224_v50, %s9767_s16  ;;  %2819 = vrot.lane.b32.xlu0 %v7216_v58, %s9767_s16  ;;  %s7260_s7 = sld [smem:[#allocation6 + $0x713]]  ;;  %v358_v55 = vmax.f32 %v6085_v56, %v357_v51  ;;  %v494_v14 = vsel %vm108_vm3, %v4721_v40, 0.0  ;;  %v3914_v11 = vld [vmem:[%s9725_s8 + $0x2c0] sm:$0xff] }
 0x325   :  { %v3375_v36 = vadd.f32 %v3374_v2, %v3371_v33  ;;  %v498_v3 = vsel %vm366_vm4, %v496_v4, 0.0  ;;  %v3204_v32 = vstv %s7226_s3  ;;  %v3389_v30 = vstv %s7231_s10  ;;  %s7267_s27 = sld [smem:[#allocation6 + $0x790]]  ;;  %v3917_v33 = vld [vmem:[%s9725_s8 + $0x2d8] sm:$0xff]  ;;  %v3915_v4 = vld [vmem:[%s9725_s8 + $0x2c8] sm:$0xff] }
 0x326   :  { %v490_v34 = vmax.f32 %v6092_v22, %v489_v60  ;;  %v499_v26 = vmax.f32 %v494_v14, %v498_v3  ;;  %v3202_v28 = vadd.f32 %v3201_v24, %v3198_v19  ;;  %v3386_v37 = vmul.f32 %v3385_v20, %v5906_v54  ;;  %s7272_s25 = sld [smem:[#allocation6 + $0x791]]  ;;  %v3973_v22 = vld [vmem:[%s9725_s8 + $0x3f0] sm:$0xff]  ;;  %v3971_v24 = vld [vmem:[%s9725_s8 + $0x3e0] sm:$0xff]  ;;  %v3968_v19 = vld [vmem:[%s9725_s8 + $0x3c8] sm:$0xff] }
 0x327   :  { %v3379_v27 = vadd.f32 %v3378_v45, %v3375_v36  ;;  %v369_v0 = vmax.f32 %v358_v55, %v368_v52  ;;  %v3393_v21 = vstv %s7239_s28  ;;  %v3205_v5 = vmul.f32 %v3204_v32, %v9756_v31  ;;  %s7292_s5 = sld [smem:[#allocation6 + $0x792]]  ;;  %v3970_v45 = vld [vmem:[%s9725_s8 + $0x3d8] sm:$0xff]  ;;  %v3965_v14 = vld [vmem:[%s9725_s8 + $0x3b0] sm:$0xff] }
 0x328   :  { %v500_v56 = vmax.f32 %v490_v34, %v499_v26  ;;  %v3390_v16 = vmul.f32 %v3389_v30, %v5186_v8  ;;  %v4860_v54 = vmov 0.0   ;;  %v3208_v53 = vstv %s7243_s14  ;;  %v3918_v8 = vld [vmem:[%s9725_s8 + $0x2e0] sm:$0xff]  ;;  %s7300_s13 = sld [smem:[#allocation7 + $0xe]]  ;;  %v3913_v52 = vld [vmem:[%s9725_s8 + $0x2b8] sm:$0xff]  ;;  %v3911_v34 = vld [vmem:[%s9725_s8 + $0x2a8] sm:$0xff] }
 0x329   :  { %v3383_v41 = vadd.f32 %v3382_v29, %v3379_v27  ;;  %598 = vmatprep.mubr.f32.mxu0 %v4860_v54  ;;  %669 = vmatprep.mubr.f32.mxu1 %v4860_v54  ;;  %v3397_v42 = vstv %s7247_s21  ;;  %v3206_v2 = vadd.f32 %v3205_v5, %v3202_v28  ;;  %v3394_v39 = vmul.f32 %v3393_v21, %v5931_v59  ;;  %s7310_s3 = sld [smem:[#allocation6 + $0x793]]  ;;  %v3916_v59 = vld [vmem:[%s9725_s8 + $0x2d0] sm:$0xff]  ;;  %v3966_v27 = vld [vmem:[%s9725_s8 + $0x3b8] sm:$0xff]  ;;  %v3964_v26 = vld [vmem:[%s9725_s8 + $0x3a8] sm:$0xff] }
 0x32a   :  { %599 = vmatmul.mubr.f32.vlgmr.msra.gmra.mxu0 %v500_v56  ;;  %670 = vmatmul.mubr.f32.vlgmr.msra.gmra.mxu1 %v369_v0  ;;  %v3401_v20 = vstv %s7252_s1  ;;  %v3209_v40 = vmul.f32 %v3208_v53, %v5995_v46  ;;  %v3398_v12 = vmul.f32 %v3397_v42, %v5939_v1  ;;  %v3212_v36 = vstv %s7260_s7  ;;  %v3967_v1 = vld [vmem:[%s9725_s8 + $0x3c0] sm:$0xff]  ;;  %s7342_s18 = sld [smem:[#allocation7 + $0xf]]  ;;  %v3909_v56 = vld [vmem:[%s9725_s8 + $0x298] sm:$0xff] }
 0x32b   :  { %v3387_v9 = vadd.f32 %v3386_v37, %v3383_v41  ;;  %809 = vmatpush1.msra.mxu0 %v3920_v18  ;;  %1014 = vmatpush1.msra.mxu1 %v3973_v22  ;;  %v3405_v38 = vstv %s7267_s27  ;;  %v3402_v60 = vmul.f32 %v3401_v20, %v5958_v48  ;;  %v3912_v48 = vld [vmem:[%s9725_s8 + $0x2b0] sm:$0xff]  ;;  %v3213_v3 = vmul.f32 %v3212_v36, %v6011_v7  ;;  %v3910_v41 = vld [vmem:[%s9725_s8 + $0x2a0] sm:$0xff]  ;;  %v3962_v18 = vld [vmem:[%s9725_s8 + $0x398] sm:$0xff]  ;;  %v4725_v36 = vpop.permute.xlu0 %4724  ;;  %s9769_s27 = sld [smem:[#allocation136_spill]] }
 0x32c   :  { %810 = vmatprep.subr.mxu0 %v3919_v47  ;;  %1015 = vmatprep.subr.mxu1 %v3972_v49  ;;  %v3210_v29 = vadd.f32 %v3209_v40, %v3206_v2  ;;  %v3409_v55 = vstv %s7272_s25  ;;  %v3406_v30 = vmul.f32 %v3405_v38, %v5955_v57  ;;  %v3963_v57 = vld [vmem:[%s9725_s8 + $0x3a0] sm:$0xff]  ;;  %v3907_v49 = vld [vmem:[%s9725_s8 + $0x288] sm:$0xff]  ;;  %v3901_v38 = vld [vmem:[%s9725_s8 + $0x258] sm:$0xff]  ;;  %s9772_s14 = sld [smem:[#allocation137_spill]] }
 0x32d   :  { %v3391_v43 = vadd.f32 %v3390_v16, %v3387_v9  ;;  %811 = vmatpush1.msra.mxu0 %v3918_v8  ;;  %1016 = vmatpush1.msra.mxu1 %v3971_v24  ;;  %v3413_v28 = vstv %s7292_s5  ;;  %v3410_v21 = vmul.f32 %v3409_v55, %v9756_v31  ;;  %v3908_v9 = vld [vmem:[%s9725_s8 + $0x290] sm:$0xff]  ;;  %v3960_v53 = vld [vmem:[%s9725_s8 + $0x388] sm:$0xff]  ;;  %v3906_v42 = vld [vmem:[%s9725_s8 + $0x280] sm:$0xff]  ;;  %s9774_s2 = sld [smem:[#allocation140_spill]] }
 0x32e   :  { %812 = vmatprep.subr.mxu0 %v3917_v33  ;;  %1017 = vmatprep.subr.mxu1 %v3970_v45  ;;  %v3214_v37 = vadd.f32 %v3213_v3, %v3210_v29  ;;  %v3216_v22 = vstv %s7300_s13  ;;  %v3961_v31 = vld [vmem:[%s9725_s8 + $0x390] sm:$0xff]  ;;  %v3414_v47 = vmul.f32 %v3413_v28, %v5995_v46  ;;  %v3959_v46 = vld [vmem:[%s9725_s8 + $0x380] sm:$0xff]  ;;  %v3950_v3 = vld [vmem:[%s9725_s8 + $0x338] sm:$0xff]  ;;  %s9770_s13 = sld [smem:[#allocation138_spill]] }
 0x32f   :  { %v3395_v10 = vadd.f32 %v3394_v39, %v3391_v43  ;;  %813 = vmatpush1.msra.mxu0 %v3916_v59  ;;  %1018 = vmatpush1.msra.mxu1 %v3969_v25  ;;  %v3417_v5 = vstv %s7310_s3  ;;  %v3905_v43 = vld [vmem:[%s9725_s8 + $0x278] sm:$0xff]  ;;  %v3904_v45 = vld [vmem:[%s9725_s8 + $0x270] sm:$0xff]  ;;  %v3903_v59 = vld [vmem:[%s9725_s8 + $0x268] sm:$0xff]  ;;  %s9771_s3 = sld [smem:[#allocation135_spill]] }
 0x330   :  { %814 = vmatprep.subr.mxu0 %v3915_v4  ;;  %1019 = vmatprep.subr.mxu1 %v3968_v19  ;;  %v3217_v8 = vadd.f32 %v3216_v22, %v3214_v37  ;;  %v3418_v2 = vmul.f32 %v3417_v5, %v6011_v7  ;;  %v3958_v39 = vld [vmem:[%s9725_s8 + $0x378] sm:$0xff]  ;;  %v3421_v33 = vstv %s7342_s18  ;;  %v3957_v7 = vld [vmem:[%s9725_s8 + $0x370] sm:$0xff]  ;;  %v3956_v25 = vld [vmem:[%s9725_s8 + $0x368] sm:$0xff]  ;;  %v4730_v19 = vpop.permute.xlu1 %4729  ;;  %v4726_v37 = vunpack.i.l.bf16 %v4725_v36 }
 0x331   :  { %v3399_v51 = vadd.f32 %v3398_v12, %v3395_v10  ;;  %815 = vmatpush1.msra.mxu0 %v3914_v11  ;;  %1020 = vmatpush1.msra.mxu1 %v3967_v1  ;;  %v3902_v40 = vld [vmem:[%s9725_s8 + $0x260] sm:$0xff]  ;;  %v3954_v11 = vld [vmem:[%s9725_s8 + $0x358] sm:$0xff]  ;;  %v3900_v1 = vld [vmem:[%s9725_s8 + $0x250] sm:$0xff]  ;;  %v4732_v28 = vunpack.i.h.bf16 %v4730_v19 }
 0x332   :  { %816 = vmatprep.subr.mxu0 %v3913_v52  ;;  %1021 = vmatprep.subr.mxu1 %v3966_v27  ;;  %v3955_v10 = vld [vmem:[%s9725_s8 + $0x360] sm:$0xff]  ;;  %v7419_v12 = vmax.f32 %v3217_v8, 0.0  ;;  %v3953_v29 = vld [vmem:[%s9725_s8 + $0x350] sm:$0xff]  ;;  %v3952_v52 = vld [vmem:[%s9725_s8 + $0x348] sm:$0xff] }
 0x333   :  { %v3403_v32 = vadd.f32 %v3402_v60, %v3399_v51  ;;  %817 = vmatpush1.msra.mxu0 %v3912_v48  ;;  %1022 = vmatpush1.msra.mxu1 %v3965_v14  ;;  %v3899_v60 = vld [vmem:[%s9725_s8 + $0x248] sm:$0xff]  ;;  %v3898_v55 = vld [vmem:[%s9725_s8 + $0x240] sm:$0xff]  ;;  %v3897_v14 = vld [vmem:[%s9725_s8 + $0x238] sm:$0xff] }
 0x334   :  { %818 = vmatprep.subr.mxu0 %v3911_v34  ;;  %1023 = vmatprep.subr.mxu1 %v3964_v26  ;;  %v3951_v48 = vld [vmem:[%s9725_s8 + $0x340] sm:$0xff]  ;;  %v3896_v34 = vld [vmem:[%s9725_s8 + $0x230] sm:$0xff] }
 0x335   :  { %v3407_v0 = vadd.f32 %v3406_v30, %v3403_v32  ;;  %819 = vmatpush1.msra.mxu0 %v3910_v41  ;;  %1024 = vmatpush1.msra.mxu1 %v3963_v57  ;;  %v975_v32 = vpop.permute.xlu1 %974  ;;  %v770_v30 = vpop.permute.xlu0 %769  ;;  %v3949_v26 = vld [vmem:[%s9725_s8 + $0x330] sm:$0xff]  ;;  %v4731_v41 = vunpack.i.l.bf16 %v4730_v19  ;;  %v4727_v57 = vunpack.i.h.bf16 %v4725_v36  ;;  %v3894_v22 = vld [vmem:[%s9725_s8 + $0x220] sm:$0xff] }
 0x336   :  { %820 = vmatprep.subr.mxu0 %v3909_v56  ;;  %1025 = vmatprep.subr.mxu1 %v3962_v18  ;;  %v977_v56 = vsel %vm366_vm4, %v975_v32, 0.0  ;;  %v772_v18 = vsel %vm366_vm4, %v770_v30, 0.0  ;;  %v3947_v5 = vld [vmem:[%s9725_s8 + $0x320] sm:$0xff]  ;;  %v4071_v32 = vld [vmem:[%s9725_s8 + $0x5b0] sm:$0xff]  ;;  %v4017_v30 = vld [vmem:[%s9725_s8 + $0x4a8] sm:$0xff] }
 0x337   :  { %v3411_v16 = vadd.f32 %v3410_v21, %v3407_v0  ;;  %821 = vmatpush1.msra.mxu0 %v3908_v9  ;;  %1026 = vmatpush1.msra.mxu1 %v3961_v31  ;;  %v3895_v0 = vld [vmem:[%s9725_s8 + $0x228] sm:$0xff]  ;;  %v3893_v9 = vld [vmem:[%s9725_s8 + $0x218] sm:$0xff]  ;;  %v4024_v19 = vld [vmem:[%s9725_s8 + $0x4e0] sm:$0xff] }
 0x338   :  { %822 = vmatprep.subr.mxu0 %v3907_v49  ;;  %1027 = vmatprep.subr.mxu1 %v3960_v53  ;;  %v3948_v21 = vld [vmem:[%s9725_s8 + $0x328] sm:$0xff]  ;;  %v3946_v31 = vld [vmem:[%s9725_s8 + $0x318] sm:$0xff]  ;;  %v973_v49 = vsel %vm108_vm3, %v4732_v28, 0.0  ;;  %v768_v53 = vsel %vm108_vm3, %v4731_v41, 0.0  ;;  %v4077_v36 = vld [vmem:[%s9725_s8 + $0x5e0] sm:$0xff] }
 0x339   :  { %v3415_v24 = vadd.f32 %v3414_v47, %v3411_v16  ;;  %823 = vmatpush1.msra.mxu0 %v3906_v42  ;;  %1028 = vmatpush1.msra.mxu1 %v3959_v46  ;;  %v968_v16 = vsel %vm103_vm2, %v4727_v57, 0.0  ;;  %v763_v47 = vsel %vm103_vm2, %v4726_v37, 0.0  ;;  %v3892_v42 = vld [vmem:[%s9725_s8 + $0x210] sm:$0xff]  ;;  %v978_v8 = vmax.f32 %v973_v49, %v977_v56  ;;  %v4069_v28 = vld [vmem:[%s9725_s8 + $0x5a0] sm:$0xff]  ;;  %v4015_v41 = vld [vmem:[%s9725_s8 + $0x498] sm:$0xff]  ;;  %v4735_v49 = vpop.permute.xlu0 %4734 }
 0x33a   :  { %824 = vmatprep.subr.mxu0 %v3905_v43  ;;  %1029 = vmatprep.subr.mxu1 %v3958_v39  ;;  %v3945_v46 = vld [vmem:[%s9725_s8 + $0x310] sm:$0xff]  ;;  %v3944_v43 = vld [vmem:[%s9725_s8 + $0x308] sm:$0xff]  ;;  %v3890_v39 = vld [vmem:[%s9725_s8 + $0x200] sm:$0xff] }
 0x33b   :  { %v3419_v20 = vadd.f32 %v3418_v2, %v3415_v24  ;;  %825 = vmatpush1.msra.mxu0 %v3904_v45  ;;  %1030 = vmatpush1.msra.mxu1 %v3957_v7  ;;  %v773_v24 = vmax.f32 %v768_v53, %v772_v18  ;;  %v3891_v2 = vld [vmem:[%s9725_s8 + $0x208] sm:$0xff]  ;;  %v764_v45 = vmax.f32 %v6182_v61, %v763_v47  ;;  %v3943_v7 = vld [vmem:[%s9725_s8 + $0x300] sm:$0xff]  ;;  %v4080_v61 = vld [vmem:[%s9725_s8 + $0x5f8] sm:$0xff]  ;;  %v4740_v47 = vpop.permute.xlu1 %4739 }
 0x33c   :  { %826 = vmatprep.subr.mxu0 %v3903_v59  ;;  %1031 = vmatprep.subr.mxu1 %v3956_v25  ;;  %v4027_v25 = vld [vmem:[%s9725_s8 + $0x4f8] sm:$0xff]  ;;  %v4014_v37 = vld [vmem:[%s9725_s8 + $0x490] sm:$0xff]  ;;  %v4066_v56 = vld [vmem:[%s9725_s8 + $0x588] sm:$0xff] }
 0x33d   :  { %v3422_v4 = vadd.f32 %v3421_v33, %v3419_v20  ;;  %827 = vmatpush1.msra.mxu0 %v3902_v40  ;;  %1032 = vmatpush1.msra.mxu1 %v3955_v10  ;;  %v969_v33 = vmax.f32 %v6217_v6, %v968_v16  ;;  %v774_v59 = vmax.f32 %v764_v45, %v773_v24  ;;  %v4026_v6 = vld [vmem:[%s9725_s8 + $0x4f0] sm:$0xff]  ;;  %v4025_v10 = vld [vmem:[%s9725_s8 + $0x4e8] sm:$0xff]  ;;  %v4068_v57 = vld [vmem:[%s9725_s8 + $0x598] sm:$0xff] }
 0x33e   :  { %828 = vmatprep.subr.mxu0 %v3901_v38  ;;  %1033 = vmatprep.subr.mxu1 %v3954_v11  ;;  %v4079_v40 = vld [vmem:[%s9725_s8 + $0x5f0] sm:$0xff]  ;;  %v4023_v38 = vld [vmem:[%s9725_s8 + $0x4d8] sm:$0xff]  ;;  %v4012_v18 = vld [vmem:[%s9725_s8 + $0x480] sm:$0xff] }
 0x33f   :  { %v7433_v51 = vmax.f32 %v3422_v4, 0.0  ;;  %829 = vmatpush1.msra.mxu0 %v3900_v1  ;;  %1034 = vmatpush1.msra.mxu1 %v3953_v29  ;;  %v979_v20 = vmax.f32 %v969_v33, %v978_v8  ;;  %v4078_v4 = vld [vmem:[%s9725_s8 + $0x5e8] sm:$0xff]  ;;  %v4076_v11 = vld [vmem:[%s9725_s8 + $0x5d8] sm:$0xff]  ;;  %v4022_v1 = vld [vmem:[%s9725_s8 + $0x4d0] sm:$0xff] }
 0x340   :  { %830 = vmatprep.subr.mxu0 %v3899_v60  ;;  %1035 = vmatprep.subr.mxu1 %v3952_v52  ;;  %v4075_v29 = vld [vmem:[%s9725_s8 + $0x5d0] sm:$0xff]  ;;  %v4021_v60 = vld [vmem:[%s9725_s8 + $0x4c8] sm:$0xff]  ;;  %v4061_v8 = vld [vmem:[%s9725_s8 + $0x560] sm:$0xff] }
 0x341   :  { %v4788_v27 = vpack.i.bf16 %v7433_v51, %v7419_v12  ;;  %831 = vmatpush1.msra.mxu0 %v3898_v55  ;;  %1036 = vmatpush1.msra.mxu1 %v3951_v48  ;;  %v4074_v52 = vld [vmem:[%s9725_s8 + $0x5c8] sm:$0xff]  ;;  %v4073_v55 = vld [vmem:[%s9725_s8 + $0x5c0] sm:$0xff]  ;;  %v4019_v48 = vld [vmem:[%s9725_s8 + $0x4b8] sm:$0xff] }
 0x342   :  { %832 = vmatprep.subr.mxu0 %v3897_v14  ;;  %1037 = vmatprep.subr.mxu1 %v3950_v3  ;;  %v4072_v14 = vld [vmem:[%s9725_s8 + $0x5b8] sm:$0xff]  ;;  %v4018_v3 = vld [vmem:[%s9725_s8 + $0x4b0] sm:$0xff]  ;;  %v4009_v53 = vld [vmem:[%s9725_s8 + $0x468] sm:$0xff] }
 0x343   :  { %4789 = vrot.lane.b32.xlu1 %v4788_v27, %s9591_s22  ;;  %4784 = vrot.lane.b32.xlu0 %v4788_v27, %s9592_s17  ;;  %v4020_v27 = vld [vmem:[%s9725_s8 + $0x4c0] sm:$0xff]  ;;  %v4063_v16 = vld [vmem:[%s9725_s8 + $0x570] sm:$0xff] }
 0x344   :  { %833 = vmatpush1.msra.mxu0 %v3896_v34  ;;  %1038 = vmatpush1.msra.mxu1 %v3949_v26  ;;  %v4070_v34 = vld [vmem:[%s9725_s8 + $0x5a8] sm:$0xff]  ;;  %v4016_v26 = vld [vmem:[%s9725_s8 + $0x4a0] sm:$0xff]  ;;  %v4007_v24 = vld [vmem:[%s9725_s8 + $0x458] sm:$0xff] }
 0x345   :  { %834 = vmatprep.subr.mxu0 %v3895_v0  ;;  %1039 = vmatprep.subr.mxu1 %v3948_v21  ;;  %v4067_v0 = vld [vmem:[%s9725_s8 + $0x590] sm:$0xff]  ;;  %v4013_v21 = vld [vmem:[%s9725_s8 + $0x488] sm:$0xff] }
 0x346   :  { %835 = vmatpush1.msra.mxu0 %v3894_v22  ;;  %1040 = vmatpush1.msra.mxu1 %v3947_v5  ;;  %v4065_v22 = vld [vmem:[%s9725_s8 + $0x580] sm:$0xff]  ;;  %v4011_v5 = vld [vmem:[%s9725_s8 + $0x478] sm:$0xff]  ;;  %v4005_v33 = vld [vmem:[%s9725_s8 + $0x448] sm:$0xff] }
 0x347   :  { %3434 = vrot.lane.b32.xlu1 %v7433_v51, %s9767_s16  ;;  %3229 = vrot.lane.b32.xlu0 %v7419_v12, %s9767_s16  ;;  %v4058_v45 = vld [vmem:[%s9725_s8 + $0x548] sm:$0xff] }
 0x348   :  { %836 = vmatprep.subr.mxu0 %v3893_v9  ;;  %1041 = vmatprep.subr.mxu1 %v3946_v31  ;;  %v4064_v9 = vld [vmem:[%s9725_s8 + $0x578] sm:$0xff]  ;;  %v4010_v31 = vld [vmem:[%s9725_s8 + $0x470] sm:$0xff] }
 0x349   :  { %837 = vmatpush1.msra.mxu0 %v3892_v42  ;;  %1042 = vmatpush1.msra.mxu1 %v3945_v46  ;;  %v4062_v42 = vld [vmem:[%s9725_s8 + $0x568] sm:$0xff]  ;;  %v4008_v46 = vld [vmem:[%s9725_s8 + $0x460] sm:$0xff] }
 0x34a   :  { %838 = vmatprep.subr.mxu0 %v3891_v2  ;;  %1043 = vmatprep.subr.mxu1 %v3944_v43  ;;  %v4060_v2 = vld [vmem:[%s9725_s8 + $0x558] sm:$0xff]  ;;  %v4006_v43 = vld [vmem:[%s9725_s8 + $0x450] sm:$0xff] }
 0x34b   :  { %839 = vmatpush1.msra.mxu0 %v3890_v39  ;;  %872 = vmatprep.mubr.f32.mxu0 %v4860_v54  ;;  %v4059_v39 = vld [vmem:[%s9725_s8 + $0x550] sm:$0xff] }
 0x34c   :  { %1044 = vmatpush1.msra.mxu1 %v3943_v7  ;;  %1077 = vmatprep.mubr.f32.mxu1 %v4860_v54  ;;  %v4004_v7 = vld [vmem:[%s9725_s8 + $0x440] sm:$0xff] }
 0x34d   :  { %873 = vmatmul.mubr.f32.vlgmr.msra.gmra.mxu0 %v774_v59  ;;  %1078 = vmatmul.mubr.f32.vlgmr.msra.gmra.mxu1 %v979_v20  ;;  %v4057_v20 = vld [vmem:[%s9725_s8 + $0x540] sm:$0xff]  ;;  %v1385_v59 = vpop.permute.xlu1 %1384 }
 0x34e   :  { %1218 = vmatprep.subr.mxu0 %v4027_v25  ;;  %1423 = vmatprep.subr.mxu1 %v4080_v61  ;;  %v1180_v25 = vpop.permute.xlu0 %1179  ;;  %v4003_v61 = vld [vmem:[%s9725_s8 + $0x438] sm:$0xff] }
 0x34f   :  { %1219 = vmatpush1.msra.mxu0 %v4026_v6  ;;  %1424 = vmatpush1.msra.mxu1 %v4079_v40  ;;  %v4056_v6 = vld [vmem:[%s9725_s8 + $0x538] sm:$0xff]  ;;  %v4742_v40 = vunpack.i.h.bf16 %v4740_v47 }
 0x350   :  { %1220 = vmatprep.subr.mxu0 %v4025_v10  ;;  %1425 = vmatprep.subr.mxu1 %v4078_v4  ;;  %v4741_v10 = vunpack.i.l.bf16 %v4740_v47  ;;  %v4737_v4 = vunpack.i.h.bf16 %v4735_v49  ;;  %v4184_v47 = vld [vmem:[%s9725_s8 + $0x7e8] sm:$0xff] }
 0x351   :  { %1221 = vmatpush1.msra.mxu0 %v4024_v19  ;;  %1426 = vmatpush1.msra.mxu1 %v4077_v36  ;;  %v4736_v19 = vunpack.i.l.bf16 %v4735_v49  ;;  %v4002_v36 = vld [vmem:[%s9725_s8 + $0x430] sm:$0xff]  ;;  %v4130_v49 = vld [vmem:[%s9725_s8 + $0x6e0] sm:$0xff] }
 0x352   :  { %1222 = vmatprep.subr.mxu0 %v4023_v38  ;;  %1427 = vmatprep.subr.mxu1 %v4076_v11  ;;  %v4055_v38 = vld [vmem:[%s9725_s8 + $0x530] sm:$0xff]  ;;  %v4001_v11 = vld [vmem:[%s9725_s8 + $0x428] sm:$0xff] }
 0x353   :  { %1223 = vmatpush1.msra.mxu0 %v4022_v1  ;;  %1428 = vmatpush1.msra.mxu1 %v4075_v29  ;;  %v4054_v1 = vld [vmem:[%s9725_s8 + $0x528] sm:$0xff]  ;;  %v1387_v29 = vsel %vm366_vm4, %v1385_v59, 0.0  ;;  %v4177_v59 = vld [vmem:[%s9725_s8 + $0x7b0] sm:$0xff] }
 0x354   :  { %1224 = vmatprep.subr.mxu0 %v4021_v60  ;;  %1429 = vmatprep.subr.mxu1 %v4074_v52  ;;  %v1182_v60 = vsel %vm366_vm4, %v1180_v25, 0.0  ;;  %v4000_v52 = vld [vmem:[%s9725_s8 + $0x420] sm:$0xff]  ;;  %v4123_v25 = vld [vmem:[%s9725_s8 + $0x6a8] sm:$0xff] }
 0x355   :  { %1225 = vmatpush1.msra.mxu0 %v4020_v27  ;;  %1430 = vmatpush1.msra.mxu1 %v4073_v55  ;;  %v4053_v27 = vld [vmem:[%s9725_s8 + $0x520] sm:$0xff]  ;;  %v3999_v55 = vld [vmem:[%s9725_s8 + $0x418] sm:$0xff] }
 0x356   :  { %1226 = vmatprep.subr.mxu0 %v4019_v48  ;;  %1431 = vmatprep.subr.mxu1 %v4072_v14  ;;  %v4052_v48 = vld [vmem:[%s9725_s8 + $0x518] sm:$0xff]  ;;  %v1378_v14 = vsel %vm103_vm2, %v4737_v4, 0.0 }
 0x357   :  { %1227 = vmatpush1.msra.mxu0 %v4018_v3  ;;  %1432 = vmatpush1.msra.mxu1 %v4071_v32  ;;  %v1173_v3 = vsel %vm103_vm2, %v4736_v19, 0.0  ;;  %v1383_v32 = vsel %vm108_vm3, %v4742_v40, 0.0  ;;  %v4175_v40 = vld [vmem:[%s9725_s8 + $0x7a0] sm:$0xff]  ;;  %v4174_v4 = vld [vmem:[%s9725_s8 + $0x798] sm:$0xff]  ;;  %v4120_v19 = vld [vmem:[%s9725_s8 + $0x690] sm:$0xff] }
 0x358   :  { %1228 = vmatprep.subr.mxu0 %v4017_v30  ;;  %1433 = vmatprep.subr.mxu1 %v4070_v34  ;;  %v1178_v30 = vsel %vm108_vm3, %v4741_v10, 0.0  ;;  %v3998_v34 = vld [vmem:[%s9725_s8 + $0x410] sm:$0xff]  ;;  %v4121_v10 = vld [vmem:[%s9725_s8 + $0x698] sm:$0xff] }
 0x359   :  { %1229 = vmatpush1.msra.mxu0 %v4016_v26  ;;  %1434 = vmatpush1.msra.mxu1 %v4069_v28  ;;  %v4051_v26 = vld [vmem:[%s9725_s8 + $0x510] sm:$0xff]  ;;  %v1388_v28 = vmax.f32 %v1383_v32, %v1387_v29  ;;  %v4171_v29 = vld [vmem:[%s9725_s8 + $0x780] sm:$0xff]  ;;  %v4168_v32 = vld [vmem:[%s9725_s8 + $0x768] sm:$0xff] }
 0x35a   :  { %1230 = vmatprep.subr.mxu0 %v4015_v41  ;;  %1435 = vmatprep.subr.mxu1 %v4068_v57  ;;  %v1183_v41 = vmax.f32 %v1178_v30, %v1182_v60  ;;  %v3997_v57 = vld [vmem:[%s9725_s8 + $0x408] sm:$0xff]  ;;  %v4117_v60 = vld [vmem:[%s9725_s8 + $0x678] sm:$0xff]  ;;  %v4114_v30 = vld [vmem:[%s9725_s8 + $0x660] sm:$0xff] }
 0x35b   :  { %1231 = vmatpush1.msra.mxu0 %v4014_v37  ;;  %1436 = vmatpush1.msra.mxu1 %v4067_v0  ;;  %v4050_v37 = vld [vmem:[%s9725_s8 + $0x508] sm:$0xff]  ;;  %v3996_v0 = vld [vmem:[%s9725_s8 + $0x400] sm:$0xff] }
 0x35c   :  { %1232 = vmatprep.subr.mxu0 %v4013_v21  ;;  %1437 = vmatprep.subr.mxu1 %v4066_v56  ;;  %v1379_v21 = vmax.f32 %v6462_v63, %v1378_v14  ;;  %v1174_v56 = vmax.f32 %v6449_v23, %v1173_v3  ;;  %v4186_v23 = vld [vmem:[%s9725_s8 + $0x7f8] sm:$0xff]  ;;  %v4132_v63 = vld [vmem:[%s9725_s8 + $0x6f0] sm:$0xff]  ;;  %v4745_v14 = vpop.permute.xlu0 %4744  ;;  %v4115_v3 = vld [vmem:[%s9725_s8 + $0x668] sm:$0xff] }
 0x35d   :  { %1233 = vmatpush1.msra.mxu0 %v4012_v18  ;;  %1438 = vmatpush1.msra.mxu1 %v4065_v22  ;;  %v4049_v18 = vld [vmem:[%s9725_s8 + $0x500] sm:$0xff] }
 0x35e   :  { %1234 = vmatprep.subr.mxu0 %v4011_v5  ;;  %1439 = vmatprep.subr.mxu1 %v4064_v9  ;;  %v1389_v22 = vmax.f32 %v1379_v21, %v1388_v28  ;;  %v1184_v5 = vmax.f32 %v1174_v56, %v1183_v41  ;;  %v4133_v9 = vld [vmem:[%s9725_s8 + $0x6f8] sm:$0xff]  ;;  %v4112_v41 = vld [vmem:[%s9725_s8 + $0x650] sm:$0xff]  ;;  %v4110_v21 = vld [vmem:[%s9725_s8 + $0x640] sm:$0xff] }
 0x35f   :  { %1235 = vmatpush1.msra.mxu0 %v4010_v31  ;;  %1440 = vmatpush1.msra.mxu1 %v4063_v16  ;;  %v4185_v31 = vld [vmem:[%s9725_s8 + $0x7f0] sm:$0xff]  ;;  %v4131_v16 = vld [vmem:[%s9725_s8 + $0x6e8] sm:$0xff]  ;;  %v4166_v28 = vld [vmem:[%s9725_s8 + $0x758] sm:$0xff] }
 0x360   :  { %1236 = vmatprep.subr.mxu0 %v4009_v53  ;;  %1441 = vmatprep.subr.mxu1 %v4062_v42  ;;  %v4183_v53 = vld [vmem:[%s9725_s8 + $0x7e0] sm:$0xff]  ;;  %v4129_v42 = vld [vmem:[%s9725_s8 + $0x6d8] sm:$0xff] }
 0x361   :  { %1237 = vmatpush1.msra.mxu0 %v4008_v46  ;;  %1442 = vmatpush1.msra.mxu1 %v4061_v8  ;;  %v4182_v46 = vld [vmem:[%s9725_s8 + $0x7d8] sm:$0xff]  ;;  %v4128_v8 = vld [vmem:[%s9725_s8 + $0x6d0] sm:$0xff]  ;;  %v4163_v56 = vld [vmem:[%s9725_s8 + $0x740] sm:$0xff] }
 0x362   :  { %1238 = vmatprep.subr.mxu0 %v4007_v24  ;;  %1443 = vmatprep.subr.mxu1 %v4060_v2  ;;  %v4181_v24 = vld [vmem:[%s9725_s8 + $0x7d0] sm:$0xff]  ;;  %v4127_v2 = vld [vmem:[%s9725_s8 + $0x6c8] sm:$0xff] }
 0x363   :  { %1239 = vmatpush1.msra.mxu0 %v4006_v43  ;;  %1444 = vmatpush1.msra.mxu1 %v4059_v39  ;;  %v4180_v43 = vld [vmem:[%s9725_s8 + $0x7c8] sm:$0xff]  ;;  %v4126_v39 = vld [vmem:[%s9725_s8 + $0x6c0] sm:$0xff] }
 0x364   :  { %1240 = vmatprep.subr.mxu0 %v4005_v33  ;;  %1445 = vmatprep.subr.mxu1 %v4058_v45  ;;  %v4179_v33 = vld [vmem:[%s9725_s8 + $0x7c0] sm:$0xff]  ;;  %v4125_v45 = vld [vmem:[%s9725_s8 + $0x6b8] sm:$0xff] }
 0x365   :  { %1241 = vmatpush1.msra.mxu0 %v4004_v7  ;;  %1446 = vmatpush1.msra.mxu1 %v4057_v20  ;;  %v4178_v7 = vld [vmem:[%s9725_s8 + $0x7b8] sm:$0xff]  ;;  %v4124_v20 = vld [vmem:[%s9725_s8 + $0x6b0] sm:$0xff] }
 0x366   :  { %1242 = vmatprep.subr.mxu0 %v4003_v61  ;;  %1447 = vmatprep.subr.mxu1 %v4056_v6  ;;  %v4176_v61 = vld [vmem:[%s9725_s8 + $0x7a8] sm:$0xff]  ;;  %v4122_v6 = vld [vmem:[%s9725_s8 + $0x6a0] sm:$0xff] }
 0x367   :  { %1243 = vmatpush1.msra.mxu0 %v4002_v36  ;;  %1448 = vmatpush1.msra.mxu1 %v4055_v38  ;;  %v4173_v36 = vld [vmem:[%s9725_s8 + $0x790] sm:$0xff]  ;;  %v4119_v38 = vld [vmem:[%s9725_s8 + $0x688] sm:$0xff] }
 0x368   :  { %1244 = vmatprep.subr.mxu0 %v4001_v11  ;;  %1449 = vmatprep.subr.mxu1 %v4054_v1  ;;  %v4172_v11 = vld [vmem:[%s9725_s8 + $0x788] sm:$0xff]  ;;  %v4118_v1 = vld [vmem:[%s9725_s8 + $0x680] sm:$0xff] }
 0x369   :  { %1245 = vmatpush1.msra.mxu0 %v4000_v52  ;;  %1450 = vmatpush1.msra.mxu1 %v4053_v27  ;;  %v4170_v52 = vld [vmem:[%s9725_s8 + $0x778] sm:$0xff]  ;;  %v4116_v27 = vld [vmem:[%s9725_s8 + $0x670] sm:$0xff] }
 0x36a   :  { %1246 = vmatprep.subr.mxu0 %v3999_v55  ;;  %1451 = vmatprep.subr.mxu1 %v4052_v48  ;;  %v4169_v55 = vld [vmem:[%s9725_s8 + $0x770] sm:$0xff]  ;;  %v4750_v48 = vpop.permute.xlu1 %4749 }
 0x36b   :  { %1247 = vmatpush1.msra.mxu0 %v3998_v34  ;;  %1452 = vmatpush1.msra.mxu1 %v4051_v26  ;;  %v4167_v34 = vld [vmem:[%s9725_s8 + $0x760] sm:$0xff]  ;;  %v4113_v26 = vld [vmem:[%s9725_s8 + $0x658] sm:$0xff] }
 0x36c   :  { %1248 = vmatprep.subr.mxu0 %v3997_v57  ;;  %1453 = vmatprep.subr.mxu1 %v4050_v37  ;;  %v4165_v57 = vld [vmem:[%s9725_s8 + $0x750] sm:$0xff]  ;;  %v4111_v37 = vld [vmem:[%s9725_s8 + $0x648] sm:$0xff] }
 0x36d   :  { %1249 = vmatpush1.msra.mxu0 %v3996_v0  ;;  %1282 = vmatprep.mubr.f32.mxu0 %v4860_v54  ;;  %v4164_v0 = vld [vmem:[%s9725_s8 + $0x748] sm:$0xff] }
 0x36e   :  { %1454 = vmatpush1.msra.mxu1 %v4049_v18  ;;  %1487 = vmatprep.mubr.f32.mxu1 %v4860_v54  ;;  %v1795_v18 = vpop.permute.xlu1 %1794 }
 0x36f   :  { %1283 = vmatmul.mubr.f32.vlgmr.msra.gmra.mxu0 %v1184_v5  ;;  %1488 = vmatmul.mubr.f32.vlgmr.msra.gmra.mxu1 %v1389_v22  ;;  %v1590_v22 = vpop.permute.xlu0 %1589  ;;  %v4109_v5 = vld [vmem:[%s9725_s8 + $0x638] sm:$0xff] }
 0x370   :  { %1628 = vmatprep.subr.mxu0 %v4133_v9  ;;  %1833 = vmatprep.subr.mxu1 %v4186_v23  ;;  %v4162_v9 = vld [vmem:[%s9725_s8 + $0x738] sm:$0xff]  ;;  %v4752_v23 = vunpack.i.h.bf16 %v4750_v48 }
 0x371   :  { %1629 = vmatpush1.msra.mxu0 %v4132_v63  ;;  %1834 = vmatpush1.msra.mxu1 %v4185_v31  ;;  %v4751_v63 = vunpack.i.l.bf16 %v4750_v48  ;;  %v4747_v31 = vunpack.i.h.bf16 %v4745_v14  ;;  %v4289_v48 = vld [vmem:[%s9725_s8 + $0x9e0] sm:$0xff] }
 0x372   :  { %1630 = vmatprep.subr.mxu0 %v4131_v16  ;;  %1835 = vmatprep.subr.mxu1 %v4184_v47  ;;  %v4746_v16 = vunpack.i.l.bf16 %v4745_v14  ;;  %v4108_v47 = vld [vmem:[%s9725_s8 + $0x630] sm:$0xff]  ;;  %v4235_v14 = vld [vmem:[%s9725_s8 + $0x8d8] sm:$0xff] }
 0x373   :  { %1631 = vmatpush1.msra.mxu0 %v4130_v49  ;;  %1836 = vmatpush1.msra.mxu1 %v4183_v53  ;;  %v4161_v49 = vld [vmem:[%s9725_s8 + $0x730] sm:$0xff]  ;;  %v4107_v53 = vld [vmem:[%s9725_s8 + $0x628] sm:$0xff] }
 0x374   :  { %1632 = vmatprep.subr.mxu0 %v4129_v42  ;;  %1837 = vmatprep.subr.mxu1 %v4182_v46  ;;  %v4160_v42 = vld [vmem:[%s9725_s8 + $0x728] sm:$0xff]  ;;  %v1797_v46 = vsel %vm366_vm4, %v1795_v18, 0.0 }
 0x375   :  { %1633 = vmatpush1.msra.mxu0 %v4128_v8  ;;  %1838 = vmatpush1.msra.mxu1 %v4181_v24  ;;  %v1592_v8 = vsel %vm366_vm4, %v1590_v22, 0.0  ;;  %v4106_v24 = vld [vmem:[%s9725_s8 + $0x620] sm:$0xff]  ;;  %v4282_v18 = vld [vmem:[%s9725_s8 + $0x9a8] sm:$0xff] }
 0x376   :  { %1634 = vmatprep.subr.mxu0 %v4127_v2  ;;  %1839 = vmatprep.subr.mxu1 %v4180_v43  ;;  %v4159_v2 = vld [vmem:[%s9725_s8 + $0x720] sm:$0xff]  ;;  %v4105_v43 = vld [vmem:[%s9725_s8 + $0x618] sm:$0xff] }
 0x377   :  { %1635 = vmatpush1.msra.mxu0 %v4126_v39  ;;  %1840 = vmatpush1.msra.mxu1 %v4179_v33  ;;  %v4158_v39 = vld [vmem:[%s9725_s8 + $0x718] sm:$0xff]  ;;  %v1788_v33 = vsel %vm103_vm2, %v4747_v31, 0.0  ;;  %v4228_v22 = vld [vmem:[%s9725_s8 + $0x8a0] sm:$0xff]  ;;  %v4279_v31 = vld [vmem:[%s9725_s8 + $0x990] sm:$0xff] }
 0x378   :  { %1636 = vmatprep.subr.mxu0 %v4125_v45  ;;  %1841 = vmatprep.subr.mxu1 %v4178_v7  ;;  %v1583_v45 = vsel %vm103_vm2, %v4746_v16, 0.0  ;;  %v1793_v7 = vsel %vm108_vm3, %v4752_v23, 0.0  ;;  %v4280_v23 = vld [vmem:[%s9725_s8 + $0x998] sm:$0xff]  ;;  %v4225_v16 = vld [vmem:[%s9725_s8 + $0x888] sm:$0xff] }
 0x379   :  { %1637 = vmatpush1.msra.mxu0 %v4124_v20  ;;  %1842 = vmatpush1.msra.mxu1 %v4177_v59  ;;  %v1588_v20 = vsel %vm108_vm3, %v4751_v63, 0.0  ;;  %v4104_v59 = vld [vmem:[%s9725_s8 + $0x610] sm:$0xff] }
 0x37a   :  { %1638 = vmatprep.subr.mxu0 %v4123_v25  ;;  %1843 = vmatprep.subr.mxu1 %v4176_v61  ;;  %v4157_v25 = vld [vmem:[%s9725_s8 + $0x710] sm:$0xff]  ;;  %v1798_v61 = vmax.f32 %v1793_v7, %v1797_v46  ;;  %v4276_v46 = vld [vmem:[%s9725_s8 + $0x978] sm:$0xff]  ;;  %v4273_v7 = vld [vmem:[%s9725_s8 + $0x960] sm:$0xff] }
 0x37b   :  { %1639 = vmatpush1.msra.mxu0 %v4122_v6  ;;  %1844 = vmatpush1.msra.mxu1 %v4175_v40  ;;  %v1593_v6 = vmax.f32 %v1588_v20, %v1592_v8  ;;  %v4103_v40 = vld [vmem:[%s9725_s8 + $0x608] sm:$0xff]  ;;  %v4226_v63 = vld [vmem:[%s9725_s8 + $0x890] sm:$0xff]  ;;  %v4219_v20 = vld [vmem:[%s9725_s8 + $0x858] sm:$0xff] }
 0x37c   :  { %1640 = vmatprep.subr.mxu0 %v4121_v10  ;;  %1845 = vmatprep.subr.mxu1 %v4174_v4  ;;  %v4156_v10 = vld [vmem:[%s9725_s8 + $0x708] sm:$0xff]  ;;  %v4102_v4 = vld [vmem:[%s9725_s8 + $0x600] sm:$0xff]  ;;  %v4222_v8 = vld [vmem:[%s9725_s8 + $0x870] sm:$0xff] }
 0x37d   :  { %1641 = vmatpush1.msra.mxu0 %v4120_v19  ;;  %1846 = vmatpush1.msra.mxu1 %v4173_v36  ;;  %v1789_v19 = vmax.f32 %v6555_v62, %v1788_v33  ;;  %v1584_v36 = vmax.f32 %v6545_v13, %v1583_v45  ;;  %v4292_v13 = vld [vmem:[%s9725_s8 + $0x9f8] sm:$0xff]  ;;  %v4238_v62 = vld [vmem:[%s9725_s8 + $0x8f0] sm:$0xff]  ;;  %v4274_v33 = vld [vmem:[%s9725_s8 + $0x968] sm:$0xff] }
 0x37e   :  { %1642 = vmatprep.subr.mxu0 %v4119_v38  ;;  %1847 = vmatprep.subr.mxu1 %v4172_v11  ;;  %v4155_v38 = vld [vmem:[%s9725_s8 + $0x700] sm:$0xff] }
 0x37f   :  { %1643 = vmatpush1.msra.mxu0 %v4118_v1  ;;  %1848 = vmatpush1.msra.mxu1 %v4171_v29  ;;  %v1799_v11 = vmax.f32 %v1789_v19, %v1798_v61  ;;  %v1594_v1 = vmax.f32 %v1584_v36, %v1593_v6  ;;  %v4239_v29 = vld [vmem:[%s9725_s8 + $0x8f8] sm:$0xff]  ;;  %v4220_v45 = vld [vmem:[%s9725_s8 + $0x860] sm:$0xff]  ;;  %v4271_v61 = vld [vmem:[%s9725_s8 + $0x950] sm:$0xff] }
 0x380   :  { %1644 = vmatprep.subr.mxu0 %v4117_v60  ;;  %1849 = vmatprep.subr.mxu1 %v4170_v52  ;;  %v4291_v60 = vld [vmem:[%s9725_s8 + $0x9f0] sm:$0xff]  ;;  %v4237_v52 = vld [vmem:[%s9725_s8 + $0x8e8] sm:$0xff] }
 0x381   :  { %1645 = vmatpush1.msra.mxu0 %v4116_v27  ;;  %1850 = vmatpush1.msra.mxu1 %v4169_v55  ;;  %v4290_v27 = vld [vmem:[%s9725_s8 + $0x9e8] sm:$0xff]  ;;  %v4236_v55 = vld [vmem:[%s9725_s8 + $0x8e0] sm:$0xff] }
 0x382   :  { %1646 = vmatprep.subr.mxu0 %v4115_v3  ;;  %1851 = vmatprep.subr.mxu1 %v4168_v32  ;;  %v4288_v3 = vld [vmem:[%s9725_s8 + $0x9d8] sm:$0xff]  ;;  %v4234_v32 = vld [vmem:[%s9725_s8 + $0x8d0] sm:$0xff]  ;;  %v4217_v6 = vld [vmem:[%s9725_s8 + $0x848] sm:$0xff] }
 0x383   :  { %1647 = vmatpush1.msra.mxu0 %v4114_v30  ;;  %1852 = vmatpush1.msra.mxu1 %v4167_v34  ;;  %v4287_v30 = vld [vmem:[%s9725_s8 + $0x9d0] sm:$0xff]  ;;  %v4233_v34 = vld [vmem:[%s9725_s8 + $0x8c8] sm:$0xff] }
 0x384   :  { %1648 = vmatprep.subr.mxu0 %v4113_v26  ;;  %1853 = vmatprep.subr.mxu1 %v4166_v28  ;;  %v4286_v26 = vld [vmem:[%s9725_s8 + $0x9c8] sm:$0xff]  ;;  %v4232_v28 = vld [vmem:[%s9725_s8 + $0x8c0] sm:$0xff] }
 0x385   :  { %1649 = vmatpush1.msra.mxu0 %v4112_v41  ;;  %1854 = vmatpush1.msra.mxu1 %v4165_v57  ;;  %v4285_v41 = vld [vmem:[%s9725_s8 + $0x9c0] sm:$0xff]  ;;  %v4231_v57 = vld [vmem:[%s9725_s8 + $0x8b8] sm:$0xff] }
 0x386   :  { %1650 = vmatprep.subr.mxu0 %v4111_v37  ;;  %1855 = vmatprep.subr.mxu1 %v4164_v0  ;;  %v4284_v37 = vld [vmem:[%s9725_s8 + $0x9b8] sm:$0xff]  ;;  %v4230_v0 = vld [vmem:[%s9725_s8 + $0x8b0] sm:$0xff] }
 0x387   :  { %1651 = vmatpush1.msra.mxu0 %v4110_v21  ;;  %1856 = vmatpush1.msra.mxu1 %v4163_v56  ;;  %v4283_v21 = vld [vmem:[%s9725_s8 + $0x9b0] sm:$0xff]  ;;  %v4229_v56 = vld [vmem:[%s9725_s8 + $0x8a8] sm:$0xff] }
 0x388   :  { %1652 = vmatprep.subr.mxu0 %v4109_v5  ;;  %1857 = vmatprep.subr.mxu1 %v4162_v9  ;;  %v4281_v5 = vld [vmem:[%s9725_s8 + $0x9a0] sm:$0xff]  ;;  %v4227_v9 = vld [vmem:[%s9725_s8 + $0x898] sm:$0xff] }
 0x389   :  { %1653 = vmatpush1.msra.mxu0 %v4108_v47  ;;  %1858 = vmatpush1.msra.mxu1 %v4161_v49  ;;  %v4278_v47 = vld [vmem:[%s9725_s8 + $0x988] sm:$0xff]  ;;  %v4224_v49 = vld [vmem:[%s9725_s8 + $0x880] sm:$0xff] }
 0x38a   :  { %1654 = vmatprep.subr.mxu0 %v4107_v53  ;;  %1859 = vmatprep.subr.mxu1 %v4160_v42  ;;  %v4277_v53 = vld [vmem:[%s9725_s8 + $0x980] sm:$0xff]  ;;  %v4223_v42 = vld [vmem:[%s9725_s8 + $0x878] sm:$0xff] }
 0x38b   :  { %1655 = vmatpush1.msra.mxu0 %v4106_v24  ;;  %1860 = vmatpush1.msra.mxu1 %v4159_v2  ;;  %v4275_v24 = vld [vmem:[%s9725_s8 + $0x970] sm:$0xff]  ;;  %v4760_v2 = vpop.permute.xlu1 %4759 }
 0x38c   :  { %1656 = vmatprep.subr.mxu0 %v4105_v43  ;;  %1861 = vmatprep.subr.mxu1 %v4158_v39  ;;  %v4755_v43 = vpop.permute.xlu0 %4754  ;;  %v4221_v39 = vld [vmem:[%s9725_s8 + $0x868] sm:$0xff] }
 0x38d   :  { %1657 = vmatpush1.msra.mxu0 %v4104_v59  ;;  %1862 = vmatpush1.msra.mxu1 %v4157_v25  ;;  %v4272_v59 = vld [vmem:[%s9725_s8 + $0x958] sm:$0xff]  ;;  %v4218_v25 = vld [vmem:[%s9725_s8 + $0x850] sm:$0xff] }
 0x38e   :  { %1658 = vmatprep.subr.mxu0 %v4103_v40  ;;  %1863 = vmatprep.subr.mxu1 %v4156_v10  ;;  %v4270_v40 = vld [vmem:[%s9725_s8 + $0x948] sm:$0xff]  ;;  %v4216_v10 = vld [vmem:[%s9725_s8 + $0x840] sm:$0xff] }
 0x38f   :  { %1659 = vmatpush1.msra.mxu0 %v4102_v4  ;;  %1692 = vmatprep.mubr.f32.mxu0 %v4860_v54  ;;  %v4269_v4 = vld [vmem:[%s9725_s8 + $0x940] sm:$0xff]  ;;  %v2205_v19 = vpop.permute.xlu1 %2204 }
 0x390   :  { %1864 = vmatpush1.msra.mxu1 %v4155_v38  ;;  %1897 = vmatprep.mubr.f32.mxu1 %v4860_v54  ;;  %v2000_v36 = vpop.permute.xlu0 %1999  ;;  %v4215_v38 = vld [vmem:[%s9725_s8 + $0x838] sm:$0xff] }
 0x391   :  { %1693 = vmatmul.mubr.f32.vlgmr.msra.gmra.mxu0 %v1594_v1  ;;  %1898 = vmatmul.mubr.f32.vlgmr.msra.gmra.mxu1 %v1799_v11  ;;  %v4268_v11 = vld [vmem:[%s9725_s8 + $0x938] sm:$0xff]  ;;  %v4762_v1 = vunpack.i.h.bf16 %v4760_v2 }
 0x392   :  { %2038 = vmatprep.subr.mxu0 %v4239_v29  ;;  %2243 = vmatprep.subr.mxu1 %v4292_v13  ;;  %v4761_v29 = vunpack.i.l.bf16 %v4760_v2  ;;  %v4757_v13 = vunpack.i.h.bf16 %v4755_v43  ;;  %v4394_v2 = vld [vmem:[%s9725_s8 + $0xbd8] sm:$0xff] }
 0x393   :  { %2039 = vmatpush1.msra.mxu0 %v4238_v62  ;;  %2244 = vmatpush1.msra.mxu1 %v4291_v60  ;;  %v4756_v62 = vunpack.i.l.bf16 %v4755_v43  ;;  %v4214_v60 = vld [vmem:[%s9725_s8 + $0x830] sm:$0xff] }
 0x394   :  { %2040 = vmatprep.subr.mxu0 %v4237_v52  ;;  %2245 = vmatprep.subr.mxu1 %v4290_v27  ;;  %v4267_v52 = vld [vmem:[%s9725_s8 + $0x930] sm:$0xff]  ;;  %v4213_v27 = vld [vmem:[%s9725_s8 + $0x828] sm:$0xff] }
 0x395   :  { %2041 = vmatpush1.msra.mxu0 %v4236_v55  ;;  %2246 = vmatpush1.msra.mxu1 %v4289_v48  ;;  %v4266_v55 = vld [vmem:[%s9725_s8 + $0x928] sm:$0xff]  ;;  %v2207_v48 = vsel %vm366_vm4, %v2205_v19, 0.0  ;;  %v4340_v43 = vld [vmem:[%s9725_s8 + $0xad0] sm:$0xff]  ;;  %v4387_v19 = vld [vmem:[%s9725_s8 + $0xba0] sm:$0xff] }
 0x396   :  { %2042 = vmatprep.subr.mxu0 %v4235_v14  ;;  %2247 = vmatprep.subr.mxu1 %v4288_v3  ;;  %v2002_v14 = vsel %vm366_vm4, %v2000_v36, 0.0  ;;  %v4212_v3 = vld [vmem:[%s9725_s8 + $0x820] sm:$0xff]  ;;  %v4333_v36 = vld [vmem:[%s9725_s8 + $0xa98] sm:$0xff] }
 0x397   :  { %2043 = vmatpush1.msra.mxu0 %v4234_v32  ;;  %2248 = vmatpush1.msra.mxu1 %v4287_v30  ;;  %v4265_v32 = vld [vmem:[%s9725_s8 + $0x920] sm:$0xff]  ;;  %v4211_v30 = vld [vmem:[%s9725_s8 + $0x818] sm:$0xff] }
 0x398   :  { %2044 = vmatprep.subr.mxu0 %v4233_v34  ;;  %2249 = vmatprep.subr.mxu1 %v4286_v26  ;;  %v4264_v34 = vld [vmem:[%s9725_s8 + $0x918] sm:$0xff]  ;;  %v2198_v26 = vsel %vm103_vm2, %v4757_v13, 0.0  ;;  %v4384_v13 = vld [vmem:[%s9725_s8 + $0xb88] sm:$0xff] }
 0x399   :  { %2045 = vmatpush1.msra.mxu0 %v4232_v28  ;;  %2250 = vmatpush1.msra.mxu1 %v4285_v41  ;;  %v1993_v28 = vsel %vm103_vm2, %v4756_v62, 0.0  ;;  %v2203_v41 = vsel %vm108_vm3, %v4762_v1, 0.0  ;;  %v4385_v1 = vld [vmem:[%s9725_s8 + $0xb90] sm:$0xff]  ;;  %v4330_v62 = vld [vmem:[%s9725_s8 + $0xa80] sm:$0xff] }
 0x39a   :  { %2046 = vmatprep.subr.mxu0 %v4231_v57  ;;  %2251 = vmatprep.subr.mxu1 %v4284_v37  ;;  %v1998_v57 = vsel %vm108_vm3, %v4761_v29, 0.0  ;;  %v4210_v37 = vld [vmem:[%s9725_s8 + $0x810] sm:$0xff]  ;;  %v4331_v29 = vld [vmem:[%s9725_s8 + $0xa88] sm:$0xff] }
 0x39b   :  { %2047 = vmatpush1.msra.mxu0 %v4230_v0  ;;  %2252 = vmatpush1.msra.mxu1 %v4283_v21  ;;  %v4263_v0 = vld [vmem:[%s9725_s8 + $0x910] sm:$0xff]  ;;  %v2208_v21 = vmax.f32 %v2203_v41, %v2207_v48  ;;  %v4378_v41 = vld [vmem:[%s9725_s8 + $0xb58] sm:$0xff] }
 0x39c   :  { %2048 = vmatprep.subr.mxu0 %v4229_v56  ;;  %2253 = vmatprep.subr.mxu1 %v4282_v18  ;;  %v2003_v56 = vmax.f32 %v1998_v57, %v2002_v14  ;;  %v4209_v18 = vld [vmem:[%s9725_s8 + $0x808] sm:$0xff]  ;;  %v4381_v48 = vld [vmem:[%s9725_s8 + $0xb70] sm:$0xff]  ;;  %v4770_v14 = vpop.permute.xlu1 %4769 }
 0x39d   :  { %2049 = vmatpush1.msra.mxu0 %v4228_v22  ;;  %2254 = vmatpush1.msra.mxu1 %v4281_v5  ;;  %v4262_v22 = vld [vmem:[%s9725_s8 + $0x908] sm:$0xff]  ;;  %v4208_v5 = vld [vmem:[%s9725_s8 + $0x800] sm:$0xff]  ;;  %v4324_v57 = vld [vmem:[%s9725_s8 + $0xa50] sm:$0xff] }
 0x39e   :  { %2050 = vmatprep.subr.mxu0 %v4227_v9  ;;  %2255 = vmatprep.subr.mxu1 %v4280_v23  ;;  %v2199_v9 = vmax.f32 %v6862_v44, %v2198_v26  ;;  %v1994_v23 = vmax.f32 %v6829_v15, %v1993_v28  ;;  %v4398_v15 = vld [vmem:[%s9725_s8 + $0xbf8] sm:$0xff]  ;;  %v4344_v44 = vld [vmem:[%s9725_s8 + $0xaf0] sm:$0xff]  ;;  %v4379_v26 = vld [vmem:[%s9725_s8 + $0xb60] sm:$0xff] }
 0x39f   :  { %2051 = vmatpush1.msra.mxu0 %v4226_v63  ;;  %2256 = vmatpush1.msra.mxu1 %v4279_v31  ;;  %v4261_v63 = vld [vmem:[%s9725_s8 + $0x900] sm:$0xff]  ;;  %v4325_v28 = vld [vmem:[%s9725_s8 + $0xa58] sm:$0xff] }
 0x3a0   :  { %2052 = vmatprep.subr.mxu0 %v4225_v16  ;;  %2257 = vmatprep.subr.mxu1 %v4278_v47  ;;  %v2209_v31 = vmax.f32 %v2199_v9, %v2208_v21  ;;  %v2004_v16 = vmax.f32 %v1994_v23, %v2003_v56  ;;  %v4345_v47 = vld [vmem:[%s9725_s8 + $0xaf8] sm:$0xff]  ;;  %v4376_v21 = vld [vmem:[%s9725_s8 + $0xb48] sm:$0xff]  ;;  %v4322_v56 = vld [vmem:[%s9725_s8 + $0xa40] sm:$0xff] }
 0x3a1   :  { %2053 = vmatpush1.msra.mxu0 %v4224_v49  ;;  %2258 = vmatpush1.msra.mxu1 %v4277_v53  ;;  %v4397_v49 = vld [vmem:[%s9725_s8 + $0xbf0] sm:$0xff]  ;;  %v4343_v53 = vld [vmem:[%s9725_s8 + $0xae8] sm:$0xff]  ;;  %v4321_v9 = vld [vmem:[%s9725_s8 + $0xa38] sm:$0xff] }
 0x3a2   :  { %2054 = vmatprep.subr.mxu0 %v4223_v42  ;;  %2259 = vmatprep.subr.mxu1 %v4276_v46  ;;  %v4396_v42 = vld [vmem:[%s9725_s8 + $0xbe8] sm:$0xff]  ;;  %v4342_v46 = vld [vmem:[%s9725_s8 + $0xae0] sm:$0xff]  ;;  %v4374_v23 = vld [vmem:[%s9725_s8 + $0xb38] sm:$0xff] }
 0x3a3   :  { %2055 = vmatpush1.msra.mxu0 %v4222_v8  ;;  %2260 = vmatpush1.msra.mxu1 %v4275_v24  ;;  %v4395_v8 = vld [vmem:[%s9725_s8 + $0xbe0] sm:$0xff]  ;;  %v4341_v24 = vld [vmem:[%s9725_s8 + $0xad8] sm:$0xff] }
 0x3a4   :  { %2056 = vmatprep.subr.mxu0 %v4221_v39  ;;  %2261 = vmatprep.subr.mxu1 %v4274_v33  ;;  %v4393_v39 = vld [vmem:[%s9725_s8 + $0xbd0] sm:$0xff]  ;;  %v4339_v33 = vld [vmem:[%s9725_s8 + $0xac8] sm:$0xff] }
 0x3a5   :  { %2057 = vmatpush1.msra.mxu0 %v4220_v45  ;;  %2262 = vmatpush1.msra.mxu1 %v4273_v7  ;;  %v4392_v45 = vld [vmem:[%s9725_s8 + $0xbc8] sm:$0xff]  ;;  %v4338_v7 = vld [vmem:[%s9725_s8 + $0xac0] sm:$0xff] }
 0x3a6   :  { %2058 = vmatprep.subr.mxu0 %v4219_v20  ;;  %2263 = vmatprep.subr.mxu1 %v4272_v59  ;;  %v4391_v20 = vld [vmem:[%s9725_s8 + $0xbc0] sm:$0xff]  ;;  %v4337_v59 = vld [vmem:[%s9725_s8 + $0xab8] sm:$0xff] }
 0x3a7   :  { %2059 = vmatpush1.msra.mxu0 %v4218_v25  ;;  %2264 = vmatpush1.msra.mxu1 %v4271_v61  ;;  %v4390_v25 = vld [vmem:[%s9725_s8 + $0xbb8] sm:$0xff]  ;;  %v4336_v61 = vld [vmem:[%s9725_s8 + $0xab0] sm:$0xff] }
 0x3a8   :  { %2060 = vmatprep.subr.mxu0 %v4217_v6  ;;  %2265 = vmatprep.subr.mxu1 %v4270_v40  ;;  %v4389_v6 = vld [vmem:[%s9725_s8 + $0xbb0] sm:$0xff]  ;;  %v4335_v40 = vld [vmem:[%s9725_s8 + $0xaa8] sm:$0xff] }
 0x3a9   :  { %2061 = vmatpush1.msra.mxu0 %v4216_v10  ;;  %2266 = vmatpush1.msra.mxu1 %v4269_v4  ;;  %v4388_v10 = vld [vmem:[%s9725_s8 + $0xba8] sm:$0xff]  ;;  %v4334_v4 = vld [vmem:[%s9725_s8 + $0xaa0] sm:$0xff] }
 0x3aa   :  { %2062 = vmatprep.subr.mxu0 %v4215_v38  ;;  %2267 = vmatprep.subr.mxu1 %v4268_v11  ;;  %v4386_v38 = vld [vmem:[%s9725_s8 + $0xb98] sm:$0xff]  ;;  %v4332_v11 = vld [vmem:[%s9725_s8 + $0xa90] sm:$0xff] }
 0x3ab   :  { %2063 = vmatpush1.msra.mxu0 %v4214_v60  ;;  %2268 = vmatpush1.msra.mxu1 %v4267_v52  ;;  %v4383_v60 = vld [vmem:[%s9725_s8 + $0xb80] sm:$0xff]  ;;  %v4329_v52 = vld [vmem:[%s9725_s8 + $0xa78] sm:$0xff] }
 0x3ac   :  { %2064 = vmatprep.subr.mxu0 %v4213_v27  ;;  %2269 = vmatprep.subr.mxu1 %v4266_v55  ;;  %v4382_v27 = vld [vmem:[%s9725_s8 + $0xb78] sm:$0xff]  ;;  %v4328_v55 = vld [vmem:[%s9725_s8 + $0xa70] sm:$0xff] }
 0x3ad   :  { %2065 = vmatpush1.msra.mxu0 %v4212_v3  ;;  %2270 = vmatpush1.msra.mxu1 %v4265_v32  ;;  %v4765_v3 = vpop.permute.xlu0 %4764  ;;  %v4327_v32 = vld [vmem:[%s9725_s8 + $0xa68] sm:$0xff] }
 0x3ae   :  { %2066 = vmatprep.subr.mxu0 %v4211_v30  ;;  %2271 = vmatprep.subr.mxu1 %v4264_v34  ;;  %v4380_v30 = vld [vmem:[%s9725_s8 + $0xb68] sm:$0xff]  ;;  %v4326_v34 = vld [vmem:[%s9725_s8 + $0xa60] sm:$0xff] }
 0x3af   :  { %2067 = vmatpush1.msra.mxu0 %v4210_v37  ;;  %2272 = vmatpush1.msra.mxu1 %v4263_v0  ;;  %v4377_v37 = vld [vmem:[%s9725_s8 + $0xb50] sm:$0xff]  ;;  %v4323_v0 = vld [vmem:[%s9725_s8 + $0xa48] sm:$0xff] }
 0x3b0   :  { %2068 = vmatprep.subr.mxu0 %v4209_v18  ;;  %2273 = vmatprep.subr.mxu1 %v4262_v22  ;;  %v4375_v18 = vld [vmem:[%s9725_s8 + $0xb40] sm:$0xff]  ;;  %v2615_v22 = vpop.permute.xlu1 %2614 }
 0x3b1   :  { %2069 = vmatpush1.msra.mxu0 %v4208_v5  ;;  %2102 = vmatprep.mubr.f32.mxu0 %v4860_v54  ;;  %v2410_v5 = vpop.permute.xlu0 %2409 }
 0x3b2   :  { %2274 = vmatpush1.msra.mxu1 %v4261_v63  ;;  %2307 = vmatprep.mubr.f32.mxu1 %v4860_v54  ;;  %v4772_v63 = vunpack.i.h.bf16 %v4770_v14 }
 0x3b3   :  { %2103 = vmatmul.mubr.f32.vlgmr.msra.gmra.mxu0 %v2004_v16  ;;  %2308 = vmatmul.mubr.f32.vlgmr.msra.gmra.mxu1 %v2209_v31  ;;  %v4771_v31 = vunpack.i.l.bf16 %v4770_v14  ;;  %v4767_v16 = vunpack.i.h.bf16 %v4765_v3  ;;  %v4499_v14 = vld [vmem:[%s9725_s8 + $0xdd0] sm:$0xff] }
 0x3b4   :  { %2448 = vmatprep.subr.mxu0 %v4345_v47  ;;  %2653 = vmatprep.subr.mxu1 %v4398_v15  ;;  %v4766_v47 = vunpack.i.l.bf16 %v4765_v3  ;;  %v4320_v15 = vld [vmem:[%s9725_s8 + $0xa30] sm:$0xff]  ;;  %v4445_v3 = vld [vmem:[%s9725_s8 + $0xcc8] sm:$0xff] }
 0x3b5   :  { %2449 = vmatpush1.msra.mxu0 %v4344_v44  ;;  %2654 = vmatpush1.msra.mxu1 %v4397_v49  ;;  %v4373_v44 = vld [vmem:[%s9725_s8 + $0xb30] sm:$0xff]  ;;  %v4319_v49 = vld [vmem:[%s9725_s8 + $0xa28] sm:$0xff] }
 0x3b6   :  { %2450 = vmatprep.subr.mxu0 %v4343_v53  ;;  %2655 = vmatprep.subr.mxu1 %v4396_v42  ;;  %v4372_v53 = vld [vmem:[%s9725_s8 + $0xb28] sm:$0xff]  ;;  %v2617_v42 = vsel %vm366_vm4, %v2615_v22, 0.0  ;;  %v4492_v22 = vld [vmem:[%s9725_s8 + $0xd98] sm:$0xff] }
 0x3b7   :  { %2451 = vmatpush1.msra.mxu0 %v4342_v46  ;;  %2656 = vmatpush1.msra.mxu1 %v4395_v8  ;;  %v2412_v46 = vsel %vm366_vm4, %v2410_v5, 0.0  ;;  %v4318_v8 = vld [vmem:[%s9725_s8 + $0xa20] sm:$0xff]  ;;  %v4438_v5 = vld [vmem:[%s9725_s8 + $0xc90] sm:$0xff] }
 0x3b8   :  { %2452 = vmatprep.subr.mxu0 %v4341_v24  ;;  %2657 = vmatprep.subr.mxu1 %v4394_v2  ;;  %v4371_v24 = vld [vmem:[%s9725_s8 + $0xb20] sm:$0xff]  ;;  %v4317_v2 = vld [vmem:[%s9725_s8 + $0xa18] sm:$0xff] }
 0x3b9   :  { %2453 = vmatpush1.msra.mxu0 %v4340_v43  ;;  %2658 = vmatpush1.msra.mxu1 %v4393_v39  ;;  %v4370_v43 = vld [vmem:[%s9725_s8 + $0xb18] sm:$0xff]  ;;  %v2608_v39 = vsel %vm103_vm2, %v4767_v16, 0.0  ;;  %v4489_v16 = vld [vmem:[%s9725_s8 + $0xd80] sm:$0xff] }
 0x3ba   :  { %2454 = vmatprep.subr.mxu0 %v4339_v33  ;;  %2659 = vmatprep.subr.mxu1 %v4392_v45  ;;  %v2403_v33 = vsel %vm103_vm2, %v4766_v47, 0.0  ;;  %v2613_v45 = vsel %vm108_vm3, %v4772_v63, 0.0  ;;  %v4490_v63 = vld [vmem:[%s9725_s8 + $0xd88] sm:$0xff]  ;;  %v4435_v47 = vld [vmem:[%s9725_s8 + $0xc78] sm:$0xff] }
 0x3bb   :  { %2455 = vmatpush1.msra.mxu0 %v4338_v7  ;;  %2660 = vmatpush1.msra.mxu1 %v4391_v20  ;;  %v2408_v7 = vsel %vm108_vm3, %v4771_v31, 0.0  ;;  %v4316_v20 = vld [vmem:[%s9725_s8 + $0xa10] sm:$0xff]  ;;  %v4436_v31 = vld [vmem:[%s9725_s8 + $0xc80] sm:$0xff] }
 0x3bc   :  { %2456 = vmatprep.subr.mxu0 %v4337_v59  ;;  %2661 = vmatprep.subr.mxu1 %v4390_v25  ;;  %v4369_v59 = vld [vmem:[%s9725_s8 + $0xb10] sm:$0xff]  ;;  %v2618_v25 = vmax.f32 %v2613_v45, %v2617_v42  ;;  %v4775_v42 = vpop.permute.xlu0 %4774 }
 0x3bd   :  { %2457 = vmatpush1.msra.mxu0 %v4336_v61  ;;  %2662 = vmatpush1.msra.mxu1 %v4389_v6  ;;  %v2413_v61 = vmax.f32 %v2408_v7, %v2412_v46  ;;  %v4315_v6 = vld [vmem:[%s9725_s8 + $0xa08] sm:$0xff]  ;;  %v4483_v45 = vld [vmem:[%s9725_s8 + $0xd50] sm:$0xff] }
 0x3be   :  { %2458 = vmatprep.subr.mxu0 %v4335_v40  ;;  %2663 = vmatprep.subr.mxu1 %v4388_v10  ;;  %v4368_v40 = vld [vmem:[%s9725_s8 + $0xb08] sm:$0xff]  ;;  %v4314_v10 = vld [vmem:[%s9725_s8 + $0xa00] sm:$0xff] }
 0x3bf   :  { %2459 = vmatpush1.msra.mxu0 %v4334_v4  ;;  %2664 = vmatpush1.msra.mxu1 %v4387_v19  ;;  %v2609_v4 = vmax.f32 %v7076_v35, %v2608_v39  ;;  %v2404_v19 = vmax.f32 %v7061_v17, %v2403_v33  ;;  %v4504_v17 = vld [vmem:[%s9725_s8 + $0xdf8] sm:$0xff]  ;;  %v4450_v35 = vld [vmem:[%s9725_s8 + $0xcf0] sm:$0xff]  ;;  %v4433_v46 = vld [vmem:[%s9725_s8 + $0xc68] sm:$0xff] }
 0x3c0   :  { %2460 = vmatprep.subr.mxu0 %v4333_v36  ;;  %2665 = vmatprep.subr.mxu1 %v4386_v38  ;;  %v4367_v36 = vld [vmem:[%s9725_s8 + $0xb00] sm:$0xff]  ;;  %v4484_v39 = vld [vmem:[%s9725_s8 + $0xd58] sm:$0xff]  ;;  %v4430_v33 = vld [vmem:[%s9725_s8 + $0xc50] sm:$0xff] }
 0x3c1   :  { %2461 = vmatpush1.msra.mxu0 %v4332_v11  ;;  %2666 = vmatpush1.msra.mxu1 %v4385_v1  ;;  %v2619_v38 = vmax.f32 %v2609_v4, %v2618_v25  ;;  %v2414_v11 = vmax.f32 %v2404_v19, %v2413_v61  ;;  %v4451_v1 = vld [vmem:[%s9725_s8 + $0xcf8] sm:$0xff]  ;;  %v4429_v7 = vld [vmem:[%s9725_s8 + $0xc48] sm:$0xff]  ;;  %v4481_v25 = vld [vmem:[%s9725_s8 + $0xd40] sm:$0xff] }
 0x3c2   :  { %2462 = vmatprep.subr.mxu0 %v4331_v29  ;;  %2667 = vmatprep.subr.mxu1 %v4384_v13  ;;  %v4503_v29 = vld [vmem:[%s9725_s8 + $0xdf0] sm:$0xff]  ;;  %v4449_v13 = vld [vmem:[%s9725_s8 + $0xce8] sm:$0xff] }
 0x3c3   :  { %2463 = vmatpush1.msra.mxu0 %v4330_v62  ;;  %2668 = vmatpush1.msra.mxu1 %v4383_v60  ;;  %v4502_v62 = vld [vmem:[%s9725_s8 + $0xde8] sm:$0xff]  ;;  %v4448_v60 = vld [vmem:[%s9725_s8 + $0xce0] sm:$0xff] }
 0x3c4   :  { %2464 = vmatprep.subr.mxu0 %v4329_v52  ;;  %2669 = vmatprep.subr.mxu1 %v4382_v27  ;;  %v4501_v52 = vld [vmem:[%s9725_s8 + $0xde0] sm:$0xff]  ;;  %v4447_v27 = vld [vmem:[%s9725_s8 + $0xcd8] sm:$0xff] }
 0x3c5   :  { %2465 = vmatpush1.msra.mxu0 %v4328_v55  ;;  %2670 = vmatpush1.msra.mxu1 %v4381_v48  ;;  %v4500_v55 = vld [vmem:[%s9725_s8 + $0xdd8] sm:$0xff]  ;;  %v4446_v48 = vld [vmem:[%s9725_s8 + $0xcd0] sm:$0xff] }
 0x3c6   :  { %2466 = vmatprep.subr.mxu0 %v4327_v32  ;;  %2671 = vmatprep.subr.mxu1 %v4380_v30  ;;  %v4498_v32 = vld [vmem:[%s9725_s8 + $0xdc8] sm:$0xff]  ;;  %v4444_v30 = vld [vmem:[%s9725_s8 + $0xcc0] sm:$0xff] }
 0x3c7   :  { %2467 = vmatpush1.msra.mxu0 %v4326_v34  ;;  %2672 = vmatpush1.msra.mxu1 %v4379_v26  ;;  %v4497_v34 = vld [vmem:[%s9725_s8 + $0xdc0] sm:$0xff]  ;;  %v4443_v26 = vld [vmem:[%s9725_s8 + $0xcb8] sm:$0xff] }
 0x3c8   :  { %2468 = vmatprep.subr.mxu0 %v4325_v28  ;;  %2673 = vmatprep.subr.mxu1 %v4378_v41  ;;  %v4496_v28 = vld [vmem:[%s9725_s8 + $0xdb8] sm:$0xff]  ;;  %v4442_v41 = vld [vmem:[%s9725_s8 + $0xcb0] sm:$0xff] }
 0x3c9   :  { %2469 = vmatpush1.msra.mxu0 %v4324_v57  ;;  %2674 = vmatpush1.msra.mxu1 %v4377_v37  ;;  %v4495_v57 = vld [vmem:[%s9725_s8 + $0xdb0] sm:$0xff]  ;;  %v4441_v37 = vld [vmem:[%s9725_s8 + $0xca8] sm:$0xff] }
 0x3ca   :  { %2470 = vmatprep.subr.mxu0 %v4323_v0  ;;  %2675 = vmatprep.subr.mxu1 %v4376_v21  ;;  %v4494_v0 = vld [vmem:[%s9725_s8 + $0xda8] sm:$0xff]  ;;  %v4440_v21 = vld [vmem:[%s9725_s8 + $0xca0] sm:$0xff] }
 0x3cb   :  { %2471 = vmatpush1.msra.mxu0 %v4322_v56  ;;  %2676 = vmatpush1.msra.mxu1 %v4375_v18  ;;  %v4493_v56 = vld [vmem:[%s9725_s8 + $0xda0] sm:$0xff]  ;;  %v4439_v18 = vld [vmem:[%s9725_s8 + $0xc98] sm:$0xff] }
 0x3cc   :  { %2472 = vmatprep.subr.mxu0 %v4321_v9  ;;  %2677 = vmatprep.subr.mxu1 %v4374_v23  ;;  %v4491_v9 = vld [vmem:[%s9725_s8 + $0xd90] sm:$0xff]  ;;  %v4437_v23 = vld [vmem:[%s9725_s8 + $0xc88] sm:$0xff] }
 0x3cd   :  { %2473 = vmatpush1.msra.mxu0 %v4320_v15  ;;  %2678 = vmatpush1.msra.mxu1 %v4373_v44  ;;  %v4488_v15 = vld [vmem:[%s9725_s8 + $0xd78] sm:$0xff]  ;;  %v4434_v44 = vld [vmem:[%s9725_s8 + $0xc70] sm:$0xff] }
 0x3ce   :  { %2474 = vmatprep.subr.mxu0 %v4319_v49  ;;  %2679 = vmatprep.subr.mxu1 %v4372_v53  ;;  %v4487_v49 = vld [vmem:[%s9725_s8 + $0xd70] sm:$0xff]  ;;  %v4780_v53 = vpop.permute.xlu1 %4779 }
 0x3cf   :  { %2475 = vmatpush1.msra.mxu0 %v4318_v8  ;;  %2680 = vmatpush1.msra.mxu1 %v4371_v24  ;;  %v4486_v8 = vld [vmem:[%s9725_s8 + $0xd68] sm:$0xff]  ;;  %v4432_v24 = vld [vmem:[%s9725_s8 + $0xc60] sm:$0xff]  ;;  %v4782_v4 = vunpack.i.h.bf16 %v4780_v53  ;;  %v4781_v19 = vunpack.i.l.bf16 %v4780_v53 }
 0x3d0   :  { %2476 = vmatprep.subr.mxu0 %v4317_v2  ;;  %2681 = vmatprep.subr.mxu1 %v4370_v43  ;;  %v4485_v2 = vld [vmem:[%s9725_s8 + $0xd60] sm:$0xff]  ;;  %v4431_v43 = vld [vmem:[%s9725_s8 + $0xc58] sm:$0xff]  ;;  %v4604_v53 = vld [vmem:[%s9725_s8 + $0xfc8] sm:$0xff] }
 0x3d1   :  { %2477 = vmatpush1.msra.mxu0 %v4316_v20  ;;  %2682 = vmatpush1.msra.mxu1 %v4369_v59  ;;  %v4482_v20 = vld [vmem:[%s9725_s8 + $0xd48] sm:$0xff]  ;;  %v4428_v59 = vld [vmem:[%s9725_s8 + $0xc40] sm:$0xff] }
 0x3d2   :  { %2478 = vmatprep.subr.mxu0 %v4315_v6  ;;  %2683 = vmatprep.subr.mxu1 %v4368_v40  ;;  %v3025_v61 = vpop.permute.xlu1 %3024  ;;  %v2820_v6 = vpop.permute.xlu0 %2819  ;;  %v4427_v40 = vld [vmem:[%s9725_s8 + $0xc38] sm:$0xff] }
 0x3d3   :  { %2479 = vmatpush1.msra.mxu0 %v4314_v10  ;;  %2512 = vmatprep.mubr.f32.mxu0 %v4860_v54  ;;  %v4480_v10 = vld [vmem:[%s9725_s8 + $0xd38] sm:$0xff] }
 0x3d4   :  { %2684 = vmatpush1.msra.mxu1 %v4367_v36  ;;  %2717 = vmatprep.mubr.f32.mxu1 %v4860_v54  ;;  %v4777_v36 = vunpack.i.h.bf16 %v4775_v42 }
 0x3d5   :  { %2513 = vmatmul.mubr.f32.vlgmr.msra.gmra.mxu0 %v2414_v11  ;;  %2718 = vmatmul.mubr.f32.vlgmr.msra.gmra.mxu1 %v2619_v38  ;;  %v4776_v38 = vunpack.i.l.bf16 %v4775_v42  ;;  %v4426_v11 = vld [vmem:[%s9725_s8 + $0xc30] sm:$0xff]  ;;  %v4550_v42 = vld [vmem:[%s9725_s8 + $0xec0] sm:$0xff] }
 0x3d6   :  { %2858 = vmatprep.subr.mxu0 %v4451_v1  ;;  %3063 = vmatprep.subr.mxu1 %v4504_v17  ;;  %v4479_v1 = vld [vmem:[%s9725_s8 + $0xd30] sm:$0xff]  ;;  %v4425_v17 = vld [vmem:[%s9725_s8 + $0xc28] sm:$0xff] }
 0x3d7   :  { %2859 = vmatpush1.msra.mxu0 %v4450_v35  ;;  %3064 = vmatpush1.msra.mxu1 %v4503_v29  ;;  %v4478_v35 = vld [vmem:[%s9725_s8 + $0xd28] sm:$0xff]  ;;  %v3027_v29 = vsel %vm366_vm4, %v3025_v61, 0.0  ;;  %v4597_v61 = vld [vmem:[%s9725_s8 + $0xf90] sm:$0xff] }
 0x3d8   :  { %2860 = vmatprep.subr.mxu0 %v4449_v13  ;;  %3065 = vmatprep.subr.mxu1 %v4502_v62  ;;  %v2822_v13 = vsel %vm366_vm4, %v2820_v6, 0.0  ;;  %v4424_v62 = vld [vmem:[%s9725_s8 + $0xc20] sm:$0xff]  ;;  %v4543_v6 = vld [vmem:[%s9725_s8 + $0xe88] sm:$0xff] }
 0x3d9   :  { %2861 = vmatpush1.msra.mxu0 %v4448_v60  ;;  %3066 = vmatpush1.msra.mxu1 %v4501_v52  ;;  %v4477_v60 = vld [vmem:[%s9725_s8 + $0xd20] sm:$0xff]  ;;  %v4423_v52 = vld [vmem:[%s9725_s8 + $0xc18] sm:$0xff] }
 0x3da   :  { %2862 = vmatprep.subr.mxu0 %v4447_v27  ;;  %3067 = vmatprep.subr.mxu1 %v4500_v55  ;;  %v4476_v27 = vld [vmem:[%s9725_s8 + $0xd18] sm:$0xff]  ;;  %v3018_v55 = vsel %vm103_vm2, %v4777_v36, 0.0 }
 0x3db   :  { %2863 = vmatpush1.msra.mxu0 %v4446_v48  ;;  %3068 = vmatpush1.msra.mxu1 %v4499_v14  ;;  %v2813_v48 = vsel %vm103_vm2, %v4776_v38, 0.0  ;;  %v3023_v14 = vsel %vm108_vm3, %v4782_v4, 0.0  ;;  %v4595_v4 = vld [vmem:[%s9725_s8 + $0xf80] sm:$0xff]  ;;  %v4594_v36 = vld [vmem:[%s9725_s8 + $0xf78] sm:$0xff]  ;;  %v4540_v38 = vld [vmem:[%s9725_s8 + $0xe70] sm:$0xff] }
 0x3dc   :  { %2864 = vmatprep.subr.mxu0 %v4445_v3  ;;  %3069 = vmatprep.subr.mxu1 %v4498_v32  ;;  %v2818_v3 = vsel %vm108_vm3, %v4781_v19, 0.0  ;;  %v4422_v32 = vld [vmem:[%s9725_s8 + $0xc10] sm:$0xff]  ;;  %v4541_v19 = vld [vmem:[%s9725_s8 + $0xe78] sm:$0xff] }
 0x3dd   :  { %2865 = vmatpush1.msra.mxu0 %v4444_v30  ;;  %3070 = vmatpush1.msra.mxu1 %v4497_v34  ;;  %v4475_v30 = vld [vmem:[%s9725_s8 + $0xd10] sm:$0xff]  ;;  %v3028_v34 = vmax.f32 %v3023_v14, %v3027_v29  ;;  %v4592_v29 = vld [vmem:[%s9725_s8 + $0xf68] sm:$0xff] }
 0x3de   :  { %2866 = vmatprep.subr.mxu0 %v4443_v26  ;;  %3071 = vmatprep.subr.mxu1 %v4496_v28  ;;  %v2823_v26 = vmax.f32 %v2818_v3, %v2822_v13  ;;  %v4421_v28 = vld [vmem:[%s9725_s8 + $0xc08] sm:$0xff]  ;;  %v4538_v13 = vld [vmem:[%s9725_s8 + $0xe60] sm:$0xff] }
 0x3df   :  { %2867 = vmatpush1.msra.mxu0 %v4442_v41  ;;  %3072 = vmatpush1.msra.mxu1 %v4495_v57  ;;  %v4474_v41 = vld [vmem:[%s9725_s8 + $0xd08] sm:$0xff]  ;;  %v4420_v57 = vld [vmem:[%s9725_s8 + $0xc00] sm:$0xff] }
 0x3e0   :  { %2868 = vmatprep.subr.mxu0 %v4441_v37  ;;  %3073 = vmatprep.subr.mxu1 %v4494_v0  ;;  %v3019_v37 = vmax.f32 %v7224_v50, %v3018_v55  ;;  %v2814_v0 = vmax.f32 %v7216_v58, %v2813_v48  ;;  %v4610_v58 = vld [vmem:[%s9725_s8 + $0xff8] sm:$0xff]  ;;  %v4556_v50 = vld [vmem:[%s9725_s8 + $0xef0] sm:$0xff]  ;;  %v4535_v48 = vld [vmem:[%s9725_s8 + $0xe48] sm:$0xff] }
 0x3e1   :  { %2869 = vmatpush1.msra.mxu0 %v4440_v21  ;;  %3074 = vmatpush1.msra.mxu1 %v4493_v56  ;;  %v4473_v21 = vld [vmem:[%s9725_s8 + $0xd00] sm:$0xff]  ;;  %v4589_v55 = vld [vmem:[%s9725_s8 + $0xf50] sm:$0xff]  ;;  %v4588_v14 = vld [vmem:[%s9725_s8 + $0xf48] sm:$0xff] }
 0x3e2   :  { %2870 = vmatprep.subr.mxu0 %v4439_v18  ;;  %3075 = vmatprep.subr.mxu1 %v4492_v22  ;;  %v3029_v56 = vmax.f32 %v3019_v37, %v3028_v34  ;;  %v2824_v18 = vmax.f32 %v2814_v0, %v2823_v26  ;;  %v4557_v22 = vld [vmem:[%s9725_s8 + $0xef8] sm:$0xff]  ;;  %v4534_v3 = vld [vmem:[%s9725_s8 + $0xe40] sm:$0xff] }
 0x3e3   :  { %2871 = vmatpush1.msra.mxu0 %v4438_v5  ;;  %3076 = vmatpush1.msra.mxu1 %v4491_v9  ;;  %v4609_v5 = vld [vmem:[%s9725_s8 + $0xff0] sm:$0xff]  ;;  %v4555_v9 = vld [vmem:[%s9725_s8 + $0xee8] sm:$0xff]  ;;  %v4533_v26 = vld [vmem:[%s9725_s8 + $0xe38] sm:$0xff] }
 0x3e4   :  { %2872 = vmatprep.subr.mxu0 %v4437_v23  ;;  %3077 = vmatprep.subr.mxu1 %v4490_v63  ;;  %v4608_v23 = vld [vmem:[%s9725_s8 + $0xfe8] sm:$0xff]  ;;  %v4554_v63 = vld [vmem:[%s9725_s8 + $0xee0] sm:$0xff] }
 0x3e5   :  { %2873 = vmatpush1.msra.mxu0 %v4436_v31  ;;  %3078 = vmatpush1.msra.mxu1 %v4489_v16  ;;  %v4607_v31 = vld [vmem:[%s9725_s8 + $0xfe0] sm:$0xff]  ;;  %v4553_v16 = vld [vmem:[%s9725_s8 + $0xed8] sm:$0xff] }
 0x3e6   :  { %2874 = vmatprep.subr.mxu0 %v4435_v47  ;;  %3079 = vmatprep.subr.mxu1 %v4488_v15  ;;  %v4606_v47 = vld [vmem:[%s9725_s8 + $0xfd8] sm:$0xff]  ;;  %v4552_v15 = vld [vmem:[%s9725_s8 + $0xed0] sm:$0xff] }
 0x3e7   :  { %2875 = vmatpush1.msra.mxu0 %v4434_v44  ;;  %3080 = vmatpush1.msra.mxu1 %v4487_v49  ;;  %v4605_v44 = vld [vmem:[%s9725_s8 + $0xfd0] sm:$0xff]  ;;  %v4551_v49 = vld [vmem:[%s9725_s8 + $0xec8] sm:$0xff] }
 0x3e8   :  { %2876 = vmatprep.subr.mxu0 %v4433_v46  ;;  %3081 = vmatprep.subr.mxu1 %v4486_v8  ;;  %v4603_v46 = vld [vmem:[%s9725_s8 + $0xfc0] sm:$0xff]  ;;  %v4549_v8 = vld [vmem:[%s9725_s8 + $0xeb8] sm:$0xff] }
 0x3e9   :  { %2877 = vmatpush1.msra.mxu0 %v4432_v24  ;;  %3082 = vmatpush1.msra.mxu1 %v4485_v2  ;;  %v4602_v24 = vld [vmem:[%s9725_s8 + $0xfb8] sm:$0xff]  ;;  %v4548_v2 = vld [vmem:[%s9725_s8 + $0xeb0] sm:$0xff] }
 0x3ea   :  { %2878 = vmatprep.subr.mxu0 %v4431_v43  ;;  %3083 = vmatprep.subr.mxu1 %v4484_v39  ;;  %v4601_v43 = vld [vmem:[%s9725_s8 + $0xfb0] sm:$0xff]  ;;  %v4547_v39 = vld [vmem:[%s9725_s8 + $0xea8] sm:$0xff] }
 0x3eb   :  { %2879 = vmatpush1.msra.mxu0 %v4430_v33  ;;  %3084 = vmatpush1.msra.mxu1 %v4483_v45  ;;  %v4600_v33 = vld [vmem:[%s9725_s8 + $0xfa8] sm:$0xff]  ;;  %v4546_v45 = vld [vmem:[%s9725_s8 + $0xea0] sm:$0xff] }
 0x3ec   :  { %2880 = vmatprep.subr.mxu0 %v4429_v7  ;;  %3085 = vmatprep.subr.mxu1 %v4482_v20  ;;  %v4599_v7 = vld [vmem:[%s9725_s8 + $0xfa0] sm:$0xff]  ;;  %v4545_v20 = vld [vmem:[%s9725_s8 + $0xe98] sm:$0xff] }
 0x3ed   :  { %2881 = vmatpush1.msra.mxu0 %v4428_v59  ;;  %3086 = vmatpush1.msra.mxu1 %v4481_v25  ;;  %v4598_v59 = vld [vmem:[%s9725_s8 + $0xf98] sm:$0xff]  ;;  %v4544_v25 = vld [vmem:[%s9725_s8 + $0xe90] sm:$0xff] }
 0x3ee   :  { %2882 = vmatprep.subr.mxu0 %v4427_v40  ;;  %3087 = vmatprep.subr.mxu1 %v4480_v10  ;;  %v4596_v40 = vld [vmem:[%s9725_s8 + $0xf88] sm:$0xff]  ;;  %v4542_v10 = vld [vmem:[%s9725_s8 + $0xe80] sm:$0xff] }
 0x3ef   :  { %2883 = vmatpush1.msra.mxu0 %v4426_v11  ;;  %3088 = vmatpush1.msra.mxu1 %v4479_v1  ;;  %v4593_v11 = vld [vmem:[%s9725_s8 + $0xf70] sm:$0xff]  ;;  %v4790_v1 = vpop.permute.xlu1 %4789 }
 0x3f0   :  { %2884 = vmatprep.subr.mxu0 %v4425_v17  ;;  %3089 = vmatprep.subr.mxu1 %v4478_v35  ;;  %v4785_v17 = vpop.permute.xlu0 %4784  ;;  %v4539_v35 = vld [vmem:[%s9725_s8 + $0xe68] sm:$0xff] }
 0x3f1   :  { %2885 = vmatpush1.msra.mxu0 %v4424_v62  ;;  %3090 = vmatpush1.msra.mxu1 %v4477_v60  ;;  %v4591_v62 = vld [vmem:[%s9725_s8 + $0xf60] sm:$0xff]  ;;  %v4537_v60 = vld [vmem:[%s9725_s8 + $0xe58] sm:$0xff]  ;;  %v4787_v37 = vunpack.i.h.bf16 %v4785_v17  ;;  %v4786_v0 = vunpack.i.l.bf16 %v4785_v17 }
 0x3f2   :  { %2886 = vmatprep.subr.mxu0 %v4423_v52  ;;  %3091 = vmatprep.subr.mxu1 %v4476_v27  ;;  %v4590_v52 = vld [vmem:[%s9725_s8 + $0xf58] sm:$0xff]  ;;  %v4536_v27 = vld [vmem:[%s9725_s8 + $0xe50] sm:$0xff] }
 0x3f3   :  { %2887 = vmatpush1.msra.mxu0 %v4422_v32  ;;  %3092 = vmatpush1.msra.mxu1 %v4475_v30  ;;  %v4587_v32 = vld [vmem:[%s9725_s8 + $0xf40] sm:$0xff]  ;;  %v3435_v30 = vpop.permute.xlu1 %3434  ;;  %v3585_v17 = vld [vmem:[%s9769_s27 + $0xb8] sm:$0xff] }
 0x3f4   :  { %2888 = vmatprep.subr.mxu0 %v4421_v28  ;;  %3093 = vmatprep.subr.mxu1 %v4474_v41  ;;  %v3230_v34 = vpop.permute.xlu0 %3229  ;;  %v4586_v28 = vld [vmem:[%s9725_s8 + $0xf38] sm:$0xff]  ;;  %v4792_v41 = vunpack.i.h.bf16 %v4790_v1 }
 0x3f5   :  { %2889 = vmatpush1.msra.mxu0 %v4420_v57  ;;  %2922 = vmatprep.mubr.f32.mxu0 %v4860_v54  ;;  %v4791_v57 = vunpack.i.l.bf16 %v4790_v1  ;;  %v3570_v1 = vld [vmem:[%s9769_s27 + $0x40] sm:$0xff] }
 0x3f6   :  { %3094 = vmatpush1.msra.mxu1 %v4473_v21  ;;  %3127 = vmatprep.mubr.f32.mxu1 %v4860_v54  ;;  %v4532_v21 = vld [vmem:[%s9725_s8 + $0xe30] sm:$0xff] }
 0x3f7   :  { %2923 = vmatmul.mubr.f32.vlgmr.msra.gmra.mxu0 %v2824_v18  ;;  %3128 = vmatmul.mubr.f32.vlgmr.msra.gmra.mxu1 %v3029_v56  ;;  %v4585_v56 = vld [vmem:[%s9725_s8 + $0xf30] sm:$0xff]  ;;  %v4531_v18 = vld [vmem:[%s9725_s8 + $0xe28] sm:$0xff] }
 0x3f8   :  { %3268 = vmatprep.subr.mxu0 %v4557_v22  ;;  %3473 = vmatprep.subr.mxu1 %v4610_v58  ;;  %v4584_v22 = vld [vmem:[%s9725_s8 + $0xf28] sm:$0xff]  ;;  %v3437_v58 = vsel %vm366_vm4, %v3435_v30, 0.0  ;;  %v3686_v30 = vld [vmem:[%s9770_s13 + $0x70] sm:$0xff] }
 0x3f9   :  { %3269 = vmatpush1.msra.mxu0 %v4556_v50  ;;  %3474 = vmatpush1.msra.mxu1 %v4609_v5  ;;  %v3232_v50 = vsel %vm366_vm4, %v3230_v34, 0.0  ;;  %v4530_v5 = vld [vmem:[%s9725_s8 + $0xe20] sm:$0xff]  ;;  %v3579_v34 = vld [vmem:[%s9769_s27 + $0x88] sm:$0xff] }
 0x3fa   :  { %3270 = vmatprep.subr.mxu0 %v4555_v9  ;;  %3475 = vmatprep.subr.mxu1 %v4608_v23  ;;  %v4583_v9 = vld [vmem:[%s9725_s8 + $0xf20] sm:$0xff]  ;;  %v4529_v23 = vld [vmem:[%s9725_s8 + $0xe18] sm:$0xff] }
 0x3fb   :  { %3271 = vmatpush1.msra.mxu0 %v4554_v63  ;;  %3476 = vmatpush1.msra.mxu1 %v4607_v31  ;;  %v4582_v63 = vld [vmem:[%s9725_s8 + $0xf18] sm:$0xff]  ;;  %v3428_v31 = vsel %vm103_vm2, %v4787_v37, 0.0  ;;  %v3684_v37 = vld [vmem:[%s9770_s13 + $0x60] sm:$0xff] }
 0x3fc   :  { %3272 = vmatprep.subr.mxu0 %v4553_v16  ;;  %3477 = vmatprep.subr.mxu1 %v4606_v47  ;;  %v3223_v16 = vsel %vm103_vm2, %v4786_v0, 0.0  ;;  %v3433_v47 = vsel %vm108_vm3, %v4792_v41, 0.0  ;;  %v3578_v41 = vld [vmem:[%s9769_s27 + $0x80] sm:$0xff]  ;;  %v3683_v0 = vld [vmem:[%s9770_s13 + $0x58] sm:$0xff] }
 0x3fd   :  { %3273 = vmatpush1.msra.mxu0 %v4552_v15  ;;  %3478 = vmatpush1.msra.mxu1 %v4605_v44  ;;  %v3228_v15 = vsel %vm108_vm3, %v4791_v57, 0.0  ;;  %v4528_v44 = vld [vmem:[%s9725_s8 + $0xe10] sm:$0xff]  ;;  %v3562_v57 = vld [vmem:[%s9769_s27] sm:$0xff] }
 0x3fe   :  { %3274 = vmatprep.subr.mxu0 %v4551_v49  ;;  %3479 = vmatprep.subr.mxu1 %v4604_v53  ;;  %v4581_v49 = vld [vmem:[%s9725_s8 + $0xf10] sm:$0xff]  ;;  %v3438_v53 = vmax.f32 %v3433_v47, %v3437_v58 }
 0x3ff   :  { %3275 = vmatpush1.msra.mxu0 %v4550_v42  ;;  %3480 = vmatpush1.msra.mxu1 %v4603_v46  ;;  %v3233_v42 = vmax.f32 %v3228_v15, %v3232_v50  ;;  %v4527_v46 = vld [vmem:[%s9725_s8 + $0xe08] sm:$0xff]  ;;  %v3678_v58 = vld [vmem:[%s9770_s13 + $0x30] sm:$0xff] }
 0x400   :  { %3276 = vmatprep.subr.mxu0 %v4549_v8  ;;  %3481 = vmatprep.subr.mxu1 %v4602_v24  ;;  %v4580_v8 = vld [vmem:[%s9725_s8 + $0xf08] sm:$0xff]  ;;  %v4526_v24 = vld [vmem:[%s9725_s8 + $0xe00] sm:$0xff] }
 0x401   :  { %3277 = vmatpush1.msra.mxu0 %v4548_v2  ;;  %3482 = vmatpush1.msra.mxu1 %v4601_v43  ;;  %v3429_v2 = vmax.f32 %v7433_v51, %v3428_v31  ;;  %v3224_v43 = vmax.f32 %v7419_v12, %v3223_v16  ;;  %v3593_v12 = vld [vmem:[%s9769_s27 + $0xf8] sm:$0xff]  ;;  %v3677_v50 = vld [vmem:[%s9770_s13 + $0x28] sm:$0xff] }
 0x402   :  { %3278 = vmatprep.subr.mxu0 %v4547_v39  ;;  %3483 = vmatprep.subr.mxu1 %v4600_v33  ;;  %v4579_v39 = vld [vmem:[%s9725_s8 + $0xf00] sm:$0xff]  ;;  %v3577_v51 = vld [vmem:[%s9769_s27 + $0x78] sm:$0xff] }
 0x403   :  { %3279 = vmatpush1.msra.mxu0 %v4546_v45  ;;  %3484 = vmatpush1.msra.mxu1 %v4599_v7  ;;  %v3439_v33 = vmax.f32 %v3429_v2, %v3438_v53  ;;  %v3234_v45 = vmax.f32 %v3224_v43, %v3233_v42  ;;  %v3592_v7 = vld [vmem:[%s9769_s27 + $0xf0] sm:$0xff] }
 0x404   :  { %3280 = vmatprep.subr.mxu0 %v4545_v20  ;;  %3485 = vmatprep.subr.mxu1 %v4598_v59  ;;  %v3576_v20 = vld [vmem:[%s9769_s27 + $0x70] sm:$0xff]  ;;  %v3591_v59 = vld [vmem:[%s9769_s27 + $0xe8] sm:$0xff] }
 0x405   :  { %3281 = vmatpush1.msra.mxu0 %v4544_v25  ;;  %3486 = vmatpush1.msra.mxu1 %v4597_v61  ;;  %v3575_v25 = vld [vmem:[%s9769_s27 + $0x68] sm:$0xff]  ;;  %v3590_v61 = vld [vmem:[%s9769_s27 + $0xe0] sm:$0xff] }
 0x406   :  { %3282 = vmatprep.subr.mxu0 %v4543_v6  ;;  %3487 = vmatprep.subr.mxu1 %v4596_v40  ;;  %v3574_v6 = vld [vmem:[%s9769_s27 + $0x60] sm:$0xff]  ;;  %v3589_v40 = vld [vmem:[%s9769_s27 + $0xd8] sm:$0xff] }
 0x407   :  { %3283 = vmatpush1.msra.mxu0 %v4542_v10  ;;  %3488 = vmatpush1.msra.mxu1 %v4595_v4  ;;  %v3573_v10 = vld [vmem:[%s9769_s27 + $0x58] sm:$0xff]  ;;  %v3588_v4 = vld [vmem:[%s9769_s27 + $0xd0] sm:$0xff] }
 0x408   :  { %3284 = vmatprep.subr.mxu0 %v4541_v19  ;;  %3489 = vmatprep.subr.mxu1 %v4594_v36  ;;  %v3572_v19 = vld [vmem:[%s9769_s27 + $0x50] sm:$0xff]  ;;  %v3587_v36 = vld [vmem:[%s9769_s27 + $0xc8] sm:$0xff] }
 0x409   :  { %3285 = vmatpush1.msra.mxu0 %v4540_v38  ;;  %3490 = vmatpush1.msra.mxu1 %v4593_v11  ;;  %v3571_v38 = vld [vmem:[%s9769_s27 + $0x48] sm:$0xff]  ;;  %v3586_v11 = vld [vmem:[%s9769_s27 + $0xc0] sm:$0xff] }
 0x40a   :  { %3286 = vmatprep.subr.mxu0 %v4539_v35  ;;  %3491 = vmatprep.subr.mxu1 %v4592_v29  ;;  %v3569_v35 = vld [vmem:[%s9769_s27 + $0x38] sm:$0xff]  ;;  %v3584_v29 = vld [vmem:[%s9769_s27 + $0xb0] sm:$0xff] }
 0x40b   :  { %3287 = vmatpush1.msra.mxu0 %v4538_v13  ;;  %3492 = vmatpush1.msra.mxu1 %v4591_v62  ;;  %v3568_v13 = vld [vmem:[%s9769_s27 + $0x30] sm:$0xff]  ;;  %v3583_v62 = vld [vmem:[%s9769_s27 + $0xa8] sm:$0xff] }
 0x40c   :  { %3288 = vmatprep.subr.mxu0 %v4537_v60  ;;  %3493 = vmatprep.subr.mxu1 %v4590_v52  ;;  %v3567_v60 = vld [vmem:[%s9769_s27 + $0x28] sm:$0xff]  ;;  %v3582_v52 = vld [vmem:[%s9769_s27 + $0xa0] sm:$0xff] }
 0x40d   :  { %3289 = vmatpush1.msra.mxu0 %v4536_v27  ;;  %3494 = vmatpush1.msra.mxu1 %v4589_v55  ;;  %v3566_v27 = vld [vmem:[%s9769_s27 + $0x20] sm:$0xff]  ;;  %v3581_v55 = vld [vmem:[%s9769_s27 + $0x98] sm:$0xff] }
 0x40e   :  { %3290 = vmatprep.subr.mxu0 %v4535_v48  ;;  %3495 = vmatprep.subr.mxu1 %v4588_v14  ;;  %v3565_v48 = vld [vmem:[%s9769_s27 + $0x18] sm:$0xff]  ;;  %v3580_v14 = vld [vmem:[%s9769_s27 + $0x90] sm:$0xff] }
 0x40f   :  { %3291 = vmatpush1.msra.mxu0 %v4534_v3  ;;  %3496 = vmatpush1.msra.mxu1 %v4587_v32  ;;  %v3564_v3 = vld [vmem:[%s9769_s27 + $0x10] sm:$0xff]  ;;  %v3687_v32 = vld [vmem:[%s9770_s13 + $0x78] sm:$0xff] }
 0x410   :  { %3292 = vmatprep.subr.mxu0 %v4533_v26  ;;  %3497 = vmatprep.subr.mxu1 %v4586_v28  ;;  %v3563_v26 = vld [vmem:[%s9769_s27 + $0x8] sm:$0xff]  ;;  %s9773_s27 = sld [smem:[#allocation139_spill]] }
 0x411   :  { %3293 = vmatpush1.msra.mxu0 %v4532_v21  ;;  %3498 = vmatpush1.msra.mxu1 %v4585_v56  ;;  %v3685_v28 = vld [vmem:[%s9770_s13 + $0x68] sm:$0xff]  ;;  %v3682_v21 = vld [vmem:[%s9770_s13 + $0x50] sm:$0xff] }
 0x412   :  { %3294 = vmatprep.subr.mxu0 %v4531_v18  ;;  %3499 = vmatprep.subr.mxu1 %v4584_v22  ;;  %v3681_v56 = vld [vmem:[%s9770_s13 + $0x48] sm:$0xff]  ;;  %v3680_v18 = vld [vmem:[%s9770_s13 + $0x40] sm:$0xff]  ;;  %v3679_v22 = vld [vmem:[%s9770_s13 + $0x38] sm:$0xff] }
 0x413   :  { %3295 = vmatpush1.msra.mxu0 %v4530_v5  ;;  %3500 = vmatpush1.msra.mxu1 %v4583_v9  ;;  %v600_v5 = vpop.f32.mrf.mxu0  ;;  %v671_v9 = vpop.f32.mrf.mxu1 }
 0x414   :  { %3296 = vmatprep.subr.mxu0 %v4529_v23  ;;  %3501 = vmatprep.subr.mxu1 %v4582_v63  ;;  %v672_v16 = vadd.f32 %v671_v9, %v600_v5 }
 0x415   :  { %3297 = vmatpush1.msra.mxu0 %v4528_v44  ;;  %3502 = vmatpush1.msra.mxu1 %v4581_v49  ;;  %v602_v23 = vpop.f32.mrf.mxu0  ;;  %v673_v31 = vpop.f32.mrf.mxu1 }
 0x416   :  { %3298 = vmatprep.subr.mxu0 %v4527_v46  ;;  %3503 = vmatprep.subr.mxu1 %v4580_v8  ;;  %v674_v44 = vadd.f32 %v673_v31, %v602_v23 }
 0x417   :  { %3299 = vmatpush1.msra.mxu0 %v4526_v24  ;;  %3332 = vmatprep.mubr.f32.mxu0 %v4860_v54  ;;  %v874_v63 = vpop.f32.mrf.mxu0  ;;  %v1079_v47 = vpop.f32.mrf.mxu1 }
 0x418   :  { %3504 = vmatpush1.msra.mxu1 %v4579_v39  ;;  %3537 = vmatprep.mubr.f32.mxu1 %v4860_v54  ;;  %v879_v49 = vadd.f32 %v874_v63, %v672_v16 }
 0x419   :  { %3333 = vmatmul.mubr.f32.vlgmr.msra.gmra.mxu0 %v3234_v45  ;;  %3538 = vmatmul.mubr.f32.vlgmr.msra.gmra.mxu1 %v3439_v33  ;;  %v876_v15 = vpop.f32.mrf.mxu0  ;;  %v1081_v46 = vpop.f32.mrf.mxu1 }
 0x41a   :  { %4665 = vmatprep.subr.mxu1 %v4860_v54  ;;  %4613 = vmatprep.subr.mxu0 %v3593_v12  ;;  %v880_v42 = vadd.f32 %v876_v15, %v674_v44  ;;  %v1084_v8 = vadd.f32 %v1079_v47, %v879_v49 }
 0x41b   :  { %4614 = vmatpush3.msra.mxu0 %v3577_v51  ;;  %4666 = vmatpush3.msra.mxu1 %v3687_v32 }
 0x41c   :  { %4615 = vmatprep.subr.mxu0 %v3592_v7  ;;  %4667 = vmatprep.subr.mxu1 %v4860_v54  ;;  %v1085_v43 = vadd.f32 %v1081_v46, %v880_v42  ;;  %v3675_v42 = vld [vmem:[%s9770_s13 + $0x18] sm:$0xff]  ;;  %v3674_v46 = vld [vmem:[%s9770_s13 + $0x10] sm:$0xff] }
 0x41d   :  { %4616 = vmatpush3.msra.mxu0 %v3576_v20  ;;  %4668 = vmatpush3.msra.mxu1 %v3686_v30 }
 0x41e   :  { %4617 = vmatprep.subr.mxu0 %v3591_v59  ;;  %4669 = vmatprep.subr.mxu1 %v4860_v54 }
 0x41f   :  { %4618 = vmatpush3.msra.mxu0 %v3575_v25  ;;  %4670 = vmatpush3.msra.mxu1 %v3685_v28 }
 0x420   :  { %4619 = vmatprep.subr.mxu0 %v3590_v61  ;;  %4671 = vmatprep.subr.mxu1 %v4860_v54 }
 0x421   :  { %4620 = vmatpush3.msra.mxu0 %v3574_v6  ;;  %4672 = vmatpush3.msra.mxu1 %v3684_v37 }
 0x422   :  { %4621 = vmatprep.subr.mxu0 %v3589_v40  ;;  %4673 = vmatprep.subr.mxu1 %v4860_v54 }
 0x423   :  { %4622 = vmatpush3.msra.mxu0 %v3573_v10  ;;  %4674 = vmatpush3.msra.mxu1 %v3683_v0  ;;  %v3546_v0 = vld [vmem:[%s9771_s3] sm:$0x3] }
 0x424   :  { %4623 = vmatprep.subr.mxu0 %v3588_v4  ;;  %4675 = vmatprep.subr.mxu1 %v4860_v54 }
 0x425   :  { %4624 = vmatpush3.msra.mxu0 %v3572_v19  ;;  %4676 = vmatpush3.msra.mxu1 %v3682_v21 }
 0x426   :  { %4625 = vmatprep.subr.mxu0 %v3587_v36  ;;  %4677 = vmatprep.subr.mxu1 %v4860_v54 }
 0x427   :  { %4626 = vmatpush3.msra.mxu0 %v3571_v38  ;;  %4678 = vmatpush3.msra.mxu1 %v3681_v56 }
 0x428   :  { %4627 = vmatprep.subr.mxu0 %v3586_v11  ;;  %4679 = vmatprep.subr.mxu1 %v4860_v54 }
 0x429   :  { %4628 = vmatpush3.msra.mxu0 %v3570_v1  ;;  %4680 = vmatpush3.msra.mxu1 %v3680_v18 }
 0x42a   :  { %4629 = vmatprep.subr.mxu0 %v3585_v17  ;;  %4681 = vmatprep.subr.mxu1 %v4860_v54 }
 0x42b   :  { %4630 = vmatpush3.msra.mxu0 %v3569_v35  ;;  %4682 = vmatpush3.msra.mxu1 %v3679_v22 }
 0x42c   :  { %4631 = vmatprep.subr.mxu0 %v3584_v29  ;;  %4683 = vmatprep.subr.mxu1 %v4860_v54 }
 0x42d   :  { %4632 = vmatpush3.msra.mxu0 %v3568_v13  ;;  %4684 = vmatpush3.msra.mxu1 %v3678_v58 }
 0x42e   :  { %4633 = vmatprep.subr.mxu0 %v3583_v62  ;;  %4685 = vmatprep.subr.mxu1 %v4860_v54 }
 0x42f   :  { %4634 = vmatpush3.msra.mxu0 %v3567_v60  ;;  %4686 = vmatpush3.msra.mxu1 %v3677_v50  ;;  %v1284_v53 = vpop.f32.mrf.mxu0  ;;  %v1489_v24 = vpop.f32.mrf.mxu1 }
 0x430   :  { %4635 = vmatprep.subr.mxu0 %v3582_v52  ;;  %4687 = vmatprep.subr.mxu1 %v4860_v54  ;;  %v1289_v39 = vadd.f32 %v1284_v53, %v1084_v8  ;;  %v3676_v53 = vld [vmem:[%s9770_s13 + $0x20] sm:$0xff]  ;;  %v3673_v8 = vld [vmem:[%s9770_s13 + $0x8] sm:$0xff] }
 0x431   :  { %4636 = vmatpush3.msra.mxu0 %v3566_v27  ;;  %v1286_v2 = vpop.f32.mrf.mxu0  ;;  %v1491_v12 = vpop.f32.mrf.mxu1  ;;  %v3548_v27 = vlaneseq  ;;  %4688 = vmatpush3.msra.mxu1 %v3676_v53 }
 0x432   :  { %4637 = vmatprep.subr.mxu0 %v3581_v55  ;;  %v1290_v45 = vadd.f32 %v1286_v2, %v1085_v43  ;;  %v1494_v51 = vadd.f32 %v1489_v24, %v1289_v39  ;;  %4689 = vmatprep.subr.mxu1 %v4860_v54  ;;  %v3672_v24 = vld [vmem:[%s9770_s13] sm:$0xff] }
 0x433   :  { %4638 = vmatpush3.msra.mxu0 %v3565_v48  ;;  %v3549_v30 = vshrl.u32 %v3548_v27, 7  ;;  %4690 = vmatpush3.msra.mxu1 %v3675_v42  ;;  %v4611_v43 = vld [vmem:[%s9772_s14] ss:$0 sm:$0xff] }
 0x434   :  { %4639 = vmatprep.subr.mxu0 %v3580_v14  ;;  %v1495_v59 = vadd.f32 %v1491_v12, %v1290_v45  ;;  %4697 = vmatprep.mubr.msk.f32.mxu1 %vm4861_vm5, %v4860_v54 }
 0x435   :  { %4640 = vmatpush3.msra.mxu0 %v3564_v3  ;;  %v3554_v21 = vsub.s32 1, %v3549_v30  ;;  %4691 = vmatprep.subr.mxu1 %v4860_v54 }
 0x436   :  { %4641 = vmatprep.subr.mxu0 %v3579_v34  ;;  %4692 = vmatpush3.msra.mxu1 %v3674_v46 }
 0x437   :  { %4642 = vmatpush3.msra.mxu0 %v3563_v26  ;;  %v3555_v63 = vrot.slane %v3546_v0, %v3554_v21  ;;  %4693 = vmatprep.subr.mxu1 %v4860_v54 }
 0x438   :  { %4643 = vmatprep.subr.mxu0 %v3578_v41  ;;  %4694 = vmatpush3.msra.mxu1 %v3673_v8 }
 0x439   :  { %4644 = vmatpush3.msra.mxu0 %v3562_v57  ;;  %v3550_v57 = vsub.s32 0, %v3549_v30  ;;  %4695 = vmatprep.subr.mxu1 %v4860_v54 }
 0x43a   :  { %4696 = vmatpush3.msra.mxu1 %v3672_v24 }
 0x43b   :  { %v3551_v50 = vrot.slane %v3546_v0, %v3550_v57 }
 0x451   :  { %v1694_v33 = vpop.f32.mrf.mxu0  ;;  %v1899_v7 = vpop.f32.mrf.mxu1 }
 0x452   :  { %v1699_v25 = vadd.f32 %v1694_v33, %v1494_v51  ;;  %v4612_v51 = vld [vmem:[%s9773_s27] ss:$0 sm:$0xff] }
 0x453   :  { %v1696_v20 = vpop.f32.mrf.mxu0  ;;  %v1901_v40 = vpop.f32.mrf.mxu1 }
 0x454   :  { %v1700_v6 = vadd.f32 %v1696_v20, %v1495_v59  ;;  %v1904_v10 = vadd.f32 %v1899_v7, %v1699_v25 }
 0x456   :  { %v1905_v36 = vadd.f32 %v1901_v40, %v1700_v6 }
 0x473   :  { %v2104_v61 = vpop.f32.mrf.mxu0  ;;  %v2309_v4 = vpop.f32.mrf.mxu1 }
 0x474   :  { %v2109_v38 = vadd.f32 %v2104_v61, %v1904_v10 }
 0x475   :  { %v2106_v19 = vpop.f32.mrf.mxu0  ;;  %v2311_v17 = vpop.f32.mrf.mxu1 }
 0x476   :  { %v2110_v1 = vadd.f32 %v2106_v19, %v1905_v36  ;;  %v2314_v35 = vadd.f32 %v2309_v4, %v2109_v38 }
 0x478   :  { %v2315_v62 = vadd.f32 %v2311_v17, %v2110_v1 }
 0x495   :  { %v2514_v11 = vpop.f32.mrf.mxu0  ;;  %v2719_v29 = vpop.f32.mrf.mxu1 }
 0x496   :  { %v2519_v60 = vadd.f32 %v2514_v11, %v2314_v35 }
 0x497   :  { %v2516_v13 = vpop.f32.mrf.mxu0  ;;  %v2721_v48 = vpop.f32.mrf.mxu1 }
 0x498   :  { %v2520_v55 = vadd.f32 %v2516_v13, %v2315_v62  ;;  %v2724_v14 = vadd.f32 %v2719_v29, %v2519_v60 }
 0x49a   :  { %v2725_v34 = vadd.f32 %v2721_v48, %v2520_v55 }
 0x4b7   :  { %v2924_v52 = vpop.f32.mrf.mxu0  ;;  %v3129_v3 = vpop.f32.mrf.mxu1 }
 0x4b8   :  { %v2929_v26 = vadd.f32 %v2924_v52, %v2724_v14 }
 0x4b9   :  { %v2926_v32 = vpop.f32.mrf.mxu0  ;;  %v3131_v41 = vpop.f32.mrf.mxu1 }
 0x4ba   :  { %v2930_v28 = vadd.f32 %v2926_v32, %v2725_v34  ;;  %v3134_v37 = vadd.f32 %v3129_v3, %v2929_v26 }
 0x4bc   :  { %v3135_v22 = vadd.f32 %v3131_v41, %v2930_v28 }
 0x4d9   :  { %v3334_v56 = vpop.f32.mrf.mxu0  ;;  %v3539_v18 = vpop.f32.mrf.mxu1 }
 0x4da   :  { %v3339_v58 = vadd.f32 %v3334_v56, %v3134_v37 }
 0x4db   :  { %v3336_v5 = vpop.f32.mrf.mxu0  ;;  %v3541_v31 = vpop.f32.mrf.mxu1 }
 0x4dc   :  { %v3544_v9 = vadd.f32 %v3539_v18, %v3339_v58  ;;  %v3340_v23 = vadd.f32 %v3336_v5, %v3135_v22 }
 0x4de   :  { %v3545_v16 = vadd.f32 %v3541_v31, %v3340_v23  ;;  %v3558_v47 = vadd.f32 %v3551_v50, %v3544_v9 }
 0x4e0   :  { %v3559_v15 = vadd.f32 %v3555_v63, %v3545_v16  ;;  %v3560_v49 = vmax.f32 %v3558_v47, 0.0 }
 0x4e2   :  { %v3561_v44 = vmax.f32 %v3559_v15, 0.0 }
 0x4e4   :  { %3665 = vmatprep.mubr.f32.mxu0 %v3561_v44 }
 0x4e5   :  { %3666 = vmatmul.mubr.f32.vlgmr.msra.gmra.mxu0 %v3560_v49 }
 0x5a5   :  { %v4645_v2 = vpop.f32.mrf.mxu0 }
 0x5a7   :  { %v4646_v39 = vpop.f32.mrf.mxu0 }
 0x5a8   :  { %v4647_v33 = vadd.f32 %v4646_v39, %v4645_v2 }
 0x5aa   :  { %v3668_v45 = vadd.f32 %v4647_v33, %v4611_v43 }
 0x5ac   :  { %v3671_v12 = vmax.f32 %v3668_v45, 0.0 }
 0x5ae   :  { %4698 = vmatmul.mubr.f32.vlgmr.msra.gmra.mxu1 %v3671_v12 }
 0x66e   :  { %v3761_v7 = vpop.f32.mrf.mxu1 }
 0x66f   :  { %v3762_v20 = vadd.f32 %v4612_v51, %v3761_v7 }
 0x670   :  { %v4699_v59 = vpop.f32.mrf.mxu1 }
 0x671   :  { %4793 = vtanh.f32 %v3762_v20 }
 0x67e   :  { %v4794_v54 = vpop.eup %4793 }
 0x67f   :  { %3767 = vst.msk [vmem:[%s9774_s2] sm:$0xff] %vm3766_vm6, %v4794_v54 }
 0x680   :  { %3772 = vsyncpa [#allocation3], 1 }
 0x681   :  { %3773 = vsyncpa [#allocation5], 1 }
 0x682   :  { %3774 = vsyncpa [#allocation8], 1 }

</bundles_post_ra>
